<compile_context>
chip_gen: v7x
topology: tpu7x:2x2x1
jax: 0.10.0
libtpu: 0.0.40
codegen_flags: <defaults>
</compile_context>

<pallas_src>
import functools

import jax
import jax.numpy as jnp
from jax.experimental import pallas as pl
from jax.experimental.pallas import tpu as pltpu

NEG_SLOPE = 0.2
BN_EPS = 1e-5
VMEM_LIMIT = 32 * 1024 * 1024        # leave headroom on v7x (64 MiB physical)


def _cparams(*sem):
    if sem:
        return pltpu.CompilerParams(dimension_semantics=sem,
                                    vmem_limit_bytes=VMEM_LIMIT)
    return pltpu.CompilerParams(vmem_limit_bytes=VMEM_LIMIT)


# ---------------------------------------------------------------------------
# Kernel 1: M-tiled matmul + fused LeakyReLU                        -- layer 1
# ---------------------------------------------------------------------------
def _matmul_act_kernel(x_ref, w_ref, o_ref, *, act):
    acc = jnp.dot(x_ref[...], w_ref[...], preferred_element_type=jnp.float32)
    if act == "leaky":
        acc = jnp.where(acc > 0, acc, NEG_SLOPE * acc)
    o_ref[...] = acc.astype(o_ref.dtype)


def _matmul(lhs, rhs, tm, act="none"):
    M, K = lhs.shape
    _, N = rhs.shape
    assert M % tm == 0
    return pl.pallas_call(
        functools.partial(_matmul_act_kernel, act=act),
        out_shape=jax.ShapeDtypeStruct((M, N), jnp.bfloat16),
        grid=(M // tm,),
        in_specs=[pl.BlockSpec((tm, K), lambda i: (i, 0)),
                  pl.BlockSpec((K, N), lambda i: (0, 0))],
        out_specs=pl.BlockSpec((tm, N), lambda i: (i, 0)),
        compiler_params=_cparams("parallel"),
    )(lhs, rhs)


# ---------------------------------------------------------------------------
# Kernel 2: stride-2 4x4 conv done inside the kernel             -- layers 2, 3
#   out[b, ho*Wo+wo, co] = sum_{a,p} xw[b, ho+a, p, wo, :] @ w_blk[2a+p]
#   (column tap pre-shifted & folded into K -> 4 aligned slabs, 4 dots)
# ---------------------------------------------------------------------------
def _conv_s2_kernel(x_ref, w_ref, o_ref, *, gb, Ho, Wo, HB):
    K4 = x_ref.shape[-1]
    Cout = o_ref.shape[-1]
    for g in range(gb):                       # images in this grid step
        for h0 in range(0, Ho, HB):           # register-sized output row blocks
            acc = jnp.zeros((HB * Wo, Cout), jnp.float32)
            for a in range(2):
                for p in range(2):
                    slab = x_ref[g, h0 + a:h0 + a + HB, p, :, :]   # (HB,Wo,4C)
                    acc = acc + jnp.dot(slab.reshape(HB * Wo, K4),
                                        w_ref[2 * a + p],
                                        preferred_element_type=jnp.float32)
            o_ref[g, h0 * Wo:(h0 + HB) * Wo, :] = acc.astype(o_ref.dtype)


def _conv_s2(x, w_blocks, gb):
    """x: (B, H, W, C) bf16, w_blocks: (4, 4C, Cout) bf16."""
    B, H, W, C = x.shape
    Ho, Wo = H // 2, W // 2
    Hp2, Wp2 = (H + 2) // 2, (W + 2) // 2
    K4 = w_blocks.shape[1]
    C_out = w_blocks.shape[-1]
    xp = jnp.pad(x, ((0, 0), (1, 1), (1, 1), (0, 0)))
    xf = xp.reshape(B, Hp2, 2, Wp2, 2 * C)               # (b, r, p, t, q*C+c)
    # pre-shift the column tap (s) so the kernel never slices the sublane dim
    xw = jnp.concatenate([xf[:, :, :, :Wo, :], xf[:, :, :, 1:Wo + 1, :]],
                         axis=-1)                        # (B, Hp2, 2, Wo, 4C)
    # row block so the f32 register accumulator stays <= 16 vregs
    HB = max(1, min(Ho, 16384 // (Wo * C_out)))
    while Ho % HB:
        HB -= 1
    out = pl.pallas_call(
        functools.partial(_conv_s2_kernel, gb=gb, Ho=Ho, Wo=Wo, HB=HB),
        out_shape=jax.ShapeDtypeStruct((B, Ho * Wo, C_out), jnp.bfloat16),
        grid=(B // gb,),
        in_specs=[pl.BlockSpec((gb, Hp2, 2, Wo, K4),
                               lambda i: (i, 0, 0, 0, 0)),
                  pl.BlockSpec((4, K4, C_out), lambda i: (0, 0, 0))],
        out_specs=pl.BlockSpec((gb, Ho * Wo, C_out), lambda i: (i, 0, 0)),
        compiler_params=_cparams("parallel"),
    )(xw, w_blocks)
    return out, Ho, Wo


# ---------------------------------------------------------------------------
# Kernel 3: BatchNorm (batch stats) + LeakyReLU, channel-tiled   -- layers 2, 3
# ---------------------------------------------------------------------------
def _bn_leaky_kernel(x_ref, g_ref, b_ref, o_ref):
    x = x_ref[...].astype(jnp.float32)
    mean = jnp.mean(x, axis=0, keepdims=True)
    var = jnp.mean(jnp.square(x - mean), axis=0, keepdims=True)     # biased var
    y = (x - mean) * jax.lax.rsqrt(var + BN_EPS) * g_ref[...] + b_ref[...]
    o_ref[...] = jnp.where(y > 0, y, NEG_SLOPE * y).astype(o_ref.dtype)


def _bn_leaky(x, gamma, beta):
    # TODO(synk): full-M blocks; very large batches (B >= 64) would need an
    #             M-tiled two-pass (sum/sumsq) reduction to stay inside VMEM.
    M, C = x.shape
    TC = 128 if C % 128 == 0 else C
    return pl.pallas_call(
        _bn_leaky_kernel,
        out_shape=jax.ShapeDtypeStruct((M, C), jnp.bfloat16),
        grid=(C // TC,),
        in_specs=[pl.BlockSpec((M, TC), lambda c: (0, c)),
                  pl.BlockSpec((1, TC), lambda c: (0, c)),
                  pl.BlockSpec((1, TC), lambda c: (0, c))],
        out_specs=pl.BlockSpec((M, TC), lambda c: (0, c)),
        compiler_params=_cparams("parallel"),
    )(x, gamma.reshape(1, C).astype(jnp.float32),
      beta.reshape(1, C).astype(jnp.float32))


# ---------------------------------------------------------------------------
# Kernel 4: fused layer 4 + head.  K-tiled matmul (f32 acc) -> BN + LeakyReLU
#           -> Conv(628->1, 4x4 valid) + Sigmoid in the final K step.
# ---------------------------------------------------------------------------
def _l4_head_kernel(p_ref, w_ref, g_ref, b_ref, wf_ref, y_ref, wy_ref,
                    o_ref, acc_ref, *, batch, hw):
    k = pl.program_id(0)

    @pl.when(k == 0)
    def _():
        acc_ref[...] = jnp.zeros_like(acc_ref)

    acc_ref[...] += jnp.dot(p_ref[...], w_ref[...],
                            preferred_element_type=jnp.float32)

    @pl.when(k == pl.num_programs(0) - 1)
    def _():
        h = acc_ref[...]                                    # (B*16, 512) f32
        mean = jnp.mean(h, axis=0, keepdims=True)
        var = jnp.mean(jnp.square(h - mean), axis=0, keepdims=True)
        hn = (h - mean) * jax.lax.rsqrt(var + BN_EPS) * g_ref[...] + b_ref[...]
        hn = jnp.where(hn > 0, hn, NEG_SLOPE * hn)          # LeakyReLU features
        t = hn * wf_ref[...]                                # head feature term
        parts = [jnp.sum(t[b * hw:(b + 1) * hw, :], axis=0, keepdims=True)
                 for b in range(batch)]                     # per-image (1, 512)
        sb = jnp.sum(jnp.concatenate(parts, axis=0), axis=1, keepdims=True)
        sy = jnp.sum(y_ref[...] * wy_ref[...], axis=1, keepdims=True)
        s = sb + sy
        o_ref[...] = 1.0 / (1.0 + jnp.exp(-s))              # exact sigmoid


def _l4_head(p4, w4, gamma, beta, wf_rows, y_pad, wy, batch, tk=1024):
    M, K = p4.shape
    N = w4.shape[1]
    tk = min(tk, K)
    assert K % tk == 0
    return pl.pallas_call(
        functools.partial(_l4_head_kernel, batch=batch, hw=M // batch),
        out_shape=jax.ShapeDtypeStruct((batch, 1), jnp.float32),
        grid=(K // tk,),
        in_specs=[pl.BlockSpec((M, tk), lambda k: (0, k)),
                  pl.BlockSpec((tk, N), lambda k: (k, 0)),
                  pl.BlockSpec((1, N), lambda k: (0, 0)),
                  pl.BlockSpec((1, N), lambda k: (0, 0)),
                  pl.BlockSpec((M, N), lambda k: (0, 0)),
                  pl.BlockSpec((batch, y_pad.shape[1]), lambda k: (0, 0)),
                  pl.BlockSpec((1, wy.shape[1]), lambda k: (0, 0))],
        out_specs=pl.BlockSpec((batch, 1), lambda k: (0, 0)),
        scratch_shapes=[pltpu.VMEM((M, N), jnp.float32)],
        compiler_params=_cparams("arbitrary"),
    )(p4, w4, gamma.reshape(1, N).astype(jnp.float32),
      beta.reshape(1, N).astype(jnp.float32), wf_rows, y_pad, wy)


# ---------------------------------------------------------------------------
# Wrapper glue (plain JAX): weight reshuffles, padding, small im2col
# ---------------------------------------------------------------------------
def _prep_w_matmul(w_oihw):
    C_out, C_in, kh, kw = w_oihw.shape
    w = jnp.transpose(w_oihw, (2, 3, 1, 0)).reshape(kh * kw * C_in, C_out)
    return w.astype(jnp.bfloat16)


def _prep_w_conv_s2(w_oihw):
    C_out, C_in, _, _ = w_oihw.shape                   # 4x4 kernel
    w = jnp.transpose(w_oihw, (2, 3, 1, 0))            # (kh, kw, Cin, Cout)
    w = w.reshape(2, 2, 2, 2, C_in, C_out)             # (a, p, s, q, Cin, Cout)
    return w.reshape(4, 4 * C_in, C_out).astype(jnp.bfloat16)


def _extract_patches(x, k, stride, pad):
    """Small im2col (layers 1 and 4 only, where K or M is tiny)."""
    B, H, W, C = x.shape
    xp = jnp.pad(x, ((0, 0), (pad, pad), (pad, pad), (0, 0)))
    Ho = (H + 2 * pad - k) // stride + 1
    Wo = (W + 2 * pad - k) // stride + 1
    pats = []
    for i in range(k):
        for j in range(k):
            pats.append(xp[:, i:i + stride * (Ho - 1) + 1:stride,
                              j:j + stride * (Wo - 1) + 1:stride, :])
    pat = jnp.stack(pats, axis=3)                       # (B, Ho, Wo, k*k, C)
    return pat.reshape(B * Ho * Wo, k * k * C), B, Ho, Wo


def _batch_block(batch, rows_per_b, target=256, max_rows=1024):
    """Smallest divisor of batch whose row count reaches `target` (capped)."""
    g = 1
    for d in range(1, batch + 1):
        if batch % d == 0 and d * rows_per_b <= max_rows:
            g = d
            if d * rows_per_b >= target:
                break
    return g


# ---------------------------------------------------------------------------
# Discriminator forward
# ---------------------------------------------------------------------------
def discriminator_forward(params, x_nchw, y):
    B = x_nchw.shape[0]
    x = jnp.transpose(x_nchw, (0, 2, 3, 1)).astype(jnp.bfloat16)    # NHWC bf16

    # layer 1: Conv(3->64, 4, 2, 1) + LeakyReLU       (im2col + tiled matmul)
    w1 = _prep_w_matmul(params["w1"])                               # (48, 64)
    p1, _, Ho, Wo = _extract_patches(x, 4, 2, 1)                    # (B*1024,48)
    h = _matmul(p1, w1, Ho * Wo, act="leaky")                       # (B*1024,64)
    x = h.reshape(B, Ho, Wo, 64)

    # layer 2: Conv(64->128, 4, 2, 1) + BN + LeakyReLU    (in-kernel s2 conv)
    w2 = _prep_w_conv_s2(params["w2"])                              # (4,256,128)
    gb = _batch_block(B, (x.shape[1] // 2) * (x.shape[2] // 2))
    h, Ho, Wo = _conv_s2(x, w2, gb)                                 # (B,256,128)
    h = _bn_leaky(h.reshape(B * Ho * Wo, 128), params["g2"], params["b2"])
    x = h.reshape(B, Ho, Wo, 128)

    # layer 3: Conv(128->256, 4, 2, 1) + BN + LeakyReLU   (batch-blocked)
    w3 = _prep_w_conv_s2(params["w3"])                              # (4,512,256)
    gb = _batch_block(B, (x.shape[1] // 2) * (x.shape[2] // 2))
    h, Ho, Wo = _conv_s2(x, w3, gb)                                 # (B,64,256)
    h = _bn_leaky(h.reshape(B * Ho * Wo, 256), params["g3"], params["b3"])
    x = h.reshape(B, Ho, Wo, 256)

    # layer 4 + head, fused: Conv(256->512, 4, 2, 1) + BN + LeakyReLU
    #                        + cat y + Conv(628->1, 4, valid) + Sigmoid
    w4 = _prep_w_matmul(params["w4"])                               # (4096, 512)
    p4, _, Ho, Wo = _extract_patches(x, 4, 2, 1)                    # (B*16, 4096)
    w5 = params["w5"]                                               # (1,628,4,4)
    wf = jnp.transpose(w5[0, :512], (1, 2, 0)).reshape(Ho * Wo, 512)
    wf = jnp.tile(wf, (B, 1)).astype(jnp.float32)                   # (B*16, 512)
    wy = jnp.sum(w5[0, 512:], axis=(1, 2))                          # (116,)
    pad_c = (-wy.shape[0]) % 128
    wy = jnp.pad(wy, (0, pad_c)).reshape(1, -1).astype(jnp.float32)
    y_pad = jnp.pad(y.astype(jnp.float32), ((0, 0), (0, pad_c)))
    out = _l4_head(p4, w4, params["g4"], params["b4"], wf, y_pad, wy, B)
    # TODO(synk): PyTorch .squeeze() would return a 0-d scalar for B == 1;
    #             we keep a stable (B,) shape instead.
    return out.reshape(B)


# ---------------------------------------------------------------------------
# Deterministic parameter init (shapes from the PyTorch module __init__)
# ---------------------------------------------------------------------------
def init_params(key):
    ks = jax.random.split(key, 11)

    def w(k, shape):
        return 0.02 * jax.random.normal(k, shape, jnp.float32)

    return {
        "w1": w(ks[0], (64, 3, 4, 4)),
        "w2": w(ks[1], (128, 64, 4, 4)),
        "g2": 1.0 + 0.1 * jax.random.normal(ks[2], (128,), jnp.float32),
        "b2": 0.1 * jax.random.normal(ks[3], (128,), jnp.float32),
        "w3": w(ks[4], (256, 128, 4, 4)),
        "g3": 1.0 + 0.1 * jax.random.normal(ks[5], (256,), jnp.float32),
        "b3": 0.1 * jax.random.normal(ks[6], (256,), jnp.float32),
        "w4": w(ks[7], (512, 256, 4, 4)),
        "g4": 1.0 + 0.1 * jax.random.normal(ks[8], (512,), jnp.float32),
        "b4": 0.1 * jax.random.normal(ks[9], (512,), jnp.float32),
        "w5": w(ks[10], (1, 512 + 116, 4, 4)),
    }


if __name__ == "__main__":
    key = jax.random.PRNGKey(0)
    kp, kx, ky = jax.random.split(key, 3)
    params = init_params(kp)

    # Architecture requires 64x64 spatial input (4 stride-2 convs -> 4x4 feats)
    x = jax.random.normal(kx, (2, 3, 64, 64), jnp.float32)
    y = jax.random.normal(ky, (2, 116), jnp.float32)

    out = jax.jit(discriminator_forward)(params, x, y)
    out = jax.block_until_ready(out)

    assert out.shape == (2,), out.shape
    assert bool(jnp.all(jnp.isfinite(out)))
    assert bool(jnp.all((out >= 0.0) & (out <= 1.0)))  # sigmoid output
    print("KERNEL_OK")
</pallas_src>

<mosaic_0001>
module attributes {stable_mosaic.version = 11 : i64} {
  func.func @_matmul_act_kernel(%arg0: i32, %arg1: memref<1024x48xbf16, #tpu.memory_space<vmem>>, %arg2: memref<48x64xbf16, #tpu.memory_space<vmem>>, %arg3: memref<1024x64xbf16, #tpu.memory_space<vmem>>) attributes {dimension_semantics = [#tpu.dimension_semantics<parallel>], iteration_bounds = array<i64: 2>, scalar_prefetch = 0 : i64, scratch_operands = 0 : i64, tpu.core_type = #tpu.core_type<tc>, window_params = [{transform_indices = @transform_0, window_bounds = array<i64: 1024, 48>}, {pipeline_mode = #tpu.pipeline_mode<synchronous>, transform_indices = @transform_1, window_bounds = array<i64: 48, 64>}, {transform_indices = @transform_2, window_bounds = array<i64: 1024, 64>}]} {
    %c0 = arith.constant 0 : index
    %c0_0 = arith.constant 0 : index
    %0 = vector.load %arg1[%c0, %c0_0] : memref<1024x48xbf16, #tpu.memory_space<vmem>>, vector<1024x48xbf16>
    %c0_1 = arith.constant 0 : index
    %c0_2 = arith.constant 0 : index
    %1 = vector.load %arg2[%c0_1, %c0_2] : memref<48x64xbf16, #tpu.memory_space<vmem>>, vector<48x64xbf16>
    %cst = arith.constant dense<0.000000e+00> : vector<1024x64xf32>
    %2 = tpu.matmul %0, %1, %cst {dimension_numbers = #tpu.dot_dimension_numbers<[1], [0], [0], [1], [0, 0, 1, 1], [], []>} : vector<1024x48xbf16>, vector<48x64xbf16>, vector<1024x64xf32> -> vector<1024x64xf32>
    %cst_3 = arith.constant 0.000000e+00 : f32
    %3 = vector.broadcast %cst_3 : f32 to vector<1024x64xf32>
    %4 = arith.cmpf ogt, %2, %3 : vector<1024x64xf32>
    %cst_4 = arith.constant 2.000000e-01 : f32
    %5 = vector.broadcast %cst_4 : f32 to vector<1024x64xf32>
    %6 = arith.mulf %5, %2 : vector<1024x64xf32>
    %7 = arith.select %4, %2, %6 : vector<1024x64xi1>, vector<1024x64xf32>
    %8 = arith.truncf %7 : vector<1024x64xf32> to vector<1024x64xbf16>
    %c0_5 = arith.constant 0 : index
    %c0_6 = arith.constant 0 : index
    %9 = vector.load %arg3[%c0_5, %c0_6] : memref<1024x64xbf16, #tpu.memory_space<vmem>>, vector<1024x64xbf16>
    tpu.vector_store %arg3[%c0_5, %c0_6], %8 {strides = array<i32>} : memref<1024x64xbf16, #tpu.memory_space<vmem>>, vector<1024x64xbf16>,
    return
  }
  func.func @transform_0(%arg0: i32) -> (i32, i32) {
    %c0_i32 = arith.constant 0 : i32
    %c0_i32_0 = arith.constant 0 : i32
    return %arg0, %c0_i32 : i32, i32
  }
  func.func @transform_1(%arg0: i32) -> (i32, i32) {
    %c0_i32 = arith.constant 0 : i32
    %c0_i32_0 = arith.constant 0 : i32
    %c0_i32_1 = arith.constant 0 : i32
    return %c0_i32, %c0_i32_0 : i32, i32
  }
  func.func @transform_2(%arg0: i32) -> (i32, i32) {
    %c0_i32 = arith.constant 0 : i32
    %c0_i32_0 = arith.constant 0 : i32
    return %arg0, %c0_i32 : i32, i32
  }
}

module attributes {stable_mosaic.version = 11 : i64} {
  func.func @_conv_s2_kernel(%arg0: i32, %arg1: memref<1x17x2x16x256xbf16, #tpu.memory_space<vmem>>, %arg2: memref<4x256x128xbf16, #tpu.memory_space<vmem>>, %arg3: memref<1x256x128xbf16, #tpu.memory_space<vmem>>) attributes {dimension_semantics = [#tpu.dimension_semantics<parallel>], iteration_bounds = array<i64: 2>, scalar_prefetch = 0 : i64, scratch_operands = 0 : i64, tpu.core_type = #tpu.core_type<tc>, window_params = [{transform_indices = @transform_0, window_bounds = array<i64: 1, 17, 2, 16, 256>}, {pipeline_mode = #tpu.pipeline_mode<synchronous>, transform_indices = @transform_1, window_bounds = array<i64: 4, 256, 128>}, {transform_indices = @transform_2, window_bounds = array<i64: 1, 256, 128>}]} {
    %cst = arith.constant 0.000000e+00 : f32
    %0 = vector.broadcast %cst : f32 to vector<128x128xf32>
    %c0 = arith.constant 0 : index
    %c0_0 = arith.constant 0 : index
    %c0_1 = arith.constant 0 : index
    %c0_2 = arith.constant 0 : index
    %c0_3 = arith.constant 0 : index
    %1 = vector.load %arg1[%c0, %c0_0, %c0_1, %c0_2, %c0_3] : memref<1x17x2x16x256xbf16, #tpu.memory_space<vmem>>, vector<1x8x1x16x256xbf16>
    %2 = vector.shape_cast %1 : vector<1x8x1x16x256xbf16> to vector<8x16x256xbf16>
    %3 = vector.shape_cast %2 : vector<8x16x256xbf16> to vector<128x256xbf16>
    %c0_4 = arith.constant 0 : index
    %c0_5 = arith.constant 0 : index
    %c0_6 = arith.constant 0 : index
    %4 = vector.load %arg2[%c0_4, %c0_5, %c0_6] : memref<4x256x128xbf16, #tpu.memory_space<vmem>>, vector<1x256x128xbf16>
    %5 = vector.shape_cast %4 : vector<1x256x128xbf16> to vector<256x128xbf16>
    %cst_7 = arith.constant dense<0.000000e+00> : vector<128x128xf32>
    %6 = tpu.matmul %3, %5, %cst_7 {dimension_numbers = #tpu.dot_dimension_numbers<[1], [0], [0], [1], [0, 0, 1, 1], [], []>} : vector<128x256xbf16>, vector<256x128xbf16>, vector<128x128xf32> -> vector<128x128xf32>
    %7 = arith.addf %0, %6 : vector<128x128xf32>
    %c0_8 = arith.constant 0 : index
    %c0_9 = arith.constant 0 : index
    %c1 = arith.constant 1 : index
    %c0_10 = arith.constant 0 : index
    %c0_11 = arith.constant 0 : index
    %8 = vector.load %arg1[%c0_8, %c0_9, %c1, %c0_10, %c0_11] : memref<1x17x2x16x256xbf16, #tpu.memory_space<vmem>>, vector<1x8x1x16x256xbf16>
    %9 = vector.shape_cast %8 : vector<1x8x1x16x256xbf16> to vector<8x16x256xbf16>
    %10 = vector.shape_cast %9 : vector<8x16x256xbf16> to vector<128x256xbf16>
    %c1_12 = arith.constant 1 : index
    %c0_13 = arith.constant 0 : index
    %c0_14 = arith.constant 0 : index
    %11 = vector.load %arg2[%c1_12, %c0_13, %c0_14] : memref<4x256x128xbf16, #tpu.memory_space<vmem>>, vector<1x256x128xbf16>
    %12 = vector.shape_cast %11 : vector<1x256x128xbf16> to vector<256x128xbf16>
    %cst_15 = arith.constant dense<0.000000e+00> : vector<128x128xf32>
    %13 = tpu.matmul %10, %12, %cst_15 {dimension_numbers = #tpu.dot_dimension_numbers<[1], [0], [0], [1], [0, 0, 1, 1], [], []>} : vector<128x256xbf16>, vector<256x128xbf16>, vector<128x128xf32> -> vector<128x128xf32>
    %14 = arith.addf %7, %13 : vector<128x128xf32>
    %c0_16 = arith.constant 0 : index
    %c1_17 = arith.constant 1 : index
    %c0_18 = arith.constant 0 : index
    %c0_19 = arith.constant 0 : index
    %c0_20 = arith.constant 0 : index
    %15 = vector.load %arg1[%c0_16, %c1_17, %c0_18, %c0_19, %c0_20] : memref<1x17x2x16x256xbf16, #tpu.memory_space<vmem>>, vector<1x8x1x16x256xbf16>
    %16 = vector.shape_cast %15 : vector<1x8x1x16x256xbf16> to vector<8x16x256xbf16>
    %17 = vector.shape_cast %16 : vector<8x16x256xbf16> to vector<128x256xbf16>
    %c2 = arith.constant 2 : index
    %c0_21 = arith.constant 0 : index
    %c0_22 = arith.constant 0 : index
    %18 = vector.load %arg2[%c2, %c0_21, %c0_22] : memref<4x256x128xbf16, #tpu.memory_space<vmem>>, vector<1x256x128xbf16>
    %19 = vector.shape_cast %18 : vector<1x256x128xbf16> to vector<256x128xbf16>
    %cst_23 = arith.constant dense<0.000000e+00> : vector<128x128xf32>
    %20 = tpu.matmul %17, %19, %cst_23 {dimension_numbers = #tpu.dot_dimension_numbers<[1], [0], [0], [1], [0, 0, 1, 1], [], []>} : vector<128x256xbf16>, vector<256x128xbf16>, vector<128x128xf32> -> vector<128x128xf32>
    %21 = arith.addf %14, %20 : vector<128x128xf32>
    %c0_24 = arith.constant 0 : index
    %c1_25 = arith.constant 1 : index
    %c1_26 = arith.constant 1 : index
    %c0_27 = arith.constant 0 : index
    %c0_28 = arith.constant 0 : index
    %22 = vector.load %arg1[%c0_24, %c1_25, %c1_26, %c0_27, %c0_28] : memref<1x17x2x16x256xbf16, #tpu.memory_space<vmem>>, vector<1x8x1x16x256xbf16>
    %23 = vector.shape_cast %22 : vector<1x8x1x16x256xbf16> to vector<8x16x256xbf16>
    %24 = vector.shape_cast %23 : vector<8x16x256xbf16> to vector<128x256xbf16>
    %c3 = arith.constant 3 : index
    %c0_29 = arith.constant 0 : index
    %c0_30 = arith.constant 0 : index
    %25 = vector.load %arg2[%c3, %c0_29, %c0_30] : memref<4x256x128xbf16, #tpu.memory_space<vmem>>, vector<1x256x128xbf16>
    %26 = vector.shape_cast %25 : vector<1x256x128xbf16> to vector<256x128xbf16>
    %cst_31 = arith.constant dense<0.000000e+00> : vector<128x128xf32>
    %27 = tpu.matmul %24, %26, %cst_31 {dimension_numbers = #tpu.dot_dimension_numbers<[1], [0], [0], [1], [0, 0, 1, 1], [], []>} : vector<128x256xbf16>, vector<256x128xbf16>, vector<128x128xf32> -> vector<128x128xf32>
    %28 = arith.addf %21, %27 : vector<128x128xf32>
    %29 = arith.truncf %28 : vector<128x128xf32> to vector<128x128xbf16>
    %c0_32 = arith.constant 0 : index
    %c0_33 = arith.constant 0 : index
    %c0_34 = arith.constant 0 : index
    %30 = vector.load %arg3[%c0_32, %c0_33, %c0_34] : memref<1x256x128xbf16, #tpu.memory_space<vmem>>, vector<1x128x128xbf16>
    %31 = vector.shape_cast %30 : vector<1x128x128xbf16> to vector<128x128xbf16>
    %32 = vector.shape_cast %29 : vector<128x128xbf16> to vector<1x128x128xbf16>
    tpu.vector_store %arg3[%c0_32, %c0_33, %c0_34], %32 {strides = array<i32>} : memref<1x256x128xbf16, #tpu.memory_space<vmem>>, vector<1x128x128xbf16>,
    %cst_35 = arith.constant 0.000000e+00 : f32
    %33 = vector.broadcast %cst_35 : f32 to vector<128x128xf32>
    %c0_36 = arith.constant 0 : index
    %c8 = arith.constant 8 : index
    %c0_37 = arith.constant 0 : index
    %c0_38 = arith.constant 0 : index
    %c0_39 = arith.constant 0 : index
    %34 = vector.load %arg1[%c0_36, %c8, %c0_37, %c0_38, %c0_39] : memref<1x17x2x16x256xbf16, #tpu.memory_space<vmem>>, vector<1x8x1x16x256xbf16>
    %35 = vector.shape_cast %34 : vector<1x8x1x16x256xbf16> to vector<8x16x256xbf16>
    %36 = vector.shape_cast %35 : vector<8x16x256xbf16> to vector<128x256xbf16>
    %c0_40 = arith.constant 0 : index
    %c0_41 = arith.constant 0 : index
    %c0_42 = arith.constant 0 : index
    %37 = vector.load %arg2[%c0_40, %c0_41, %c0_42] : memref<4x256x128xbf16, #tpu.memory_space<vmem>>, vector<1x256x128xbf16>
    %38 = vector.shape_cast %37 : vector<1x256x128xbf16> to vector<256x128xbf16>
    %cst_43 = arith.constant dense<0.000000e+00> : vector<128x128xf32>
    %39 = tpu.matmul %36, %38, %cst_43 {dimension_numbers = #tpu.dot_dimension_numbers<[1], [0], [0], [1], [0, 0, 1, 1], [], []>} : vector<128x256xbf16>, vector<256x128xbf16>, vector<128x128xf32> -> vector<128x128xf32>
    %40 = arith.addf %33, %39 : vector<128x128xf32>
    %c0_44 = arith.constant 0 : index
    %c8_45 = arith.constant 8 : index
    %c1_46 = arith.constant 1 : index
    %c0_47 = arith.constant 0 : index
    %c0_48 = arith.constant 0 : index
    %41 = vector.load %arg1[%c0_44, %c8_45, %c1_46, %c0_47, %c0_48] : memref<1x17x2x16x256xbf16, #tpu.memory_space<vmem>>, vector<1x8x1x16x256xbf16>
    %42 = vector.shape_cast %41 : vector<1x8x1x16x256xbf16> to vector<8x16x256xbf16>
    %43 = vector.shape_cast %42 : vector<8x16x256xbf16> to vector<128x256xbf16>
    %c1_49 = arith.constant 1 : index
    %c0_50 = arith.constant 0 : index
    %c0_51 = arith.constant 0 : index
    %44 = vector.load %arg2[%c1_49, %c0_50, %c0_51] : memref<4x256x128xbf16, #tpu.memory_space<vmem>>, vector<1x256x128xbf16>
    %45 = vector.shape_cast %44 : vector<1x256x128xbf16> to vector<256x128xbf16>
    %cst_52 = arith.constant dense<0.000000e+00> : vector<128x128xf32>
    %46 = tpu.matmul %43, %45, %cst_52 {dimension_numbers = #tpu.dot_dimension_numbers<[1], [0], [0], [1], [0, 0, 1, 1], [], []>} : vector<128x256xbf16>, vector<256x128xbf16>, vector<128x128xf32> -> vector<128x128xf32>
    %47 = arith.addf %40, %46 : vector<128x128xf32>
    %c0_53 = arith.constant 0 : index
    %c9 = arith.constant 9 : index
    %c0_54 = arith.constant 0 : index
    %c0_55 = arith.constant 0 : index
    %c0_56 = arith.constant 0 : index
    %48 = vector.load %arg1[%c0_53, %c9, %c0_54, %c0_55, %c0_56] : memref<1x17x2x16x256xbf16, #tpu.memory_space<vmem>>, vector<1x8x1x16x256xbf16>
    %49 = vector.shape_cast %48 : vector<1x8x1x16x256xbf16> to vector<8x16x256xbf16>
    %50 = vector.shape_cast %49 : vector<8x16x256xbf16> to vector<128x256xbf16>
    %c2_57 = arith.constant 2 : index
    %c0_58 = arith.constant 0 : index
    %c0_59 = arith.constant 0 : index
    %51 = vector.load %arg2[%c2_57, %c0_58, %c0_59] : memref<4x256x128xbf16, #tpu.memory_space<vmem>>, vector<1x256x128xbf16>
    %52 = vector.shape_cast %51 : vector<1x256x128xbf16> to vector<256x128xbf16>
    %cst_60 = arith.constant dense<0.000000e+00> : vector<128x128xf32>
    %53 = tpu.matmul %50, %52, %cst_60 {dimension_numbers = #tpu.dot_dimension_numbers<[1], [0], [0], [1], [0, 0, 1, 1], [], []>} : vector<128x256xbf16>, vector<256x128xbf16>, vector<128x128xf32> -> vector<128x128xf32>
    %54 = arith.addf %47, %53 : vector<128x128xf32>
    %c0_61 = arith.constant 0 : index
    %c9_62 = arith.constant 9 : index
    %c1_63 = arith.constant 1 : index
    %c0_64 = arith.constant 0 : index
    %c0_65 = arith.constant 0 : index
    %55 = vector.load %arg1[%c0_61, %c9_62, %c1_63, %c0_64, %c0_65] : memref<1x17x2x16x256xbf16, #tpu.memory_space<vmem>>, vector<1x8x1x16x256xbf16>
    %56 = vector.shape_cast %55 : vector<1x8x1x16x256xbf16> to vector<8x16x256xbf16>
    %57 = vector.shape_cast %56 : vector<8x16x256xbf16> to vector<128x256xbf16>
    %c3_66 = arith.constant 3 : index
    %c0_67 = arith.constant 0 : index
    %c0_68 = arith.constant 0 : index
    %58 = vector.load %arg2[%c3_66, %c0_67, %c0_68] : memref<4x256x128xbf16, #tpu.memory_space<vmem>>, vector<1x256x128xbf16>
    %59 = vector.shape_cast %58 : vector<1x256x128xbf16> to vector<256x128xbf16>
    %cst_69 = arith.constant dense<0.000000e+00> : vector<128x128xf32>
    %60 = tpu.matmul %57, %59, %cst_69 {dimension_numbers = #tpu.dot_dimension_numbers<[1], [0], [0], [1], [0, 0, 1, 1], [], []>} : vector<128x256xbf16>, vector<256x128xbf16>, vector<128x128xf32> -> vector<128x128xf32>
    %61 = arith.addf %54, %60 : vector<128x128xf32>
    %62 = arith.truncf %61 : vector<128x128xf32> to vector<128x128xbf16>
    %c0_70 = arith.constant 0 : index
    %c128 = arith.constant 128 : index
    %c0_71 = arith.constant 0 : index
    %63 = vector.load %arg3[%c0_70, %c128, %c0_71] : memref<1x256x128xbf16, #tpu.memory_space<vmem>>, vector<1x128x128xbf16>
    %64 = vector.shape_cast %63 : vector<1x128x128xbf16> to vector<128x128xbf16>
    %65 = vector.shape_cast %62 : vector<128x128xbf16> to vector<1x128x128xbf16>
    tpu.vector_store %arg3[%c0_70, %c128, %c0_71], %65 {strides = array<i32>} : memref<1x256x128xbf16, #tpu.memory_space<vmem>>, vector<1x128x128xbf16>,
    return
  }
  func.func @transform_0(%arg0: i32) -> (i32, i32, i32, i32, i32) {
    %c0_i32 = arith.constant 0 : i32
    %c0_i32_0 = arith.constant 0 : i32
    %c0_i32_1 = arith.constant 0 : i32
    %c0_i32_2 = arith.constant 0 : i32
    %c0_i32_3 = arith.constant 0 : i32
    return %arg0, %c0_i32, %c0_i32_0, %c0_i32_1, %c0_i32_2 : i32, i32, i32, i32, i32
  }
  func.func @transform_1(%arg0: i32) -> (i32, i32, i32) {
    %c0_i32 = arith.constant 0 : i32
    %c0_i32_0 = arith.constant 0 : i32
    %c0_i32_1 = arith.constant 0 : i32
    %c0_i32_2 = arith.constant 0 : i32
    return %c0_i32, %c0_i32_0, %c0_i32_1 : i32, i32, i32
  }
  func.func @transform_2(%arg0: i32) -> (i32, i32, i32) {
    %c0_i32 = arith.constant 0 : i32
    %c0_i32_0 = arith.constant 0 : i32
    %c0_i32_1 = arith.constant 0 : i32
    return %arg0, %c0_i32, %c0_i32_0 : i32, i32, i32
  }
}

module attributes {stable_mosaic.version = 11 : i64} {
  func.func @_bn_leaky_kernel(%arg0: i32, %arg1: memref<512x128xbf16, #tpu.memory_space<vmem>>, %arg2: memref<1x128xf32, #tpu.memory_space<vmem>>, %arg3: memref<1x128xf32, #tpu.memory_space<vmem>>, %arg4: memref<512x128xbf16, #tpu.memory_space<vmem>>) attributes {dimension_semantics = [#tpu.dimension_semantics<parallel>], iteration_bounds = array<i64: 1>, scalar_prefetch = 0 : i64, scratch_operands = 0 : i64, tpu.core_type = #tpu.core_type<tc>, window_params = [{transform_indices = @transform_0, window_bounds = array<i64: 512, 128>}, {transform_indices = @transform_1, window_bounds = array<i64: 1, 128>}, {transform_indices = @transform_2, window_bounds = array<i64: 1, 128>}, {transform_indices = @transform_3, window_bounds = array<i64: 512, 128>}]} {
    %c0 = arith.constant 0 : index
    %c0_0 = arith.constant 0 : index
    %0 = vector.load %arg1[%c0, %c0_0] : memref<512x128xbf16, #tpu.memory_space<vmem>>, vector<512x128xbf16>
    %1 = arith.extf %0 : vector<512x128xbf16> to vector<512x128xf32>
    %cst = arith.constant dense<0.000000e+00> : vector<128xf32>
    %2 = vector.multi_reduction <add>, %1, %cst [0] : vector<512x128xf32> to vector<128xf32>
    %3 = vector.shape_cast %2 : vector<128xf32> to vector<1x128xf32>
    %cst_1 = arith.constant 5.120000e+02 : f32
    %4 = vector.broadcast %cst_1 : f32 to vector<1x128xf32>
    %5 = arith.divf %3, %4 : vector<1x128xf32>
    %6 = vector.broadcast %5 : vector<1x128xf32> to vector<512x128xf32>
    %7 = arith.subf %1, %6 : vector<512x128xf32>
    %8 = arith.mulf %7, %7 : vector<512x128xf32>
    %cst_2 = arith.constant dense<0.000000e+00> : vector<128xf32>
    %9 = vector.multi_reduction <add>, %8, %cst_2 [0] : vector<512x128xf32> to vector<128xf32>
    %10 = vector.shape_cast %9 : vector<128xf32> to vector<1x128xf32>
    %cst_3 = arith.constant 5.120000e+02 : f32
    %11 = vector.broadcast %cst_3 : f32 to vector<1x128xf32>
    %12 = arith.divf %10, %11 : vector<1x128xf32>
    %13 = vector.broadcast %5 : vector<1x128xf32> to vector<512x128xf32>
    %14 = arith.subf %1, %13 : vector<512x128xf32>
    %cst_4 = arith.constant 9.99999974E-6 : f32
    %15 = vector.broadcast %cst_4 : f32 to vector<1x128xf32>
    %16 = arith.addf %12, %15 : vector<1x128xf32>
    %17 = math.rsqrt %16 : vector<1x128xf32>
    %18 = vector.broadcast %17 : vector<1x128xf32> to vector<512x128xf32>
    %19 = arith.mulf %14, %18 : vector<512x128xf32>
    %c0_5 = arith.constant 0 : index
    %c0_6 = arith.constant 0 : index
    %20 = vector.load %arg2[%c0_5, %c0_6] : memref<1x128xf32, #tpu.memory_space<vmem>>, vector<1x128xf32>
    %21 = vector.broadcast %20 : vector<1x128xf32> to vector<512x128xf32>
    %22 = arith.mulf %19, %21 : vector<512x128xf32>
    %c0_7 = arith.constant 0 : index
    %c0_8 = arith.constant 0 : index
    %23 = vector.load %arg3[%c0_7, %c0_8] : memref<1x128xf32, #tpu.memory_space<vmem>>, vector<1x128xf32>
    %24 = vector.broadcast %23 : vector<1x128xf32> to vector<512x128xf32>
    %25 = arith.addf %22, %24 : vector<512x128xf32>
    %cst_9 = arith.constant 0.000000e+00 : f32
    %26 = vector.broadcast %cst_9 : f32 to vector<512x128xf32>
    %27 = arith.cmpf ogt, %25, %26 : vector<512x128xf32>
    %cst_10 = arith.constant 2.000000e-01 : f32
    %28 = vector.broadcast %cst_10 : f32 to vector<512x128xf32>
    %29 = arith.mulf %28, %25 : vector<512x128xf32>
    %30 = arith.select %27, %25, %29 : vector<512x128xi1>, vector<512x128xf32>
    %31 = arith.truncf %30 : vector<512x128xf32> to vector<512x128xbf16>
    %c0_11 = arith.constant 0 : index
    %c0_12 = arith.constant 0 : index
    %32 = vector.load %arg4[%c0_11, %c0_12] : memref<512x128xbf16, #tpu.memory_space<vmem>>, vector<512x128xbf16>
    tpu.vector_store %arg4[%c0_11, %c0_12], %31 {strides = array<i32>} : memref<512x128xbf16, #tpu.memory_space<vmem>>, vector<512x128xbf16>,
    return
  }
  func.func @transform_0(%arg0: i32) -> (i32, i32) {
    %c0_i32 = arith.constant 0 : i32
    %c0_i32_0 = arith.constant 0 : i32
    return %c0_i32, %arg0 : i32, i32
  }
  func.func @transform_1(%arg0: i32) -> (i32, i32) {
    %c0_i32 = arith.constant 0 : i32
    %c0_i32_0 = arith.constant 0 : i32
    return %c0_i32, %arg0 : i32, i32
  }
  func.func @transform_2(%arg0: i32) -> (i32, i32) {
    %c0_i32 = arith.constant 0 : i32
    %c0_i32_0 = arith.constant 0 : i32
    return %c0_i32, %arg0 : i32, i32
  }
  func.func @transform_3(%arg0: i32) -> (i32, i32) {
    %c0_i32 = arith.constant 0 : i32
    %c0_i32_0 = arith.constant 0 : i32
    return %c0_i32, %arg0 : i32, i32
  }
}

module attributes {stable_mosaic.version = 11 : i64} {
  func.func @_conv_s2_kernel(%arg0: i32, %arg1: memref<2x9x2x8x512xbf16, #tpu.memory_space<vmem>>, %arg2: memref<4x512x256xbf16, #tpu.memory_space<vmem>>, %arg3: memref<2x64x256xbf16, #tpu.memory_space<vmem>>) attributes {dimension_semantics = [#tpu.dimension_semantics<parallel>], iteration_bounds = array<i64: 1>, scalar_prefetch = 0 : i64, scratch_operands = 0 : i64, tpu.core_type = #tpu.core_type<tc>, window_params = [{transform_indices = @transform_0, window_bounds = array<i64: 2, 9, 2, 8, 512>}, {pipeline_mode = #tpu.pipeline_mode<synchronous>, transform_indices = @transform_1, window_bounds = array<i64: 4, 512, 256>}, {transform_indices = @transform_2, window_bounds = array<i64: 2, 64, 256>}]} {
    %cst = arith.constant 0.000000e+00 : f32
    %0 = vector.broadcast %cst : f32 to vector<64x256xf32>
    %c0 = arith.constant 0 : index
    %c0_0 = arith.constant 0 : index
    %c0_1 = arith.constant 0 : index
    %c0_2 = arith.constant 0 : index
    %c0_3 = arith.constant 0 : index
    %1 = vector.load %arg1[%c0, %c0_0, %c0_1, %c0_2, %c0_3] : memref<2x9x2x8x512xbf16, #tpu.memory_space<vmem>>, vector<1x8x1x8x512xbf16>
    %2 = vector.shape_cast %1 : vector<1x8x1x8x512xbf16> to vector<8x8x512xbf16>
    %3 = vector.shape_cast %2 : vector<8x8x512xbf16> to vector<64x512xbf16>
    %c0_4 = arith.constant 0 : index
    %c0_5 = arith.constant 0 : index
    %c0_6 = arith.constant 0 : index
    %4 = vector.load %arg2[%c0_4, %c0_5, %c0_6] : memref<4x512x256xbf16, #tpu.memory_space<vmem>>, vector<1x512x256xbf16>
    %5 = vector.shape_cast %4 : vector<1x512x256xbf16> to vector<512x256xbf16>
    %cst_7 = arith.constant dense<0.000000e+00> : vector<64x256xf32>
    %6 = tpu.matmul %3, %5, %cst_7 {dimension_numbers = #tpu.dot_dimension_numbers<[1], [0], [0], [1], [0, 0, 1, 1], [], []>} : vector<64x512xbf16>, vector<512x256xbf16>, vector<64x256xf32> -> vector<64x256xf32>
    %7 = arith.addf %0, %6 : vector<64x256xf32>
    %c0_8 = arith.constant 0 : index
    %c0_9 = arith.constant 0 : index
    %c1 = arith.constant 1 : index
    %c0_10 = arith.constant 0 : index
    %c0_11 = arith.constant 0 : index
    %8 = vector.load %arg1[%c0_8, %c0_9, %c1, %c0_10, %c0_11] : memref<2x9x2x8x512xbf16, #tpu.memory_space<vmem>>, vector<1x8x1x8x512xbf16>
    %9 = vector.shape_cast %8 : vector<1x8x1x8x512xbf16> to vector<8x8x512xbf16>
    %10 = vector.shape_cast %9 : vector<8x8x512xbf16> to vector<64x512xbf16>
    %c1_12 = arith.constant 1 : index
    %c0_13 = arith.constant 0 : index
    %c0_14 = arith.constant 0 : index
    %11 = vector.load %arg2[%c1_12, %c0_13, %c0_14] : memref<4x512x256xbf16, #tpu.memory_space<vmem>>, vector<1x512x256xbf16>
    %12 = vector.shape_cast %11 : vector<1x512x256xbf16> to vector<512x256xbf16>
    %cst_15 = arith.constant dense<0.000000e+00> : vector<64x256xf32>
    %13 = tpu.matmul %10, %12, %cst_15 {dimension_numbers = #tpu.dot_dimension_numbers<[1], [0], [0], [1], [0, 0, 1, 1], [], []>} : vector<64x512xbf16>, vector<512x256xbf16>, vector<64x256xf32> -> vector<64x256xf32>
    %14 = arith.addf %7, %13 : vector<64x256xf32>
    %c0_16 = arith.constant 0 : index
    %c1_17 = arith.constant 1 : index
    %c0_18 = arith.constant 0 : index
    %c0_19 = arith.constant 0 : index
    %c0_20 = arith.constant 0 : index
    %15 = vector.load %arg1[%c0_16, %c1_17, %c0_18, %c0_19, %c0_20] : memref<2x9x2x8x512xbf16, #tpu.memory_space<vmem>>, vector<1x8x1x8x512xbf16>
    %16 = vector.shape_cast %15 : vector<1x8x1x8x512xbf16> to vector<8x8x512xbf16>
    %17 = vector.shape_cast %16 : vector<8x8x512xbf16> to vector<64x512xbf16>
    %c2 = arith.constant 2 : index
    %c0_21 = arith.constant 0 : index
    %c0_22 = arith.constant 0 : index
    %18 = vector.load %arg2[%c2, %c0_21, %c0_22] : memref<4x512x256xbf16, #tpu.memory_space<vmem>>, vector<1x512x256xbf16>
    %19 = vector.shape_cast %18 : vector<1x512x256xbf16> to vector<512x256xbf16>
    %cst_23 = arith.constant dense<0.000000e+00> : vector<64x256xf32>
    %20 = tpu.matmul %17, %19, %cst_23 {dimension_numbers = #tpu.dot_dimension_numbers<[1], [0], [0], [1], [0, 0, 1, 1], [], []>} : vector<64x512xbf16>, vector<512x256xbf16>, vector<64x256xf32> -> vector<64x256xf32>
    %21 = arith.addf %14, %20 : vector<64x256xf32>
    %c0_24 = arith.constant 0 : index
    %c1_25 = arith.constant 1 : index
    %c1_26 = arith.constant 1 : index
    %c0_27 = arith.constant 0 : index
    %c0_28 = arith.constant 0 : index
    %22 = vector.load %arg1[%c0_24, %c1_25, %c1_26, %c0_27, %c0_28] : memref<2x9x2x8x512xbf16, #tpu.memory_space<vmem>>, vector<1x8x1x8x512xbf16>
    %23 = vector.shape_cast %22 : vector<1x8x1x8x512xbf16> to vector<8x8x512xbf16>
    %24 = vector.shape_cast %23 : vector<8x8x512xbf16> to vector<64x512xbf16>
    %c3 = arith.constant 3 : index
    %c0_29 = arith.constant 0 : index
    %c0_30 = arith.constant 0 : index
    %25 = vector.load %arg2[%c3, %c0_29, %c0_30] : memref<4x512x256xbf16, #tpu.memory_space<vmem>>, vector<1x512x256xbf16>
    %26 = vector.shape_cast %25 : vector<1x512x256xbf16> to vector<512x256xbf16>
    %cst_31 = arith.constant dense<0.000000e+00> : vector<64x256xf32>
    %27 = tpu.matmul %24, %26, %cst_31 {dimension_numbers = #tpu.dot_dimension_numbers<[1], [0], [0], [1], [0, 0, 1, 1], [], []>} : vector<64x512xbf16>, vector<512x256xbf16>, vector<64x256xf32> -> vector<64x256xf32>
    %28 = arith.addf %21, %27 : vector<64x256xf32>
    %29 = arith.truncf %28 : vector<64x256xf32> to vector<64x256xbf16>
    %c0_32 = arith.constant 0 : index
    %c0_33 = arith.constant 0 : index
    %c0_34 = arith.constant 0 : index
    %30 = vector.load %arg3[%c0_32, %c0_33, %c0_34] : memref<2x64x256xbf16, #tpu.memory_space<vmem>>, vector<1x64x256xbf16>
    %31 = vector.shape_cast %30 : vector<1x64x256xbf16> to vector<64x256xbf16>
    %32 = vector.shape_cast %29 : vector<64x256xbf16> to vector<1x64x256xbf16>
    tpu.vector_store %arg3[%c0_32, %c0_33, %c0_34], %32 {strides = array<i32>} : memref<2x64x256xbf16, #tpu.memory_space<vmem>>, vector<1x64x256xbf16>,
    %cst_35 = arith.constant 0.000000e+00 : f32
    %33 = vector.broadcast %cst_35 : f32 to vector<64x256xf32>
    %c1_36 = arith.constant 1 : index
    %c0_37 = arith.constant 0 : index
    %c0_38 = arith.constant 0 : index
    %c0_39 = arith.constant 0 : index
    %c0_40 = arith.constant 0 : index
    %34 = vector.load %arg1[%c1_36, %c0_37, %c0_38, %c0_39, %c0_40] : memref<2x9x2x8x512xbf16, #tpu.memory_space<vmem>>, vector<1x8x1x8x512xbf16>
    %35 = vector.shape_cast %34 : vector<1x8x1x8x512xbf16> to vector<8x8x512xbf16>
    %36 = vector.shape_cast %35 : vector<8x8x512xbf16> to vector<64x512xbf16>
    %c0_41 = arith.constant 0 : index
    %c0_42 = arith.constant 0 : index
    %c0_43 = arith.constant 0 : index
    %37 = vector.load %arg2[%c0_41, %c0_42, %c0_43] : memref<4x512x256xbf16, #tpu.memory_space<vmem>>, vector<1x512x256xbf16>
    %38 = vector.shape_cast %37 : vector<1x512x256xbf16> to vector<512x256xbf16>
    %cst_44 = arith.constant dense<0.000000e+00> : vector<64x256xf32>
    %39 = tpu.matmul %36, %38, %cst_44 {dimension_numbers = #tpu.dot_dimension_numbers<[1], [0], [0], [1], [0, 0, 1, 1], [], []>} : vector<64x512xbf16>, vector<512x256xbf16>, vector<64x256xf32> -> vector<64x256xf32>
    %40 = arith.addf %33, %39 : vector<64x256xf32>
    %c1_45 = arith.constant 1 : index
    %c0_46 = arith.constant 0 : index
    %c1_47 = arith.constant 1 : index
    %c0_48 = arith.constant 0 : index
    %c0_49 = arith.constant 0 : index
    %41 = vector.load %arg1[%c1_45, %c0_46, %c1_47, %c0_48, %c0_49] : memref<2x9x2x8x512xbf16, #tpu.memory_space<vmem>>, vector<1x8x1x8x512xbf16>
    %42 = vector.shape_cast %41 : vector<1x8x1x8x512xbf16> to vector<8x8x512xbf16>
    %43 = vector.shape_cast %42 : vector<8x8x512xbf16> to vector<64x512xbf16>
    %c1_50 = arith.constant 1 : index
    %c0_51 = arith.constant 0 : index
    %c0_52 = arith.constant 0 : index
    %44 = vector.load %arg2[%c1_50, %c0_51, %c0_52] : memref<4x512x256xbf16, #tpu.memory_space<vmem>>, vector<1x512x256xbf16>
    %45 = vector.shape_cast %44 : vector<1x512x256xbf16> to vector<512x256xbf16>
    %cst_53 = arith.constant dense<0.000000e+00> : vector<64x256xf32>
    %46 = tpu.matmul %43, %45, %cst_53 {dimension_numbers = #tpu.dot_dimension_numbers<[1], [0], [0], [1], [0, 0, 1, 1], [], []>} : vector<64x512xbf16>, vector<512x256xbf16>, vector<64x256xf32> -> vector<64x256xf32>
    %47 = arith.addf %40, %46 : vector<64x256xf32>
    %c1_54 = arith.constant 1 : index
    %c1_55 = arith.constant 1 : index
    %c0_56 = arith.constant 0 : index
    %c0_57 = arith.constant 0 : index
    %c0_58 = arith.constant 0 : index
    %48 = vector.load %arg1[%c1_54, %c1_55, %c0_56, %c0_57, %c0_58] : memref<2x9x2x8x512xbf16, #tpu.memory_space<vmem>>, vector<1x8x1x8x512xbf16>
    %49 = vector.shape_cast %48 : vector<1x8x1x8x512xbf16> to vector<8x8x512xbf16>
    %50 = vector.shape_cast %49 : vector<8x8x512xbf16> to vector<64x512xbf16>
    %c2_59 = arith.constant 2 : index
    %c0_60 = arith.constant 0 : index
    %c0_61 = arith.constant 0 : index
    %51 = vector.load %arg2[%c2_59, %c0_60, %c0_61] : memref<4x512x256xbf16, #tpu.memory_space<vmem>>, vector<1x512x256xbf16>
    %52 = vector.shape_cast %51 : vector<1x512x256xbf16> to vector<512x256xbf16>
    %cst_62 = arith.constant dense<0.000000e+00> : vector<64x256xf32>
    %53 = tpu.matmul %50, %52, %cst_62 {dimension_numbers = #tpu.dot_dimension_numbers<[1], [0], [0], [1], [0, 0, 1, 1], [], []>} : vector<64x512xbf16>, vector<512x256xbf16>, vector<64x256xf32> -> vector<64x256xf32>
    %54 = arith.addf %47, %53 : vector<64x256xf32>
    %c1_63 = arith.constant 1 : index
    %c1_64 = arith.constant 1 : index
    %c1_65 = arith.constant 1 : index
    %c0_66 = arith.constant 0 : index
    %c0_67 = arith.constant 0 : index
    %55 = vector.load %arg1[%c1_63, %c1_64, %c1_65, %c0_66, %c0_67] : memref<2x9x2x8x512xbf16, #tpu.memory_space<vmem>>, vector<1x8x1x8x512xbf16>
    %56 = vector.shape_cast %55 : vector<1x8x1x8x512xbf16> to vector<8x8x512xbf16>
    %57 = vector.shape_cast %56 : vector<8x8x512xbf16> to vector<64x512xbf16>
    %c3_68 = arith.constant 3 : index
    %c0_69 = arith.constant 0 : index
    %c0_70 = arith.constant 0 : index
    %58 = vector.load %arg2[%c3_68, %c0_69, %c0_70] : memref<4x512x256xbf16, #tpu.memory_space<vmem>>, vector<1x512x256xbf16>
    %59 = vector.shape_cast %58 : vector<1x512x256xbf16> to vector<512x256xbf16>
    %cst_71 = arith.constant dense<0.000000e+00> : vector<64x256xf32>
    %60 = tpu.matmul %57, %59, %cst_71 {dimension_numbers = #tpu.dot_dimension_numbers<[1], [0], [0], [1], [0, 0, 1, 1], [], []>} : vector<64x512xbf16>, vector<512x256xbf16>, vector<64x256xf32> -> vector<64x256xf32>
    %61 = arith.addf %54, %60 : vector<64x256xf32>
    %62 = arith.truncf %61 : vector<64x256xf32> to vector<64x256xbf16>
    %c1_72 = arith.constant 1 : index
    %c0_73 = arith.constant 0 : index
    %c0_74 = arith.constant 0 : index
    %63 = vector.load %arg3[%c1_72, %c0_73, %c0_74] : memref<2x64x256xbf16, #tpu.memory_space<vmem>>, vector<1x64x256xbf16>
    %64 = vector.shape_cast %63 : vector<1x64x256xbf16> to vector<64x256xbf16>
    %65 = vector.shape_cast %62 : vector<64x256xbf16> to vector<1x64x256xbf16>
    tpu.vector_store %arg3[%c1_72, %c0_73, %c0_74], %65 {strides = array<i32>} : memref<2x64x256xbf16, #tpu.memory_space<vmem>>, vector<1x64x256xbf16>,
    return
  }
  func.func @transform_0(%arg0: i32) -> (i32, i32, i32, i32, i32) {
    %c0_i32 = arith.constant 0 : i32
    %c0_i32_0 = arith.constant 0 : i32
    %c0_i32_1 = arith.constant 0 : i32
    %c0_i32_2 = arith.constant 0 : i32
    %c0_i32_3 = arith.constant 0 : i32
    return %arg0, %c0_i32, %c0_i32_0, %c0_i32_1, %c0_i32_2 : i32, i32, i32, i32, i32
  }
  func.func @transform_1(%arg0: i32) -> (i32, i32, i32) {
    %c0_i32 = arith.constant 0 : i32
    %c0_i32_0 = arith.constant 0 : i32
    %c0_i32_1 = arith.constant 0 : i32
    %c0_i32_2 = arith.constant 0 : i32
    return %c0_i32, %c0_i32_0, %c0_i32_1 : i32, i32, i32
  }
  func.func @transform_2(%arg0: i32) -> (i32, i32, i32) {
    %c0_i32 = arith.constant 0 : i32
    %c0_i32_0 = arith.constant 0 : i32
    %c0_i32_1 = arith.constant 0 : i32
    return %arg0, %c0_i32, %c0_i32_0 : i32, i32, i32
  }
}

module attributes {stable_mosaic.version = 11 : i64} {
  func.func @_bn_leaky_kernel(%arg0: i32, %arg1: memref<128x128xbf16, #tpu.memory_space<vmem>>, %arg2: memref<1x128xf32, #tpu.memory_space<vmem>>, %arg3: memref<1x128xf32, #tpu.memory_space<vmem>>, %arg4: memref<128x128xbf16, #tpu.memory_space<vmem>>) attributes {dimension_semantics = [#tpu.dimension_semantics<parallel>], iteration_bounds = array<i64: 2>, scalar_prefetch = 0 : i64, scratch_operands = 0 : i64, tpu.core_type = #tpu.core_type<tc>, window_params = [{transform_indices = @transform_0, window_bounds = array<i64: 128, 128>}, {transform_indices = @transform_1, window_bounds = array<i64: 1, 128>}, {transform_indices = @transform_2, window_bounds = array<i64: 1, 128>}, {transform_indices = @transform_3, window_bounds = array<i64: 128, 128>}]} {
    %c0 = arith.constant 0 : index
    %c0_0 = arith.constant 0 : index
    %0 = vector.load %arg1[%c0, %c0_0] : memref<128x128xbf16, #tpu.memory_space<vmem>>, vector<128x128xbf16>
    %1 = arith.extf %0 : vector<128x128xbf16> to vector<128x128xf32>
    %cst = arith.constant dense<0.000000e+00> : vector<128xf32>
    %2 = vector.multi_reduction <add>, %1, %cst [0] : vector<128x128xf32> to vector<128xf32>
    %3 = vector.shape_cast %2 : vector<128xf32> to vector<1x128xf32>
    %cst_1 = arith.constant 1.280000e+02 : f32
    %4 = vector.broadcast %cst_1 : f32 to vector<1x128xf32>
    %5 = arith.divf %3, %4 : vector<1x128xf32>
    %6 = vector.broadcast %5 : vector<1x128xf32> to vector<128x128xf32>
    %7 = arith.subf %1, %6 : vector<128x128xf32>
    %8 = arith.mulf %7, %7 : vector<128x128xf32>
    %cst_2 = arith.constant dense<0.000000e+00> : vector<128xf32>
    %9 = vector.multi_reduction <add>, %8, %cst_2 [0] : vector<128x128xf32> to vector<128xf32>
    %10 = vector.shape_cast %9 : vector<128xf32> to vector<1x128xf32>
    %cst_3 = arith.constant 1.280000e+02 : f32
    %11 = vector.broadcast %cst_3 : f32 to vector<1x128xf32>
    %12 = arith.divf %10, %11 : vector<1x128xf32>
    %13 = vector.broadcast %5 : vector<1x128xf32> to vector<128x128xf32>
    %14 = arith.subf %1, %13 : vector<128x128xf32>
    %cst_4 = arith.constant 9.99999974E-6 : f32
    %15 = vector.broadcast %cst_4 : f32 to vector<1x128xf32>
    %16 = arith.addf %12, %15 : vector<1x128xf32>
    %17 = math.rsqrt %16 : vector<1x128xf32>
    %18 = vector.broadcast %17 : vector<1x128xf32> to vector<128x128xf32>
    %19 = arith.mulf %14, %18 : vector<128x128xf32>
    %c0_5 = arith.constant 0 : index
    %c0_6 = arith.constant 0 : index
    %20 = vector.load %arg2[%c0_5, %c0_6] : memref<1x128xf32, #tpu.memory_space<vmem>>, vector<1x128xf32>
    %21 = vector.broadcast %20 : vector<1x128xf32> to vector<128x128xf32>
    %22 = arith.mulf %19, %21 : vector<128x128xf32>
    %c0_7 = arith.constant 0 : index
    %c0_8 = arith.constant 0 : index
    %23 = vector.load %arg3[%c0_7, %c0_8] : memref<1x128xf32, #tpu.memory_space<vmem>>, vector<1x128xf32>
    %24 = vector.broadcast %23 : vector<1x128xf32> to vector<128x128xf32>
    %25 = arith.addf %22, %24 : vector<128x128xf32>
    %cst_9 = arith.constant 0.000000e+00 : f32
    %26 = vector.broadcast %cst_9 : f32 to vector<128x128xf32>
    %27 = arith.cmpf ogt, %25, %26 : vector<128x128xf32>
    %cst_10 = arith.constant 2.000000e-01 : f32
    %28 = vector.broadcast %cst_10 : f32 to vector<128x128xf32>
    %29 = arith.mulf %28, %25 : vector<128x128xf32>
    %30 = arith.select %27, %25, %29 : vector<128x128xi1>, vector<128x128xf32>
    %31 = arith.truncf %30 : vector<128x128xf32> to vector<128x128xbf16>
    %c0_11 = arith.constant 0 : index
    %c0_12 = arith.constant 0 : index
    %32 = vector.load %arg4[%c0_11, %c0_12] : memref<128x128xbf16, #tpu.memory_space<vmem>>, vector<128x128xbf16>
    tpu.vector_store %arg4[%c0_11, %c0_12], %31 {strides = array<i32>} : memref<128x128xbf16, #tpu.memory_space<vmem>>, vector<128x128xbf16>,
    return
  }
  func.func @transform_0(%arg0: i32) -> (i32, i32) {
    %c0_i32 = arith.constant 0 : i32
    %c0_i32_0 = arith.constant 0 : i32
    return %c0_i32, %arg0 : i32, i32
  }
  func.func @transform_1(%arg0: i32) -> (i32, i32) {
    %c0_i32 = arith.constant 0 : i32
    %c0_i32_0 = arith.constant 0 : i32
    return %c0_i32, %arg0 : i32, i32
  }
  func.func @transform_2(%arg0: i32) -> (i32, i32) {
    %c0_i32 = arith.constant 0 : i32
    %c0_i32_0 = arith.constant 0 : i32
    return %c0_i32, %arg0 : i32, i32
  }
  func.func @transform_3(%arg0: i32) -> (i32, i32) {
    %c0_i32 = arith.constant 0 : i32
    %c0_i32_0 = arith.constant 0 : i32
    return %c0_i32, %arg0 : i32, i32
  }
}

module attributes {stable_mosaic.version = 11 : i64} {
  func.func @_l4_head_kernel(%arg0: i32, %arg1: memref<32x1024xbf16, #tpu.memory_space<vmem>>, %arg2: memref<1024x512xbf16, #tpu.memory_space<vmem>>, %arg3: memref<1x512xf32, #tpu.memory_space<vmem>>, %arg4: memref<1x512xf32, #tpu.memory_space<vmem>>, %arg5: memref<32x512xf32, #tpu.memory_space<vmem>>, %arg6: memref<2x128xf32, #tpu.memory_space<vmem>>, %arg7: memref<1x128xf32, #tpu.memory_space<vmem>>, %arg8: memref<2x1xf32, #tpu.memory_space<vmem>>, %arg9: memref<32x512xf32, #tpu.memory_space<vmem>>) attributes {dimension_semantics = [#tpu.dimension_semantics<arbitrary>], iteration_bounds = array<i64: 4>, scalar_prefetch = 0 : i64, scratch_operands = 1 : i64, tpu.core_type = #tpu.core_type<tc>, window_params = [{transform_indices = @transform_0, window_bounds = array<i64: 32, 1024>}, {transform_indices = @transform_1, window_bounds = array<i64: 1024, 512>}, {pipeline_mode = #tpu.pipeline_mode<synchronous>, transform_indices = @transform_2, window_bounds = array<i64: 1, 512>}, {pipeline_mode = #tpu.pipeline_mode<synchronous>, transform_indices = @transform_3, window_bounds = array<i64: 1, 512>}, {pipeline_mode = #tpu.pipeline_mode<synchronous>, transform_indices = @transform_4, window_bounds = array<i64: 32, 512>}, {pipeline_mode = #tpu.pipeline_mode<synchronous>, transform_indices = @transform_5, window_bounds = array<i64: 2, 128>}, {pipeline_mode = #tpu.pipeline_mode<synchronous>, transform_indices = @transform_6, window_bounds = array<i64: 1, 128>}, {pipeline_mode = #tpu.pipeline_mode<synchronous>, transform_indices = @transform_7, window_bounds = array<i64: 2, 1>}]} {
    %c0_i32 = arith.constant 0 : i32
    %0 = arith.cmpi eq, %arg0, %c0_i32 : i32
    %1 = arith.extui %0 : i1 to i32
    %c0_i32_0 = arith.constant 0 : i32
    %2 = arith.cmpi ne, %1, %c0_i32_0 : i32
    scf.if %2 {
      %cst_9 = arith.constant 0.000000e+00 : f32
      %12 = vector.broadcast %cst_9 : f32 to vector<32x512xf32>
      %c0_10 = arith.constant 0 : index
      %c0_11 = arith.constant 0 : index
      %13 = vector.load %arg9[%c0_10, %c0_11] : memref<32x512xf32, #tpu.memory_space<vmem>>, vector<32x512xf32>
      tpu.vector_store %arg9[%c0_10, %c0_11], %12 {strides = array<i32>} : memref<32x512xf32, #tpu.memory_space<vmem>>, vector<32x512xf32>,
    } else {
    }
    %c0 = arith.constant 0 : index
    %c0_1 = arith.constant 0 : index
    %3 = vector.load %arg9[%c0, %c0_1] : memref<32x512xf32, #tpu.memory_space<vmem>>, vector<32x512xf32>
    %c0_2 = arith.constant 0 : index
    %c0_3 = arith.constant 0 : index
    %4 = vector.load %arg1[%c0_2, %c0_3] : memref<32x1024xbf16, #tpu.memory_space<vmem>>, vector<32x1024xbf16>
    %c0_4 = arith.constant 0 : index
    %c0_5 = arith.constant 0 : index
    %5 = vector.load %arg2[%c0_4, %c0_5] : memref<1024x512xbf16, #tpu.memory_space<vmem>>, vector<1024x512xbf16>
    %cst = arith.constant dense<0.000000e+00> : vector<32x512xf32>
    %6 = tpu.matmul %4, %5, %cst {dimension_numbers = #tpu.dot_dimension_numbers<[1], [0], [0], [1], [0, 0, 1, 1], [], []>} : vector<32x1024xbf16>, vector<1024x512xbf16>, vector<32x512xf32> -> vector<32x512xf32>
    %7 = arith.addf %3, %6 : vector<32x512xf32>
    %c0_6 = arith.constant 0 : index
    %c0_7 = arith.constant 0 : index
    %8 = vector.load %arg9[%c0_6, %c0_7] : memref<32x512xf32, #tpu.memory_space<vmem>>, vector<32x512xf32>
    tpu.vector_store %arg9[%c0_6, %c0_7], %7 {strides = array<i32>} : memref<32x512xf32, #tpu.memory_space<vmem>>, vector<32x512xf32>,
    %c3_i32 = arith.constant 3 : i32
    %9 = arith.cmpi eq, %arg0, %c3_i32 : i32
    %10 = arith.extui %9 : i1 to i32
    %c0_i32_8 = arith.constant 0 : i32
    %11 = arith.cmpi ne, %10, %c0_i32_8 : i32
    scf.if %11 {
      %c0_9 = arith.constant 0 : index
      %c0_10 = arith.constant 0 : index
      %12 = vector.load %arg9[%c0_9, %c0_10] : memref<32x512xf32, #tpu.memory_space<vmem>>, vector<32x512xf32>
      %cst_11 = arith.constant dense<0.000000e+00> : vector<512xf32>
      %13 = vector.multi_reduction <add>, %12, %cst_11 [0] : vector<32x512xf32> to vector<512xf32>
      %14 = vector.shape_cast %13 : vector<512xf32> to vector<1x512xf32>
      %cst_12 = arith.constant 3.200000e+01 : f32
      %15 = vector.broadcast %cst_12 : f32 to vector<1x512xf32>
      %16 = arith.divf %14, %15 : vector<1x512xf32>
      %17 = vector.broadcast %16 : vector<1x512xf32> to vector<32x512xf32>
      %18 = arith.subf %12, %17 : vector<32x512xf32>
      %19 = arith.mulf %18, %18 : vector<32x512xf32>
      %cst_13 = arith.constant dense<0.000000e+00> : vector<512xf32>
      %20 = vector.multi_reduction <add>, %19, %cst_13 [0] : vector<32x512xf32> to vector<512xf32>
      %21 = vector.shape_cast %20 : vector<512xf32> to vector<1x512xf32>
      %cst_14 = arith.constant 3.200000e+01 : f32
      %22 = vector.broadcast %cst_14 : f32 to vector<1x512xf32>
      %23 = arith.divf %21, %22 : vector<1x512xf32>
      %24 = vector.broadcast %16 : vector<1x512xf32> to vector<32x512xf32>
      %25 = arith.subf %12, %24 : vector<32x512xf32>
      %cst_15 = arith.constant 9.99999974E-6 : f32
      %26 = vector.broadcast %cst_15 : f32 to vector<1x512xf32>
      %27 = arith.addf %23, %26 : vector<1x512xf32>
      %28 = math.rsqrt %27 : vector<1x512xf32>
      %29 = vector.broadcast %28 : vector<1x512xf32> to vector<32x512xf32>
      %30 = arith.mulf %25, %29 : vector<32x512xf32>
      %c0_16 = arith.constant 0 : index
      %c0_17 = arith.constant 0 : index
      %31 = vector.load %arg3[%c0_16, %c0_17] : memref<1x512xf32, #tpu.memory_space<vmem>>, vector<1x512xf32>
      %32 = vector.broadcast %31 : vector<1x512xf32> to vector<32x512xf32>
      %33 = arith.mulf %30, %32 : vector<32x512xf32>
      %c0_18 = arith.constant 0 : index
      %c0_19 = arith.constant 0 : index
      %34 = vector.load %arg4[%c0_18, %c0_19] : memref<1x512xf32, #tpu.memory_space<vmem>>, vector<1x512xf32>
      %35 = vector.broadcast %34 : vector<1x512xf32> to vector<32x512xf32>
      %36 = arith.addf %33, %35 : vector<32x512xf32>
      %cst_20 = arith.constant 0.000000e+00 : f32
      %37 = vector.broadcast %cst_20 : f32 to vector<32x512xf32>
      %38 = arith.cmpf ogt, %36, %37 : vector<32x512xf32>
      %cst_21 = arith.constant 2.000000e-01 : f32
      %39 = vector.broadcast %cst_21 : f32 to vector<32x512xf32>
      %40 = arith.mulf %39, %36 : vector<32x512xf32>
      %41 = arith.select %38, %36, %40 : vector<32x512xi1>, vector<32x512xf32>
      %c0_22 = arith.constant 0 : index
      %c0_23 = arith.constant 0 : index
      %42 = vector.load %arg5[%c0_22, %c0_23] : memref<32x512xf32, #tpu.memory_space<vmem>>, vector<32x512xf32>
      %43 = arith.mulf %41, %42 : vector<32x512xf32>
      %44 = vector.extract_strided_slice %43 {offsets = [0, 0], sizes = [16, 512], strides = [1, 1]} : vector<32x512xf32> to vector<16x512xf32>
      %cst_24 = arith.constant dense<0.000000e+00> : vector<512xf32>
      %45 = vector.multi_reduction <add>, %44, %cst_24 [0] : vector<16x512xf32> to vector<512xf32>
      %46 = vector.shape_cast %45 : vector<512xf32> to vector<1x512xf32>
      %47 = vector.extract_strided_slice %43 {offsets = [16, 0], sizes = [16, 512], strides = [1, 1]} : vector<32x512xf32> to vector<16x512xf32>
      %cst_25 = arith.constant dense<0.000000e+00> : vector<512xf32>
      %48 = vector.multi_reduction <add>, %47, %cst_25 [0] : vector<16x512xf32> to vector<512xf32>
      %49 = vector.shape_cast %48 : vector<512xf32> to vector<1x512xf32>
      %50 = tpu.concatenate %46, %49 in 0 : vector<1x512xf32>, vector<1x512xf32> -> vector<2x512xf32>
      %cst_26 = arith.constant dense<0.000000e+00> : vector<2xf32>
      %51 = vector.multi_reduction <add>, %50, %cst_26 [1] : vector<2x512xf32> to vector<2xf32>
      %52 = vector.shape_cast %51 : vector<2xf32> to vector<2x1xf32>
      %c0_27 = arith.constant 0 : index
      %c0_28 = arith.constant 0 : index
      %53 = vector.load %arg6[%c0_27, %c0_28] : memref<2x128xf32, #tpu.memory_space<vmem>>, vector<2x128xf32>
      %c0_29 = arith.constant 0 : index
      %c0_30 = arith.constant 0 : index
      %54 = vector.load %arg7[%c0_29, %c0_30] : memref<1x128xf32, #tpu.memory_space<vmem>>, vector<1x128xf32>
      %55 = vector.broadcast %54 : vector<1x128xf32> to vector<2x128xf32>
      %56 = arith.mulf %53, %55 : vector<2x128xf32>
      %cst_31 = arith.constant dense<0.000000e+00> : vector<2xf32>
      %57 = vector.multi_reduction <add>, %56, %cst_31 [1] : vector<2x128xf32> to vector<2xf32>
      %58 = vector.shape_cast %57 : vector<2xf32> to vector<2x1xf32>
      %59 = arith.addf %52, %58 : vector<2x1xf32>
      %cst_32 = arith.constant 0.000000e+00 : f32
      %60 = vector.broadcast %cst_32 : f32 to vector<2x1xf32>
      %61 = arith.subf %60, %59 : vector<2x1xf32>
      %62 = math.exp %61 : vector<2x1xf32>
      %cst_33 = arith.constant 1.000000e+00 : f32
      %63 = vector.broadcast %cst_33 : f32 to vector<2x1xf32>
      %64 = arith.addf %63, %62 : vector<2x1xf32>
      %cst_34 = arith.constant 1.000000e+00 : f32
      %65 = vector.broadcast %cst_34 : f32 to vector<2x1xf32>
      %66 = arith.divf %65, %64 : vector<2x1xf32>
      %c0_35 = arith.constant 0 : index
      %c0_36 = arith.constant 0 : index
      %67 = vector.load %arg8[%c0_35, %c0_36] : memref<2x1xf32, #tpu.memory_space<vmem>>, vector<2x1xf32>
      tpu.vector_store %arg8[%c0_35, %c0_36], %66 {strides = array<i32>} : memref<2x1xf32, #tpu.memory_space<vmem>>, vector<2x1xf32>,
    } else {
    }
    return
  }
  func.func @transform_0(%arg0: i32) -> (i32, i32) {
    %c0_i32 = arith.constant 0 : i32
    %c0_i32_0 = arith.constant 0 : i32
    return %c0_i32, %arg0 : i32, i32
  }
  func.func @transform_1(%arg0: i32) -> (i32, i32) {
    %c0_i32 = arith.constant 0 : i32
    %c0_i32_0 = arith.constant 0 : i32
    return %arg0, %c0_i32 : i32, i32
  }
  func.func @transform_2(%arg0: i32) -> (i32, i32) {
    %c0_i32 = arith.constant 0 : i32
    %c0_i32_0 = arith.constant 0 : i32
    %c0_i32_1 = arith.constant 0 : i32
    return %c0_i32, %c0_i32_0 : i32, i32
  }
  func.func @transform_3(%arg0: i32) -> (i32, i32) {
    %c0_i32 = arith.constant 0 : i32
    %c0_i32_0 = arith.constant 0 : i32
    %c0_i32_1 = arith.constant 0 : i32
    return %c0_i32, %c0_i32_0 : i32, i32
  }
  func.func @transform_4(%arg0: i32) -> (i32, i32) {
    %c0_i32 = arith.constant 0 : i32
    %c0_i32_0 = arith.constant 0 : i32
    %c0_i32_1 = arith.constant 0 : i32
    return %c0_i32, %c0_i32_0 : i32, i32
  }
  func.func @transform_5(%arg0: i32) -> (i32, i32) {
    %c0_i32 = arith.constant 0 : i32
    %c0_i32_0 = arith.constant 0 : i32
    %c0_i32_1 = arith.constant 0 : i32
    return %c0_i32, %c0_i32_0 : i32, i32
  }
  func.func @transform_6(%arg0: i32) -> (i32, i32) {
    %c0_i32 = arith.constant 0 : i32
    %c0_i32_0 = arith.constant 0 : i32
    %c0_i32_1 = arith.constant 0 : i32
    return %c0_i32, %c0_i32_0 : i32, i32
  }
  func.func @transform_7(%arg0: i32) -> (i32, i32) {
    %c0_i32 = arith.constant 0 : i32
    %c0_i32_0 = arith.constant 0 : i32
    %c0_i32_1 = arith.constant 0 : i32
    return %c0_i32, %c0_i32_0 : i32, i32
  }
}

</mosaic_0001>

<bundles_post_ra>
// kernel: discriminator_forward.6
= control target key start
LH: loop header
LB: loop body
LE: loop exit
PB: predicated region body
PF: predicated region fallthrough
CT: control target
= control target key end

     0   :  { %s3142_s9 = smov 0   ;;  %s3564_s0 = inlined_call_operand.vmem [shape: bf16[2048,48], index: 0, kind: input, shape index: {}]   ;;  %s3565_s1 = inlined_call_operand.vmem [shape: bf16[48,64], index: 1, kind: input, shape index: {}]   ;;  %s3566_s2 = inlined_call_operand.vmem [shape: bf16[2048,64], index: 2, kind: output, shape index: {}]  }
   0x1 LB: > { %s2439_s10 = sadd.s32 4294967295, %s3125_s9   ;;  %p2443_p0 = scmp.ge.s32.totalorder %s3125_s9, 1  ;;  %s3125_s9 = sphi %s3142_s9, %s12_s9  }
   0x2   : > { %p113_p1 = scmp.lt.s32.totalorder %s3125_s9, 3 }
   0x4   : > { %p114_p2 = pnand %p2443_p0, %p113_p1 }
   0x5   : > { %v3052_v0 = vld [vmem:[%s3565_s1] sm:$0xff] (!%p114_p2)   ;;  %s2444_s13 = sshll.u32 (!%p114_p2), %s2439_s10, 7  ;;  %v3053_v1 = vld [vmem:[%s3565_s1 + $0x8] sm:$0xff] (!%p114_p2)   ;;  %v3054_v2 = vld [vmem:[%s3565_s1 + $0x10] sm:$0xff] (!%p114_p2)   ;;  %vm620_vm0 = vcmask (!%p114_p2), 392192   ;;  %vm2254_vm3 = vcmask (!%p114_p2), 519168  }
   0x6   : > { %117 = sbr.rel (%p114_p2) target bundleno = 366 (0x16e), region = 28  ;;  %p136_p3 = scmp.lt.s32.totalorder (!%p114_p2), %s2444_s13, 255  ;;  %2904 = vmatprep.subr.bf16.mxu0 (!%p114_p2), %v3052_v0  ;;  %3038 = vmatprep.subr.bf16.mxu1 (!%p114_p2), %v3052_v0 }
   0x7   : > { %2905 = vmatpush3.bf16.msra.mxu0 (!%p114_p2), %v3052_v0  ;;  %3041 = vmatpush3.bf16.msra.mxu1 (!%p114_p2), %v3052_v0 }
   0x8   : > { %2906 = vmatprep.subr.bf16.mxu0 (!%p114_p2), %v3053_v1  ;;  %3039 = vmatprep.subr.bf16.mxu1 (!%p114_p2), %v3053_v1 }
   0xb   : > { %2907 = vmatpush3.bf16.msra.mxu0 (!%p114_p2), %v3053_v1  ;;  %3042 = vmatpush3.bf16.msra.mxu1 (!%p114_p2), %v3053_v1 }
   0xc   : > { %2908 = vmatprep.subr.bf16.mxu0 (!%p114_p2), %v3054_v2  ;;  %3040 = vmatprep.subr.bf16.mxu1 (!%p114_p2), %v3054_v2 }
   0xd   : > { %s3568_s13 = smov (!%p136_p3, %s2444_s13), 255 }
   0xe   : > { %s2445_s18 = sshll.u32 %s3568_s13, 2 }
   0xf   : > { %s3167_s21 = scalar_lea.vmem %s3564_s0, %s2445_s18  ;;  %2909 = vmatpush3.bf16.msra.mxu0 %v3054_v2  ;;  %3043 = vmatpush3.bf16.msra.mxu1 %v3054_v2  ;;  %s3302_s24 = scalar_lea.vmem %s3566_s2, %s2445_s18 }
  0x10   : > { %v3055_v3 = vld [vmem:[%s3167_s21] sm:$0xff]   ;;  %v3057_v5 = vld [vmem:[%s3167_s21 + $0x8] sm:$0xff]   ;;  %v3059_v7 = vld [vmem:[%s3167_s21 + $0x10] sm:$0xff]  }
  0x11   : > { %v3056_v4 = vld [vmem:[%s3167_s21 + $0x100] sm:$0xff]   ;;  %2910 = vmatprep.mubr.msk.bf16.mxu0 %vm620_vm0, %v3055_v3  ;;  %v3058_v6 = vld [vmem:[%s3167_s21 + $0x108] sm:$0xff]   ;;  %v3060_v8 = vld [vmem:[%s3167_s21 + $0x110] sm:$0xff]  }
  0x12   : > { %2974 = vmatprep.mubr.msk.bf16.mxu1 %vm620_vm0, %v3056_v4  ;;  %2911 = vmatmul.mubr.msk.bf16.vlgmr.msra.gmra.mrb[0].mxu0 %vm620_vm0, %v3057_v5  ;;  %v3061_v9 = vld [vmem:[%s3167_s21 + $0x18] sm:$0xff]   ;;  %v3063_v11 = vld [vmem:[%s3167_s21 + $0x20] sm:$0xff]   ;;  %v3065_v13 = vld [vmem:[%s3167_s21 + $0x28] sm:$0xff]  }
  0x13   : > { %2975 = vmatmul.mubr.msk.bf16.vlgmr.msra.gmra.mrb[0].mxu1 %vm620_vm0, %v3058_v6  ;;  %2914 = vmatprep.mubr.msk.bf16.mxu0 %vm620_vm0, %v3059_v7  ;;  %v3062_v10 = vld [vmem:[%s3167_s21 + $0x118] sm:$0xff]   ;;  %v3064_v12 = vld [vmem:[%s3167_s21 + $0x120] sm:$0xff]   ;;  %v3066_v14 = vld [vmem:[%s3167_s21 + $0x128] sm:$0xff]  }
  0x14   : > { %2978 = vmatprep.mubr.msk.bf16.mxu1 %vm620_vm0, %v3060_v8  ;;  %v3067_v15 = vld [vmem:[%s3167_s21 + $0x30] sm:$0xff]   ;;  %v3069_v17 = vld [vmem:[%s3167_s21 + $0x38] sm:$0xff]   ;;  %v3071_v19 = vld [vmem:[%s3167_s21 + $0x40] sm:$0xff]  }
  0x15   : > { %v3068_v16 = vld [vmem:[%s3167_s21 + $0x130] sm:$0xff]   ;;  %v3070_v18 = vld [vmem:[%s3167_s21 + $0x138] sm:$0xff]   ;;  %v3072_v20 = vld [vmem:[%s3167_s21 + $0x140] sm:$0xff]  }
  0x16   : > { %v3073_v21 = vld [vmem:[%s3167_s21 + $0x48] sm:$0xff]   ;;  %v3075_v23 = vld [vmem:[%s3167_s21 + $0x50] sm:$0xff]   ;;  %v3077_v25 = vld [vmem:[%s3167_s21 + $0x58] sm:$0xff]  }
  0x17   : > { %v3074_v22 = vld [vmem:[%s3167_s21 + $0x148] sm:$0xff]   ;;  %v3076_v24 = vld [vmem:[%s3167_s21 + $0x150] sm:$0xff]   ;;  %v3078_v26 = vld [vmem:[%s3167_s21 + $0x158] sm:$0xff]  }
  0x18   : > { %v3079_v27 = vld [vmem:[%s3167_s21 + $0x60] sm:$0xff]   ;;  %v3081_v29 = vld [vmem:[%s3167_s21 + $0x68] sm:$0xff]   ;;  %v3083_v31 = vld [vmem:[%s3167_s21 + $0x70] sm:$0xff]  }
  0x19   : > { %v3080_v28 = vld [vmem:[%s3167_s21 + $0x160] sm:$0xff]   ;;  %v3082_v30 = vld [vmem:[%s3167_s21 + $0x168] sm:$0xff]   ;;  %v3084_v32 = vld [vmem:[%s3167_s21 + $0x170] sm:$0xff]  }
  0x1a   : > { %2915 = vmatmul.mubr.msk.bf16.gmra.mrb[4].mxu0 %vm620_vm0, %v3061_v9  ;;  %v3085_v33 = vld [vmem:[%s3167_s21 + $0x78] sm:$0xff]   ;;  %v3087_v35 = vld [vmem:[%s3167_s21 + $0x80] sm:$0xff]   ;;  %v3089_v37 = vld [vmem:[%s3167_s21 + $0x88] sm:$0xff]  }
  0x1b   : > { %2979 = vmatmul.mubr.msk.bf16.gmra.mrb[4].mxu1 %vm620_vm0, %v3062_v10  ;;  %2918 = vmatprep.mubr.msk.bf16.mxu0 %vm620_vm0, %v3063_v11  ;;  %v3086_v34 = vld [vmem:[%s3167_s21 + $0x178] sm:$0xff]   ;;  %v3088_v36 = vld [vmem:[%s3167_s21 + $0x180] sm:$0xff]   ;;  %v3090_v38 = vld [vmem:[%s3167_s21 + $0x188] sm:$0xff]  }
  0x1c   : > { %2982 = vmatprep.mubr.msk.bf16.mxu1 %vm620_vm0, %v3064_v12  ;;  %v3091_v39 = vld [vmem:[%s3167_s21 + $0x90] sm:$0xff]   ;;  %v3093_v41 = vld [vmem:[%s3167_s21 + $0x98] sm:$0xff]   ;;  %v3095_v43 = vld [vmem:[%s3167_s21 + $0xa0] sm:$0xff]  }
  0x1d   : > { %v3092_v40 = vld [vmem:[%s3167_s21 + $0x190] sm:$0xff]   ;;  %v3094_v42 = vld [vmem:[%s3167_s21 + $0x198] sm:$0xff]   ;;  %v3096_v44 = vld [vmem:[%s3167_s21 + $0x1a0] sm:$0xff]  }
  0x1e   : > { %v3097_v45 = vld [vmem:[%s3167_s21 + $0xa8] sm:$0xff]   ;;  %v3099_v47 = vld [vmem:[%s3167_s21 + $0xb0] sm:$0xff]   ;;  %v3101_v49 = vld [vmem:[%s3167_s21 + $0xb8] sm:$0xff]  }
  0x1f   : > { %v3098_v46 = vld [vmem:[%s3167_s21 + $0x1a8] sm:$0xff]   ;;  %v3100_v48 = vld [vmem:[%s3167_s21 + $0x1b0] sm:$0xff]   ;;  %v3102_v50 = vld [vmem:[%s3167_s21 + $0x1b8] sm:$0xff]  }
  0x20   : > { %v3103_v51 = vld [vmem:[%s3167_s21 + $0xc0] sm:$0xff]   ;;  %v3105_v53 = vld [vmem:[%s3167_s21 + $0xc8] sm:$0xff]   ;;  %v3107_v55 = vld [vmem:[%s3167_s21 + $0xd0] sm:$0xff]  }
  0x21   : > { %v3104_v52 = vld [vmem:[%s3167_s21 + $0x1c0] sm:$0xff]   ;;  %v3106_v54 = vld [vmem:[%s3167_s21 + $0x1c8] sm:$0xff]   ;;  %v3108_v56 = vld [vmem:[%s3167_s21 + $0x1d0] sm:$0xff]  }
  0x22   : > { %2919 = vmatmul.mubr.msk.bf16.gmra.mrb[8].mxu0 %vm620_vm0, %v3065_v13  ;;  %v3109_v57 = vld [vmem:[%s3167_s21 + $0xd8] sm:$0xff]   ;;  %v3111_v59 = vld [vmem:[%s3167_s21 + $0xe0] sm:$0xff]   ;;  %v3113_v61 = vld [vmem:[%s3167_s21 + $0xe8] sm:$0xff]  }
  0x23   : > { %2983 = vmatmul.mubr.msk.bf16.gmra.mrb[8].mxu1 %vm620_vm0, %v3066_v14  ;;  %2922 = vmatprep.mubr.msk.bf16.mxu0 %vm620_vm0, %v3067_v15  ;;  %v3110_v58 = vld [vmem:[%s3167_s21 + $0x1d8] sm:$0xff]   ;;  %v3112_v60 = vld [vmem:[%s3167_s21 + $0x1e0] sm:$0xff]   ;;  %v3114_v62 = vld [vmem:[%s3167_s21 + $0x1e8] sm:$0xff]  }
  0x24   : > { %2986 = vmatprep.mubr.msk.bf16.mxu1 %vm620_vm0, %v3068_v16  ;;  %v3115_v63 = vld [vmem:[%s3167_s21 + $0xf0] sm:$0xff]   ;;  %v3117_v1 = vld [vmem:[%s3167_s21 + $0xf8] sm:$0xff]  }
  0x25   : > { %v3116_v0 = vld [vmem:[%s3167_s21 + $0x1f0] sm:$0xff]   ;;  %v3118_v2 = vld [vmem:[%s3167_s21 + $0x1f8] sm:$0xff]  }
  0x2a   : > { %2923 = vmatmul.mubr.msk.bf16.gmra.mrb[12].mxu0 %vm620_vm0, %v3069_v17 }
  0x2b   : > { %2987 = vmatmul.mubr.msk.bf16.gmra.mrb[12].mxu1 %vm620_vm0, %v3070_v18  ;;  %2926 = vmatprep.mubr.msk.bf16.mxu0 %vm620_vm0, %v3071_v19 }
  0x2c   : > { %2990 = vmatprep.mubr.msk.bf16.mxu1 %vm620_vm0, %v3072_v20 }
  0x32   : > { %2927 = vmatmul.mubr.msk.bf16.gmra.mrb[16].mxu0 %vm620_vm0, %v3073_v21 }
  0x33   : > { %2991 = vmatmul.mubr.msk.bf16.gmra.mrb[16].mxu1 %vm620_vm0, %v3074_v22  ;;  %2930 = vmatprep.mubr.msk.bf16.mxu0 %vm620_vm0, %v3075_v23 }
  0x34   : > { %2994 = vmatprep.mubr.msk.bf16.mxu1 %vm620_vm0, %v3076_v24 }
  0x3a   : > { %2931 = vmatmul.mubr.msk.bf16.gmra.mrb[20].mxu0 %vm620_vm0, %v3077_v25 }
  0x3b   : > { %2995 = vmatmul.mubr.msk.bf16.gmra.mrb[20].mxu1 %vm620_vm0, %v3078_v26  ;;  %2934 = vmatprep.mubr.msk.bf16.mxu0 %vm620_vm0, %v3079_v27 }
  0x3c   : > { %2998 = vmatprep.mubr.msk.bf16.mxu1 %vm620_vm0, %v3080_v28 }
  0x42   : > { %2935 = vmatmul.mubr.msk.bf16.gmra.mrb[24].mxu0 %vm620_vm0, %v3081_v29 }
  0x43   : > { %2999 = vmatmul.mubr.msk.bf16.gmra.mrb[24].mxu1 %vm620_vm0, %v3082_v30  ;;  %2938 = vmatprep.mubr.msk.bf16.mxu0 %vm620_vm0, %v3083_v31 }
  0x44   : > { %3002 = vmatprep.mubr.msk.bf16.mxu1 %vm620_vm0, %v3084_v32 }
  0x4a   : > { %2939 = vmatmul.mubr.msk.bf16.gmra.mrb[28].mxu0 %vm620_vm0, %v3085_v33 }
  0x4b   : > { %3003 = vmatmul.mubr.msk.bf16.gmra.mrb[28].mxu1 %vm620_vm0, %v3086_v34  ;;  %2942 = vmatprep.mubr.msk.bf16.mxu0 %vm620_vm0, %v3087_v35 }
  0x4c   : > { %3006 = vmatprep.mubr.msk.bf16.mxu1 %vm620_vm0, %v3088_v36 }
  0x52   : > { %2943 = vmatmul.mubr.msk.bf16.gmra.mrb[32].mxu0 %vm620_vm0, %v3089_v37 }
  0x53   : > { %3007 = vmatmul.mubr.msk.bf16.gmra.mrb[32].mxu1 %vm620_vm0, %v3090_v38  ;;  %2946 = vmatprep.mubr.msk.bf16.mxu0 %vm620_vm0, %v3091_v39 }
  0x54   : > { %3010 = vmatprep.mubr.msk.bf16.mxu1 %vm620_vm0, %v3092_v40 }
  0x5a   : > { %2947 = vmatmul.mubr.msk.bf16.gmra.mrb[36].mxu0 %vm620_vm0, %v3093_v41 }
  0x5b   : > { %3011 = vmatmul.mubr.msk.bf16.gmra.mrb[36].mxu1 %vm620_vm0, %v3094_v42  ;;  %2950 = vmatprep.mubr.msk.bf16.mxu0 %vm620_vm0, %v3095_v43 }
  0x5c   : > { %3014 = vmatprep.mubr.msk.bf16.mxu1 %vm620_vm0, %v3096_v44 }
  0x62   : > { %2951 = vmatmul.mubr.msk.bf16.gmra.mrb[40].mxu0 %vm620_vm0, %v3097_v45 }
  0x63   : > { %3015 = vmatmul.mubr.msk.bf16.gmra.mrb[40].mxu1 %vm620_vm0, %v3098_v46  ;;  %2954 = vmatprep.mubr.msk.bf16.mxu0 %vm620_vm0, %v3099_v47 }
  0x64   : > { %3018 = vmatprep.mubr.msk.bf16.mxu1 %vm620_vm0, %v3100_v48 }
  0x6a   : > { %2955 = vmatmul.mubr.msk.bf16.gmra.mrb[44].mxu0 %vm620_vm0, %v3101_v49 }
  0x6b   : > { %3019 = vmatmul.mubr.msk.bf16.gmra.mrb[44].mxu1 %vm620_vm0, %v3102_v50  ;;  %2958 = vmatprep.mubr.msk.bf16.mxu0 %vm620_vm0, %v3103_v51 }
  0x6c   : > { %3022 = vmatprep.mubr.msk.bf16.mxu1 %vm620_vm0, %v3104_v52 }
  0x72   : > { %2959 = vmatmul.mubr.msk.bf16.gmra.mrb[48].mxu0 %vm620_vm0, %v3105_v53 }
  0x73   : > { %3023 = vmatmul.mubr.msk.bf16.gmra.mrb[48].mxu1 %vm620_vm0, %v3106_v54  ;;  %2962 = vmatprep.mubr.msk.bf16.mxu0 %vm620_vm0, %v3107_v55 }
  0x74   : > { %3026 = vmatprep.mubr.msk.bf16.mxu1 %vm620_vm0, %v3108_v56 }
  0x7a   : > { %2963 = vmatmul.mubr.msk.bf16.gmra.mrb[52].mxu0 %vm620_vm0, %v3109_v57 }
  0x7b   : > { %3027 = vmatmul.mubr.msk.bf16.gmra.mrb[52].mxu1 %vm620_vm0, %v3110_v58  ;;  %2966 = vmatprep.mubr.msk.bf16.mxu0 %vm620_vm0, %v3111_v59 }
  0x7c   : > { %3030 = vmatprep.mubr.msk.bf16.mxu1 %vm620_vm0, %v3112_v60 }
  0x82   : > { %2967 = vmatmul.mubr.msk.bf16.gmra.mrb[56].mxu0 %vm620_vm0, %v3113_v61 }
  0x83   : > { %3031 = vmatmul.mubr.msk.bf16.gmra.mrb[56].mxu1 %vm620_vm0, %v3114_v62  ;;  %2970 = vmatprep.mubr.msk.bf16.mxu0 %vm620_vm0, %v3115_v63 }
  0x84   : > { %3034 = vmatprep.mubr.msk.bf16.mxu1 %vm620_vm0, %v3116_v0 }
  0x8a   : > { %2971 = vmatmul.mubr.msk.bf16.gmra.mrb[60].mxu0 %vm620_vm0, %v3117_v1 }
  0x8b   : > { %3035 = vmatmul.mubr.msk.bf16.gmra.mrb[60].mxu1 %vm620_vm0, %v3118_v2 }
  0xe5   : > { %v2912_v3 = vpop.f32.mrb[0].mxu0 }
  0xe6   : > { %v2976_v4 = vpop.f32.mrb[0].mxu1  ;;  %vm1360_vm1 = vcmp.gt.f32.partialorder %v2912_v3, 0.0  ;;  %v1488_v5 = vmul.f32 0.2, %v2912_v3  ;;  %v847_v7 = vpop.f32.mrb[1].mxu0 }
  0xe7   : > { %vm1424_vm2 = vcmp.gt.f32.partialorder %v2976_v4, 0.0  ;;  %v1552_v6 = vmul.f32 0.2, %v2976_v4  ;;  %v1103_v8 = vpop.f32.mrb[1].mxu1  ;;  %vm1358_vm4 = vcmp.gt.f32.partialorder %v847_v7, 0.0  ;;  %v2913_v12 = vpop.f32.mrb[2].mxu0 }
  0xe8   : > { %v1616_v9 = vsel %vm1360_vm1, %v2912_v3, %v1488_v5  ;;  %v1486_v11 = vmul.f32 0.2, %v847_v7  ;;  %v2977_v13 = vpop.f32.mrb[2].mxu1  ;;  %vm1422_vm5 = vcmp.gt.f32.partialorder %v1103_v8, 0.0  ;;  %v1550_v16 = vmul.f32 0.2, %v1103_v8 }
  0xe9   : > { %v1680_v10 = vsel %vm1424_vm2, %v2976_v4, %v1552_v6  ;;  %v2711_v14 = vpack.c.bf16 %v1616_v9, %v1616_v9  ;;  %v850_v17 = vpop.f32.mrb[3].mxu0  ;;  %v1106_v18 = vpop.f32.mrb[3].mxu1  ;;  %vm1361_vm6 = vcmp.gt.f32.partialorder %v2913_v12, 0.0  ;;  %v1489_v20 = vmul.f32 0.2, %v2913_v12 }
  0xea   : > { %v2775_v15 = vpack.c.bf16 %v1680_v10, %v1680_v10  ;;  %v1614_v19 = vsel %vm1358_vm4, %v847_v7, %v1486_v11  ;;  %vm1425_vm7 = vcmp.gt.f32.partialorder %v2977_v13, 0.0  ;;  %v1678_v22 = vsel %vm1422_vm5, %v1103_v8, %v1550_v16 }
  0xeb   : > { %2257 = vst.msk [vmem:[%s3302_s24 + $0x8] sm:$0xf] %vm2254_vm3, %v2711_v14  ;;  %v2709_v21 = vpack.c.bf16 %v1614_v19, %v1614_v19  ;;  %v1553_v23 = vmul.f32 0.2, %v2977_v13  ;;  %vm1359_vm8 = vcmp.gt.f32.partialorder %v850_v17, 0.0  ;;  %v2773_v24 = vpack.c.bf16 %v1678_v22, %v1678_v22 }
  0xec   : > { %2321 = vst.msk [vmem:[%s3302_s24 + $0x108] sm:$0xf] %vm2254_vm3, %v2775_v15  ;;  %v1617_v25 = vsel %vm1361_vm6, %v2913_v12, %v1489_v20  ;;  %v1487_v26 = vmul.f32 0.2, %v850_v17  ;;  %vm1423_vm9 = vcmp.gt.f32.partialorder %v1106_v18, 0.0 }
  0xed   : > { %2255 = vst.msk [vmem:[%s3302_s24] sm:$0xf] %vm2254_vm3, %v2709_v21  ;;  %v2712_v27 = vpack.c.bf16 %v1617_v25, %v1617_v25  ;;  %v1681_v28 = vsel %vm1425_vm7, %v2977_v13, %v1553_v23  ;;  %v1551_v29 = vmul.f32 0.2, %v1106_v18  ;;  %v2916_v30 = vpop.f32.mrb[4].mxu0 }
  0xee   : > { %v2980_v31 = vpop.f32.mrb[4].mxu1  ;;  %2319 = vst.msk [vmem:[%s3302_s24 + $0x100] sm:$0xf] %vm2254_vm3, %v2773_v24  ;;  %v2776_v32 = vpack.c.bf16 %v1681_v28, %v1681_v28  ;;  %v1615_v33 = vsel %vm1359_vm8, %v850_v17, %v1487_v26  ;;  %vm1364_vm10 = vcmp.gt.f32.partialorder %v2916_v30, 0.0  ;;  %v1492_v34 = vmul.f32 0.2, %v2916_v30 }
  0xef   : > { %v863_v35 = vpop.f32.mrb[5].mxu0  ;;  %v1119_v36 = vpop.f32.mrb[5].mxu1  ;;  %2258 = vst.msk [vmem:[%s3302_s24 + $0xc] sm:$0xf] %vm2254_vm3, %v2712_v27  ;;  %v2710_v37 = vpack.c.bf16 %v1615_v33, %v1615_v33  ;;  %v1679_v38 = vsel %vm1423_vm9, %v1106_v18, %v1551_v29  ;;  %vm1428_vm11 = vcmp.gt.f32.partialorder %v2980_v31, 0.0 }
  0xf0   : > { %v1556_v39 = vmul.f32 0.2, %v2980_v31  ;;  %v2917_v40 = vpop.f32.mrb[6].mxu0  ;;  %v2981_v41 = vpop.f32.mrb[6].mxu1  ;;  %2322 = vst.msk [vmem:[%s3302_s24 + $0x10c] sm:$0xf] %vm2254_vm3, %v2776_v32  ;;  %v2774_v42 = vpack.c.bf16 %v1679_v38, %v1679_v38  ;;  %v1620_v43 = vsel %vm1364_vm10, %v2916_v30, %v1492_v34 }
  0xf1   : > { %vm1362_vm12 = vcmp.gt.f32.partialorder %v863_v35, 0.0  ;;  %v1490_v44 = vmul.f32 0.2, %v863_v35  ;;  %v866_v45 = vpop.f32.mrb[7].mxu0  ;;  %v1122_v46 = vpop.f32.mrb[7].mxu1  ;;  %v2715_v47 = vpack.c.bf16 %v1620_v43, %v1620_v43  ;;  %vm1426_vm13 = vcmp.gt.f32.partialorder %v1119_v36, 0.0 }
  0xf2   : > { %2256 = vst.msk [vmem:[%s3302_s24 + $0x4] sm:$0xf] %vm2254_vm3, %v2710_v37  ;;  %v1684_v48 = vsel %vm1428_vm11, %v2980_v31, %v1556_v39  ;;  %v1554_v49 = vmul.f32 0.2, %v1119_v36  ;;  %2320 = vst.msk [vmem:[%s3302_s24 + $0x104] sm:$0xf] %vm2254_vm3, %v2774_v42 }
  0xf3   : > { %v2779_v50 = vpack.c.bf16 %v1684_v48, %v1684_v48  ;;  %v1618_v51 = vsel %vm1362_vm12, %v863_v35, %v1490_v44  ;;  %vm1365_vm14 = vcmp.gt.f32.partialorder %v2917_v40, 0.0  ;;  %v1493_v52 = vmul.f32 0.2, %v2917_v40  ;;  %2261 = vst.msk [vmem:[%s3302_s24 + $0x18] sm:$0xf] %vm2254_vm3, %v2715_v47 }
  0xf4   : > { %v2713_v53 = vpack.c.bf16 %v1618_v51, %v1618_v51  ;;  %v1682_v54 = vsel %vm1426_vm13, %v1119_v36, %v1554_v49  ;;  %vm1429_vm15 = vcmp.gt.f32.partialorder %v2981_v41, 0.0  ;;  %v1557_v55 = vmul.f32 0.2, %v2981_v41 }
  0xf5   : > { %2325 = vst.msk [vmem:[%s3302_s24 + $0x118] sm:$0xf] %vm2254_vm3, %v2779_v50  ;;  %v2777_v56 = vpack.c.bf16 %v1682_v54, %v1682_v54  ;;  %v1621_v57 = vsel %vm1365_vm14, %v2917_v40, %v1493_v52  ;;  %vm1363_vm0 = vcmp.gt.f32.partialorder %v866_v45, 0.0  ;;  %v1491_v58 = vmul.f32 0.2, %v866_v45  ;;  %v2920_v62 = vpop.f32.mrb[8].mxu0 }
  0xf6   : > { %2259 = vst.msk [vmem:[%s3302_s24 + $0x10] sm:$0xf] %vm2254_vm3, %v2713_v53  ;;  %v2716_v59 = vpack.c.bf16 %v1621_v57, %v1621_v57  ;;  %v1685_v60 = vsel %vm1429_vm15, %v2981_v41, %v1557_v55  ;;  %vm1427_vm1 = vcmp.gt.f32.partialorder %v1122_v46, 0.0  ;;  %v1555_v61 = vmul.f32 0.2, %v1122_v46  ;;  %v2984_v63 = vpop.f32.mrb[8].mxu1 }
  0xf7   : > { %2323 = vst.msk [vmem:[%s3302_s24 + $0x110] sm:$0xf] %vm2254_vm3, %v2777_v56  ;;  %v2780_v0 = vpack.c.bf16 %v1685_v60, %v1685_v60  ;;  %v1619_v1 = vsel %vm1363_vm0, %v866_v45, %v1491_v58  ;;  %vm1368_vm2 = vcmp.gt.f32.partialorder %v2920_v62, 0.0  ;;  %v1496_v2 = vmul.f32 0.2, %v2920_v62  ;;  %v879_v3 = vpop.f32.mrb[9].mxu0 }
  0xf8   : > { %v1135_v4 = vpop.f32.mrb[9].mxu1  ;;  %2262 = vst.msk [vmem:[%s3302_s24 + $0x1c] sm:$0xf] %vm2254_vm3, %v2716_v59  ;;  %v2714_v5 = vpack.c.bf16 %v1619_v1, %v1619_v1  ;;  %v1683_v6 = vsel %vm1427_vm1, %v1122_v46, %v1555_v61  ;;  %vm1432_vm4 = vcmp.gt.f32.partialorder %v2984_v63, 0.0  ;;  %v1560_v7 = vmul.f32 0.2, %v2984_v63 }
  0xf9   : > { %v2921_v8 = vpop.f32.mrb[10].mxu0  ;;  %v2985_v9 = vpop.f32.mrb[10].mxu1  ;;  %2326 = vst.msk [vmem:[%s3302_s24 + $0x11c] sm:$0xf] %vm2254_vm3, %v2780_v0  ;;  %v2778_v10 = vpack.c.bf16 %v1683_v6, %v1683_v6  ;;  %v1624_v11 = vsel %vm1368_vm2, %v2920_v62, %v1496_v2  ;;  %vm1366_vm5 = vcmp.gt.f32.partialorder %v879_v3, 0.0  ;;  %vm1430_vm6 = vcmp.gt.f32.partialorder %v1135_v4, 0.0 }
  0xfa   : > { %v1494_v12 = vmul.f32 0.2, %v879_v3  ;;  %v882_v13 = vpop.f32.mrb[11].mxu0  ;;  %v1138_v14 = vpop.f32.mrb[11].mxu1  ;;  %2260 = vst.msk [vmem:[%s3302_s24 + $0x14] sm:$0xf] %vm2254_vm3, %v2714_v5  ;;  %v2719_v15 = vpack.c.bf16 %v1624_v11, %v1624_v11  ;;  %v1688_v16 = vsel %vm1432_vm4, %v2984_v63, %v1560_v7 }
  0xfb   : > { %v1558_v17 = vmul.f32 0.2, %v1135_v4  ;;  %2324 = vst.msk [vmem:[%s3302_s24 + $0x114] sm:$0xf] %vm2254_vm3, %v2778_v10  ;;  %v2783_v18 = vpack.c.bf16 %v1688_v16, %v1688_v16  ;;  %vm1369_vm7 = vcmp.gt.f32.partialorder %v2921_v8, 0.0  ;;  %vm1433_vm8 = vcmp.gt.f32.partialorder %v2985_v9, 0.0 }
  0xfc   : > { %v1622_v19 = vsel %vm1366_vm5, %v879_v3, %v1494_v12  ;;  %v1497_v20 = vmul.f32 0.2, %v2921_v8  ;;  %2265 = vst.msk [vmem:[%s3302_s24 + $0x28] sm:$0xf] %vm2254_vm3, %v2719_v15  ;;  %v1561_v23 = vmul.f32 0.2, %v2985_v9 }
  0xfd   : > { %v2717_v21 = vpack.c.bf16 %v1622_v19, %v1622_v19  ;;  %v1686_v22 = vsel %vm1430_vm6, %v1135_v4, %v1558_v17  ;;  %2329 = vst.msk [vmem:[%s3302_s24 + $0x128] sm:$0xf] %vm2254_vm3, %v2783_v18  ;;  %vm1367_vm9 = vcmp.gt.f32.partialorder %v882_v13, 0.0  ;;  %v1495_v26 = vmul.f32 0.2, %v882_v13  ;;  %v2924_v30 = vpop.f32.mrb[12].mxu0 }
  0xfe   : > { %v2781_v24 = vpack.c.bf16 %v1686_v22, %v1686_v22  ;;  %v1625_v25 = vsel %vm1369_vm7, %v2921_v8, %v1497_v20  ;;  %v1689_v28 = vsel %vm1433_vm8, %v2985_v9, %v1561_v23  ;;  %vm1431_vm10 = vcmp.gt.f32.partialorder %v1138_v14, 0.0  ;;  %v2988_v31 = vpop.f32.mrb[12].mxu1  ;;  %v895_v35 = vpop.f32.mrb[13].mxu0 }
  0xff   : > { %2263 = vst.msk [vmem:[%s3302_s24 + $0x20] sm:$0xf] %vm2254_vm3, %v2717_v21  ;;  %v2720_v27 = vpack.c.bf16 %v1625_v25, %v1625_v25  ;;  %v1559_v29 = vmul.f32 0.2, %v1138_v14  ;;  %v2784_v32 = vpack.c.bf16 %v1689_v28, %v1689_v28  ;;  %v1623_v33 = vsel %vm1367_vm9, %v882_v13, %v1495_v26  ;;  %v1151_v36 = vpop.f32.mrb[13].mxu1  ;;  %v2925_v40 = vpop.f32.mrb[14].mxu0 }
 0x100   : > { %2327 = vst.msk [vmem:[%s3302_s24 + $0x120] sm:$0xf] %vm2254_vm3, %v2781_v24  ;;  %vm1372_vm11 = vcmp.gt.f32.partialorder %v2924_v30, 0.0  ;;  %v1500_v34 = vmul.f32 0.2, %v2924_v30  ;;  %v2718_v37 = vpack.c.bf16 %v1623_v33, %v1623_v33  ;;  %vm1436_vm12 = vcmp.gt.f32.partialorder %v2988_v31, 0.0 }
 0x101   : > { %2266 = vst.msk [vmem:[%s3302_s24 + $0x2c] sm:$0xf] %vm2254_vm3, %v2720_v27  ;;  %v1687_v38 = vsel %vm1431_vm10, %v1138_v14, %v1559_v29  ;;  %v1564_v39 = vmul.f32 0.2, %v2988_v31  ;;  %v2989_v41 = vpop.f32.mrb[14].mxu1  ;;  %vm1370_vm13 = vcmp.gt.f32.partialorder %v895_v35, 0.0 }
 0x102   : > { %2330 = vst.msk [vmem:[%s3302_s24 + $0x12c] sm:$0xf] %vm2254_vm3, %v2784_v32  ;;  %v2782_v42 = vpack.c.bf16 %v1687_v38, %v1687_v38  ;;  %v1628_v43 = vsel %vm1372_vm11, %v2924_v30, %v1500_v34  ;;  %v1498_v44 = vmul.f32 0.2, %v895_v35  ;;  %v898_v45 = vpop.f32.mrb[15].mxu0  ;;  %v1154_v46 = vpop.f32.mrb[15].mxu1 }
 0x103   : > { %2264 = vst.msk [vmem:[%s3302_s24 + $0x24] sm:$0xf] %vm2254_vm3, %v2718_v37  ;;  %v2723_v47 = vpack.c.bf16 %v1628_v43, %v1628_v43  ;;  %v1692_v48 = vsel %vm1436_vm12, %v2988_v31, %v1564_v39  ;;  %vm1434_vm14 = vcmp.gt.f32.partialorder %v1151_v36, 0.0  ;;  %v1562_v49 = vmul.f32 0.2, %v1151_v36 }
 0x104   : > { %2328 = vst.msk [vmem:[%s3302_s24 + $0x124] sm:$0xf] %vm2254_vm3, %v2782_v42  ;;  %v2787_v50 = vpack.c.bf16 %v1692_v48, %v1692_v48  ;;  %v1626_v51 = vsel %vm1370_vm13, %v895_v35, %v1498_v44  ;;  %vm1373_vm15 = vcmp.gt.f32.partialorder %v2925_v40, 0.0  ;;  %v1501_v52 = vmul.f32 0.2, %v2925_v40 }
 0x105   : > { %2269 = vst.msk [vmem:[%s3302_s24 + $0x38] sm:$0xf] %vm2254_vm3, %v2723_v47  ;;  %v2721_v53 = vpack.c.bf16 %v1626_v51, %v1626_v51  ;;  %v1690_v54 = vsel %vm1434_vm14, %v1151_v36, %v1562_v49  ;;  %vm1437_vm0 = vcmp.gt.f32.partialorder %v2989_v41, 0.0  ;;  %v1565_v55 = vmul.f32 0.2, %v2989_v41  ;;  %v2928_v62 = vpop.f32.mrb[16].mxu0 }
 0x106   : > { %2333 = vst.msk [vmem:[%s3302_s24 + $0x138] sm:$0xf] %vm2254_vm3, %v2787_v50  ;;  %v2785_v56 = vpack.c.bf16 %v1690_v54, %v1690_v54  ;;  %v1629_v57 = vsel %vm1373_vm15, %v2925_v40, %v1501_v52  ;;  %vm1371_vm1 = vcmp.gt.f32.partialorder %v898_v45, 0.0  ;;  %v1499_v58 = vmul.f32 0.2, %v898_v45  ;;  %v2992_v63 = vpop.f32.mrb[16].mxu1 }
 0x107   : > { %2267 = vst.msk [vmem:[%s3302_s24 + $0x30] sm:$0xf] %vm2254_vm3, %v2721_v53  ;;  %v2724_v59 = vpack.c.bf16 %v1629_v57, %v1629_v57  ;;  %v1693_v60 = vsel %vm1437_vm0, %v2989_v41, %v1565_v55  ;;  %vm1435_vm2 = vcmp.gt.f32.partialorder %v1154_v46, 0.0  ;;  %v1563_v61 = vmul.f32 0.2, %v1154_v46  ;;  %v911_v3 = vpop.f32.mrb[17].mxu0 }
 0x108   : > { %2331 = vst.msk [vmem:[%s3302_s24 + $0x130] sm:$0xf] %vm2254_vm3, %v2785_v56  ;;  %v2788_v0 = vpack.c.bf16 %v1693_v60, %v1693_v60  ;;  %v1627_v1 = vsel %vm1371_vm1, %v898_v45, %v1499_v58  ;;  %vm1376_vm4 = vcmp.gt.f32.partialorder %v2928_v62, 0.0  ;;  %v1504_v2 = vmul.f32 0.2, %v2928_v62  ;;  %v1167_v4 = vpop.f32.mrb[17].mxu1 }
 0x109   : > { %2270 = vst.msk [vmem:[%s3302_s24 + $0x3c] sm:$0xf] %vm2254_vm3, %v2724_v59  ;;  %v2722_v5 = vpack.c.bf16 %v1627_v1, %v1627_v1  ;;  %v1691_v6 = vsel %vm1435_vm2, %v1154_v46, %v1563_v61  ;;  %vm1440_vm5 = vcmp.gt.f32.partialorder %v2992_v63, 0.0  ;;  %v1568_v7 = vmul.f32 0.2, %v2992_v63  ;;  %v2929_v8 = vpop.f32.mrb[18].mxu0 }
 0x10a   : > { %v2993_v9 = vpop.f32.mrb[18].mxu1  ;;  %2334 = vst.msk [vmem:[%s3302_s24 + $0x13c] sm:$0xf] %vm2254_vm3, %v2788_v0  ;;  %v2786_v10 = vpack.c.bf16 %v1691_v6, %v1691_v6  ;;  %v1632_v11 = vsel %vm1376_vm4, %v2928_v62, %v1504_v2  ;;  %vm1374_vm6 = vcmp.gt.f32.partialorder %v911_v3, 0.0  ;;  %v1502_v12 = vmul.f32 0.2, %v911_v3 }
 0x10b   : > { %v914_v13 = vpop.f32.mrb[19].mxu0  ;;  %v1170_v14 = vpop.f32.mrb[19].mxu1  ;;  %2268 = vst.msk [vmem:[%s3302_s24 + $0x34] sm:$0xf] %vm2254_vm3, %v2722_v5  ;;  %v2727_v15 = vpack.c.bf16 %v1632_v11, %v1632_v11  ;;  %v1696_v16 = vsel %vm1440_vm5, %v2992_v63, %v1568_v7  ;;  %vm1438_vm7 = vcmp.gt.f32.partialorder %v1167_v4, 0.0  ;;  %vm1377_vm8 = vcmp.gt.f32.partialorder %v2929_v8, 0.0 }
 0x10c   : > { %v1566_v17 = vmul.f32 0.2, %v1167_v4  ;;  %2332 = vst.msk [vmem:[%s3302_s24 + $0x134] sm:$0xf] %vm2254_vm3, %v2786_v10  ;;  %v2791_v18 = vpack.c.bf16 %v1696_v16, %v1696_v16  ;;  %v1630_v19 = vsel %vm1374_vm6, %v911_v3, %v1502_v12  ;;  %v1505_v20 = vmul.f32 0.2, %v2929_v8 }
 0x10d   : > { %2273 = vst.msk [vmem:[%s3302_s24 + $0x48] sm:$0xf] %vm2254_vm3, %v2727_v15  ;;  %v2725_v21 = vpack.c.bf16 %v1630_v19, %v1630_v19  ;;  %vm1441_vm9 = vcmp.gt.f32.partialorder %v2993_v9, 0.0  ;;  %v1569_v23 = vmul.f32 0.2, %v2993_v9  ;;  %vm1375_vm10 = vcmp.gt.f32.partialorder %v914_v13, 0.0 }
 0x10e   : > { %v1694_v22 = vsel %vm1438_vm7, %v1167_v4, %v1566_v17  ;;  %2337 = vst.msk [vmem:[%s3302_s24 + $0x148] sm:$0xf] %vm2254_vm3, %v2791_v18  ;;  %v1633_v25 = vsel %vm1377_vm8, %v2929_v8, %v1505_v20  ;;  %v1503_v26 = vmul.f32 0.2, %v914_v13  ;;  %vm1439_vm11 = vcmp.gt.f32.partialorder %v1170_v14, 0.0  ;;  %v2932_v30 = vpop.f32.mrb[20].mxu0 }
 0x10f   : > { %v2789_v24 = vpack.c.bf16 %v1694_v22, %v1694_v22  ;;  %2271 = vst.msk [vmem:[%s3302_s24 + $0x40] sm:$0xf] %vm2254_vm3, %v2725_v21  ;;  %v2728_v27 = vpack.c.bf16 %v1633_v25, %v1633_v25  ;;  %v1697_v28 = vsel %vm1441_vm9, %v2993_v9, %v1569_v23  ;;  %v1567_v29 = vmul.f32 0.2, %v1170_v14  ;;  %v2996_v31 = vpop.f32.mrb[20].mxu1  ;;  %v927_v35 = vpop.f32.mrb[21].mxu0 }
 0x110   : > { %v2792_v32 = vpack.c.bf16 %v1697_v28, %v1697_v28  ;;  %v1631_v33 = vsel %vm1375_vm10, %v914_v13, %v1503_v26  ;;  %vm1380_vm12 = vcmp.gt.f32.partialorder %v2932_v30, 0.0  ;;  %v1508_v34 = vmul.f32 0.2, %v2932_v30  ;;  %v1183_v36 = vpop.f32.mrb[21].mxu1  ;;  %v2933_v40 = vpop.f32.mrb[22].mxu0 }
 0x111   : > { %2335 = vst.msk [vmem:[%s3302_s24 + $0x140] sm:$0xf] %vm2254_vm3, %v2789_v24  ;;  %2274 = vst.msk [vmem:[%s3302_s24 + $0x4c] sm:$0xf] %vm2254_vm3, %v2728_v27  ;;  %v2726_v37 = vpack.c.bf16 %v1631_v33, %v1631_v33  ;;  %v1695_v38 = vsel %vm1439_vm11, %v1170_v14, %v1567_v29  ;;  %vm1444_vm13 = vcmp.gt.f32.partialorder %v2996_v31, 0.0  ;;  %v2997_v41 = vpop.f32.mrb[22].mxu1 }
 0x112   : > { %v1572_v39 = vmul.f32 0.2, %v2996_v31  ;;  %2338 = vst.msk [vmem:[%s3302_s24 + $0x14c] sm:$0xf] %vm2254_vm3, %v2792_v32  ;;  %v2790_v42 = vpack.c.bf16 %v1695_v38, %v1695_v38  ;;  %v1636_v43 = vsel %vm1380_vm12, %v2932_v30, %v1508_v34  ;;  %vm1378_vm14 = vcmp.gt.f32.partialorder %v927_v35, 0.0  ;;  %v930_v45 = vpop.f32.mrb[23].mxu0 }
 0x113   : > { %v1506_v44 = vmul.f32 0.2, %v927_v35  ;;  %v1186_v46 = vpop.f32.mrb[23].mxu1  ;;  %2272 = vst.msk [vmem:[%s3302_s24 + $0x44] sm:$0xf] %vm2254_vm3, %v2726_v37  ;;  %v2731_v47 = vpack.c.bf16 %v1636_v43, %v1636_v43  ;;  %vm1442_vm15 = vcmp.gt.f32.partialorder %v1183_v36, 0.0 }
 0x114   : > { %v1700_v48 = vsel %vm1444_vm13, %v2996_v31, %v1572_v39  ;;  %v1570_v49 = vmul.f32 0.2, %v1183_v36  ;;  %2336 = vst.msk [vmem:[%s3302_s24 + $0x144] sm:$0xf] %vm2254_vm3, %v2790_v42  ;;  %vm1381_vm0 = vcmp.gt.f32.partialorder %v2933_v40, 0.0  ;;  %vm1445_vm1 = vcmp.gt.f32.partialorder %v2997_v41, 0.0 }
 0x115   : > { %v2795_v50 = vpack.c.bf16 %v1700_v48, %v1700_v48  ;;  %v1634_v51 = vsel %vm1378_vm14, %v927_v35, %v1506_v44  ;;  %v1509_v52 = vmul.f32 0.2, %v2933_v40  ;;  %2277 = vst.msk [vmem:[%s3302_s24 + $0x58] sm:$0xf] %vm2254_vm3, %v2731_v47  ;;  %v1573_v55 = vmul.f32 0.2, %v2997_v41 }
 0x116   : > { %v2729_v53 = vpack.c.bf16 %v1634_v51, %v1634_v51  ;;  %v1698_v54 = vsel %vm1442_vm15, %v1183_v36, %v1570_v49  ;;  %vm1379_vm2 = vcmp.gt.f32.partialorder %v930_v45, 0.0  ;;  %v1507_v58 = vmul.f32 0.2, %v930_v45  ;;  %v2936_v62 = vpop.f32.mrb[24].mxu0  ;;  %v3000_v63 = vpop.f32.mrb[24].mxu1 }
 0x117   : > { %2341 = vst.msk [vmem:[%s3302_s24 + $0x158] sm:$0xf] %vm2254_vm3, %v2795_v50  ;;  %v2793_v56 = vpack.c.bf16 %v1698_v54, %v1698_v54  ;;  %v1637_v57 = vsel %vm1381_vm0, %v2933_v40, %v1509_v52  ;;  %v1701_v60 = vsel %vm1445_vm1, %v2997_v41, %v1573_v55  ;;  %vm1443_vm4 = vcmp.gt.f32.partialorder %v1186_v46, 0.0  ;;  %v943_v3 = vpop.f32.mrb[25].mxu0  ;;  %v1199_v4 = vpop.f32.mrb[25].mxu1 }
 0x118   : > { %2275 = vst.msk [vmem:[%s3302_s24 + $0x50] sm:$0xf] %vm2254_vm3, %v2729_v53  ;;  %v2732_v59 = vpack.c.bf16 %v1637_v57, %v1637_v57  ;;  %v1571_v61 = vmul.f32 0.2, %v1186_v46  ;;  %v2796_v0 = vpack.c.bf16 %v1701_v60, %v1701_v60  ;;  %v1635_v1 = vsel %vm1379_vm2, %v930_v45, %v1507_v58  ;;  %v2937_v8 = vpop.f32.mrb[26].mxu0  ;;  %v3001_v9 = vpop.f32.mrb[26].mxu1 }
 0x119   : > { %2339 = vst.msk [vmem:[%s3302_s24 + $0x150] sm:$0xf] %vm2254_vm3, %v2793_v56  ;;  %vm1384_vm5 = vcmp.gt.f32.partialorder %v2936_v62, 0.0  ;;  %v1512_v2 = vmul.f32 0.2, %v2936_v62  ;;  %v2730_v5 = vpack.c.bf16 %v1635_v1, %v1635_v1  ;;  %vm1448_vm6 = vcmp.gt.f32.partialorder %v3000_v63, 0.0 }
 0x11a   : > { %2278 = vst.msk [vmem:[%s3302_s24 + $0x5c] sm:$0xf] %vm2254_vm3, %v2732_v59  ;;  %v1699_v6 = vsel %vm1443_vm4, %v1186_v46, %v1571_v61  ;;  %v1576_v7 = vmul.f32 0.2, %v3000_v63  ;;  %2342 = vst.msk [vmem:[%s3302_s24 + $0x15c] sm:$0xf] %vm2254_vm3, %v2796_v0 }
 0x11b   : > { %v2794_v10 = vpack.c.bf16 %v1699_v6, %v1699_v6  ;;  %v1640_v11 = vsel %vm1384_vm5, %v2936_v62, %v1512_v2  ;;  %vm1382_vm7 = vcmp.gt.f32.partialorder %v943_v3, 0.0  ;;  %v1510_v12 = vmul.f32 0.2, %v943_v3  ;;  %v946_v13 = vpop.f32.mrb[27].mxu0  ;;  %v1202_v14 = vpop.f32.mrb[27].mxu1 }
 0x11c   : > { %2276 = vst.msk [vmem:[%s3302_s24 + $0x54] sm:$0xf] %vm2254_vm3, %v2730_v5  ;;  %v2735_v15 = vpack.c.bf16 %v1640_v11, %v1640_v11  ;;  %v1704_v16 = vsel %vm1448_vm6, %v3000_v63, %v1576_v7  ;;  %vm1446_vm8 = vcmp.gt.f32.partialorder %v1199_v4, 0.0  ;;  %v1574_v17 = vmul.f32 0.2, %v1199_v4 }
 0x11d   : > { %2340 = vst.msk [vmem:[%s3302_s24 + $0x154] sm:$0xf] %vm2254_vm3, %v2794_v10  ;;  %v2799_v18 = vpack.c.bf16 %v1704_v16, %v1704_v16  ;;  %v1638_v19 = vsel %vm1382_vm7, %v943_v3, %v1510_v12  ;;  %vm1385_vm9 = vcmp.gt.f32.partialorder %v2937_v8, 0.0  ;;  %v1513_v20 = vmul.f32 0.2, %v2937_v8  ;;  %v2940_v30 = vpop.f32.mrb[28].mxu0 }
 0x11e   : > { %2281 = vst.msk [vmem:[%s3302_s24 + $0x68] sm:$0xf] %vm2254_vm3, %v2735_v15  ;;  %v2733_v21 = vpack.c.bf16 %v1638_v19, %v1638_v19  ;;  %v1702_v22 = vsel %vm1446_vm8, %v1199_v4, %v1574_v17  ;;  %vm1449_vm10 = vcmp.gt.f32.partialorder %v3001_v9, 0.0  ;;  %v1577_v23 = vmul.f32 0.2, %v3001_v9  ;;  %v3004_v31 = vpop.f32.mrb[28].mxu1 }
 0x11f   : > { %2345 = vst.msk [vmem:[%s3302_s24 + $0x168] sm:$0xf] %vm2254_vm3, %v2799_v18  ;;  %v2797_v24 = vpack.c.bf16 %v1702_v22, %v1702_v22  ;;  %v1641_v25 = vsel %vm1385_vm9, %v2937_v8, %v1513_v20  ;;  %vm1383_vm11 = vcmp.gt.f32.partialorder %v946_v13, 0.0  ;;  %v1511_v26 = vmul.f32 0.2, %v946_v13  ;;  %v959_v35 = vpop.f32.mrb[29].mxu0 }
 0x120   : > { %2279 = vst.msk [vmem:[%s3302_s24 + $0x60] sm:$0xf] %vm2254_vm3, %v2733_v21  ;;  %v2736_v27 = vpack.c.bf16 %v1641_v25, %v1641_v25  ;;  %v1705_v28 = vsel %vm1449_vm10, %v3001_v9, %v1577_v23  ;;  %vm1447_vm12 = vcmp.gt.f32.partialorder %v1202_v14, 0.0  ;;  %v1575_v29 = vmul.f32 0.2, %v1202_v14  ;;  %v1215_v36 = vpop.f32.mrb[29].mxu1 }
 0x121   : > { %2343 = vst.msk [vmem:[%s3302_s24 + $0x160] sm:$0xf] %vm2254_vm3, %v2797_v24  ;;  %v2800_v32 = vpack.c.bf16 %v1705_v28, %v1705_v28  ;;  %v1639_v33 = vsel %vm1383_vm11, %v946_v13, %v1511_v26  ;;  %vm1388_vm13 = vcmp.gt.f32.partialorder %v2940_v30, 0.0  ;;  %v1516_v34 = vmul.f32 0.2, %v2940_v30  ;;  %v2941_v40 = vpop.f32.mrb[30].mxu0 }
 0x122   : > { %2282 = vst.msk [vmem:[%s3302_s24 + $0x6c] sm:$0xf] %vm2254_vm3, %v2736_v27  ;;  %v2734_v37 = vpack.c.bf16 %v1639_v33, %v1639_v33  ;;  %v1703_v38 = vsel %vm1447_vm12, %v1202_v14, %v1575_v29  ;;  %vm1452_vm14 = vcmp.gt.f32.partialorder %v3004_v31, 0.0  ;;  %v1580_v39 = vmul.f32 0.2, %v3004_v31  ;;  %v3005_v41 = vpop.f32.mrb[30].mxu1 }
 0x123   : > { %2346 = vst.msk [vmem:[%s3302_s24 + $0x16c] sm:$0xf] %vm2254_vm3, %v2800_v32  ;;  %v2798_v42 = vpack.c.bf16 %v1703_v38, %v1703_v38  ;;  %v1644_v43 = vsel %vm1388_vm13, %v2940_v30, %v1516_v34  ;;  %vm1386_vm15 = vcmp.gt.f32.partialorder %v959_v35, 0.0  ;;  %v1514_v44 = vmul.f32 0.2, %v959_v35  ;;  %v962_v45 = vpop.f32.mrb[31].mxu0 }
 0x124   : > { %v1218_v46 = vpop.f32.mrb[31].mxu1  ;;  %2280 = vst.msk [vmem:[%s3302_s24 + $0x64] sm:$0xf] %vm2254_vm3, %v2734_v37  ;;  %v2739_v47 = vpack.c.bf16 %v1644_v43, %v1644_v43  ;;  %v1708_v48 = vsel %vm1452_vm14, %v3004_v31, %v1580_v39  ;;  %vm1450_vm0 = vcmp.gt.f32.partialorder %v1215_v36, 0.0  ;;  %v1578_v49 = vmul.f32 0.2, %v1215_v36 }
 0x125   : > { %2344 = vst.msk [vmem:[%s3302_s24 + $0x164] sm:$0xf] %vm2254_vm3, %v2798_v42  ;;  %v2803_v50 = vpack.c.bf16 %v1708_v48, %v1708_v48  ;;  %v1642_v51 = vsel %vm1386_vm15, %v959_v35, %v1514_v44  ;;  %vm1389_vm1 = vcmp.gt.f32.partialorder %v2941_v40, 0.0  ;;  %v1517_v52 = vmul.f32 0.2, %v2941_v40  ;;  %v2944_v62 = vpop.f32.mrb[32].mxu0 }
 0x126   : > { %2285 = vst.msk [vmem:[%s3302_s24 + $0x78] sm:$0xf] %vm2254_vm3, %v2739_v47  ;;  %v2737_v53 = vpack.c.bf16 %v1642_v51, %v1642_v51  ;;  %v1706_v54 = vsel %vm1450_vm0, %v1215_v36, %v1578_v49  ;;  %vm1453_vm2 = vcmp.gt.f32.partialorder %v3005_v41, 0.0  ;;  %v1581_v55 = vmul.f32 0.2, %v3005_v41  ;;  %v3008_v63 = vpop.f32.mrb[32].mxu1 }
 0x127   : > { %2349 = vst.msk [vmem:[%s3302_s24 + $0x178] sm:$0xf] %vm2254_vm3, %v2803_v50  ;;  %v2801_v56 = vpack.c.bf16 %v1706_v54, %v1706_v54  ;;  %v1645_v57 = vsel %vm1389_vm1, %v2941_v40, %v1517_v52  ;;  %vm1387_vm4 = vcmp.gt.f32.partialorder %v962_v45, 0.0  ;;  %v1515_v58 = vmul.f32 0.2, %v962_v45  ;;  %v975_v3 = vpop.f32.mrb[33].mxu0 }
 0x128   : > { %2283 = vst.msk [vmem:[%s3302_s24 + $0x70] sm:$0xf] %vm2254_vm3, %v2737_v53  ;;  %v2740_v59 = vpack.c.bf16 %v1645_v57, %v1645_v57  ;;  %v1709_v60 = vsel %vm1453_vm2, %v3005_v41, %v1581_v55  ;;  %vm1451_vm5 = vcmp.gt.f32.partialorder %v1218_v46, 0.0  ;;  %v1579_v61 = vmul.f32 0.2, %v1218_v46  ;;  %v1231_v4 = vpop.f32.mrb[33].mxu1 }
 0x129   : > { %2347 = vst.msk [vmem:[%s3302_s24 + $0x170] sm:$0xf] %vm2254_vm3, %v2801_v56  ;;  %v2804_v0 = vpack.c.bf16 %v1709_v60, %v1709_v60  ;;  %v1643_v1 = vsel %vm1387_vm4, %v962_v45, %v1515_v58  ;;  %vm1392_vm6 = vcmp.gt.f32.partialorder %v2944_v62, 0.0  ;;  %v1520_v2 = vmul.f32 0.2, %v2944_v62  ;;  %v2945_v8 = vpop.f32.mrb[34].mxu0 }
 0x12a   : > { %2286 = vst.msk [vmem:[%s3302_s24 + $0x7c] sm:$0xf] %vm2254_vm3, %v2740_v59  ;;  %v2738_v5 = vpack.c.bf16 %v1643_v1, %v1643_v1  ;;  %v1707_v6 = vsel %vm1451_vm5, %v1218_v46, %v1579_v61  ;;  %vm1456_vm7 = vcmp.gt.f32.partialorder %v3008_v63, 0.0  ;;  %v1584_v7 = vmul.f32 0.2, %v3008_v63  ;;  %v3009_v9 = vpop.f32.mrb[34].mxu1 }
 0x12b   : > { %2350 = vst.msk [vmem:[%s3302_s24 + $0x17c] sm:$0xf] %vm2254_vm3, %v2804_v0  ;;  %v2802_v10 = vpack.c.bf16 %v1707_v6, %v1707_v6  ;;  %v1648_v11 = vsel %vm1392_vm6, %v2944_v62, %v1520_v2  ;;  %vm1390_vm8 = vcmp.gt.f32.partialorder %v975_v3, 0.0  ;;  %v1518_v12 = vmul.f32 0.2, %v975_v3  ;;  %v978_v13 = vpop.f32.mrb[35].mxu0 }
 0x12c   : > { %v1234_v14 = vpop.f32.mrb[35].mxu1  ;;  %2284 = vst.msk [vmem:[%s3302_s24 + $0x74] sm:$0xf] %vm2254_vm3, %v2738_v5  ;;  %v2743_v15 = vpack.c.bf16 %v1648_v11, %v1648_v11  ;;  %v1712_v16 = vsel %vm1456_vm7, %v3008_v63, %v1584_v7  ;;  %vm1454_vm9 = vcmp.gt.f32.partialorder %v1231_v4, 0.0  ;;  %v1582_v17 = vmul.f32 0.2, %v1231_v4 }
 0x12d   : > { %2348 = vst.msk [vmem:[%s3302_s24 + $0x174] sm:$0xf] %vm2254_vm3, %v2802_v10  ;;  %v2807_v18 = vpack.c.bf16 %v1712_v16, %v1712_v16  ;;  %v1646_v19 = vsel %vm1390_vm8, %v975_v3, %v1518_v12  ;;  %vm1393_vm10 = vcmp.gt.f32.partialorder %v2945_v8, 0.0  ;;  %v1521_v20 = vmul.f32 0.2, %v2945_v8  ;;  %v2948_v30 = vpop.f32.mrb[36].mxu0 }
 0x12e   : > { %2289 = vst.msk [vmem:[%s3302_s24 + $0x88] sm:$0xf] %vm2254_vm3, %v2743_v15  ;;  %v2741_v21 = vpack.c.bf16 %v1646_v19, %v1646_v19  ;;  %v1710_v22 = vsel %vm1454_vm9, %v1231_v4, %v1582_v17  ;;  %vm1457_vm11 = vcmp.gt.f32.partialorder %v3009_v9, 0.0  ;;  %v1585_v23 = vmul.f32 0.2, %v3009_v9  ;;  %v3012_v31 = vpop.f32.mrb[36].mxu1 }
 0x12f   : > { %2353 = vst.msk [vmem:[%s3302_s24 + $0x188] sm:$0xf] %vm2254_vm3, %v2807_v18  ;;  %v2805_v24 = vpack.c.bf16 %v1710_v22, %v1710_v22  ;;  %v1649_v25 = vsel %vm1393_vm10, %v2945_v8, %v1521_v20  ;;  %vm1391_vm12 = vcmp.gt.f32.partialorder %v978_v13, 0.0  ;;  %v1519_v26 = vmul.f32 0.2, %v978_v13  ;;  %v991_v35 = vpop.f32.mrb[37].mxu0 }
 0x130   : > { %2287 = vst.msk [vmem:[%s3302_s24 + $0x80] sm:$0xf] %vm2254_vm3, %v2741_v21  ;;  %v2744_v27 = vpack.c.bf16 %v1649_v25, %v1649_v25  ;;  %v1713_v28 = vsel %vm1457_vm11, %v3009_v9, %v1585_v23  ;;  %vm1455_vm13 = vcmp.gt.f32.partialorder %v1234_v14, 0.0  ;;  %v1583_v29 = vmul.f32 0.2, %v1234_v14  ;;  %v1247_v36 = vpop.f32.mrb[37].mxu1 }
 0x131   : > { %2351 = vst.msk [vmem:[%s3302_s24 + $0x180] sm:$0xf] %vm2254_vm3, %v2805_v24  ;;  %v2808_v32 = vpack.c.bf16 %v1713_v28, %v1713_v28  ;;  %v1647_v33 = vsel %vm1391_vm12, %v978_v13, %v1519_v26  ;;  %vm1396_vm14 = vcmp.gt.f32.partialorder %v2948_v30, 0.0  ;;  %v1524_v34 = vmul.f32 0.2, %v2948_v30  ;;  %v2949_v40 = vpop.f32.mrb[38].mxu0 }
 0x132   : > { %2290 = vst.msk [vmem:[%s3302_s24 + $0x8c] sm:$0xf] %vm2254_vm3, %v2744_v27  ;;  %v2742_v37 = vpack.c.bf16 %v1647_v33, %v1647_v33  ;;  %v1711_v38 = vsel %vm1455_vm13, %v1234_v14, %v1583_v29  ;;  %vm1460_vm15 = vcmp.gt.f32.partialorder %v3012_v31, 0.0  ;;  %v1588_v39 = vmul.f32 0.2, %v3012_v31  ;;  %v3013_v41 = vpop.f32.mrb[38].mxu1 }
 0x133   : > { %2354 = vst.msk [vmem:[%s3302_s24 + $0x18c] sm:$0xf] %vm2254_vm3, %v2808_v32  ;;  %v2806_v42 = vpack.c.bf16 %v1711_v38, %v1711_v38  ;;  %v1652_v43 = vsel %vm1396_vm14, %v2948_v30, %v1524_v34  ;;  %vm1394_vm0 = vcmp.gt.f32.partialorder %v991_v35, 0.0  ;;  %v1522_v44 = vmul.f32 0.2, %v991_v35  ;;  %v994_v45 = vpop.f32.mrb[39].mxu0 }
 0x134   : > { %v1250_v46 = vpop.f32.mrb[39].mxu1  ;;  %2288 = vst.msk [vmem:[%s3302_s24 + $0x84] sm:$0xf] %vm2254_vm3, %v2742_v37  ;;  %v2747_v47 = vpack.c.bf16 %v1652_v43, %v1652_v43  ;;  %v1716_v48 = vsel %vm1460_vm15, %v3012_v31, %v1588_v39  ;;  %vm1458_vm1 = vcmp.gt.f32.partialorder %v1247_v36, 0.0  ;;  %v1586_v49 = vmul.f32 0.2, %v1247_v36 }
 0x135   : > { %2352 = vst.msk [vmem:[%s3302_s24 + $0x184] sm:$0xf] %vm2254_vm3, %v2806_v42  ;;  %v2811_v50 = vpack.c.bf16 %v1716_v48, %v1716_v48  ;;  %v1650_v51 = vsel %vm1394_vm0, %v991_v35, %v1522_v44  ;;  %vm1397_vm2 = vcmp.gt.f32.partialorder %v2949_v40, 0.0  ;;  %v1525_v52 = vmul.f32 0.2, %v2949_v40  ;;  %v2952_v62 = vpop.f32.mrb[40].mxu0 }
 0x136   : > { %2293 = vst.msk [vmem:[%s3302_s24 + $0x98] sm:$0xf] %vm2254_vm3, %v2747_v47  ;;  %v2745_v53 = vpack.c.bf16 %v1650_v51, %v1650_v51  ;;  %v1714_v54 = vsel %vm1458_vm1, %v1247_v36, %v1586_v49  ;;  %vm1461_vm4 = vcmp.gt.f32.partialorder %v3013_v41, 0.0  ;;  %v1589_v55 = vmul.f32 0.2, %v3013_v41  ;;  %v3016_v63 = vpop.f32.mrb[40].mxu1 }
 0x137   : > { %2357 = vst.msk [vmem:[%s3302_s24 + $0x198] sm:$0xf] %vm2254_vm3, %v2811_v50  ;;  %v2809_v56 = vpack.c.bf16 %v1714_v54, %v1714_v54  ;;  %v1653_v57 = vsel %vm1397_vm2, %v2949_v40, %v1525_v52  ;;  %vm1395_vm5 = vcmp.gt.f32.partialorder %v994_v45, 0.0  ;;  %v1523_v58 = vmul.f32 0.2, %v994_v45  ;;  %v1007_v3 = vpop.f32.mrb[41].mxu0 }
 0x138   : > { %2291 = vst.msk [vmem:[%s3302_s24 + $0x90] sm:$0xf] %vm2254_vm3, %v2745_v53  ;;  %v2748_v59 = vpack.c.bf16 %v1653_v57, %v1653_v57  ;;  %v1717_v60 = vsel %vm1461_vm4, %v3013_v41, %v1589_v55  ;;  %vm1459_vm6 = vcmp.gt.f32.partialorder %v1250_v46, 0.0  ;;  %v1587_v61 = vmul.f32 0.2, %v1250_v46  ;;  %v1263_v4 = vpop.f32.mrb[41].mxu1 }
 0x139   : > { %2355 = vst.msk [vmem:[%s3302_s24 + $0x190] sm:$0xf] %vm2254_vm3, %v2809_v56  ;;  %v2812_v0 = vpack.c.bf16 %v1717_v60, %v1717_v60  ;;  %v1651_v1 = vsel %vm1395_vm5, %v994_v45, %v1523_v58  ;;  %vm1400_vm7 = vcmp.gt.f32.partialorder %v2952_v62, 0.0  ;;  %v1528_v2 = vmul.f32 0.2, %v2952_v62  ;;  %v2953_v8 = vpop.f32.mrb[42].mxu0 }
 0x13a   : > { %2294 = vst.msk [vmem:[%s3302_s24 + $0x9c] sm:$0xf] %vm2254_vm3, %v2748_v59  ;;  %v2746_v5 = vpack.c.bf16 %v1651_v1, %v1651_v1  ;;  %v1715_v6 = vsel %vm1459_vm6, %v1250_v46, %v1587_v61  ;;  %vm1464_vm8 = vcmp.gt.f32.partialorder %v3016_v63, 0.0  ;;  %v1592_v7 = vmul.f32 0.2, %v3016_v63  ;;  %v3017_v9 = vpop.f32.mrb[42].mxu1 }
 0x13b   : > { %2358 = vst.msk [vmem:[%s3302_s24 + $0x19c] sm:$0xf] %vm2254_vm3, %v2812_v0  ;;  %v2810_v10 = vpack.c.bf16 %v1715_v6, %v1715_v6  ;;  %v1656_v11 = vsel %vm1400_vm7, %v2952_v62, %v1528_v2  ;;  %vm1398_vm9 = vcmp.gt.f32.partialorder %v1007_v3, 0.0  ;;  %v1526_v12 = vmul.f32 0.2, %v1007_v3  ;;  %v1010_v13 = vpop.f32.mrb[43].mxu0 }
 0x13c   : > { %v1266_v14 = vpop.f32.mrb[43].mxu1  ;;  %2292 = vst.msk [vmem:[%s3302_s24 + $0x94] sm:$0xf] %vm2254_vm3, %v2746_v5  ;;  %v2751_v15 = vpack.c.bf16 %v1656_v11, %v1656_v11  ;;  %v1720_v16 = vsel %vm1464_vm8, %v3016_v63, %v1592_v7  ;;  %vm1462_vm10 = vcmp.gt.f32.partialorder %v1263_v4, 0.0  ;;  %v1590_v17 = vmul.f32 0.2, %v1263_v4 }
 0x13d   : > { %2356 = vst.msk [vmem:[%s3302_s24 + $0x194] sm:$0xf] %vm2254_vm3, %v2810_v10  ;;  %v2815_v18 = vpack.c.bf16 %v1720_v16, %v1720_v16  ;;  %v1654_v19 = vsel %vm1398_vm9, %v1007_v3, %v1526_v12  ;;  %vm1401_vm11 = vcmp.gt.f32.partialorder %v2953_v8, 0.0  ;;  %v1529_v20 = vmul.f32 0.2, %v2953_v8  ;;  %v2956_v30 = vpop.f32.mrb[44].mxu0 }
 0x13e   : > { %2297 = vst.msk [vmem:[%s3302_s24 + $0xa8] sm:$0xf] %vm2254_vm3, %v2751_v15  ;;  %v2749_v21 = vpack.c.bf16 %v1654_v19, %v1654_v19  ;;  %v1718_v22 = vsel %vm1462_vm10, %v1263_v4, %v1590_v17  ;;  %vm1465_vm12 = vcmp.gt.f32.partialorder %v3017_v9, 0.0  ;;  %v1593_v23 = vmul.f32 0.2, %v3017_v9  ;;  %v3020_v31 = vpop.f32.mrb[44].mxu1 }
 0x13f   : > { %2361 = vst.msk [vmem:[%s3302_s24 + $0x1a8] sm:$0xf] %vm2254_vm3, %v2815_v18  ;;  %v2813_v24 = vpack.c.bf16 %v1718_v22, %v1718_v22  ;;  %v1657_v25 = vsel %vm1401_vm11, %v2953_v8, %v1529_v20  ;;  %vm1399_vm13 = vcmp.gt.f32.partialorder %v1010_v13, 0.0  ;;  %v1527_v26 = vmul.f32 0.2, %v1010_v13  ;;  %v1023_v35 = vpop.f32.mrb[45].mxu0 }
 0x140   : > { %2295 = vst.msk [vmem:[%s3302_s24 + $0xa0] sm:$0xf] %vm2254_vm3, %v2749_v21  ;;  %v2752_v27 = vpack.c.bf16 %v1657_v25, %v1657_v25  ;;  %v1721_v28 = vsel %vm1465_vm12, %v3017_v9, %v1593_v23  ;;  %vm1463_vm14 = vcmp.gt.f32.partialorder %v1266_v14, 0.0  ;;  %v1591_v29 = vmul.f32 0.2, %v1266_v14  ;;  %v1279_v36 = vpop.f32.mrb[45].mxu1 }
 0x141   : > { %2359 = vst.msk [vmem:[%s3302_s24 + $0x1a0] sm:$0xf] %vm2254_vm3, %v2813_v24  ;;  %v2816_v32 = vpack.c.bf16 %v1721_v28, %v1721_v28  ;;  %v1655_v33 = vsel %vm1399_vm13, %v1010_v13, %v1527_v26  ;;  %vm1404_vm15 = vcmp.gt.f32.partialorder %v2956_v30, 0.0  ;;  %v1532_v34 = vmul.f32 0.2, %v2956_v30  ;;  %v2957_v40 = vpop.f32.mrb[46].mxu0 }
 0x142   : > { %2298 = vst.msk [vmem:[%s3302_s24 + $0xac] sm:$0xf] %vm2254_vm3, %v2752_v27  ;;  %v2750_v37 = vpack.c.bf16 %v1655_v33, %v1655_v33  ;;  %v1719_v38 = vsel %vm1463_vm14, %v1266_v14, %v1591_v29  ;;  %vm1468_vm0 = vcmp.gt.f32.partialorder %v3020_v31, 0.0  ;;  %v1596_v39 = vmul.f32 0.2, %v3020_v31  ;;  %v3021_v41 = vpop.f32.mrb[46].mxu1 }
 0x143   : > { %2362 = vst.msk [vmem:[%s3302_s24 + $0x1ac] sm:$0xf] %vm2254_vm3, %v2816_v32  ;;  %v2814_v42 = vpack.c.bf16 %v1719_v38, %v1719_v38  ;;  %v1660_v43 = vsel %vm1404_vm15, %v2956_v30, %v1532_v34  ;;  %vm1402_vm1 = vcmp.gt.f32.partialorder %v1023_v35, 0.0  ;;  %v1530_v44 = vmul.f32 0.2, %v1023_v35  ;;  %v1026_v45 = vpop.f32.mrb[47].mxu0 }
 0x144   : > { %v1282_v46 = vpop.f32.mrb[47].mxu1  ;;  %2296 = vst.msk [vmem:[%s3302_s24 + $0xa4] sm:$0xf] %vm2254_vm3, %v2750_v37  ;;  %v2755_v47 = vpack.c.bf16 %v1660_v43, %v1660_v43  ;;  %v1724_v48 = vsel %vm1468_vm0, %v3020_v31, %v1596_v39  ;;  %vm1466_vm2 = vcmp.gt.f32.partialorder %v1279_v36, 0.0  ;;  %v1594_v49 = vmul.f32 0.2, %v1279_v36 }
 0x145   : > { %2360 = vst.msk [vmem:[%s3302_s24 + $0x1a4] sm:$0xf] %vm2254_vm3, %v2814_v42  ;;  %v2819_v50 = vpack.c.bf16 %v1724_v48, %v1724_v48  ;;  %v1658_v51 = vsel %vm1402_vm1, %v1023_v35, %v1530_v44  ;;  %vm1405_vm4 = vcmp.gt.f32.partialorder %v2957_v40, 0.0  ;;  %v1533_v52 = vmul.f32 0.2, %v2957_v40  ;;  %v2960_v62 = vpop.f32.mrb[48].mxu0 }
 0x146   : > { %2301 = vst.msk [vmem:[%s3302_s24 + $0xb8] sm:$0xf] %vm2254_vm3, %v2755_v47  ;;  %v2753_v53 = vpack.c.bf16 %v1658_v51, %v1658_v51  ;;  %v1722_v54 = vsel %vm1466_vm2, %v1279_v36, %v1594_v49  ;;  %vm1469_vm5 = vcmp.gt.f32.partialorder %v3021_v41, 0.0  ;;  %v1597_v55 = vmul.f32 0.2, %v3021_v41  ;;  %v3024_v63 = vpop.f32.mrb[48].mxu1 }
 0x147   : > { %2365 = vst.msk [vmem:[%s3302_s24 + $0x1b8] sm:$0xf] %vm2254_vm3, %v2819_v50  ;;  %v2817_v56 = vpack.c.bf16 %v1722_v54, %v1722_v54  ;;  %v1661_v57 = vsel %vm1405_vm4, %v2957_v40, %v1533_v52  ;;  %vm1403_vm6 = vcmp.gt.f32.partialorder %v1026_v45, 0.0  ;;  %v1531_v58 = vmul.f32 0.2, %v1026_v45  ;;  %v1039_v3 = vpop.f32.mrb[49].mxu0 }
 0x148   : > { %2299 = vst.msk [vmem:[%s3302_s24 + $0xb0] sm:$0xf] %vm2254_vm3, %v2753_v53  ;;  %v2756_v59 = vpack.c.bf16 %v1661_v57, %v1661_v57  ;;  %v1725_v60 = vsel %vm1469_vm5, %v3021_v41, %v1597_v55  ;;  %vm1467_vm7 = vcmp.gt.f32.partialorder %v1282_v46, 0.0  ;;  %v1595_v61 = vmul.f32 0.2, %v1282_v46  ;;  %v1295_v4 = vpop.f32.mrb[49].mxu1 }
 0x149   : > { %2363 = vst.msk [vmem:[%s3302_s24 + $0x1b0] sm:$0xf] %vm2254_vm3, %v2817_v56  ;;  %v2820_v0 = vpack.c.bf16 %v1725_v60, %v1725_v60  ;;  %v1659_v1 = vsel %vm1403_vm6, %v1026_v45, %v1531_v58  ;;  %vm1408_vm8 = vcmp.gt.f32.partialorder %v2960_v62, 0.0  ;;  %v1536_v2 = vmul.f32 0.2, %v2960_v62  ;;  %v2961_v8 = vpop.f32.mrb[50].mxu0 }
 0x14a   : > { %2302 = vst.msk [vmem:[%s3302_s24 + $0xbc] sm:$0xf] %vm2254_vm3, %v2756_v59  ;;  %v2754_v5 = vpack.c.bf16 %v1659_v1, %v1659_v1  ;;  %v1723_v6 = vsel %vm1467_vm7, %v1282_v46, %v1595_v61  ;;  %vm1472_vm9 = vcmp.gt.f32.partialorder %v3024_v63, 0.0  ;;  %v1600_v7 = vmul.f32 0.2, %v3024_v63  ;;  %v3025_v9 = vpop.f32.mrb[50].mxu1 }
 0x14b   : > { %2366 = vst.msk [vmem:[%s3302_s24 + $0x1bc] sm:$0xf] %vm2254_vm3, %v2820_v0  ;;  %v2818_v10 = vpack.c.bf16 %v1723_v6, %v1723_v6  ;;  %v1664_v11 = vsel %vm1408_vm8, %v2960_v62, %v1536_v2  ;;  %vm1406_vm10 = vcmp.gt.f32.partialorder %v1039_v3, 0.0  ;;  %v1534_v12 = vmul.f32 0.2, %v1039_v3  ;;  %v1042_v13 = vpop.f32.mrb[51].mxu0 }
 0x14c   : > { %v1298_v14 = vpop.f32.mrb[51].mxu1  ;;  %2300 = vst.msk [vmem:[%s3302_s24 + $0xb4] sm:$0xf] %vm2254_vm3, %v2754_v5  ;;  %v2759_v15 = vpack.c.bf16 %v1664_v11, %v1664_v11  ;;  %v1728_v16 = vsel %vm1472_vm9, %v3024_v63, %v1600_v7  ;;  %vm1470_vm11 = vcmp.gt.f32.partialorder %v1295_v4, 0.0  ;;  %v1598_v17 = vmul.f32 0.2, %v1295_v4 }
 0x14d   : > { %2364 = vst.msk [vmem:[%s3302_s24 + $0x1b4] sm:$0xf] %vm2254_vm3, %v2818_v10  ;;  %v2823_v18 = vpack.c.bf16 %v1728_v16, %v1728_v16  ;;  %v1662_v19 = vsel %vm1406_vm10, %v1039_v3, %v1534_v12  ;;  %vm1409_vm12 = vcmp.gt.f32.partialorder %v2961_v8, 0.0  ;;  %v1537_v20 = vmul.f32 0.2, %v2961_v8  ;;  %v2964_v30 = vpop.f32.mrb[52].mxu0 }
 0x14e   : > { %2305 = vst.msk [vmem:[%s3302_s24 + $0xc8] sm:$0xf] %vm2254_vm3, %v2759_v15  ;;  %v2757_v21 = vpack.c.bf16 %v1662_v19, %v1662_v19  ;;  %v1726_v22 = vsel %vm1470_vm11, %v1295_v4, %v1598_v17  ;;  %vm1473_vm13 = vcmp.gt.f32.partialorder %v3025_v9, 0.0  ;;  %v1601_v23 = vmul.f32 0.2, %v3025_v9  ;;  %v3028_v31 = vpop.f32.mrb[52].mxu1 }
 0x14f   : > { %2369 = vst.msk [vmem:[%s3302_s24 + $0x1c8] sm:$0xf] %vm2254_vm3, %v2823_v18  ;;  %v2821_v24 = vpack.c.bf16 %v1726_v22, %v1726_v22  ;;  %v1665_v25 = vsel %vm1409_vm12, %v2961_v8, %v1537_v20  ;;  %vm1407_vm14 = vcmp.gt.f32.partialorder %v1042_v13, 0.0  ;;  %v1535_v26 = vmul.f32 0.2, %v1042_v13  ;;  %v1055_v35 = vpop.f32.mrb[53].mxu0 }
 0x150   : > { %2303 = vst.msk [vmem:[%s3302_s24 + $0xc0] sm:$0xf] %vm2254_vm3, %v2757_v21  ;;  %v2760_v27 = vpack.c.bf16 %v1665_v25, %v1665_v25  ;;  %v1729_v28 = vsel %vm1473_vm13, %v3025_v9, %v1601_v23  ;;  %vm1471_vm15 = vcmp.gt.f32.partialorder %v1298_v14, 0.0  ;;  %v1599_v29 = vmul.f32 0.2, %v1298_v14  ;;  %v1311_v36 = vpop.f32.mrb[53].mxu1 }
 0x151   : > { %2367 = vst.msk [vmem:[%s3302_s24 + $0x1c0] sm:$0xf] %vm2254_vm3, %v2821_v24  ;;  %v2824_v32 = vpack.c.bf16 %v1729_v28, %v1729_v28  ;;  %v1663_v33 = vsel %vm1407_vm14, %v1042_v13, %v1535_v26  ;;  %vm1412_vm0 = vcmp.gt.f32.partialorder %v2964_v30, 0.0  ;;  %v1540_v34 = vmul.f32 0.2, %v2964_v30  ;;  %v2965_v40 = vpop.f32.mrb[54].mxu0 }
 0x152   : > { %2306 = vst.msk [vmem:[%s3302_s24 + $0xcc] sm:$0xf] %vm2254_vm3, %v2760_v27  ;;  %v2758_v37 = vpack.c.bf16 %v1663_v33, %v1663_v33  ;;  %v1727_v38 = vsel %vm1471_vm15, %v1298_v14, %v1599_v29  ;;  %vm1476_vm1 = vcmp.gt.f32.partialorder %v3028_v31, 0.0  ;;  %v1604_v39 = vmul.f32 0.2, %v3028_v31  ;;  %v3029_v41 = vpop.f32.mrb[54].mxu1 }
 0x153   : > { %2370 = vst.msk [vmem:[%s3302_s24 + $0x1cc] sm:$0xf] %vm2254_vm3, %v2824_v32  ;;  %v2822_v42 = vpack.c.bf16 %v1727_v38, %v1727_v38  ;;  %v1668_v43 = vsel %vm1412_vm0, %v2964_v30, %v1540_v34  ;;  %vm1410_vm2 = vcmp.gt.f32.partialorder %v1055_v35, 0.0  ;;  %v1538_v44 = vmul.f32 0.2, %v1055_v35  ;;  %v1058_v45 = vpop.f32.mrb[55].mxu0 }
 0x154   : > { %v1314_v46 = vpop.f32.mrb[55].mxu1  ;;  %2304 = vst.msk [vmem:[%s3302_s24 + $0xc4] sm:$0xf] %vm2254_vm3, %v2758_v37  ;;  %v2763_v47 = vpack.c.bf16 %v1668_v43, %v1668_v43  ;;  %v1732_v48 = vsel %vm1476_vm1, %v3028_v31, %v1604_v39  ;;  %vm1474_vm4 = vcmp.gt.f32.partialorder %v1311_v36, 0.0  ;;  %v1602_v49 = vmul.f32 0.2, %v1311_v36 }
 0x155   : > { %2368 = vst.msk [vmem:[%s3302_s24 + $0x1c4] sm:$0xf] %vm2254_vm3, %v2822_v42  ;;  %v2827_v50 = vpack.c.bf16 %v1732_v48, %v1732_v48  ;;  %v1666_v51 = vsel %vm1410_vm2, %v1055_v35, %v1538_v44  ;;  %vm1413_vm5 = vcmp.gt.f32.partialorder %v2965_v40, 0.0  ;;  %v1541_v52 = vmul.f32 0.2, %v2965_v40  ;;  %v2968_v62 = vpop.f32.mrb[56].mxu0 }
 0x156   : > { %2309 = vst.msk [vmem:[%s3302_s24 + $0xd8] sm:$0xf] %vm2254_vm3, %v2763_v47  ;;  %v2761_v53 = vpack.c.bf16 %v1666_v51, %v1666_v51  ;;  %v1730_v54 = vsel %vm1474_vm4, %v1311_v36, %v1602_v49  ;;  %vm1477_vm6 = vcmp.gt.f32.partialorder %v3029_v41, 0.0  ;;  %v1605_v55 = vmul.f32 0.2, %v3029_v41  ;;  %v3032_v63 = vpop.f32.mrb[56].mxu1 }
 0x157   : > { %2373 = vst.msk [vmem:[%s3302_s24 + $0x1d8] sm:$0xf] %vm2254_vm3, %v2827_v50  ;;  %v2825_v56 = vpack.c.bf16 %v1730_v54, %v1730_v54  ;;  %v1669_v57 = vsel %vm1413_vm5, %v2965_v40, %v1541_v52  ;;  %vm1411_vm7 = vcmp.gt.f32.partialorder %v1058_v45, 0.0  ;;  %v1539_v58 = vmul.f32 0.2, %v1058_v45  ;;  %v1071_v3 = vpop.f32.mrb[57].mxu0 }
 0x158   : > { %2307 = vst.msk [vmem:[%s3302_s24 + $0xd0] sm:$0xf] %vm2254_vm3, %v2761_v53  ;;  %v2764_v59 = vpack.c.bf16 %v1669_v57, %v1669_v57  ;;  %v1733_v60 = vsel %vm1477_vm6, %v3029_v41, %v1605_v55  ;;  %vm1475_vm8 = vcmp.gt.f32.partialorder %v1314_v46, 0.0  ;;  %v1603_v61 = vmul.f32 0.2, %v1314_v46  ;;  %v1327_v4 = vpop.f32.mrb[57].mxu1 }
 0x159   : > { %2371 = vst.msk [vmem:[%s3302_s24 + $0x1d0] sm:$0xf] %vm2254_vm3, %v2825_v56  ;;  %v2828_v0 = vpack.c.bf16 %v1733_v60, %v1733_v60  ;;  %v1667_v1 = vsel %vm1411_vm7, %v1058_v45, %v1539_v58  ;;  %vm1416_vm9 = vcmp.gt.f32.partialorder %v2968_v62, 0.0  ;;  %v1544_v2 = vmul.f32 0.2, %v2968_v62  ;;  %v2969_v8 = vpop.f32.mrb[58].mxu0 }
 0x15a   : > { %2310 = vst.msk [vmem:[%s3302_s24 + $0xdc] sm:$0xf] %vm2254_vm3, %v2764_v59  ;;  %v2762_v5 = vpack.c.bf16 %v1667_v1, %v1667_v1  ;;  %v1731_v6 = vsel %vm1475_vm8, %v1314_v46, %v1603_v61  ;;  %vm1480_vm10 = vcmp.gt.f32.partialorder %v3032_v63, 0.0  ;;  %v1608_v7 = vmul.f32 0.2, %v3032_v63  ;;  %v3033_v9 = vpop.f32.mrb[58].mxu1 }
 0x15b   : > { %2374 = vst.msk [vmem:[%s3302_s24 + $0x1dc] sm:$0xf] %vm2254_vm3, %v2828_v0  ;;  %v2826_v10 = vpack.c.bf16 %v1731_v6, %v1731_v6  ;;  %v1672_v11 = vsel %vm1416_vm9, %v2968_v62, %v1544_v2  ;;  %vm1414_vm11 = vcmp.gt.f32.partialorder %v1071_v3, 0.0  ;;  %v1542_v12 = vmul.f32 0.2, %v1071_v3  ;;  %v1074_v13 = vpop.f32.mrb[59].mxu0 }
 0x15c   : > { %v1330_v14 = vpop.f32.mrb[59].mxu1  ;;  %2308 = vst.msk [vmem:[%s3302_s24 + $0xd4] sm:$0xf] %vm2254_vm3, %v2762_v5  ;;  %v2767_v15 = vpack.c.bf16 %v1672_v11, %v1672_v11  ;;  %v1736_v16 = vsel %vm1480_vm10, %v3032_v63, %v1608_v7  ;;  %vm1478_vm12 = vcmp.gt.f32.partialorder %v1327_v4, 0.0  ;;  %v1606_v17 = vmul.f32 0.2, %v1327_v4 }
 0x15d   : > { %2372 = vst.msk [vmem:[%s3302_s24 + $0x1d4] sm:$0xf] %vm2254_vm3, %v2826_v10  ;;  %v2831_v18 = vpack.c.bf16 %v1736_v16, %v1736_v16  ;;  %v1670_v19 = vsel %vm1414_vm11, %v1071_v3, %v1542_v12  ;;  %vm1417_vm13 = vcmp.gt.f32.partialorder %v2969_v8, 0.0  ;;  %v1545_v20 = vmul.f32 0.2, %v2969_v8  ;;  %v2972_v30 = vpop.f32.mrb[60].mxu0 }
 0x15e   : > { %2313 = vst.msk [vmem:[%s3302_s24 + $0xe8] sm:$0xf] %vm2254_vm3, %v2767_v15  ;;  %v2765_v21 = vpack.c.bf16 %v1670_v19, %v1670_v19  ;;  %v1734_v22 = vsel %vm1478_vm12, %v1327_v4, %v1606_v17  ;;  %vm1481_vm14 = vcmp.gt.f32.partialorder %v3033_v9, 0.0  ;;  %v1609_v23 = vmul.f32 0.2, %v3033_v9  ;;  %v3036_v31 = vpop.f32.mrb[60].mxu1 }
 0x15f   : > { %2377 = vst.msk [vmem:[%s3302_s24 + $0x1e8] sm:$0xf] %vm2254_vm3, %v2831_v18  ;;  %v2829_v24 = vpack.c.bf16 %v1734_v22, %v1734_v22  ;;  %v1673_v25 = vsel %vm1417_vm13, %v2969_v8, %v1545_v20  ;;  %vm1415_vm15 = vcmp.gt.f32.partialorder %v1074_v13, 0.0  ;;  %v1543_v26 = vmul.f32 0.2, %v1074_v13  ;;  %v1087_v35 = vpop.f32.mrb[61].mxu0 }
 0x160   : > { %2311 = vst.msk [vmem:[%s3302_s24 + $0xe0] sm:$0xf] %vm2254_vm3, %v2765_v21  ;;  %v2768_v27 = vpack.c.bf16 %v1673_v25, %v1673_v25  ;;  %v1737_v28 = vsel %vm1481_vm14, %v3033_v9, %v1609_v23  ;;  %vm1479_vm0 = vcmp.gt.f32.partialorder %v1330_v14, 0.0  ;;  %v1607_v29 = vmul.f32 0.2, %v1330_v14  ;;  %v1343_v36 = vpop.f32.mrb[61].mxu1 }
 0x161   : > { %2375 = vst.msk [vmem:[%s3302_s24 + $0x1e0] sm:$0xf] %vm2254_vm3, %v2829_v24  ;;  %v2832_v32 = vpack.c.bf16 %v1737_v28, %v1737_v28  ;;  %v1671_v33 = vsel %vm1415_vm15, %v1074_v13, %v1543_v26  ;;  %vm1420_vm1 = vcmp.gt.f32.partialorder %v2972_v30, 0.0  ;;  %v1548_v34 = vmul.f32 0.2, %v2972_v30  ;;  %v2973_v40 = vpop.f32.mrb[62].mxu0 }
 0x162   : > { %2314 = vst.msk [vmem:[%s3302_s24 + $0xec] sm:$0xf] %vm2254_vm3, %v2768_v27  ;;  %v2766_v37 = vpack.c.bf16 %v1671_v33, %v1671_v33  ;;  %v1735_v38 = vsel %vm1479_vm0, %v1330_v14, %v1607_v29  ;;  %vm1484_vm2 = vcmp.gt.f32.partialorder %v3036_v31, 0.0  ;;  %v1612_v39 = vmul.f32 0.2, %v3036_v31  ;;  %v3037_v41 = vpop.f32.mrb[62].mxu1 }
 0x163   : > { %2378 = vst.msk [vmem:[%s3302_s24 + $0x1ec] sm:$0xf] %vm2254_vm3, %v2832_v32  ;;  %v2830_v42 = vpack.c.bf16 %v1735_v38, %v1735_v38  ;;  %v1676_v43 = vsel %vm1420_vm1, %v2972_v30, %v1548_v34  ;;  %vm1418_vm4 = vcmp.gt.f32.partialorder %v1087_v35, 0.0  ;;  %v1546_v44 = vmul.f32 0.2, %v1087_v35  ;;  %v1090_v45 = vpop.f32.mrb[63].mxu0 }
 0x164   : > { %v1346_v46 = vpop.f32.mrb[63].mxu1  ;;  %2312 = vst.msk [vmem:[%s3302_s24 + $0xe4] sm:$0xf] %vm2254_vm3, %v2766_v37  ;;  %v2771_v47 = vpack.c.bf16 %v1676_v43, %v1676_v43  ;;  %v1740_v48 = vsel %vm1484_vm2, %v3036_v31, %v1612_v39  ;;  %vm1482_vm5 = vcmp.gt.f32.partialorder %v1343_v36, 0.0  ;;  %v1610_v49 = vmul.f32 0.2, %v1343_v36 }
 0x165   : > { %2376 = vst.msk [vmem:[%s3302_s24 + $0x1e4] sm:$0xf] %vm2254_vm3, %v2830_v42  ;;  %v2835_v50 = vpack.c.bf16 %v1740_v48, %v1740_v48  ;;  %v1674_v51 = vsel %vm1418_vm4, %v1087_v35, %v1546_v44  ;;  %vm1421_vm6 = vcmp.gt.f32.partialorder %v2973_v40, 0.0  ;;  %v1549_v52 = vmul.f32 0.2, %v2973_v40 }
 0x166   : > { %2317 = vst.msk [vmem:[%s3302_s24 + $0xf8] sm:$0xf] %vm2254_vm3, %v2771_v47  ;;  %v2769_v53 = vpack.c.bf16 %v1674_v51, %v1674_v51  ;;  %v1738_v54 = vsel %vm1482_vm5, %v1343_v36, %v1610_v49  ;;  %vm1485_vm7 = vcmp.gt.f32.partialorder %v3037_v41, 0.0  ;;  %v1613_v55 = vmul.f32 0.2, %v3037_v41 }
 0x167   : > { %2381 = vst.msk [vmem:[%s3302_s24 + $0x1f8] sm:$0xf] %vm2254_vm3, %v2835_v50  ;;  %v2833_v56 = vpack.c.bf16 %v1738_v54, %v1738_v54  ;;  %v1677_v57 = vsel %vm1421_vm6, %v2973_v40, %v1549_v52  ;;  %vm1419_vm8 = vcmp.gt.f32.partialorder %v1090_v45, 0.0  ;;  %v1547_v58 = vmul.f32 0.2, %v1090_v45 }
 0x168   : > { %2315 = vst.msk [vmem:[%s3302_s24 + $0xf0] sm:$0xf] %vm2254_vm3, %v2769_v53  ;;  %v2772_v59 = vpack.c.bf16 %v1677_v57, %v1677_v57  ;;  %v1741_v60 = vsel %vm1485_vm7, %v3037_v41, %v1613_v55  ;;  %vm1483_vm9 = vcmp.gt.f32.partialorder %v1346_v46, 0.0  ;;  %v1611_v61 = vmul.f32 0.2, %v1346_v46 }
 0x169   : > { %2379 = vst.msk [vmem:[%s3302_s24 + $0x1f0] sm:$0xf] %vm2254_vm3, %v2833_v56  ;;  %v2836_v62 = vpack.c.bf16 %v1741_v60, %v1741_v60  ;;  %v1675_v63 = vsel %vm1419_vm8, %v1090_v45, %v1547_v58 }
 0x16a   : > { %2318 = vst.msk [vmem:[%s3302_s24 + $0xfc] sm:$0xf] %vm2254_vm3, %v2772_v59  ;;  %v2770_v0 = vpack.c.bf16 %v1675_v63, %v1675_v63  ;;  %v1739_v1 = vsel %vm1483_vm9, %v1346_v46, %v1611_v61 }
 0x16b   : > { %2382 = vst.msk [vmem:[%s3302_s24 + $0x1fc] sm:$0xf] %vm2254_vm3, %v2836_v62  ;;  %v2834_v2 = vpack.c.bf16 %v1739_v1, %v1739_v1 }
 0x16c   : > { %2316 = vst.msk [vmem:[%s3302_s24 + $0xf4] sm:$0xf] %vm2254_vm3, %v2770_v0 }
 0x16d   : > { %2380 = vst.msk [vmem:[%s3302_s24 + $0x1f4] sm:$0xf] %vm2254_vm3, %v2834_v2 }
 0x16e PF: > { %s12_s9 = sadd.s32 1, %s3125_s9  }
 0x16f   : > { %p9_p4 = scmp.ge.s32.totalorder %s12_s9, 4  }
 0x171   :  { %11 = sbr.rel (!%p9_p4) target bundleno = 1 (0x1), region = 58 }

// kernel: discriminator_forward.8
= control target key start
LH: loop header
LB: loop body
LE: loop exit
PB: predicated region body
PF: predicated region fallthrough
CT: control target
= control target key end

     0   :  { %s2691_s0 = inlined_call_operand.vmem [shape: bf16[512,128], index: 0, kind: input, shape index: {}]   ;;  %s2692_s1 = inlined_call_operand.vmem [shape: f32[1,128], index: 1, kind: input, shape index: {}]   ;;  %s2693_s2 = inlined_call_operand.vmem [shape: f32[1,128], index: 2, kind: input, shape index: {}]   ;;  %s2694_s3 = inlined_call_operand.vmem [shape: bf16[512,128], index: 3, kind: output, shape index: {}]  }
   0x1   :  { %v1640_v0 = vld [vmem:[%s2691_s0] sm:$0xff]   ;;  %v1645_v1 = vld [vmem:[%s2691_s0 + $0x8] sm:$0xff]   ;;  %v1653_v5 = vld [vmem:[%s2691_s0 + $0x10] sm:$0xff]  }
   0x2   :  { %v1267_v2 = vunpack.c.l.bf16 %v1640_v0  ;;  %v1268_v3 = vunpack.c.h.bf16 %v1640_v0  ;;  %v1271_v4 = vunpack.c.l.bf16 %v1645_v1  ;;  %v1272_v6 = vunpack.c.h.bf16 %v1645_v1  ;;  %v1666_v10 = vld [vmem:[%s2691_s0 + $0x18] sm:$0xff]   ;;  %v1677_v15 = vld [vmem:[%s2691_s0 + $0x20] sm:$0xff]   ;;  %v1688_v20 = vld [vmem:[%s2691_s0 + $0x28] sm:$0xff]  }
   0x3   :  { %v1275_v8 = vunpack.c.l.bf16 %v1653_v5  ;;  %v1276_v11 = vunpack.c.h.bf16 %v1653_v5  ;;  %v2733_v13 = vunpack.c.l.bf16 %v1666_v10  ;;  %v2732_v16 = vunpack.c.h.bf16 %v1666_v10  ;;  %v1699_v25 = vld [vmem:[%s2691_s0 + $0x30] sm:$0xff]   ;;  %v1710_v30 = vld [vmem:[%s2691_s0 + $0x38] sm:$0xff]   ;;  %v1721_v35 = vld [vmem:[%s2691_s0 + $0x40] sm:$0xff]  }
   0x4   :  { %v142_v7 = vadd.f32 %v1268_v3, %v1267_v2  ;;  %v2731_v18 = vunpack.c.l.bf16 %v1677_v15  ;;  %v2730_v21 = vunpack.c.h.bf16 %v1677_v15  ;;  %v2729_v23 = vunpack.c.l.bf16 %v1688_v20  ;;  %v1732_v40 = vld [vmem:[%s2691_s0 + $0x48] sm:$0xff]   ;;  %v1743_v45 = vld [vmem:[%s2691_s0 + $0x50] sm:$0xff]   ;;  %v1754_v50 = vld [vmem:[%s2691_s0 + $0x58] sm:$0xff]  }
   0x5   :  { %v2728_v26 = vunpack.c.h.bf16 %v1688_v20  ;;  %v2727_v28 = vunpack.c.l.bf16 %v1699_v25  ;;  %v2726_v31 = vunpack.c.h.bf16 %v1699_v25  ;;  %v2725_v33 = vunpack.c.l.bf16 %v1710_v30  ;;  %v1765_v55 = vld [vmem:[%s2691_s0 + $0x60] sm:$0xff]   ;;  %v1776_v60 = vld [vmem:[%s2691_s0 + $0x68] sm:$0xff]  }
   0x6   :  { %v143_v9 = vadd.f32 %v1271_v4, %v142_v7  ;;  %v2724_v36 = vunpack.c.h.bf16 %v1710_v30  ;;  %v2723_v38 = vunpack.c.l.bf16 %v1721_v35  ;;  %v2722_v41 = vunpack.c.h.bf16 %v1721_v35 }
   0x7   :  { %v2721_v43 = vunpack.c.l.bf16 %v1732_v40  ;;  %v2720_v46 = vunpack.c.h.bf16 %v1732_v40  ;;  %v2719_v48 = vunpack.c.l.bf16 %v1743_v45  ;;  %v2718_v51 = vunpack.c.h.bf16 %v1743_v45 }
   0x8   :  { %v144_v12 = vadd.f32 %v1272_v6, %v143_v9  ;;  %v2717_v53 = vunpack.c.l.bf16 %v1754_v50  ;;  %v2716_v56 = vunpack.c.h.bf16 %v1754_v50  ;;  %v2713_v58 = vunpack.c.l.bf16 %v1765_v55  ;;  %v1787_v9 = vld [vmem:[%s2691_s0 + $0x70] sm:$0xff]  }
   0x9   :  { %v2712_v61 = vunpack.c.h.bf16 %v1765_v55  ;;  %v2711_v63 = vunpack.c.l.bf16 %v1776_v60 }
   0xa   :  { %v145_v14 = vadd.f32 %v1275_v8, %v144_v12  ;;  %v2710_v12 = vunpack.c.h.bf16 %v1776_v60 }
   0xc   :  { %v146_v17 = vadd.f32 %v1276_v11, %v145_v14 }
   0xe   :  { %v147_v19 = vadd.f32 %v2733_v13, %v146_v17  ;;  %v2708_v17 = vunpack.c.l.bf16 %v1787_v9 }
  0x10   :  { %v148_v22 = vadd.f32 %v2732_v16, %v147_v19 }
  0x12   :  { %v149_v24 = vadd.f32 %v2731_v18, %v148_v22  ;;  %v1798_v22 = vld [vmem:[%s2691_s0 + $0x78] sm:$0xff]  }
  0x14   :  { %v150_v27 = vadd.f32 %v2730_v21, %v149_v24  ;;  %v2706_v24 = vunpack.c.h.bf16 %v1787_v9 }
  0x16   :  { %v151_v29 = vadd.f32 %v2729_v23, %v150_v27 }
  0x18   :  { %v152_v32 = vadd.f32 %v2728_v26, %v151_v29  ;;  %v2705_v29 = vunpack.c.l.bf16 %v1798_v22 }
  0x1a   :  { %v153_v34 = vadd.f32 %v2727_v28, %v152_v32 }
  0x1c   :  { %v154_v37 = vadd.f32 %v2726_v31, %v153_v34  ;;  %v1809_v34 = vld [vmem:[%s2691_s0 + $0x80] sm:$0xff]  }
  0x1e   :  { %v155_v39 = vadd.f32 %v2725_v33, %v154_v37  ;;  %v2702_v37 = vunpack.c.h.bf16 %v1798_v22 }
  0x20   :  { %v156_v42 = vadd.f32 %v2724_v36, %v155_v39 }
  0x22   :  { %v157_v44 = vadd.f32 %v2723_v38, %v156_v42  ;;  %v2699_v42 = vunpack.c.l.bf16 %v1809_v34 }
  0x24   :  { %v158_v47 = vadd.f32 %v2722_v41, %v157_v44 }
  0x26   :  { %v159_v49 = vadd.f32 %v2721_v43, %v158_v47  ;;  %v1820_v47 = vld [vmem:[%s2691_s0 + $0x88] sm:$0xff]  }
  0x28   :  { %v160_v52 = vadd.f32 %v2720_v46, %v159_v49  ;;  %v2696_v49 = vunpack.c.h.bf16 %v1809_v34 }
  0x2a   :  { %v161_v54 = vadd.f32 %v2719_v48, %v160_v52 }
  0x2c   :  { %v162_v57 = vadd.f32 %v2718_v51, %v161_v54  ;;  %v2695_v54 = vunpack.c.l.bf16 %v1820_v47 }
  0x2e   :  { %v163_v59 = vadd.f32 %v2717_v53, %v162_v57 }
  0x30   :  { %v164_v62 = vadd.f32 %v2716_v56, %v163_v59  ;;  %v1831_v59 = vld [vmem:[%s2691_s0 + $0x90] sm:$0xff]  }
  0x32   :  { %v165_v7 = vadd.f32 %v2713_v58, %v164_v62  ;;  %v2697_v62 = vunpack.c.h.bf16 %v1820_v47 }
  0x34   :  { %v166_v14 = vadd.f32 %v2712_v61, %v165_v7 }
  0x36   :  { %v167_v19 = vadd.f32 %v2711_v63, %v166_v14  ;;  %v2698_v14 = vunpack.c.l.bf16 %v1831_v59 }
  0x38   :  { %v168_v27 = vadd.f32 %v2710_v12, %v167_v19  ;;  %v1577_v12 = vld [vmem:[%s2691_s0 + $0xc8] sm:$0xff]  }
  0x39   :  { %v1367_v58 = vunpack.c.l.bf16 %v1577_v12 }
  0x3a   :  { %v169_v32 = vadd.f32 %v2708_v17, %v168_v27  ;;  %v1842_v27 = vld [vmem:[%s2691_s0 + $0x98] sm:$0xff]  }
  0x3c   :  { %v170_v39 = vadd.f32 %v2706_v24, %v169_v32  ;;  %v2700_v32 = vunpack.c.h.bf16 %v1831_v59 }
  0x3e   :  { %v171_v44 = vadd.f32 %v2705_v29, %v170_v39 }
  0x40   :  { %v172_v52 = vadd.f32 %v2702_v37, %v171_v44  ;;  %v2701_v44 = vunpack.c.l.bf16 %v1842_v27 }
  0x42   :  { %v173_v57 = vadd.f32 %v2699_v42, %v172_v52 }
  0x44   :  { %v174_v7 = vadd.f32 %v2696_v49, %v173_v57  ;;  %v1853_v57 = vld [vmem:[%s2691_s0 + $0xa0] sm:$0xff]  }
  0x45   :  { %v2704_v49 = vunpack.c.l.bf16 %v1853_v57 }
  0x46   :  { %v175_v19 = vadd.f32 %v2695_v54, %v174_v7  ;;  %v2703_v7 = vunpack.c.h.bf16 %v1842_v27 }
  0x48   :  { %v176_v39 = vadd.f32 %v2697_v62, %v175_v19  ;;  %v1864_v62 = vld [vmem:[%s2691_s0 + $0xa8] sm:$0xff]  }
  0x49   :  { %v2709_v42 = vunpack.c.l.bf16 %v1864_v62 }
  0x4a   :  { %v177_v52 = vadd.f32 %v2698_v14, %v176_v39  ;;  %v2707_v39 = vunpack.c.h.bf16 %v1853_v57 }
  0x4c   :  { %v178_v54 = vadd.f32 %v2700_v32, %v177_v52  ;;  %v1875_v32 = vld [vmem:[%s2691_s0 + $0xb0] sm:$0xff]  }
  0x4d   :  { %v2714_v37 = vunpack.c.l.bf16 %v1875_v32 }
  0x4e   :  { %v179_v19 = vadd.f32 %v2701_v44, %v178_v54  ;;  %v2715_v54 = vunpack.c.h.bf16 %v1864_v62 }
  0x50   :  { %v180_v14 = vadd.f32 %v2703_v7, %v179_v19  ;;  %v1575_v7 = vld [vmem:[%s2691_s0 + $0xb8] sm:$0xff]  }
  0x51   :  { %v1359_v29 = vunpack.c.l.bf16 %v1575_v7 }
  0x52   :  { %v181_v52 = vadd.f32 %v2704_v49, %v180_v14  ;;  %v1356_v14 = vunpack.c.h.bf16 %v1875_v32 }
  0x54   :  { %v182_v44 = vadd.f32 %v2707_v39, %v181_v52  ;;  %v1576_v52 = vld [vmem:[%s2691_s0 + $0xc0] sm:$0xff]   ;;  %v1360_v39 = vunpack.c.h.bf16 %v1575_v7 }
  0x55   :  { %v1364_v63 = vunpack.c.h.bf16 %v1576_v52 }
  0x56   :  { %v183_v19 = vadd.f32 %v2709_v42, %v182_v44  ;;  %v1363_v44 = vunpack.c.l.bf16 %v1576_v52 }
  0x58   :  { %v184_v49 = vadd.f32 %v2715_v54, %v183_v19 }
  0x5a   :  { %v185_v24 = vadd.f32 %v2714_v37, %v184_v49  ;;  %v1578_v49 = vld [vmem:[%s2691_s0 + $0xd0] sm:$0xff]   ;;  %v1368_v37 = vunpack.c.h.bf16 %v1577_v12  ;;  %v1581_v12 = vld [vmem:[%s2691_s0 + $0xe8] sm:$0xff]  }
  0x5b   :  { %v1371_v56 = vunpack.c.l.bf16 %v1578_v49  ;;  %v1383_v41 = vunpack.c.l.bf16 %v1581_v12 }
  0x5c   :  { %v186_v17 = vadd.f32 %v1356_v14, %v185_v24  ;;  %v1372_v24 = vunpack.c.h.bf16 %v1578_v49  ;;  %v1384_v49 = vunpack.c.h.bf16 %v1581_v12 }
  0x5e   :  { %v187_v42 = vadd.f32 %v1359_v29, %v186_v17  ;;  %v1579_v17 = vld [vmem:[%s2691_s0 + $0xd8] sm:$0xff]  }
  0x5f   :  { %v1375_v51 = vunpack.c.l.bf16 %v1579_v17 }
  0x60   :  { %v188_v61 = vadd.f32 %v1360_v39, %v187_v42  ;;  %v1376_v42 = vunpack.c.h.bf16 %v1579_v17 }
  0x62   :  { %v189_v19 = vadd.f32 %v1363_v44, %v188_v61  ;;  %v1580_v61 = vld [vmem:[%s2691_s0 + $0xe0] sm:$0xff]  }
  0x63   :  { %v1379_v46 = vunpack.c.l.bf16 %v1580_v61 }
  0x64   :  { %v190_v54 = vadd.f32 %v1364_v63, %v189_v19 }
  0x66   :  { %v191_v53 = vadd.f32 %v1367_v58, %v190_v54  ;;  %v1380_v54 = vunpack.c.h.bf16 %v1580_v61 }
  0x68   :  { %v192_v7 = vadd.f32 %v1368_v37, %v191_v53  ;;  %v1582_v53 = vld [vmem:[%s2691_s0 + $0xf0] sm:$0xff]  }
  0x69   :  { %v1387_v36 = vunpack.c.l.bf16 %v1582_v53  ;;  %v1388_v17 = vunpack.c.h.bf16 %v1582_v53 }
  0x6a   :  { %v193_v48 = vadd.f32 %v1371_v56, %v192_v7 }
  0x6c   :  { %v194_v52 = vadd.f32 %v1372_v24, %v193_v48  ;;  %v1583_v48 = vld [vmem:[%s2691_s0 + $0xf8] sm:$0xff]  }
  0x6d   :  { %v1391_v31 = vunpack.c.l.bf16 %v1583_v48  ;;  %v1392_v61 = vunpack.c.h.bf16 %v1583_v48 }
  0x6e   :  { %v195_v43 = vadd.f32 %v1375_v51, %v194_v52 }
  0x70   :  { %v196_v19 = vadd.f32 %v1376_v42, %v195_v43 }
  0x72   :  { %v197_v38 = vadd.f32 %v1379_v46, %v196_v19 }
  0x74   :  { %v198_v7 = vadd.f32 %v1380_v54, %v197_v38 }
  0x76   :  { %v199_v33 = vadd.f32 %v1383_v41, %v198_v7 }
  0x78   :  { %v200_v52 = vadd.f32 %v1384_v49, %v199_v33 }
  0x7a   :  { %v201_v28 = vadd.f32 %v1387_v36, %v200_v52 }
  0x7c   :  { %v202_v43 = vadd.f32 %v1388_v17, %v201_v28 }
  0x7e   :  { %v203_v26 = vadd.f32 %v1391_v31, %v202_v43 }
  0x80   :  { %v204_v19 = vadd.f32 %v1392_v61, %v203_v26 }
  0x82   :  { %v205_v23 = vrot.slane %v204_v19, 4 }
  0x84   :  { %v206_v21 = vadd.f32 %v205_v23, %v204_v19 }
  0x86   :  { %v207_v18 = vrot.slane %v206_v21, 2 }
  0x88   :  { %v208_v16 = vadd.f32 %v207_v18, %v206_v21 }
  0x8a   :  { %v209_v12 = vrot.slane %v208_v16, 1 }
  0x8c   :  { %v210_v38 = vadd.f32 %v209_v12, %v208_v16 }
  0x8e   :  { %v1915_v13 = vmul.f32 0.001953125, %v210_v38  ;;  %v2761_v38 = vunpack.c.h.bf16 %v1677_v15 }
  0x90   :  { %v1918_v7 = vsub.f32 %v1356_v14, %v1915_v13  ;;  %v1921_v53 = vsub.f32 %v1359_v29, %v1915_v13  ;;  %v1924_v33 = vsub.f32 %v1360_v39, %v1915_v13  ;;  %v1927_v28 = vsub.f32 %v1363_v44, %v1915_v13 }
  0x91   :  { %v1930_v23 = vsub.f32 %v1364_v63, %v1915_v13  ;;  %v1933_v18 = vsub.f32 %v1367_v58, %v1915_v13  ;;  %v1936_v16 = vsub.f32 %v1368_v37, %v1915_v13  ;;  %v1939_v21 = vsub.f32 %v1371_v56, %v1915_v13 }
  0x92   :  { %v1942_v26 = vsub.f32 %v1372_v24, %v1915_v13  ;;  %v1945_v29 = vsub.f32 %v1375_v51, %v1915_v13  ;;  %v1948_v39 = vsub.f32 %v1376_v42, %v1915_v13  ;;  %v1951_v63 = vsub.f32 %v1379_v46, %v1915_v13 }
  0x93   :  { %v1954_v58 = vsub.f32 %v1380_v54, %v1915_v13  ;;  %v1957_v37 = vsub.f32 %v1383_v41, %v1915_v13  ;;  %v1960_v56 = vsub.f32 %v1384_v49, %v1915_v13  ;;  %v1963_v14 = vsub.f32 %v1387_v36, %v1915_v13 }
  0x94   :  { %2753 = vst [vmem:[#allocation2_spill] sm:$0xff] %v1951_v63  ;;  %v1966_v51 = vsub.f32 %v1388_v17, %v1915_v13  ;;  %v1969_v44 = vsub.f32 %v1391_v31, %v1915_v13  ;;  %v1972_v46 = vsub.f32 %v1392_v61, %v1915_v13  ;;  %v1977_v41 = vsub.f32 %v1267_v2, %v1915_v13 }
  0x95   :  { %2754 = vst [vmem:[#allocation3_spill] sm:$0xff] %v1954_v58  ;;  %2755 = vst [vmem:[#allocation4_spill] sm:$0xff] %v1957_v37  ;;  %v1982_v24 = vsub.f32 %v1268_v3, %v1915_v13  ;;  %v1987_v36 = vsub.f32 %v1271_v4, %v1915_v13  ;;  %v1992_v31 = vsub.f32 %v1272_v6, %v1915_v13  ;;  %v2758_v54 = vunpack.c.l.bf16 %v1666_v10 }
  0x96   :  { %2756 = vst [vmem:[#allocation5_spill] sm:$0xff] %v1960_v56  ;;  %2757 = vst [vmem:[#allocation6_spill] sm:$0xff] %v1963_v14  ;;  %v277_v42 = vmul.f32 %v1977_v41, %v1977_v41  ;;  %v2001_v0 = vsub.f32 %v1275_v8, %v1915_v13  ;;  %v2008_v1 = vsub.f32 %v1276_v11, %v1915_v13  ;;  %v2759_v17 = vunpack.c.h.bf16 %v1666_v10 }
  0x97   :  { %v278_v2 = vmul.f32 %v1982_v24, %v1982_v24  ;;  %v279_v3 = vmul.f32 %v1987_v36, %v1987_v36  ;;  %v280_v4 = vmul.f32 %v1992_v31, %v1992_v31  ;;  %v2015_v49 = vsub.f32 %v2758_v54, %v1915_v13 }
  0x98   :  { %v281_v8 = vmul.f32 %v2001_v0, %v2001_v0  ;;  %v2022_v52 = vsub.f32 %v2759_v17, %v1915_v13  ;;  %v282_v5 = vmul.f32 %v2008_v1, %v2008_v1  ;;  %v2760_v61 = vunpack.c.l.bf16 %v1677_v15 }
  0x99   :  { %v341_v6 = vadd.f32 %v278_v2, %v277_v42  ;;  %v283_v19 = vmul.f32 %v2015_v49, %v2015_v49  ;;  %v2036_v42 = vsub.f32 %v2761_v38, %v1915_v13 }
  0x9a   :  { %v2029_v43 = vsub.f32 %v2760_v61, %v1915_v13  ;;  %v284_v10 = vmul.f32 %v2022_v52, %v2022_v52 }
  0x9b   :  { %v342_v48 = vadd.f32 %v341_v6, %v279_v3  ;;  %v2762_v3 = vunpack.c.l.bf16 %v1688_v20  ;;  %v286_v15 = vmul.f32 %v2036_v42, %v2036_v42 }
  0x9c   :  { %v285_v6 = vmul.f32 %v2029_v43, %v2029_v43 }
  0x9d   :  { %v343_v11 = vadd.f32 %v342_v48, %v280_v4  ;;  %v2043_v4 = vsub.f32 %v2762_v3, %v1915_v13 }
  0x9f   :  { %v344_v12 = vadd.f32 %v343_v11, %v281_v8  ;;  %v2763_v8 = vunpack.c.h.bf16 %v1688_v20  ;;  %v287_v61 = vmul.f32 %v2043_v4, %v2043_v4 }
  0xa1   :  { %v345_v2 = vadd.f32 %v344_v12, %v282_v5  ;;  %v2050_v48 = vsub.f32 %v2763_v8, %v1915_v13  ;;  %v2764_v5 = vunpack.c.l.bf16 %v1699_v25 }
  0xa3   :  { %v346_v54 = vadd.f32 %v345_v2, %v283_v19  ;;  %v2057_v11 = vsub.f32 %v2764_v5, %v1915_v13  ;;  %v2765_v19 = vunpack.c.h.bf16 %v1699_v25  ;;  %v288_v20 = vmul.f32 %v2050_v48, %v2050_v48 }
  0xa5   :  { %v347_v17 = vadd.f32 %v346_v54, %v284_v10  ;;  %v2064_v38 = vsub.f32 %v2765_v19, %v1915_v13  ;;  %v2767_v10 = vunpack.c.l.bf16 %v1710_v30  ;;  %v289_v54 = vmul.f32 %v2057_v11, %v2057_v11 }
  0xa7   :  { %v348_v12 = vadd.f32 %v347_v17, %v285_v6  ;;  %2766 = vst [vmem:[#allocation7_spill] sm:$0xff] %v2064_v38  ;;  %v2071_v3 = vsub.f32 %v2767_v10, %v1915_v13  ;;  %v2768_v6 = vunpack.c.h.bf16 %v1710_v30  ;;  %v290_v25 = vmul.f32 %v2064_v38, %v2064_v38 }
  0xa9   :  { %v349_v2 = vadd.f32 %v348_v12, %v286_v15  ;;  %v2078_v17 = vsub.f32 %v2768_v6, %v1915_v13  ;;  %v2770_v15 = vunpack.c.l.bf16 %v1721_v35  ;;  %v291_v19 = vmul.f32 %v2071_v3, %v2071_v3 }
  0xab   :  { %v350_v8 = vadd.f32 %v349_v2, %v287_v61  ;;  %2769 = vst [vmem:[#allocation8_spill] sm:$0xff] %v2078_v17  ;;  %v2085_v12 = vsub.f32 %v2770_v15, %v1915_v13  ;;  %v2771_v61 = vunpack.c.h.bf16 %v1721_v35  ;;  %v292_v30 = vmul.f32 %v2078_v17, %v2078_v17 }
  0xad   :  { %v351_v5 = vadd.f32 %v350_v8, %v288_v20  ;;  %v2092_v2 = vsub.f32 %v2771_v61, %v1915_v13  ;;  %v2773_v20 = vunpack.c.l.bf16 %v1732_v40  ;;  %v293_v15 = vmul.f32 %v2085_v12, %v2085_v12 }
  0xaf   :  { %v352_v10 = vadd.f32 %v351_v5, %v289_v54  ;;  %2772 = vst [vmem:[#allocation9_spill] sm:$0xff] %v2092_v2  ;;  %v2099_v8 = vsub.f32 %v2773_v20, %v1915_v13  ;;  %v2774_v54 = vunpack.c.h.bf16 %v1732_v40  ;;  %v294_v35 = vmul.f32 %v2092_v2, %v2092_v2 }
  0xb1   :  { %v353_v6 = vadd.f32 %v352_v10, %v290_v25  ;;  %v2106_v5 = vsub.f32 %v2774_v54, %v1915_v13  ;;  %v2776_v25 = vunpack.c.l.bf16 %v1743_v45  ;;  %v295_v20 = vmul.f32 %v2099_v8, %v2099_v8 }
  0xb3   :  { %v354_v38 = vadd.f32 %v353_v6, %v291_v19  ;;  %2775 = vst [vmem:[#allocation10_spill] sm:$0xff] %v2106_v5  ;;  %v2113_v10 = vsub.f32 %v2776_v25, %v1915_v13  ;;  %v2777_v19 = vunpack.c.h.bf16 %v1743_v45  ;;  %v296_v40 = vmul.f32 %v2106_v5, %v2106_v5 }
  0xb5   :  { %v355_v61 = vadd.f32 %v354_v38, %v292_v30  ;;  %v2120_v6 = vsub.f32 %v2777_v19, %v1915_v13  ;;  %v2779_v38 = vunpack.c.l.bf16 %v1754_v50  ;;  %v297_v25 = vmul.f32 %v2113_v10, %v2113_v10 }
  0xb7   :  { %v356_v17 = vadd.f32 %v355_v61, %v293_v15  ;;  %2778 = vst [vmem:[#allocation11_spill] sm:$0xff] %v2120_v6  ;;  %v2127_v30 = vsub.f32 %v2779_v38, %v1915_v13  ;;  %v2780_v15 = vunpack.c.h.bf16 %v1754_v50  ;;  %v298_v45 = vmul.f32 %v2120_v6, %v2120_v6 }
  0xb9   :  { %v357_v54 = vadd.f32 %v356_v17, %v294_v35  ;;  %v2134_v61 = vsub.f32 %v2780_v15, %v1915_v13  ;;  %v2782_v17 = vunpack.c.l.bf16 %v1765_v55  ;;  %v299_v38 = vmul.f32 %v2127_v30, %v2127_v30 }
  0xbb   :  { %v358_v2 = vadd.f32 %v357_v54, %v295_v20  ;;  %2781 = vst [vmem:[#allocation12_spill] sm:$0xff] %v2134_v61  ;;  %v2141_v35 = vsub.f32 %v2782_v17, %v1915_v13  ;;  %v2783_v20 = vunpack.c.h.bf16 %v1765_v55  ;;  %v300_v50 = vmul.f32 %v2134_v61, %v2134_v61 }
  0xbd   :  { %v359_v19 = vadd.f32 %v358_v2, %v296_v40  ;;  %v2148_v54 = vsub.f32 %v2783_v20, %v1915_v13  ;;  %v2785_v2 = vunpack.c.l.bf16 %v1776_v60  ;;  %v301_v17 = vmul.f32 %v2141_v35, %v2141_v35 }
  0xbf   :  { %v360_v5 = vadd.f32 %v359_v19, %v297_v25  ;;  %2784 = vst [vmem:[#allocation13_spill] sm:$0xff] %v2148_v54  ;;  %v2155_v40 = vsub.f32 %v2785_v2, %v1915_v13  ;;  %v2786_v25 = vunpack.c.h.bf16 %v1776_v60  ;;  %v302_v55 = vmul.f32 %v2148_v54, %v2148_v54 }
  0xc1   :  { %v361_v15 = vadd.f32 %v360_v5, %v298_v45  ;;  %v2162_v19 = vsub.f32 %v2786_v25, %v1915_v13  ;;  %v2788_v5 = vunpack.c.l.bf16 %v1787_v9  ;;  %v303_v2 = vmul.f32 %v2155_v40, %v2155_v40 }
  0xc3   :  { %v362_v6 = vadd.f32 %v361_v15, %v299_v38  ;;  %2787 = vst [vmem:[#allocation14_spill] sm:$0xff] %v2162_v19  ;;  %v2169_v45 = vsub.f32 %v2788_v5, %v1915_v13  ;;  %v2789_v38 = vunpack.c.h.bf16 %v1787_v9  ;;  %v304_v60 = vmul.f32 %v2162_v19, %v2162_v19 }
  0xc5   :  { %v363_v20 = vadd.f32 %v362_v6, %v300_v50  ;;  %v2176_v15 = vsub.f32 %v2789_v38, %v1915_v13  ;;  %v2791_v6 = vunpack.c.l.bf16 %v1798_v22  ;;  %v305_v5 = vmul.f32 %v2169_v45, %v2169_v45 }
  0xc7   :  { %v364_v61 = vadd.f32 %v363_v20, %v301_v17  ;;  %2790 = vst [vmem:[#allocation15_spill] sm:$0xff] %v2176_v15  ;;  %v2183_v50 = vsub.f32 %v2791_v6, %v1915_v13  ;;  %v2792_v17 = vunpack.c.h.bf16 %v1798_v22  ;;  %v306_v9 = vmul.f32 %v2176_v15, %v2176_v15 }
  0xc9   :  { %v365_v25 = vadd.f32 %v364_v61, %v302_v55  ;;  %v2190_v20 = vsub.f32 %v2792_v17, %v1915_v13  ;;  %v2794_v61 = vunpack.c.l.bf16 %v1809_v34  ;;  %v307_v6 = vmul.f32 %v2183_v50, %v2183_v50 }
  0xcb   :  { %v366_v54 = vadd.f32 %v365_v25, %v303_v2  ;;  %2793 = vst [vmem:[#allocation16_spill] sm:$0xff] %v2190_v20  ;;  %v2197_v55 = vsub.f32 %v2794_v61, %v1915_v13  ;;  %v2795_v2 = vunpack.c.h.bf16 %v1809_v34  ;;  %v308_v22 = vmul.f32 %v2190_v20, %v2190_v20 }
  0xcd   :  { %v367_v38 = vadd.f32 %v366_v54, %v304_v60  ;;  %v2204_v25 = vsub.f32 %v2795_v2, %v1915_v13  ;;  %v2797_v54 = vunpack.c.l.bf16 %v1820_v47  ;;  %v309_v61 = vmul.f32 %v2197_v55, %v2197_v55 }
  0xcf   :  { %v368_v19 = vadd.f32 %v367_v38, %v305_v5  ;;  %2796 = vst [vmem:[#allocation17_spill] sm:$0xff] %v2204_v25  ;;  %v2211_v60 = vsub.f32 %v2797_v54, %v1915_v13  ;;  %v2798_v5 = vunpack.c.h.bf16 %v1820_v47  ;;  %v310_v34 = vmul.f32 %v2204_v25, %v2204_v25 }
  0xd1   :  { %v369_v17 = vadd.f32 %v368_v19, %v306_v9  ;;  %v2218_v38 = vsub.f32 %v2798_v5, %v1915_v13  ;;  %v2800_v19 = vunpack.c.l.bf16 %v1831_v59  ;;  %v311_v54 = vmul.f32 %v2211_v60, %v2211_v60 }
  0xd3   :  { %v370_v15 = vadd.f32 %v369_v17, %v307_v6  ;;  %2799 = vst [vmem:[#allocation18_spill] sm:$0xff] %v2218_v38  ;;  %v2225_v9 = vsub.f32 %v2800_v19, %v1915_v13  ;;  %v2801_v6 = vunpack.c.h.bf16 %v1831_v59  ;;  %v312_v47 = vmul.f32 %v2218_v38, %v2218_v38 }
  0xd5   :  { %v371_v2 = vadd.f32 %v370_v15, %v308_v22  ;;  %v2232_v17 = vsub.f32 %v2801_v6, %v1915_v13  ;;  %v2803_v15 = vunpack.c.l.bf16 %v1842_v27  ;;  %v313_v19 = vmul.f32 %v2225_v9, %v2225_v9 }
  0xd7   :  { %v372_v20 = vadd.f32 %v371_v2, %v309_v61  ;;  %2802 = vst [vmem:[#allocation19_spill] sm:$0xff] %v2232_v17  ;;  %v2239_v22 = vsub.f32 %v2803_v15, %v1915_v13  ;;  %v2804_v61 = vunpack.c.h.bf16 %v1842_v27  ;;  %v314_v59 = vmul.f32 %v2232_v17, %v2232_v17 }
  0xd9   :  { %v373_v5 = vadd.f32 %v372_v20, %v310_v34  ;;  %v2246_v2 = vsub.f32 %v2804_v61, %v1915_v13  ;;  %v2806_v20 = vunpack.c.l.bf16 %v1853_v57  ;;  %v315_v15 = vmul.f32 %v2239_v22, %v2239_v22 }
  0xdb   :  { %v374_v25 = vadd.f32 %v373_v5, %v311_v54  ;;  %2805 = vst [vmem:[#allocation20_spill] sm:$0xff] %v2246_v2  ;;  %v2253_v34 = vsub.f32 %v2806_v20, %v1915_v13  ;;  %v2807_v54 = vunpack.c.h.bf16 %v1853_v57  ;;  %v316_v27 = vmul.f32 %v2246_v2, %v2246_v2 }
  0xdd   :  { %v375_v6 = vadd.f32 %v374_v25, %v312_v47  ;;  %v2260_v5 = vsub.f32 %v2807_v54, %v1915_v13  ;;  %v2808_v25 = vunpack.c.l.bf16 %v1864_v62  ;;  %v317_v20 = vmul.f32 %v2253_v34, %v2253_v34 }
  0xdf   :  { %v376_v38 = vadd.f32 %v375_v6, %v313_v19  ;;  %v2267_v47 = vsub.f32 %v2808_v25, %v1915_v13  ;;  %v2809_v19 = vunpack.c.h.bf16 %v1864_v62  ;;  %v318_v57 = vmul.f32 %v2260_v5, %v2260_v5 }
  0xe1   :  { %v377_v61 = vadd.f32 %v376_v38, %v314_v59  ;;  %v2274_v6 = vsub.f32 %v2809_v19, %v1915_v13  ;;  %v2810_v38 = vunpack.c.l.bf16 %v1875_v32  ;;  %v319_v25 = vmul.f32 %v2267_v47, %v2267_v47 }
  0xe3   :  { %v378_v17 = vadd.f32 %v377_v61, %v315_v15  ;;  %v2281_v59 = vsub.f32 %v2810_v38, %v1915_v13  ;;  %v320_v15 = vmul.f32 %v2274_v6, %v2274_v6  ;;  %v323_v13 = vmul.f32 %v1921_v53, %v1921_v53 }
  0xe4   :  { %v324_v38 = vmul.f32 %v1924_v33, %v1924_v33 }
  0xe5   :  { %v379_v54 = vadd.f32 %v378_v17, %v316_v27  ;;  %v321_v62 = vmul.f32 %v2281_v59, %v2281_v59  ;;  %v322_v17 = vmul.f32 %v1918_v7, %v1918_v7 }
  0xe7   :  { %v380_v2 = vadd.f32 %v379_v54, %v317_v20  ;;  %v325_v54 = vmul.f32 %v1927_v28, %v1927_v28 }
  0xe9   :  { %v381_v61 = vadd.f32 %v380_v2, %v318_v57  ;;  %v326_v57 = vmul.f32 %v1930_v23, %v1930_v23 }
  0xeb   :  { %v382_v19 = vadd.f32 %v381_v61, %v319_v25  ;;  %v327_v61 = vmul.f32 %v1933_v18, %v1933_v18 }
  0xed   :  { %v383_v27 = vadd.f32 %v382_v19, %v320_v15  ;;  %v328_v19 = vmul.f32 %v1936_v16, %v1936_v16 }
  0xef   :  { %v384_v32 = vadd.f32 %v383_v27, %v321_v62  ;;  %v329_v27 = vmul.f32 %v1939_v21, %v1939_v21 }
  0xf1   :  { %v385_v20 = vadd.f32 %v384_v32, %v322_v17  ;;  %v330_v32 = vmul.f32 %v1942_v26, %v1942_v26 }
  0xf3   :  { %v386_v2 = vadd.f32 %v385_v20, %v323_v13  ;;  %v331_v20 = vmul.f32 %v1945_v29, %v1945_v29 }
  0xf5   :  { %v387_v25 = vadd.f32 %v386_v2, %v324_v38  ;;  %v332_v2 = vmul.f32 %v1948_v39, %v1948_v39 }
  0xf7   :  { %v388_v15 = vadd.f32 %v387_v25, %v325_v54  ;;  %v333_v25 = vmul.f32 %v1951_v63, %v1951_v63 }
  0xf9   :  { %v389_v62 = vadd.f32 %v388_v15, %v326_v57  ;;  %v334_v15 = vmul.f32 %v1954_v58, %v1954_v58 }
  0xfb   :  { %v390_v17 = vadd.f32 %v389_v62, %v327_v61  ;;  %v335_v62 = vmul.f32 %v1957_v37, %v1957_v37 }
  0xfd   :  { %v391_v13 = vadd.f32 %v390_v17, %v328_v19  ;;  %v336_v17 = vmul.f32 %v1960_v56, %v1960_v56 }
  0xff   :  { %v392_v38 = vadd.f32 %v391_v13, %v329_v27  ;;  %v337_v13 = vmul.f32 %v1963_v14, %v1963_v14 }
 0x101   :  { %v393_v54 = vadd.f32 %v392_v38, %v330_v32  ;;  %v338_v38 = vmul.f32 %v1966_v51, %v1966_v51 }
 0x103   :  { %v394_v57 = vadd.f32 %v393_v54, %v331_v20  ;;  %v339_v54 = vmul.f32 %v1969_v44, %v1969_v44 }
 0x105   :  { %v395_v61 = vadd.f32 %v394_v57, %v332_v2  ;;  %v340_v57 = vmul.f32 %v1972_v46, %v1972_v46 }
 0x107   :  { %v396_v19 = vadd.f32 %v395_v61, %v333_v25 }
 0x109   :  { %v397_v27 = vadd.f32 %v396_v19, %v334_v15 }
 0x10b   :  { %v398_v32 = vadd.f32 %v397_v27, %v335_v62 }
 0x10d   :  { %v399_v20 = vadd.f32 %v398_v32, %v336_v17 }
 0x10f   :  { %v400_v2 = vadd.f32 %v399_v20, %v337_v13  ;;  %v2332_v13 = vld [vmem:[%s2692_s1] ss:$0 sm:$0xff] }
 0x111   :  { %v401_v25 = vadd.f32 %v400_v2, %v338_v38 }
 0x113   :  { %v402_v61 = vadd.f32 %v401_v25, %v339_v54 }
 0x115   :  { %v403_v37 = vadd.f32 %v402_v61, %v340_v57 }
 0x117   :  { %v404_v56 = vrot.slane %v403_v37, 4 }
 0x119   :  { %v405_v15 = vadd.f32 %v404_v56, %v403_v37 }
 0x11b   :  { %v406_v19 = vrot.slane %v405_v15, 2 }
 0x11d   :  { %v407_v58 = vadd.f32 %v406_v19, %v405_v15 }
 0x11f   :  { %v408_v14 = vrot.slane %v407_v58, 1 }
 0x121   :  { %v409_v62 = vadd.f32 %v408_v14, %v407_v58 }
 0x123   :  { %v410_v27 = vmul.f32 0.001953125, %v409_v62 }
 0x125   :  { %v411_v63 = vadd.f32 1e-05, %v410_v27 }
 0x127   :  { %1615 = vrsqrt.f32 %v411_v63  ;;  %v2345_v63 = vld [vmem:[%s2693_s2] ss:$0 sm:$0xff] }
 0x131   :  { %v2327_v17 = vpop.eup %1615 }
 0x132   :  { %v413_v32 = vmul.f32 %v2327_v17, %v1977_v41  ;;  %v414_v37 = vmul.f32 %v2327_v17, %v1982_v24  ;;  %v415_v56 = vmul.f32 %v2327_v17, %v1987_v36  ;;  %v416_v58 = vmul.f32 %v2327_v17, %v1992_v31 }
 0x133   :  { %v417_v14 = vmul.f32 %v2327_v17, %v2001_v0  ;;  %v418_v41 = vmul.f32 %v2327_v17, %v2008_v1  ;;  %v419_v24 = vmul.f32 %v2327_v17, %v2015_v49  ;;  %v420_v36 = vmul.f32 %v2327_v17, %v2022_v52 }
 0x134   :  { %v484_v38 = vmul.f32 %v2332_v13, %v413_v32  ;;  %v485_v31 = vmul.f32 %v2332_v13, %v414_v37  ;;  %v486_v20 = vmul.f32 %v2332_v13, %v415_v56  ;;  %v487_v54 = vmul.f32 %v2332_v13, %v416_v58 }
 0x135   :  { %v488_v2 = vmul.f32 %v2332_v13, %v417_v14  ;;  %v489_v0 = vmul.f32 %v2332_v13, %v418_v41  ;;  %v490_v1 = vmul.f32 %v2332_v13, %v419_v24  ;;  %v491_v57 = vmul.f32 %v2332_v13, %v420_v36 }
 0x136   :  { %v555_v49 = vadd.f32 %v2345_v63, %v484_v38  ;;  %v556_v52 = vadd.f32 %v2345_v63, %v485_v31  ;;  %v557_v25 = vadd.f32 %v2345_v63, %v486_v20  ;;  %v558_v61 = vadd.f32 %v2345_v63, %v487_v54 }
 0x137   :  { %v559_v15 = vadd.f32 %v2345_v63, %v488_v2  ;;  %v560_v19 = vadd.f32 %v2345_v63, %v489_v0  ;;  %v561_v62 = vadd.f32 %v2345_v63, %v490_v1  ;;  %v562_v27 = vadd.f32 %v2345_v63, %v491_v57 }
 0x138   :  { %vm619_vm0 = vcmp.gt.f32.partialorder %v555_v49, 0.0  ;;  %vm620_vm1 = vcmp.gt.f32.partialorder %v556_v52, 0.0  ;;  %v683_v32 = vmul.f32 0.2, %v555_v49  ;;  %v684_v37 = vmul.f32 0.2, %v556_v52 }
 0x139   :  { %vm621_vm2 = vcmp.gt.f32.partialorder %v557_v25, 0.0  ;;  %vm622_vm3 = vcmp.gt.f32.partialorder %v558_v61, 0.0  ;;  %v685_v56 = vmul.f32 0.2, %v557_v25  ;;  %v686_v58 = vmul.f32 0.2, %v558_v61 }
 0x13a   :  { %v747_v14 = vsel %vm619_vm0, %v555_v49, %v683_v32  ;;  %v748_v41 = vsel %vm620_vm1, %v556_v52, %v684_v37  ;;  %vm623_vm4 = vcmp.gt.f32.partialorder %v559_v15, 0.0  ;;  %vm624_vm5 = vcmp.gt.f32.partialorder %v560_v19, 0.0 }
 0x13b   :  { %v1396_v24 = vpack.c.bf16 %v748_v41, %v747_v14  ;;  %v749_v36 = vsel %vm621_vm2, %v557_v25, %v685_v56  ;;  %v750_v38 = vsel %vm622_vm3, %v558_v61, %v686_v58  ;;  %v687_v31 = vmul.f32 0.2, %v559_v15 }
 0x13c   :  { %v1401_v20 = vpack.c.bf16 %v750_v38, %v749_v36  ;;  %v688_v54 = vmul.f32 0.2, %v560_v19  ;;  %vm625_vm6 = vcmp.gt.f32.partialorder %v561_v62, 0.0  ;;  %vm626_vm7 = vcmp.gt.f32.partialorder %v562_v27, 0.0  ;;  %v2812_v38 = vld [vmem:[#allocation8_spill] sm:$0xff] }
 0x13d   :  { %1397 = vst [vmem:[%s2694_s3] sm:$0xff] %v1396_v24   ;;  %v751_v2 = vsel %vm623_vm4, %v559_v15, %v687_v31  ;;  %v689_v0 = vmul.f32 0.2, %v561_v62  ;;  %v690_v1 = vmul.f32 0.2, %v562_v27  ;;  %v421_v57 = vmul.f32 %v2327_v17, %v2029_v43 }
 0x13e   :  { %1584 = vst [vmem:[%s2694_s3 + $0x8] sm:$0xff] %v1401_v20   ;;  %v752_v49 = vsel %vm624_vm5, %v560_v19, %v688_v54  ;;  %v422_v52 = vmul.f32 %v2327_v17, %v2036_v42  ;;  %v423_v25 = vmul.f32 %v2327_v17, %v2043_v4  ;;  %v424_v61 = vmul.f32 %v2327_v17, %v2050_v48  ;;  %v2811_v48 = vld [vmem:[#allocation7_spill] sm:$0xff] }
 0x13f   :  { %v1406_v15 = vpack.c.bf16 %v752_v49, %v751_v2  ;;  %v753_v32 = vsel %vm625_vm6, %v561_v62, %v689_v0  ;;  %v754_v37 = vsel %vm626_vm7, %v562_v27, %v690_v1  ;;  %v492_v56 = vmul.f32 %v2332_v13, %v421_v57 }
 0x140   :  { %v1411_v43 = vpack.c.bf16 %v754_v37, %v753_v32  ;;  %v493_v58 = vmul.f32 %v2332_v13, %v422_v52  ;;  %v494_v14 = vmul.f32 %v2332_v13, %v423_v25  ;;  %v495_v19 = vmul.f32 %v2332_v13, %v424_v61 }
 0x141   :  { %1585 = vst [vmem:[%s2694_s3 + $0x10] sm:$0xff] %v1406_v15   ;;  %v563_v42 = vadd.f32 %v2345_v63, %v492_v56  ;;  %v425_v4 = vmul.f32 %v2327_v17, %v2057_v11  ;;  %v426_v62 = vmul.f32 %v2327_v17, %v2811_v48  ;;  %v427_v27 = vmul.f32 %v2327_v17, %v2071_v3 }
 0x142   :  { %1586 = vst [vmem:[%s2694_s3 + $0x18] sm:$0xff] %v1411_v43   ;;  %v564_v41 = vadd.f32 %v2345_v63, %v493_v58  ;;  %v565_v24 = vadd.f32 %v2345_v63, %v494_v14  ;;  %v566_v36 = vadd.f32 %v2345_v63, %v495_v19  ;;  %v428_v31 = vmul.f32 %v2327_v17, %v2812_v38 }
 0x143   :  { %vm627_vm8 = vcmp.gt.f32.partialorder %v563_v42, 0.0  ;;  %v691_v11 = vmul.f32 0.2, %v563_v42  ;;  %v496_v20 = vmul.f32 %v2332_v13, %v425_v4  ;;  %v497_v54 = vmul.f32 %v2332_v13, %v426_v62  ;;  %v2813_v4 = vld [vmem:[#allocation9_spill] sm:$0xff] }
 0x144   :  { %vm628_vm9 = vcmp.gt.f32.partialorder %v564_v41, 0.0  ;;  %v692_v3 = vmul.f32 0.2, %v564_v41  ;;  %vm629_vm10 = vcmp.gt.f32.partialorder %v565_v24, 0.0  ;;  %vm630_vm11 = vcmp.gt.f32.partialorder %v566_v36, 0.0 }
 0x145   :  { %v755_v2 = vsel %vm627_vm8, %v563_v42, %v691_v11  ;;  %v693_v0 = vmul.f32 0.2, %v565_v24  ;;  %v694_v1 = vmul.f32 0.2, %v566_v36  ;;  %v567_v57 = vadd.f32 %v2345_v63, %v496_v20 }
 0x146   :  { %v756_v49 = vsel %vm628_vm9, %v564_v41, %v692_v3  ;;  %v568_v52 = vadd.f32 %v2345_v63, %v497_v54  ;;  %v498_v25 = vmul.f32 %v2332_v13, %v427_v27  ;;  %v499_v61 = vmul.f32 %v2332_v13, %v428_v31 }
 0x147   :  { %v1416_v15 = vpack.c.bf16 %v756_v49, %v755_v2  ;;  %v757_v32 = vsel %vm629_vm10, %v565_v24, %v693_v0  ;;  %v758_v37 = vsel %vm630_vm11, %v566_v36, %v694_v1  ;;  %vm631_vm12 = vcmp.gt.f32.partialorder %v567_v57, 0.0  ;;  %v2814_v24 = vld [vmem:[#allocation10_spill] sm:$0xff]  ;;  %v2815_v0 = vld [vmem:[#allocation11_spill] sm:$0xff] }
 0x148   :  { %v1421_v56 = vpack.c.bf16 %v758_v37, %v757_v32  ;;  %vm632_vm13 = vcmp.gt.f32.partialorder %v568_v52, 0.0  ;;  %v695_v43 = vmul.f32 0.2, %v567_v57  ;;  %v696_v58 = vmul.f32 0.2, %v568_v52 }
 0x149   :  { %1587 = vst [vmem:[%s2694_s3 + $0x20] sm:$0xff] %v1416_v15   ;;  %v569_v14 = vadd.f32 %v2345_v63, %v498_v25  ;;  %v570_v19 = vadd.f32 %v2345_v63, %v499_v61  ;;  %v429_v42 = vmul.f32 %v2327_v17, %v2085_v12  ;;  %v430_v48 = vmul.f32 %v2327_v17, %v2813_v4 }
 0x14a   :  { %1588 = vst [vmem:[%s2694_s3 + $0x28] sm:$0xff] %v1421_v56   ;;  %v759_v62 = vsel %vm631_vm12, %v567_v57, %v695_v43  ;;  %v760_v27 = vsel %vm632_vm13, %v568_v52, %v696_v58  ;;  %v431_v41 = vmul.f32 %v2327_v17, %v2099_v8  ;;  %v432_v36 = vmul.f32 %v2327_v17, %v2814_v24 }
 0x14b   :  { %v1426_v38 = vpack.c.bf16 %v760_v27, %v759_v62  ;;  %vm633_vm14 = vcmp.gt.f32.partialorder %v569_v14, 0.0  ;;  %vm634_vm15 = vcmp.gt.f32.partialorder %v570_v19, 0.0  ;;  %v697_v31 = vmul.f32 0.2, %v569_v14 }
 0x14c   :  { %v698_v12 = vmul.f32 0.2, %v570_v19  ;;  %v500_v11 = vmul.f32 %v2332_v13, %v429_v42  ;;  %v501_v20 = vmul.f32 %v2332_v13, %v430_v48  ;;  %v502_v54 = vmul.f32 %v2332_v13, %v431_v41 }
 0x14d   :  { %1589 = vst [vmem:[%s2694_s3 + $0x30] sm:$0xff] %v1426_v38   ;;  %v761_v3 = vsel %vm633_vm14, %v569_v14, %v697_v31  ;;  %v503_v8 = vmul.f32 %v2332_v13, %v432_v36  ;;  %v433_v2 = vmul.f32 %v2327_v17, %v2113_v10  ;;  %v434_v1 = vmul.f32 %v2327_v17, %v2815_v0  ;;  %v2816_v31 = vld [vmem:[#allocation12_spill] sm:$0xff] }
 0x14e   :  { %v762_v57 = vsel %vm634_vm15, %v570_v19, %v698_v12  ;;  %v571_v49 = vadd.f32 %v2345_v63, %v500_v11  ;;  %v572_v52 = vadd.f32 %v2345_v63, %v501_v20  ;;  %v573_v25 = vadd.f32 %v2345_v63, %v502_v54  ;;  %v2817_v54 = vld [vmem:[#allocation13_spill] sm:$0xff] }
 0x14f   :  { %v1431_v61 = vpack.c.bf16 %v762_v57, %v761_v3  ;;  %v574_v15 = vadd.f32 %v2345_v63, %v503_v8  ;;  %v504_v32 = vmul.f32 %v2332_v13, %v433_v2  ;;  %v505_v37 = vmul.f32 %v2332_v13, %v434_v1  ;;  %v2818_v2 = vld [vmem:[#allocation14_spill] sm:$0xff] }
 0x150   :  { %vm635_vm0 = vcmp.gt.f32.partialorder %v571_v49, 0.0  ;;  %vm636_vm1 = vcmp.gt.f32.partialorder %v572_v52, 0.0  ;;  %v699_v10 = vmul.f32 0.2, %v571_v49  ;;  %v700_v56 = vmul.f32 0.2, %v572_v52 }
 0x151   :  { %1590 = vst [vmem:[%s2694_s3 + $0x38] sm:$0xff] %v1431_v61   ;;  %vm637_vm2 = vcmp.gt.f32.partialorder %v573_v25, 0.0  ;;  %vm638_vm3 = vcmp.gt.f32.partialorder %v574_v15, 0.0  ;;  %v701_v43 = vmul.f32 0.2, %v573_v25  ;;  %v575_v42 = vadd.f32 %v2345_v63, %v504_v32 }
 0x152   :  { %v702_v58 = vmul.f32 0.2, %v574_v15  ;;  %v763_v14 = vsel %vm635_vm0, %v571_v49, %v699_v10  ;;  %v764_v19 = vsel %vm636_vm1, %v572_v52, %v700_v56  ;;  %v576_v4 = vadd.f32 %v2345_v63, %v505_v37 }
 0x153   :  { %v1436_v48 = vpack.c.bf16 %v764_v19, %v763_v14  ;;  %v765_v62 = vsel %vm637_vm2, %v573_v25, %v701_v43  ;;  %v435_v41 = vmul.f32 %v2327_v17, %v2127_v30  ;;  %vm639_vm4 = vcmp.gt.f32.partialorder %v575_v42, 0.0 }
 0x154   :  { %v766_v27 = vsel %vm638_vm3, %v574_v15, %v702_v58  ;;  %vm640_vm5 = vcmp.gt.f32.partialorder %v576_v4, 0.0  ;;  %v703_v36 = vmul.f32 0.2, %v575_v42  ;;  %v704_v38 = vmul.f32 0.2, %v576_v4 }
 0x155   :  { %v1441_v24 = vpack.c.bf16 %v766_v27, %v765_v62  ;;  %1591 = vst [vmem:[%s2694_s3 + $0x40] sm:$0xff] %v1436_v48   ;;  %v436_v12 = vmul.f32 %v2327_v17, %v2816_v31  ;;  %v506_v11 = vmul.f32 %v2332_v13, %v435_v41  ;;  %v437_v20 = vmul.f32 %v2327_v17, %v2141_v35 }
 0x156   :  { %v767_v30 = vsel %vm639_vm4, %v575_v42, %v703_v36  ;;  %v438_v3 = vmul.f32 %v2327_v17, %v2817_v54  ;;  %v439_v8 = vmul.f32 %v2327_v17, %v2155_v40  ;;  %v440_v0 = vmul.f32 %v2327_v17, %v2818_v2 }
 0x157   :  { %1592 = vst [vmem:[%s2694_s3 + $0x48] sm:$0xff] %v1441_v24   ;;  %v768_v1 = vsel %vm640_vm5, %v576_v4, %v704_v38  ;;  %v507_v57 = vmul.f32 %v2332_v13, %v436_v12  ;;  %v577_v49 = vadd.f32 %v2345_v63, %v506_v11  ;;  %v508_v35 = vmul.f32 %v2332_v13, %v437_v20  ;;  %v2819_v38 = vld [vmem:[#allocation15_spill] sm:$0xff] }
 0x158   :  { %v1446_v52 = vpack.c.bf16 %v768_v1, %v767_v30  ;;  %v509_v25 = vmul.f32 %v2332_v13, %v438_v3  ;;  %v510_v61 = vmul.f32 %v2332_v13, %v439_v8  ;;  %v511_v15 = vmul.f32 %v2332_v13, %v440_v0  ;;  %v2820_v8 = vld [vmem:[#allocation16_spill] sm:$0xff] }
 0x159   :  { %v578_v32 = vadd.f32 %v2345_v63, %v507_v57  ;;  %vm641_vm6 = vcmp.gt.f32.partialorder %v577_v49, 0.0  ;;  %v705_v40 = vmul.f32 0.2, %v577_v49  ;;  %v579_v37 = vadd.f32 %v2345_v63, %v508_v35  ;;  %v2821_v57 = vld [vmem:[#allocation17_spill] sm:$0xff] }
 0x15a   :  { %1593 = vst [vmem:[%s2694_s3 + $0x50] sm:$0xff] %v1446_v52   ;;  %v580_v10 = vadd.f32 %v2345_v63, %v509_v25  ;;  %v581_v56 = vadd.f32 %v2345_v63, %v510_v61  ;;  %v582_v43 = vadd.f32 %v2345_v63, %v511_v15  ;;  %v441_v58 = vmul.f32 %v2327_v17, %v2169_v45  ;;  %v2822_v61 = vld [vmem:[#allocation18_spill] sm:$0xff] }
 0x15b   :  { %vm642_vm7 = vcmp.gt.f32.partialorder %v578_v32, 0.0  ;;  %v706_v14 = vmul.f32 0.2, %v578_v32  ;;  %v769_v19 = vsel %vm641_vm6, %v577_v49, %v705_v40  ;;  %vm643_vm8 = vcmp.gt.f32.partialorder %v579_v37, 0.0 }
 0x15c   :  { %vm644_vm9 = vcmp.gt.f32.partialorder %v580_v10, 0.0  ;;  %v707_v42 = vmul.f32 0.2, %v579_v37  ;;  %v708_v4 = vmul.f32 0.2, %v580_v10  ;;  %vm645_vm10 = vcmp.gt.f32.partialorder %v581_v56, 0.0 }
 0x15d   :  { %v770_v48 = vsel %vm642_vm7, %v578_v32, %v706_v14  ;;  %vm646_vm11 = vcmp.gt.f32.partialorder %v582_v43, 0.0  ;;  %v709_v62 = vmul.f32 0.2, %v581_v56  ;;  %v710_v27 = vmul.f32 0.2, %v582_v43 }
 0x15e   :  { %v1451_v41 = vpack.c.bf16 %v770_v48, %v769_v19  ;;  %v771_v24 = vsel %vm643_vm8, %v579_v37, %v707_v42  ;;  %v772_v36 = vsel %vm644_vm9, %v580_v10, %v708_v4  ;;  %v442_v31 = vmul.f32 %v2327_v17, %v2819_v38 }
 0x15f   :  { %v1456_v12 = vpack.c.bf16 %v772_v36, %v771_v24  ;;  %v773_v45 = vsel %vm645_vm10, %v581_v56, %v709_v62  ;;  %v774_v11 = vsel %vm646_vm11, %v582_v43, %v710_v27  ;;  %v512_v20 = vmul.f32 %v2332_v13, %v441_v58 }
 0x160   :  { %1594 = vst [vmem:[%s2694_s3 + $0x58] sm:$0xff] %v1451_v41   ;;  %v1461_v30 = vpack.c.bf16 %v774_v11, %v773_v45  ;;  %v513_v54 = vmul.f32 %v2332_v13, %v442_v31  ;;  %v443_v3 = vmul.f32 %v2327_v17, %v2183_v50  ;;  %v444_v2 = vmul.f32 %v2327_v17, %v2820_v8 }
 0x161   :  { %1595 = vst [vmem:[%s2694_s3 + $0x60] sm:$0xff] %v1456_v12   ;;  %v583_v0 = vadd.f32 %v2345_v63, %v512_v20  ;;  %v445_v1 = vmul.f32 %v2327_v17, %v2197_v55  ;;  %v446_v49 = vmul.f32 %v2327_v17, %v2821_v57  ;;  %v447_v35 = vmul.f32 %v2327_v17, %v2211_v60  ;;  %v2823_v12 = vld [vmem:[#allocation19_spill] sm:$0xff] }
 0x162   :  { %1596 = vst [vmem:[%s2694_s3 + $0x68] sm:$0xff] %v1461_v30   ;;  %v584_v50 = vadd.f32 %v2345_v63, %v513_v54  ;;  %v514_v52 = vmul.f32 %v2332_v13, %v443_v3  ;;  %v515_v25 = vmul.f32 %v2332_v13, %v444_v2  ;;  %v448_v15 = vmul.f32 %v2327_v17, %v2822_v61 }
 0x163   :  { %vm647_vm12 = vcmp.gt.f32.partialorder %v583_v0, 0.0  ;;  %v711_v55 = vmul.f32 0.2, %v583_v0  ;;  %v516_v32 = vmul.f32 %v2332_v13, %v445_v1  ;;  %v517_v40 = vmul.f32 %v2332_v13, %v446_v49 }
 0x164   :  { %vm648_vm13 = vcmp.gt.f32.partialorder %v584_v50, 0.0  ;;  %v712_v60 = vmul.f32 0.2, %v584_v50  ;;  %v585_v37 = vadd.f32 %v2345_v63, %v514_v52  ;;  %v586_v10 = vadd.f32 %v2345_v63, %v515_v25 }
 0x165   :  { %v775_v56 = vsel %vm647_vm12, %v583_v0, %v711_v55  ;;  %v587_v43 = vadd.f32 %v2345_v63, %v516_v32  ;;  %v588_v58 = vadd.f32 %v2345_v63, %v517_v40  ;;  %v518_v14 = vmul.f32 %v2332_v13, %v447_v35  ;;  %v2824_v35 = vld [vmem:[#allocation20_spill] sm:$0xff] }
 0x166   :  { %v776_v19 = vsel %vm648_vm13, %v584_v50, %v712_v60  ;;  %vm649_vm14 = vcmp.gt.f32.partialorder %v585_v37, 0.0  ;;  %vm650_vm15 = vcmp.gt.f32.partialorder %v586_v10, 0.0  ;;  %v713_v42 = vmul.f32 0.2, %v585_v37 }
 0x167   :  { %v1466_v4 = vpack.c.bf16 %v776_v19, %v775_v56  ;;  %v714_v48 = vmul.f32 0.2, %v586_v10  ;;  %vm651_vm0 = vcmp.gt.f32.partialorder %v587_v43, 0.0  ;;  %vm652_vm1 = vcmp.gt.f32.partialorder %v588_v58, 0.0 }
 0x168   :  { %v777_v62 = vsel %vm649_vm14, %v585_v37, %v713_v42  ;;  %v715_v27 = vmul.f32 0.2, %v587_v43  ;;  %v716_v41 = vmul.f32 0.2, %v588_v58  ;;  %v519_v24 = vmul.f32 %v2332_v13, %v448_v15 }
 0x169   :  { %1597 = vst [vmem:[%s2694_s3 + $0x70] sm:$0xff] %v1466_v4   ;;  %v778_v36 = vsel %vm650_vm15, %v586_v10, %v714_v48  ;;  %v589_v38 = vadd.f32 %v2345_v63, %v518_v14  ;;  %v449_v31 = vmul.f32 %v2327_v17, %v2225_v9  ;;  %v450_v45 = vmul.f32 %v2327_v17, %v2823_v12 }
 0x16a   :  { %v1471_v11 = vpack.c.bf16 %v778_v36, %v777_v62  ;;  %v779_v20 = vsel %vm651_vm0, %v587_v43, %v715_v27  ;;  %v780_v30 = vsel %vm652_vm1, %v588_v58, %v716_v41  ;;  %v590_v54 = vadd.f32 %v2345_v63, %v519_v24 }
 0x16b   :  { %v1476_v3 = vpack.c.bf16 %v780_v30, %v779_v20  ;;  %vm653_vm2 = vcmp.gt.f32.partialorder %v589_v38, 0.0  ;;  %v717_v8 = vmul.f32 0.2, %v589_v38  ;;  %v520_v2 = vmul.f32 %v2332_v13, %v449_v31 }
 0x16c   :  { %1598 = vst [vmem:[%s2694_s3 + $0x78] sm:$0xff] %v1471_v11   ;;  %vm654_vm3 = vcmp.gt.f32.partialorder %v590_v54, 0.0  ;;  %v718_v0 = vmul.f32 0.2, %v590_v54  ;;  %v521_v9 = vmul.f32 %v2332_v13, %v450_v45  ;;  %v451_v1 = vmul.f32 %v2327_v17, %v2239_v22 }
 0x16d   :  { %1599 = vst [vmem:[%s2694_s3 + $0x80] sm:$0xff] %v1476_v3   ;;  %v781_v57 = vsel %vm653_vm2, %v589_v38, %v717_v8  ;;  %v591_v49 = vadd.f32 %v2345_v63, %v520_v2  ;;  %v452_v50 = vmul.f32 %v2327_v17, %v2824_v35  ;;  %v453_v52 = vmul.f32 %v2327_v17, %v2253_v34 }
 0x16e   :  { %v782_v25 = vsel %vm654_vm3, %v590_v54, %v718_v0  ;;  %v592_v61 = vadd.f32 %v2345_v63, %v521_v9  ;;  %v522_v15 = vmul.f32 %v2332_v13, %v451_v1  ;;  %v454_v22 = vmul.f32 %v2327_v17, %v2260_v5 }
 0x16f   :  { %v1481_v55 = vpack.c.bf16 %v782_v25, %v781_v57  ;;  %vm655_vm4 = vcmp.gt.f32.partialorder %v591_v49, 0.0  ;;  %v719_v32 = vmul.f32 0.2, %v591_v49  ;;  %v523_v40 = vmul.f32 %v2332_v13, %v452_v50 }
 0x170   :  { %vm656_vm5 = vcmp.gt.f32.partialorder %v592_v61, 0.0  ;;  %v720_v60 = vmul.f32 0.2, %v592_v61  ;;  %v593_v37 = vadd.f32 %v2345_v63, %v522_v15  ;;  %v524_v10 = vmul.f32 %v2332_v13, %v453_v52 }
 0x171   :  { %1600 = vst [vmem:[%s2694_s3 + $0x88] sm:$0xff] %v1481_v55   ;;  %v783_v34 = vsel %vm655_vm4, %v591_v49, %v719_v32  ;;  %v594_v56 = vadd.f32 %v2345_v63, %v523_v40  ;;  %v525_v5 = vmul.f32 %v2332_v13, %v454_v22  ;;  %v455_v43 = vmul.f32 %v2327_v17, %v2267_v47 }
 0x172   :  { %v784_v58 = vsel %vm656_vm5, %v592_v61, %v720_v60  ;;  %vm657_vm6 = vcmp.gt.f32.partialorder %v593_v37, 0.0  ;;  %v721_v14 = vmul.f32 0.2, %v593_v37  ;;  %v595_v19 = vadd.f32 %v2345_v63, %v524_v10 }
 0x173   :  { %v1486_v42 = vpack.c.bf16 %v784_v58, %v783_v34  ;;  %vm658_vm7 = vcmp.gt.f32.partialorder %v594_v56, 0.0  ;;  %v722_v4 = vmul.f32 0.2, %v594_v56  ;;  %v596_v48 = vadd.f32 %v2345_v63, %v525_v5 }
 0x174   :  { %v785_v62 = vsel %vm657_vm6, %v593_v37, %v721_v14  ;;  %vm659_vm8 = vcmp.gt.f32.partialorder %v595_v19, 0.0  ;;  %v723_v27 = vmul.f32 0.2, %v595_v19  ;;  %v456_v41 = vmul.f32 %v2327_v17, %v2274_v6 }
 0x175   :  { %1601 = vst [vmem:[%s2694_s3 + $0x90] sm:$0xff] %v1486_v42   ;;  %v786_v47 = vsel %vm658_vm7, %v594_v56, %v722_v4  ;;  %vm660_vm9 = vcmp.gt.f32.partialorder %v596_v48, 0.0  ;;  %v724_v24 = vmul.f32 0.2, %v596_v48  ;;  %v526_v36 = vmul.f32 %v2332_v13, %v455_v43 }
 0x176   :  { %v1491_v38 = vpack.c.bf16 %v786_v47, %v785_v62  ;;  %v787_v31 = vsel %vm659_vm8, %v595_v19, %v723_v27  ;;  %v527_v12 = vmul.f32 %v2332_v13, %v456_v41  ;;  %v457_v45 = vmul.f32 %v2327_v17, %v2281_v59 }
 0x177   :  { %v788_v11 = vsel %vm660_vm9, %v596_v48, %v724_v24  ;;  %v597_v20 = vadd.f32 %v2345_v63, %v526_v36  ;;  %v458_v6 = vmul.f32 %v2327_v17, %v1918_v7  ;;  %v459_v30 = vmul.f32 %v2327_v17, %v1921_v53 }
 0x178   :  { %1602 = vst [vmem:[%s2694_s3 + $0x98] sm:$0xff] %v1491_v38   ;;  %v1496_v54 = vpack.c.bf16 %v788_v11, %v787_v31  ;;  %v598_v3 = vadd.f32 %v2345_v63, %v527_v12  ;;  %v528_v8 = vmul.f32 %v2332_v13, %v457_v45  ;;  %v460_v59 = vmul.f32 %v2327_v17, %v1924_v33 }
 0x179   :  { %vm661_vm10 = vcmp.gt.f32.partialorder %v597_v20, 0.0  ;;  %v725_v2 = vmul.f32 0.2, %v597_v20  ;;  %v529_v0 = vmul.f32 %v2332_v13, %v458_v6  ;;  %v530_v7 = vmul.f32 %v2332_v13, %v459_v30 }
 0x17a   :  { %1603 = vst [vmem:[%s2694_s3 + $0xa0] sm:$0xff] %v1496_v54   ;;  %vm662_vm11 = vcmp.gt.f32.partialorder %v598_v3, 0.0  ;;  %v726_v53 = vmul.f32 0.2, %v598_v3  ;;  %v599_v9 = vadd.f32 %v2345_v63, %v528_v8  ;;  %v531_v1 = vmul.f32 %v2332_v13, %v460_v59 }
 0x17b   :  { %v789_v57 = vsel %vm661_vm10, %v597_v20, %v725_v2  ;;  %v600_v49 = vadd.f32 %v2345_v63, %v529_v0  ;;  %v601_v33 = vadd.f32 %v2345_v63, %v530_v7  ;;  %v461_v35 = vmul.f32 %v2327_v17, %v1927_v28  ;;  %v2825_v2 = vld [vmem:[#allocation2_spill] sm:$0xff]  ;;  %v2826_v7 = vld [vmem:[#allocation3_spill] sm:$0xff] }
 0x17c   :  { %v790_v50 = vsel %vm662_vm11, %v598_v3, %v726_v53  ;;  %vm663_vm12 = vcmp.gt.f32.partialorder %v599_v9, 0.0  ;;  %v727_v52 = vmul.f32 0.2, %v599_v9  ;;  %v602_v25 = vadd.f32 %v2345_v63, %v531_v1 }
 0x17d   :  { %v1501_v61 = vpack.c.bf16 %v790_v50, %v789_v57  ;;  %vm664_vm13 = vcmp.gt.f32.partialorder %v600_v49, 0.0  ;;  %v728_v15 = vmul.f32 0.2, %v600_v49  ;;  %vm665_vm14 = vcmp.gt.f32.partialorder %v601_v33, 0.0  ;;  %v2827_v57 = vld [vmem:[#allocation4_spill] sm:$0xff] }
 0x17e   :  { %v791_v22 = vsel %vm663_vm12, %v599_v9, %v727_v52  ;;  %vm666_vm15 = vcmp.gt.f32.partialorder %v602_v25, 0.0  ;;  %v729_v55 = vmul.f32 0.2, %v601_v33  ;;  %v730_v32 = vmul.f32 0.2, %v602_v25 }
 0x17f   :  { %1604 = vst [vmem:[%s2694_s3 + $0xa8] sm:$0xff] %v1501_v61   ;;  %v792_v40 = vsel %vm664_vm13, %v600_v49, %v728_v15  ;;  %v462_v28 = vmul.f32 %v2327_v17, %v1930_v23  ;;  %v532_v60 = vmul.f32 %v2332_v13, %v461_v35  ;;  %v463_v37 = vmul.f32 %v2327_v17, %v1933_v18 }
 0x180   :  { %v1506_v10 = vpack.c.bf16 %v792_v40, %v791_v22  ;;  %v793_v34 = vsel %vm665_vm14, %v601_v33, %v729_v55  ;;  %v794_v56 = vsel %vm666_vm15, %v602_v25, %v730_v32  ;;  %v464_v5 = vmul.f32 %v2327_v17, %v1936_v16  ;;  %v2828_v33 = vld [vmem:[#allocation5_spill] sm:$0xff]  ;;  %v2829_v40 = vld [vmem:[#allocation6_spill] sm:$0xff] }
 0x181   :  { %v1511_v43 = vpack.c.bf16 %v794_v56, %v793_v34  ;;  %v533_v58 = vmul.f32 %v2332_v13, %v462_v28  ;;  %v603_v14 = vadd.f32 %v2345_v63, %v532_v60  ;;  %v534_v19 = vmul.f32 %v2332_v13, %v463_v37 }
 0x182   :  { %1605 = vst [vmem:[%s2694_s3 + $0xb0] sm:$0xff] %v1506_v10   ;;  %v535_v23 = vmul.f32 %v2332_v13, %v464_v5  ;;  %v465_v18 = vmul.f32 %v2327_v17, %v1939_v21  ;;  %v466_v42 = vmul.f32 %v2327_v17, %v1942_v26  ;;  %v467_v16 = vmul.f32 %v2327_v17, %v1945_v29 }
 0x183   :  { %1606 = vst [vmem:[%s2694_s3 + $0xb8] sm:$0xff] %v1511_v43   ;;  %v604_v4 = vadd.f32 %v2345_v63, %v533_v58  ;;  %vm667_vm0 = vcmp.gt.f32.partialorder %v603_v14, 0.0  ;;  %v731_v48 = vmul.f32 0.2, %v603_v14  ;;  %v605_v62 = vadd.f32 %v2345_v63, %v534_v19 }
 0x184   :  { %v606_v27 = vadd.f32 %v2345_v63, %v535_v23  ;;  %v536_v21 = vmul.f32 %v2332_v13, %v465_v18  ;;  %v537_v41 = vmul.f32 %v2332_v13, %v466_v42  ;;  %v468_v26 = vmul.f32 %v2327_v17, %v1948_v39 }
 0x185   :  { %vm668_vm1 = vcmp.gt.f32.partialorder %v604_v4, 0.0  ;;  %v732_v29 = vmul.f32 0.2, %v604_v4  ;;  %v795_v47 = vsel %vm667_vm0, %v603_v14, %v731_v48  ;;  %vm669_vm2 = vcmp.gt.f32.partialorder %v605_v62, 0.0 }
 0x186   :  { %vm670_vm3 = vcmp.gt.f32.partialorder %v606_v27, 0.0  ;;  %v733_v24 = vmul.f32 0.2, %v605_v62  ;;  %v734_v36 = vmul.f32 0.2, %v606_v27  ;;  %v607_v38 = vadd.f32 %v2345_v63, %v536_v21 }
 0x187   :  { %v796_v31 = vsel %vm668_vm1, %v604_v4, %v732_v29  ;;  %v608_v12 = vadd.f32 %v2345_v63, %v537_v41  ;;  %v538_v45 = vmul.f32 %v2332_v13, %v467_v16  ;;  %v539_v11 = vmul.f32 %v2332_v13, %v468_v26 }
 0x188   :  { %v1516_v20 = vpack.c.bf16 %v796_v31, %v795_v47  ;;  %v797_v6 = vsel %vm669_vm2, %v605_v62, %v733_v24  ;;  %v798_v30 = vsel %vm670_vm3, %v606_v27, %v734_v36  ;;  %vm671_vm4 = vcmp.gt.f32.partialorder %v607_v38, 0.0 }
 0x189   :  { %v1521_v39 = vpack.c.bf16 %v798_v30, %v797_v6  ;;  %vm672_vm5 = vcmp.gt.f32.partialorder %v608_v12, 0.0  ;;  %v735_v54 = vmul.f32 0.2, %v607_v38  ;;  %v736_v3 = vmul.f32 0.2, %v608_v12 }
 0x18a   :  { %1607 = vst [vmem:[%s2694_s3 + $0xc0] sm:$0xff] %v1516_v20   ;;  %v609_v8 = vadd.f32 %v2345_v63, %v538_v45  ;;  %v610_v59 = vadd.f32 %v2345_v63, %v539_v11  ;;  %v469_v0 = vmul.f32 %v2327_v17, %v2825_v2  ;;  %v470_v53 = vmul.f32 %v2327_v17, %v2826_v7 }
 0x18b   :  { %1608 = vst [vmem:[%s2694_s3 + $0xc8] sm:$0xff] %v1521_v39   ;;  %v799_v9 = vsel %vm671_vm4, %v607_v38, %v735_v54  ;;  %v800_v1 = vsel %vm672_vm5, %v608_v12, %v736_v3  ;;  %v471_v49 = vmul.f32 %v2327_v17, %v2827_v57  ;;  %v472_v35 = vmul.f32 %v2327_v17, %v2828_v33 }
 0x18c   :  { %v1526_v50 = vpack.c.bf16 %v800_v1, %v799_v9  ;;  %vm673_vm6 = vcmp.gt.f32.partialorder %v609_v8, 0.0  ;;  %vm674_vm7 = vcmp.gt.f32.partialorder %v610_v59, 0.0  ;;  %v737_v52 = vmul.f32 0.2, %v609_v8 }
 0x18d   :  { %v738_v25 = vmul.f32 0.2, %v610_v59  ;;  %v540_v61 = vmul.f32 %v2332_v13, %v469_v0  ;;  %v541_v15 = vmul.f32 %v2332_v13, %v470_v53  ;;  %v542_v22 = vmul.f32 %v2332_v13, %v471_v49 }
 0x18e   :  { %1609 = vst [vmem:[%s2694_s3 + $0xd0] sm:$0xff] %v1526_v50   ;;  %v801_v55 = vsel %vm673_vm6, %v609_v8, %v737_v52  ;;  %v543_v32 = vmul.f32 %v2332_v13, %v472_v35  ;;  %v473_v28 = vmul.f32 %v2327_v17, %v2829_v40  ;;  %v474_v60 = vmul.f32 %v2327_v17, %v1966_v51 }
 0x18f   :  { %v802_v37 = vsel %vm674_vm7, %v610_v59, %v738_v25  ;;  %v611_v10 = vadd.f32 %v2345_v63, %v540_v61  ;;  %v612_v34 = vadd.f32 %v2345_v63, %v541_v15  ;;  %v613_v56 = vadd.f32 %v2345_v63, %v542_v22 }
 0x190   :  { %v1531_v5 = vpack.c.bf16 %v802_v37, %v801_v55  ;;  %v614_v43 = vadd.f32 %v2345_v63, %v543_v32  ;;  %v544_v58 = vmul.f32 %v2332_v13, %v473_v28  ;;  %v545_v14 = vmul.f32 %v2332_v13, %v474_v60 }
 0x191   :  { %vm675_vm8 = vcmp.gt.f32.partialorder %v611_v10, 0.0  ;;  %vm676_vm9 = vcmp.gt.f32.partialorder %v612_v34, 0.0  ;;  %v739_v19 = vmul.f32 0.2, %v611_v10  ;;  %v740_v23 = vmul.f32 0.2, %v612_v34 }
 0x192   :  { %1610 = vst [vmem:[%s2694_s3 + $0xd8] sm:$0xff] %v1531_v5   ;;  %vm677_vm10 = vcmp.gt.f32.partialorder %v613_v56, 0.0  ;;  %vm678_vm11 = vcmp.gt.f32.partialorder %v614_v43, 0.0  ;;  %v741_v51 = vmul.f32 0.2, %v613_v56  ;;  %v615_v4 = vadd.f32 %v2345_v63, %v544_v58 }
 0x193   :  { %v742_v18 = vmul.f32 0.2, %v614_v43  ;;  %v803_v42 = vsel %vm675_vm8, %v611_v10, %v739_v19  ;;  %v804_v16 = vsel %vm676_vm9, %v612_v34, %v740_v23  ;;  %v616_v48 = vadd.f32 %v2345_v63, %v545_v14 }
 0x194   :  { %v1536_v62 = vpack.c.bf16 %v804_v16, %v803_v42  ;;  %v805_v27 = vsel %vm677_vm10, %v613_v56, %v741_v51  ;;  %v475_v41 = vmul.f32 %v2327_v17, %v1969_v44  ;;  %vm679_vm12 = vcmp.gt.f32.partialorder %v615_v4, 0.0 }
 0x195   :  { %v806_v21 = vsel %vm678_vm11, %v614_v43, %v742_v18  ;;  %vm680_vm13 = vcmp.gt.f32.partialorder %v616_v48, 0.0  ;;  %v743_v29 = vmul.f32 0.2, %v615_v4  ;;  %v744_v47 = vmul.f32 0.2, %v616_v48 }
 0x196   :  { %v1541_v26 = vpack.c.bf16 %v806_v21, %v805_v27  ;;  %1611 = vst [vmem:[%s2694_s3 + $0xe0] sm:$0xff] %v1536_v62   ;;  %v476_v24 = vmul.f32 %v2327_v17, %v1972_v46  ;;  %v546_v36 = vmul.f32 %v2332_v13, %v475_v41 }
 0x197   :  { %v807_v38 = vsel %vm679_vm12, %v615_v4, %v743_v29  ;;  %v808_v44 = vsel %vm680_vm13, %v616_v48, %v744_v47 }
 0x198   :  { %1612 = vst [vmem:[%s2694_s3 + $0xe8] sm:$0xff] %v1541_v26   ;;  %v547_v31 = vmul.f32 %v2332_v13, %v476_v24  ;;  %v617_v12 = vadd.f32 %v2345_v63, %v546_v36  ;;  %v1546_v45 = vpack.c.bf16 %v808_v44, %v807_v38 }
 0x19a   :  { %v618_v11 = vadd.f32 %v2345_v63, %v547_v31  ;;  %vm681_vm14 = vcmp.gt.f32.partialorder %v617_v12, 0.0  ;;  %v745_v20 = vmul.f32 0.2, %v617_v12  ;;  %1613 = vst [vmem:[%s2694_s3 + $0xf0] sm:$0xff] %v1546_v45  }
 0x19c   :  { %vm682_vm15 = vcmp.gt.f32.partialorder %v618_v11, 0.0  ;;  %v746_v46 = vmul.f32 0.2, %v618_v11  ;;  %v809_v17 = vsel %vm681_vm14, %v617_v12, %v745_v20 }
 0x19e   :  { %v810_v6 = vsel %vm682_vm15, %v618_v11, %v746_v46 }
 0x19f   :  { %v1551_v30 = vpack.c.bf16 %v810_v6, %v809_v17 }
 0x1a1   :  { %1614 = vst [vmem:[%s2694_s3 + $0xf8] sm:$0xff] %v1551_v30  }

// kernel: discriminator_forward.7
= control target key start
LH: loop header
LB: loop body
LE: loop exit
PB: predicated region body
PF: predicated region fallthrough
CT: control target
= control target key end

     0   :  { %s4506_s9 = smov 0   ;;  %s5295_s0 = inlined_call_operand.vmem [shape: bf16[2,17,2,16,256], index: 0, kind: input, shape index: {}]   ;;  %s5296_s1 = inlined_call_operand.vmem [shape: bf16[4,256,128], index: 1, kind: input, shape index: {}]   ;;  %s5297_s2 = inlined_call_operand.vmem [shape: bf16[2,256,128], index: 2, kind: output, shape index: {}]  }
   0x1 LB: > { %s3002_s10 = sadd.s32 4294967295, %s4489_s9   ;;  %p3006_p0 = scmp.ge.s32.totalorder %s4489_s9, 1  ;;  %s4489_s9 = sphi %s4506_s9, %s12_s9  }
   0x2   : > { %p112_p1 = scmp.lt.s32.totalorder %s4489_s9, 3 }
   0x4   : > { %p113_p2 = pnand %p3006_p0, %p112_p1 }
   0x5   : > { %v4253_v0 = vld [vmem:[%s5296_s1 + $0xc0] sm:$0xff] (!%p113_p2)   ;;  %v4257_v4 = vld [vmem:[%s5296_s1 + $0xc8] sm:$0xff] (!%p113_p2)   ;;  %v4261_v8 = vld [vmem:[%s5296_s1 + $0xd0] sm:$0xff] (!%p113_p2)   ;;  %p134_p3 = scmp.lt.s32.totalorder (!%p113_p2), %s3002_s10, 1 }
   0x6   : > { %116 = sbr.rel (%p113_p2) target bundleno = 511 (0x1ff), region = 28  ;;  %v4254_v1 = vld [vmem:[%s5296_s1 + $0x40] sm:$0xff] (!%p113_p2)   ;;  %3732 = vmatprep.subr.bf16.mxu0 (!%p113_p2), %v4253_v0  ;;  %v4258_v5 = vld [vmem:[%s5296_s1 + $0x48] sm:$0xff] (!%p113_p2)   ;;  %v4262_v9 = vld [vmem:[%s5296_s1 + $0x50] sm:$0xff] (!%p113_p2)  }
   0x7   : > { %v4255_v2 = vld [vmem:[%s5296_s1 + $0x80] sm:$0xff] (!%p113_p2)   ;;  %3796 = vmatprep.subr.bf16.mxu1 (!%p113_p2), %v4254_v1  ;;  %v4259_v6 = vld [vmem:[%s5296_s1 + $0x88] sm:$0xff] (!%p113_p2)   ;;  %v4263_v10 = vld [vmem:[%s5296_s1 + $0x90] sm:$0xff] (!%p113_p2)  }
   0x8   : > { %v4256_v3 = vld [vmem:[%s5296_s1] sm:$0xff] (!%p113_p2)   ;;  %3733 = vmatpush3.bf16.msra.mxu0 (!%p113_p2), %v4255_v2  ;;  %v4260_v7 = vld [vmem:[%s5296_s1 + $0x8] sm:$0xff] (!%p113_p2)   ;;  %v4264_v11 = vld [vmem:[%s5296_s1 + $0x10] sm:$0xff] (!%p113_p2)  }
   0x9   : > { %3797 = vmatpush3.bf16.msra.mxu1 (!%p113_p2), %v4256_v3  ;;  %3734 = vmatprep.subr.bf16.mxu0 (!%p113_p2), %v4257_v4  ;;  %v4265_v12 = vld [vmem:[%s5296_s1 + $0xd8] sm:$0xff] (!%p113_p2)   ;;  %v4269_v16 = vld [vmem:[%s5296_s1 + $0xe0] sm:$0xff] (!%p113_p2)   ;;  %v4273_v20 = vld [vmem:[%s5296_s1 + $0xe8] sm:$0xff] (!%p113_p2)  }
   0xa   : > { %3798 = vmatprep.subr.bf16.mxu1 (!%p113_p2), %v4258_v5  ;;  %v4266_v13 = vld [vmem:[%s5296_s1 + $0x58] sm:$0xff] (!%p113_p2)   ;;  %v4270_v17 = vld [vmem:[%s5296_s1 + $0x60] sm:$0xff] (!%p113_p2)   ;;  %v4274_v21 = vld [vmem:[%s5296_s1 + $0x68] sm:$0xff] (!%p113_p2)  }
   0xb   : > { %v4267_v14 = vld [vmem:[%s5296_s1 + $0x98] sm:$0xff] (!%p113_p2)   ;;  %v4271_v18 = vld [vmem:[%s5296_s1 + $0xa0] sm:$0xff] (!%p113_p2)   ;;  %v4275_v22 = vld [vmem:[%s5296_s1 + $0xa8] sm:$0xff] (!%p113_p2)  }
   0xc   : > { %3735 = vmatpush3.bf16.msra.mxu0 (!%p113_p2), %v4259_v6  ;;  %v4268_v15 = vld [vmem:[%s5296_s1 + $0x18] sm:$0xff] (!%p113_p2)   ;;  %v4272_v19 = vld [vmem:[%s5296_s1 + $0x20] sm:$0xff] (!%p113_p2)   ;;  %v4276_v23 = vld [vmem:[%s5296_s1 + $0x28] sm:$0xff] (!%p113_p2)  }
   0xd   : > { %3799 = vmatpush3.bf16.msra.mxu1 %v4260_v7  ;;  %3736 = vmatprep.subr.bf16.mxu0 %v4261_v8  ;;  %s5299_s10 = smov (!%p134_p3, %s3002_s10), 1  ;;  %v4277_v24 = vld [vmem:[%s5296_s1 + $0xf0] sm:$0xff]   ;;  %v4281_v28 = vld [vmem:[%s5296_s1 + $0xf8] sm:$0xff]   ;;  %v4291_v36 = vld [vmem:[%s5296_s1 + $0x140] sm:$0xff]  }
   0xe   : > { %3800 = vmatprep.subr.bf16.mxu1 %v4262_v9  ;;  %v4278_v25 = vld [vmem:[%s5296_s1 + $0x70] sm:$0xff]   ;;  %s4244_s11 = smul.u32 544, %s5299_s10  ;;  %v4282_v29 = vld [vmem:[%s5296_s1 + $0x78] sm:$0xff]   ;;  %v4292_v37 = vld [vmem:[%s5296_s1 + $0x100] sm:$0xff]  }
   0xf   : > { %v4279_v26 = vld [vmem:[%s5296_s1 + $0xb0] sm:$0xff]   ;;  %v4283_v30 = vld [vmem:[%s5296_s1 + $0xb8] sm:$0xff]   ;;  %v4293_v38 = vld [vmem:[%s5296_s1 + $0x1c0] sm:$0xff]  }
  0x10   : > { %3737 = vmatpush3.bf16.msra.mxu0 %v4263_v10  ;;  %v4280_v27 = vld [vmem:[%s5296_s1 + $0x30] sm:$0xff]   ;;  %s4614_s22 = scalar_lea.vmem %s5295_s0, %s4244_s11  ;;  %v4284_v31 = vld [vmem:[%s5296_s1 + $0x38] sm:$0xff]   ;;  %v4294_v39 = vld [vmem:[%s5296_s1 + $0x180] sm:$0xff]  }
  0x11   : > { %3801 = vmatpush3.bf16.msra.mxu1 %v4264_v11  ;;  %3738 = vmatprep.subr.bf16.mxu0 %v4265_v12  ;;  %v4285_v32 = vld [vmem:[%s4614_s22 + $0x10] ss:$8 sps:$4 sm:$0xff]   ;;  %v4287_v33 = vld [vmem:[%s4614_s22 + $0x14] ss:$8 sps:$4 sm:$0xff]   ;;  %v4288_v34 = vld [vmem:[%s4614_s22] ss:$8 sps:$4 sm:$0xff]  }
  0x12   : > { %3802 = vmatprep.subr.bf16.mxu1 %v4266_v13  ;;  %v4290_v35 = vld [vmem:[%s4614_s22 + $0x4] ss:$8 sps:$4 sm:$0xff]   ;;  %451 = vmatprep.mubr.bf16.mxu0 %v4287_v33  ;;  %v4639_v40 = vld [vmem:[%s4614_s22 + $0x34] ss:$8 sps:$4 sm:$0xff]   ;;  %v4645_v42 = vld [vmem:[%s4614_s22 + $0x30] ss:$8 sps:$4 sm:$0xff]  }
  0x13   : > { %724 = vmatprep.mubr.bf16.mxu1 %v4290_v35  ;;  %v4642_v41 = vld [vmem:[%s4614_s22 + $0x24] ss:$8 sps:$4 sm:$0xff]   ;;  %v4649_v43 = vld [vmem:[%s4614_s22 + $0x20] ss:$8 sps:$4 sm:$0xff]   ;;  %v4667_v48 = vld [vmem:[%s4614_s22 + $0x54] ss:$8 sps:$4 sm:$0xff]  }
  0x14   : > { %3739 = vmatpush3.bf16.msra.mxu0 %v4267_v14  ;;  %v4301_v44 = vld [vmem:[%s5296_s1 + $0x148] sm:$0xff]   ;;  %v4673_v50 = vld [vmem:[%s4614_s22 + $0x50] ss:$8 sps:$4 sm:$0xff]   ;;  %v4694_v56 = vld [vmem:[%s4614_s22 + $0x74] ss:$8 sps:$4 sm:$0xff]  }
  0x15   : > { %3803 = vmatpush3.bf16.msra.mxu1 %v4268_v15  ;;  %3740 = vmatprep.subr.bf16.mxu0 %v4269_v16  ;;  %v4302_v45 = vld [vmem:[%s5296_s1 + $0x108] sm:$0xff]   ;;  %v4311_v52 = vld [vmem:[%s5296_s1 + $0x150] sm:$0xff]   ;;  %v4321_v60 = vld [vmem:[%s5296_s1 + $0x158] sm:$0xff]  }
  0x16   : > { %3804 = vmatprep.subr.bf16.mxu1 %v4270_v17  ;;  %v4303_v46 = vld [vmem:[%s5296_s1 + $0x1c8] sm:$0xff]   ;;  %v4312_v53 = vld [vmem:[%s5296_s1 + $0x110] sm:$0xff]   ;;  %v4322_v61 = vld [vmem:[%s5296_s1 + $0x118] sm:$0xff]  }
  0x17   : > { %v4304_v47 = vld [vmem:[%s5296_s1 + $0x188] sm:$0xff]   ;;  %v4313_v54 = vld [vmem:[%s5296_s1 + $0x1d0] sm:$0xff]   ;;  %v4323_v62 = vld [vmem:[%s5296_s1 + $0x1d8] sm:$0xff]  }
  0x18   : > { %3741 = vmatpush3.bf16.msra.mxu0 %v4271_v18  ;;  %v4670_v49 = vld [vmem:[%s4614_s22 + $0x44] ss:$8 sps:$4 sm:$0xff]   ;;  %v4676_v51 = vld [vmem:[%s4614_s22 + $0x40] ss:$8 sps:$4 sm:$0xff]   ;;  %v4314_v55 = vld [vmem:[%s5296_s1 + $0x190] sm:$0xff]  }
  0x19   : > { %3805 = vmatpush3.bf16.msra.mxu1 %v4272_v19  ;;  %3742 = vmatprep.subr.bf16.mxu0 %v4273_v20  ;;  %v4698_v57 = vld [vmem:[%s4614_s22 + $0x64] ss:$8 sps:$4 sm:$0xff]   ;;  %v4702_v58 = vld [vmem:[%s4614_s22 + $0x70] ss:$8 sps:$4 sm:$0xff]   ;;  %v4706_v59 = vld [vmem:[%s4614_s22 + $0x60] ss:$8 sps:$4 sm:$0xff]  }
  0x1a   : > { %3806 = vmatprep.subr.bf16.mxu1 %v4274_v21  ;;  %v4324_v63 = vld [vmem:[%s5296_s1 + $0x198] sm:$0xff]   ;;  %v4725_v1 = vld [vmem:[%s4614_s22 + $0x84] ss:$8 sps:$4 sm:$0xff]   ;;  %v4737_v4 = vld [vmem:[%s4614_s22 + $0x80] ss:$8 sps:$4 sm:$0xff]  }
  0x1b   : > { %v4721_v0 = vld [vmem:[%s4614_s22 + $0x94] ss:$8 sps:$4 sm:$0xff]   ;;  %v4731_v2 = vld [vmem:[%s4614_s22 + $0x90] ss:$8 sps:$4 sm:$0xff]   ;;  %v4331_v3 = vld [vmem:[%s5296_s1 + $0x160] sm:$0xff]  }
  0x1c   : > { %3743 = vmatpush3.bf16.msra.mxu0 %v4275_v22  ;;  %v4332_v5 = vld [vmem:[%s5296_s1 + $0x120] sm:$0xff]   ;;  %v4749_v8 = vld [vmem:[%s4614_s22 + $0xb4] ss:$8 sps:$4 sm:$0xff]   ;;  %v4341_v10 = vld [vmem:[%s5296_s1 + $0x168] sm:$0xff]  }
  0x1d   : > { %3807 = vmatpush3.bf16.msra.mxu1 %v4276_v23  ;;  %3744 = vmatprep.subr.bf16.mxu0 %v4277_v24  ;;  %v4333_v6 = vld [vmem:[%s5296_s1 + $0x1e0] sm:$0xff]   ;;  %v4342_v11 = vld [vmem:[%s5296_s1 + $0x128] sm:$0xff]   ;;  %v4765_v12 = vld [vmem:[%s4614_s22 + $0xb0] ss:$8 sps:$4 sm:$0xff]  }
  0x1e   : > { %3808 = vmatprep.subr.bf16.mxu1 %v4278_v25  ;;  %v4334_v7 = vld [vmem:[%s5296_s1 + $0x1a0] sm:$0xff]   ;;  %v4343_v13 = vld [vmem:[%s5296_s1 + $0x1e8] sm:$0xff]   ;;  %v4777_v16 = vld [vmem:[%s4614_s22 + $0xd4] ss:$8 sps:$4 sm:$0xff]  }
  0x1f   : > { %v4752_v9 = vld [vmem:[%s4614_s22 + $0xa4] ss:$8 sps:$4 sm:$0xff]   ;;  %v4774_v15 = vld [vmem:[%s4614_s22 + $0xa0] ss:$8 sps:$4 sm:$0xff]   ;;  %v4351_v18 = vld [vmem:[%s5296_s1 + $0x170] sm:$0xff]  }
  0x20   : > { %3745 = vmatpush3.bf16.msra.mxu0 %v4279_v26  ;;  %v4344_v14 = vld [vmem:[%s5296_s1 + $0x1a8] sm:$0xff]   ;;  %v4352_v19 = vld [vmem:[%s5296_s1 + $0x130] sm:$0xff]   ;;  %v4361_v26 = vld [vmem:[%s5296_s1 + $0x178] sm:$0xff]  }
  0x21   : > { %3809 = vmatpush3.bf16.msra.mxu1 %v4280_v27  ;;  %3746 = vmatprep.subr.bf16.mxu0 %v4281_v28  ;;  %v4780_v17 = vld [vmem:[%s4614_s22 + $0xc4] ss:$8 sps:$4 sm:$0xff]   ;;  %v4353_v20 = vld [vmem:[%s5296_s1 + $0x1f0] sm:$0xff]   ;;  %v4802_v23 = vld [vmem:[%s4614_s22 + $0xc0] ss:$8 sps:$4 sm:$0xff]  }
  0x22   : > { %3810 = vmatprep.subr.bf16.mxu1 %v4282_v29  ;;  %v4354_v21 = vld [vmem:[%s5296_s1 + $0x1b0] sm:$0xff]   ;;  %v4808_v25 = vld [vmem:[%s4614_s22 + $0xe4] ss:$8 sps:$4 sm:$0xff]   ;;  %v4362_v27 = vld [vmem:[%s5296_s1 + $0x138] sm:$0xff]  }
  0x23   : > { %v4799_v22 = vld [vmem:[%s4614_s22 + $0xd0] ss:$8 sps:$4 sm:$0xff]   ;;  %v4805_v24 = vld [vmem:[%s4614_s22 + $0xf4] ss:$8 sps:$4 sm:$0xff]   ;;  %v4836_v33 = vld [vmem:[%s4614_s22 + $0xe0] ss:$8 sps:$4 sm:$0xff]  }
  0x24   : > { %3747 = vmatpush3.bf16.msra.mxu0 %v4283_v30  ;;  %v4363_v28 = vld [vmem:[%s5296_s1 + $0x1f8] sm:$0xff]   ;;  %v4365_v30 = vld [vmem:[%s5296_s1 + $0xc0] sm:$0xff]  }
  0x25   : > { %3811 = vmatpush3.bf16.msra.mxu1 %v4284_v31  ;;  %3860 = vmatprep.subr.bf16.mxu0 %v4291_v36  ;;  %v4364_v29 = vld [vmem:[%s5296_s1 + $0x1b8] sm:$0xff]   ;;  %v4368_v35 = vld [vmem:[%s5296_s1] sm:$0xff]   ;;  %v4369_v36 = vld [vmem:[%s5296_s1 + $0xc8] sm:$0xff]  }
  0x26   : > { %3924 = vmatprep.subr.bf16.mxu1 %v4293_v38  ;;  %v4830_v31 = vld [vmem:[%s4614_s22 + $0xf0] ss:$8 sps:$4 sm:$0xff]   ;;  %v4371_v38 = vld [vmem:[%s5296_s1 + $0x48] sm:$0xff]  }
  0x27   : > { %452 = vmatmul.mubr.bf16.vlgmr.msra.gmra.mrb[0].mxu0 %v4285_v32  ;;  %v4367_v32 = vld [vmem:[%s5296_s1 + $0x40] sm:$0xff]  }
  0x28   : > { %725 = vmatmul.mubr.bf16.vlgmr.msra.gmra.mrb[0].mxu1 %v4288_v34  ;;  %3861 = vmatpush3.bf16.msra.mxu0 %v4292_v37  ;;  %v4366_v34 = vld [vmem:[%s5296_s1 + $0x80] sm:$0xff]   ;;  %v4370_v37 = vld [vmem:[%s5296_s1 + $0x88] sm:$0xff]  }
  0x29   : > { %3925 = vmatpush3.bf16.msra.mxu1 %v4294_v39  ;;  %459 = vmatprep.mubr.bf16.mxu0 %v4639_v40  ;;  %v4372_v39 = vld [vmem:[%s5296_s1 + $0x8] sm:$0xff]  }
  0x2a   : > { %732 = vmatprep.mubr.bf16.mxu1 %v4642_v41  ;;  %3862 = vmatprep.subr.bf16.mxu0 %v4301_v44  ;;  %v4377_v44 = vld [vmem:[%s5296_s1 + $0xd8] sm:$0xff]  }
  0x2b   : > { %3926 = vmatprep.subr.bf16.mxu1 %v4303_v46  ;;  %v4378_v46 = vld [vmem:[%s5296_s1 + $0x98] sm:$0xff]  }
  0x2c   : > { %3863 = vmatpush3.bf16.msra.mxu0 %v4302_v45  ;;  %v4379_v45 = vld [vmem:[%s5296_s1 + $0x58] sm:$0xff]  }
  0x2d   : > { %3927 = vmatpush3.bf16.msra.mxu1 %v4304_v47  ;;  %3864 = vmatprep.subr.bf16.mxu0 %v4311_v52  ;;  %v4380_v47 = vld [vmem:[%s5296_s1 + $0x18] sm:$0xff]   ;;  %v4385_v52 = vld [vmem:[%s5296_s1 + $0xe8] sm:$0xff]  }
  0x2e   : > { %3928 = vmatprep.subr.bf16.mxu1 %v4313_v54  ;;  %v4386_v54 = vld [vmem:[%s5296_s1 + $0xa8] sm:$0xff]  }
  0x2f   : > { %460 = vmatmul.mubr.bf16.gmra.mrb[4].mxu0 %v4645_v42 }
  0x30   : > { %733 = vmatmul.mubr.bf16.gmra.mrb[4].mxu1 %v4649_v43  ;;  %467 = vmatprep.mubr.bf16.mxu0 %v4667_v48 }
  0x31   : > { %740 = vmatprep.mubr.bf16.mxu1 %v4670_v49  ;;  %3865 = vmatpush3.bf16.msra.mxu0 %v4312_v53  ;;  %v4387_v53 = vld [vmem:[%s5296_s1 + $0x68] sm:$0xff]  }
  0x32   : > { %3929 = vmatpush3.bf16.msra.mxu1 %v4314_v55  ;;  %3866 = vmatprep.subr.bf16.mxu0 %v4321_v60  ;;  %v4388_v55 = vld [vmem:[%s5296_s1 + $0x28] sm:$0xff]   ;;  %v4399_v60 = vld [vmem:[%s5296_s1 + $0xf8] sm:$0xff]  }
  0x33   : > { %3930 = vmatprep.subr.bf16.mxu1 %v4323_v62  ;;  %v4400_v62 = vld [vmem:[%s5296_s1 + $0xb8] sm:$0xff]  }
  0x35   : > { %3867 = vmatpush3.bf16.msra.mxu0 %v4322_v61  ;;  %v4401_v61 = vld [vmem:[%s5296_s1 + $0x78] sm:$0xff]  }
  0x36   : > { %3931 = vmatpush3.bf16.msra.mxu1 %v4324_v63  ;;  %3868 = vmatprep.subr.bf16.mxu0 %v4331_v3  ;;  %v4402_v63 = vld [vmem:[%s5296_s1 + $0x38] sm:$0xff]  }
  0x37   : > { %468 = vmatmul.mubr.bf16.gmra.mrb[8].mxu0 %v4673_v50  ;;  %3932 = vmatprep.subr.bf16.mxu1 %v4333_v6  ;;  %v4395_v3 = vld [vmem:[%s4614_s22 + $0x114] ss:$8 sps:$4 sm:$0xff]   ;;  %v4404_v6 = vld [vmem:[%s5296_s1 + $0x100] sm:$0xff]  }
  0x38   : > { %741 = vmatmul.mubr.bf16.gmra.mrb[8].mxu1 %v4676_v51  ;;  %475 = vmatprep.mubr.bf16.mxu0 %v4694_v56 }
  0x39   : > { %748 = vmatprep.mubr.bf16.mxu1 %v4698_v57  ;;  %3869 = vmatpush3.bf16.msra.mxu0 %v4332_v5  ;;  %v4398_v5 = vld [vmem:[%s4614_s22 + $0x110] ss:$8 sps:$4 sm:$0xff]  }
  0x3a   : > { %3933 = vmatpush3.bf16.msra.mxu1 %v4334_v7  ;;  %3870 = vmatprep.subr.bf16.mxu0 %v4341_v10  ;;  %v4406_v7 = vld [vmem:[%s5296_s1 + $0x180] sm:$0xff]   ;;  %v4413_v10 = vld [vmem:[%s5296_s1 + $0x148] sm:$0xff]  }
  0x3b   : > { %3934 = vmatprep.subr.bf16.mxu1 %v4343_v13  ;;  %v4991_v13 = vld [vmem:[%s4614_s22 + $0x130] ss:$8 sps:$4 sm:$0xff]  }
  0x3d   : > { %3871 = vmatpush3.bf16.msra.mxu0 %v4342_v11  ;;  %v4415_v11 = vld [vmem:[%s5296_s1 + $0x1c8] sm:$0xff]  }
  0x3e   : > { %3935 = vmatpush3.bf16.msra.mxu1 %v4344_v14  ;;  %3872 = vmatprep.subr.bf16.mxu0 %v4351_v18  ;;  %v4416_v14 = vld [vmem:[%s5296_s1 + $0x188] sm:$0xff]   ;;  %v4425_v18 = vld [vmem:[%s5296_s1 + $0x1d0] sm:$0xff]  }
  0x3f   : > { %476 = vmatmul.mubr.bf16.gmra.mrb[12].mxu0 %v4702_v58  ;;  %3936 = vmatprep.subr.bf16.mxu1 %v4353_v20  ;;  %v4424_v20 = vld [vmem:[%s5296_s1 + $0x110] sm:$0xff]  }
  0x40   : > { %749 = vmatmul.mubr.bf16.gmra.mrb[12].mxu1 %v4706_v59  ;;  %483 = vmatprep.mubr.bf16.mxu0 %v4721_v0 }
  0x41   : > { %756 = vmatprep.mubr.bf16.mxu1 %v4725_v1  ;;  %3873 = vmatpush3.bf16.msra.mxu0 %v4352_v19  ;;  %v5010_v19 = vld [vmem:[%s4614_s22 + $0x144] ss:$8 sps:$4 sm:$0xff]  }
  0x42   : > { %3937 = vmatpush3.bf16.msra.mxu1 %v4354_v21  ;;  %3874 = vmatprep.subr.bf16.mxu0 %v4361_v26  ;;  %v4426_v21 = vld [vmem:[%s5296_s1 + $0x190] sm:$0xff]   ;;  %v4443_v26 = vld [vmem:[%s5296_s1 + $0x160] sm:$0xff]  }
  0x43   : > { %3938 = vmatprep.subr.bf16.mxu1 %v4363_v28  ;;  %v4445_v28 = vld [vmem:[%s5296_s1 + $0x1e0] sm:$0xff]  }
  0x45   : > { %3875 = vmatpush3.bf16.msra.mxu0 %v4362_v27  ;;  %v5038_v27 = vld [vmem:[%s4614_s22 + $0x150] ss:$8 sps:$4 sm:$0xff]  }
  0x46   : > { %3939 = vmatpush3.bf16.msra.mxu1 %v4364_v29  ;;  %3988 = vmatprep.subr.bf16.mxu0 %v4365_v30  ;;  %v5044_v29 = vld [vmem:[%s4614_s22 + $0x140] ss:$8 sps:$4 sm:$0xff]   ;;  %v5047_v30 = vld [vmem:[%s4614_s22 + $0x174] ss:$8 sps:$4 sm:$0xff]  }
  0x47   : > { %484 = vmatmul.mubr.bf16.gmra.mrb[16].mxu0 %v4731_v2  ;;  %4052 = vmatprep.subr.bf16.mxu1 %v4367_v32  ;;  %v4444_v32 = vld [vmem:[%s5296_s1 + $0x120] sm:$0xff]  }
  0x48   : > { %757 = vmatmul.mubr.bf16.gmra.mrb[16].mxu1 %v4737_v4  ;;  %491 = vmatprep.mubr.bf16.mxu0 %v4749_v8 }
  0x49   : > { %764 = vmatprep.mubr.bf16.mxu1 %v4752_v9 }
  0x4f   : > { %492 = vmatmul.mubr.bf16.gmra.mrb[20].mxu0 %v4765_v12 }
  0x50   : > { %765 = vmatmul.mubr.bf16.gmra.mrb[20].mxu1 %v4774_v15  ;;  %499 = vmatprep.mubr.bf16.mxu0 %v4777_v16 }
  0x51   : > { %772 = vmatprep.mubr.bf16.mxu1 %v4780_v17 }
  0x57   : > { %500 = vmatmul.mubr.bf16.gmra.mrb[24].mxu0 %v4799_v22 }
  0x58   : > { %773 = vmatmul.mubr.bf16.gmra.mrb[24].mxu1 %v4802_v23  ;;  %507 = vmatprep.mubr.bf16.mxu0 %v4805_v24 }
  0x59   : > { %780 = vmatprep.mubr.bf16.mxu1 %v4808_v25 }
  0x5f   : > { %508 = vmatmul.mubr.bf16.gmra.mrb[28].mxu0 %v4830_v31 }
  0x60   : > { %781 = vmatmul.mubr.bf16.gmra.mrb[28].mxu1 %v4836_v33  ;;  %1047 = vmatprep.mubr.bf16.mxu0 %v4642_v41  ;;  %v4375_v41 = vld [vmem:[%s5296_s1 + $0x50] sm:$0xff]  }
  0x61   : > { %1386 = vmatprep.mubr.bf16.mxu1 %v4639_v40  ;;  %v4373_v40 = vld [vmem:[%s5296_s1 + $0xd0] sm:$0xff]  }
  0x67   : > { %1048 = vmatmul.mubr.bf16.vlgmr.msra.gmra.mrb[32].mxu0 %v4649_v43  ;;  %v4376_v43 = vld [vmem:[%s5296_s1 + $0x10] sm:$0xff]  }
  0x68   : > { %1387 = vmatmul.mubr.bf16.vlgmr.msra.gmra.mrb[32].mxu1 %v4645_v42  ;;  %3989 = vmatpush3.bf16.msra.mxu0 %v4366_v34  ;;  %v4374_v42 = vld [vmem:[%s5296_s1 + $0x90] sm:$0xff]   ;;  %v4453_v34 = vld [vmem:[%s5296_s1 + $0x168] sm:$0xff]  }
  0x69   : > { %4053 = vmatpush3.bf16.msra.mxu1 %v4368_v35  ;;  %1055 = vmatprep.mubr.bf16.mxu0 %v4670_v49  ;;  %v4383_v49 = vld [vmem:[%s5296_s1 + $0x60] sm:$0xff]   ;;  %v4455_v35 = vld [vmem:[%s5296_s1 + $0x1e8] sm:$0xff]  }
  0x6a   : > { %1394 = vmatprep.mubr.bf16.mxu1 %v4667_v48  ;;  %3990 = vmatprep.subr.bf16.mxu0 %v4369_v36  ;;  %v4381_v48 = vld [vmem:[%s5296_s1 + $0xe0] sm:$0xff]   ;;  %v4454_v36 = vld [vmem:[%s5296_s1 + $0x128] sm:$0xff]  }
  0x6b   : > { %4054 = vmatprep.subr.bf16.mxu1 %v4371_v38  ;;  %v4463_v38 = vld [vmem:[%s5296_s1 + $0x170] sm:$0xff]  }
  0x6c   : > { %3991 = vmatpush3.bf16.msra.mxu0 %v4370_v37  ;;  %v4456_v37 = vld [vmem:[%s5296_s1 + $0x1a8] sm:$0xff]  }
  0x6d   : > { %4055 = vmatpush3.bf16.msra.mxu1 %v4372_v39  ;;  %3992 = vmatprep.subr.bf16.mxu0 %v4373_v40  ;;  %v5078_v39 = vld [vmem:[%s4614_s22 + $0x170] ss:$8 sps:$4 sm:$0xff]  }
  0x6e   : > { %4056 = vmatprep.subr.bf16.mxu1 %v4375_v41  ;;  %v4465_v40 = vld [vmem:[%s5296_s1 + $0x1f0] sm:$0xff]   ;;  %v4432_v41 = vld [vmem:[%s4614_s22 + $0x160] ss:$8 sps:$4 sm:$0xff]  }
  0x6f   : > { %1056 = vmatmul.mubr.bf16.gmra.mrb[36].mxu0 %v4676_v51  ;;  %v4384_v51 = vld [vmem:[%s5296_s1 + $0x20] sm:$0xff]  }
  0x70   : > { %1395 = vmatmul.mubr.bf16.gmra.mrb[36].mxu1 %v4673_v50  ;;  %1063 = vmatprep.mubr.bf16.mxu0 %v4698_v57  ;;  %v4382_v50 = vld [vmem:[%s5296_s1 + $0xa0] sm:$0xff]   ;;  %v4391_v57 = vld [vmem:[%s5296_s1 + $0x70] sm:$0xff]  }
  0x71   : > { %1402 = vmatprep.mubr.bf16.mxu1 %v4694_v56  ;;  %3993 = vmatpush3.bf16.msra.mxu0 %v4374_v42  ;;  %v4389_v56 = vld [vmem:[%s5296_s1 + $0xf0] sm:$0xff]  }
  0x72   : > { %4057 = vmatpush3.bf16.msra.mxu1 %v4376_v43  ;;  %3994 = vmatprep.subr.bf16.mxu0 %v4377_v44  ;;  %v4437_v42 = vld [vmem:[%s4614_s22 + $0x194] ss:$8 sps:$4 sm:$0xff]   ;;  %v4439_v43 = vld [vmem:[%s4614_s22 + $0x184] ss:$8 sps:$4 sm:$0xff]  }
  0x73   : > { %4058 = vmatprep.subr.bf16.mxu1 %v4379_v45  ;;  %v4464_v44 = vld [vmem:[%s5296_s1 + $0x130] sm:$0xff]  }
  0x74   : > { %v4466_v45 = vld [vmem:[%s5296_s1 + $0x1b0] sm:$0xff]  }
  0x75   : > { %3995 = vmatpush3.bf16.msra.mxu0 %v4378_v46  ;;  %v4473_v46 = vld [vmem:[%s5296_s1 + $0x178] sm:$0xff]  }
  0x76   : > { %4059 = vmatpush3.bf16.msra.mxu1 %v4380_v47  ;;  %3996 = vmatprep.subr.bf16.mxu0 %v4381_v48  ;;  %v4475_v47 = vld [vmem:[%s5296_s1 + $0x1f8] sm:$0xff]  }
  0x77   : > { %1064 = vmatmul.mubr.bf16.gmra.mrb[40].mxu0 %v4706_v59  ;;  %4060 = vmatprep.subr.bf16.mxu1 %v4383_v49  ;;  %v4392_v59 = vld [vmem:[%s5296_s1 + $0x30] sm:$0xff]   ;;  %v4474_v48 = vld [vmem:[%s5296_s1 + $0x138] sm:$0xff]  }
  0x78   : > { %1403 = vmatmul.mubr.bf16.gmra.mrb[40].mxu1 %v4702_v58  ;;  %1071 = vmatprep.mubr.bf16.mxu0 %v4725_v1  ;;  %v4390_v58 = vld [vmem:[%s5296_s1 + $0xb0] sm:$0xff]   ;;  %v4405_v1 = vld [vmem:[%s5296_s1 + $0x1c0] sm:$0xff]   ;;  %v4476_v49 = vld [vmem:[%s5296_s1 + $0x1b8] sm:$0xff]  }
  0x79   : > { %1410 = vmatprep.mubr.bf16.mxu1 %v4721_v0  ;;  %3997 = vmatpush3.bf16.msra.mxu0 %v4382_v50  ;;  %v4403_v0 = vld [vmem:[%s5296_s1 + $0x140] sm:$0xff]   ;;  %v4441_v50 = vld [vmem:[%s4614_s22 + $0x190] ss:$8 sps:$4 sm:$0xff]  }
  0x7a   : > { %4061 = vmatpush3.bf16.msra.mxu1 %v4384_v51  ;;  %3998 = vmatprep.subr.bf16.mxu0 %v4385_v52  ;;  %v4442_v51 = vld [vmem:[%s4614_s22 + $0x180] ss:$8 sps:$4 sm:$0xff]   ;;  %v4447_v52 = vld [vmem:[%s4614_s22 + $0x1b4] ss:$8 sps:$4 sm:$0xff]  }
  0x7b   : > { %4062 = vmatprep.subr.bf16.mxu1 %v4387_v53  ;;  %v4449_v53 = vld [vmem:[%s4614_s22 + $0x1a4] ss:$8 sps:$4 sm:$0xff]  }
  0x7d   : > { %3999 = vmatpush3.bf16.msra.mxu0 %v4386_v54  ;;  %v5110_v54 = vld [vmem:[%s4614_s22 + $0x1b0] ss:$8 sps:$4 sm:$0xff]  }
  0x7e   : > { %4063 = vmatpush3.bf16.msra.mxu1 %v4388_v55  ;;  %4000 = vmatprep.subr.bf16.mxu0 %v4389_v56  ;;  %v5113_v55 = vld [vmem:[%s4614_s22 + $0x1a0] ss:$8 sps:$4 sm:$0xff]   ;;  %v5116_v56 = vld [vmem:[%s4614_s22 + $0x1d4] ss:$8 sps:$4 sm:$0xff]  }
  0x7f   : > { %1072 = vmatmul.mubr.bf16.gmra.mrb[44].mxu0 %v4737_v4  ;;  %4064 = vmatprep.subr.bf16.mxu1 %v4391_v57  ;;  %v4397_v4 = vld [vmem:[%s4614_s22 + $0x100] ss:$8 sps:$4 sm:$0xff]   ;;  %v5119_v57 = vld [vmem:[%s4614_s22 + $0x1c4] ss:$8 sps:$4 sm:$0xff]  }
  0x80   : > { %1411 = vmatmul.mubr.bf16.gmra.mrb[44].mxu1 %v4731_v2  ;;  %1079 = vmatprep.mubr.bf16.mxu0 %v4752_v9  ;;  %v4393_v2 = vld [vmem:[%s4614_s22 + $0x104] ss:$8 sps:$4 sm:$0xff]  }
  0x81   : > { %1418 = vmatprep.mubr.bf16.mxu1 %v4749_v8  ;;  %4001 = vmatpush3.bf16.msra.mxu0 %v4390_v58  ;;  %v4975_v8 = vld [vmem:[%s4614_s22 + $0x134] ss:$8 sps:$4 sm:$0xff]   ;;  %v4978_v9 = vld [vmem:[%s4614_s22 + $0x124] ss:$8 sps:$4 sm:$0xff]   ;;  %v5126_v58 = vld [vmem:[%s4614_s22 + $0x1d0] ss:$8 sps:$4 sm:$0xff]  }
  0x82   : > { %4065 = vmatpush3.bf16.msra.mxu1 %v4392_v59  ;;  %4002 = vmatprep.subr.bf16.mxu0 %v4399_v60  ;;  %v5129_v59 = vld [vmem:[%s4614_s22 + $0x1c0] ss:$8 sps:$4 sm:$0xff]   ;;  %v5132_v60 = vld [vmem:[%s4614_s22 + $0x1f4] ss:$8 sps:$4 sm:$0xff]  }
  0x83   : > { %4066 = vmatprep.subr.bf16.mxu1 %v4401_v61  ;;  %v5135_v61 = vld [vmem:[%s4614_s22 + $0x1e4] ss:$8 sps:$4 sm:$0xff]  }
  0x85   : > { %4003 = vmatpush3.bf16.msra.mxu0 %v4400_v62  ;;  %v5142_v62 = vld [vmem:[%s4614_s22 + $0x1f0] ss:$8 sps:$4 sm:$0xff]  }
  0x86   : > { %4067 = vmatpush3.bf16.msra.mxu1 %v4402_v63  ;;  %4116 = vmatprep.subr.bf16.mxu0 %v4403_v0  ;;  %v5145_v63 = vld [vmem:[%s4614_s22 + $0x1e0] ss:$8 sps:$4 sm:$0xff]  }
  0x87   : > { %1080 = vmatmul.mubr.bf16.gmra.mrb[48].mxu0 %v4774_v15  ;;  %4180 = vmatprep.subr.bf16.mxu1 %v4405_v1  ;;  %v4423_v15 = vld [vmem:[%s5296_s1 + $0x150] sm:$0xff]  }
  0x88   : > { %1419 = vmatmul.mubr.bf16.gmra.mrb[48].mxu1 %v4765_v12  ;;  %1087 = vmatprep.mubr.bf16.mxu0 %v4780_v17  ;;  %v4414_v12 = vld [vmem:[%s5296_s1 + $0x108] sm:$0xff]   ;;  %v5004_v17 = vld [vmem:[%s4614_s22 + $0x154] ss:$8 sps:$4 sm:$0xff]  }
  0x89   : > { %1426 = vmatprep.mubr.bf16.mxu1 %v4777_v16  ;;  %v5001_v16 = vld [vmem:[%s4614_s22 + $0x120] ss:$8 sps:$4 sm:$0xff]  }
  0x8f   : > { %1088 = vmatmul.mubr.bf16.gmra.mrb[52].mxu0 %v4802_v23  ;;  %v4435_v23 = vld [vmem:[%s5296_s1 + $0x1d8] sm:$0xff]  }
  0x90   : > { %1427 = vmatmul.mubr.bf16.gmra.mrb[52].mxu1 %v4799_v22  ;;  %1095 = vmatprep.mubr.bf16.mxu0 %v4808_v25  ;;  %v4433_v22 = vld [vmem:[%s5296_s1 + $0x158] sm:$0xff]  }
  0x91   : > { %1434 = vmatprep.mubr.bf16.mxu1 %v4805_v24  ;;  %v4434_v24 = vld [vmem:[%s5296_s1 + $0x118] sm:$0xff]  }
  0x92   : > { %v4436_v25 = vld [vmem:[%s5296_s1 + $0x198] sm:$0xff]  }
  0x97   : > { %1096 = vmatmul.mubr.bf16.gmra.mrb[56].mxu0 %v4836_v33  ;;  %v4446_v33 = vld [vmem:[%s5296_s1 + $0x1a0] sm:$0xff]  }
  0x98   : > { %1435 = vmatmul.mubr.bf16.gmra.mrb[56].mxu1 %v4830_v31  ;;  %1103 = vmatprep.mubr.bf16.mxu0 %v4393_v2  ;;  %v5050_v31 = vld [vmem:[%s4614_s22 + $0x164] ss:$8 sps:$4 sm:$0xff]  }
  0x99   : > { %1442 = vmatprep.mubr.bf16.mxu1 %v4395_v3 }
  0x9f   : > { %1104 = vmatmul.mubr.bf16.gmra.mrb[60].mxu0 %v4397_v4 }
  0xa0   : > { %1443 = vmatmul.mubr.bf16.gmra.mrb[60].mxu1 %v4398_v5  ;;  %1853 = vmatprep.mubr.bf16.mxu0 %v4395_v3 }
  0xa1   : > { %2126 = vmatprep.mubr.bf16.mxu1 %v4393_v2 }
  0xa7   : > { %1854 = vmatmul.mubr.bf16.vlgmr.msra.gmra.mrb[64].mxu0 %v4398_v5 }
  0xa8   : > { %2127 = vmatmul.mubr.bf16.vlgmr.msra.gmra.mrb[64].mxu1 %v4397_v4  ;;  %4117 = vmatpush3.bf16.msra.mxu0 %v4404_v6 }
  0xa9   : > { %4181 = vmatpush3.bf16.msra.mxu1 %v4406_v7  ;;  %1861 = vmatprep.mubr.bf16.mxu0 %v4975_v8 }
  0xaa   : > { %2134 = vmatprep.mubr.bf16.mxu1 %v4978_v9  ;;  %4118 = vmatprep.subr.bf16.mxu0 %v4413_v10 }
  0xab   : > { %4182 = vmatprep.subr.bf16.mxu1 %v4415_v11 }
  0xac   : > { %4119 = vmatpush3.bf16.msra.mxu0 %v4414_v12 }
  0xad   : > { %4183 = vmatpush3.bf16.msra.mxu1 %v4416_v14  ;;  %4120 = vmatprep.subr.bf16.mxu0 %v4423_v15 }
  0xae   : > { %4184 = vmatprep.subr.bf16.mxu1 %v4425_v18 }
  0xaf   : > { %1862 = vmatmul.mubr.bf16.gmra.mrb[68].mxu0 %v4991_v13 }
  0xb0   : > { %2135 = vmatmul.mubr.bf16.gmra.mrb[68].mxu1 %v5001_v16  ;;  %1869 = vmatprep.mubr.bf16.mxu0 %v5004_v17 }
  0xb1   : > { %2142 = vmatprep.mubr.bf16.mxu1 %v5010_v19  ;;  %4121 = vmatpush3.bf16.msra.mxu0 %v4424_v20 }
  0xb2   : > { %4185 = vmatpush3.bf16.msra.mxu1 %v4426_v21  ;;  %4122 = vmatprep.subr.bf16.mxu0 %v4433_v22 }
  0xb3   : > { %4186 = vmatprep.subr.bf16.mxu1 %v4435_v23 }
  0xb5   : > { %4123 = vmatpush3.bf16.msra.mxu0 %v4434_v24 }
  0xb6   : > { %4187 = vmatpush3.bf16.msra.mxu1 %v4436_v25  ;;  %4124 = vmatprep.subr.bf16.mxu0 %v4443_v26 }
  0xb7   : > { %1870 = vmatmul.mubr.bf16.gmra.mrb[72].mxu0 %v5038_v27  ;;  %4188 = vmatprep.subr.bf16.mxu1 %v4445_v28 }
  0xb8   : > { %2143 = vmatmul.mubr.bf16.gmra.mrb[72].mxu1 %v5044_v29  ;;  %1877 = vmatprep.mubr.bf16.mxu0 %v5047_v30 }
  0xb9   : > { %2150 = vmatprep.mubr.bf16.mxu1 %v5050_v31  ;;  %4125 = vmatpush3.bf16.msra.mxu0 %v4444_v32 }
  0xba   : > { %4189 = vmatpush3.bf16.msra.mxu1 %v4446_v33  ;;  %4126 = vmatprep.subr.bf16.mxu0 %v4453_v34 }
  0xbb   : > { %4190 = vmatprep.subr.bf16.mxu1 %v4455_v35 }
  0xbd   : > { %4127 = vmatpush3.bf16.msra.mxu0 %v4454_v36 }
  0xbe   : > { %4191 = vmatpush3.bf16.msra.mxu1 %v4456_v37  ;;  %4128 = vmatprep.subr.bf16.mxu0 %v4463_v38 }
  0xbf   : > { %1878 = vmatmul.mubr.bf16.gmra.mrb[76].mxu0 %v5078_v39  ;;  %4192 = vmatprep.subr.bf16.mxu1 %v4465_v40 }
  0xc0   : > { %2151 = vmatmul.mubr.bf16.gmra.mrb[76].mxu1 %v4432_v41  ;;  %1885 = vmatprep.mubr.bf16.mxu0 %v4437_v42 }
  0xc1   : > { %2158 = vmatprep.mubr.bf16.mxu1 %v4439_v43  ;;  %4129 = vmatpush3.bf16.msra.mxu0 %v4464_v44 }
  0xc2   : > { %4193 = vmatpush3.bf16.msra.mxu1 %v4466_v45  ;;  %4130 = vmatprep.subr.bf16.mxu0 %v4473_v46 }
  0xc3   : > { %4194 = vmatprep.subr.bf16.mxu1 %v4475_v47 }
  0xc5   : > { %4131 = vmatpush3.bf16.msra.mxu0 %v4474_v48  ;;  %v4477_v48 = vld [vmem:[%s4614_s22 + $0x204] ss:$8 sps:$4 sm:$0xff]  }
  0xc6   : > { %4195 = vmatpush3.bf16.msra.mxu1 %v4476_v49 }
  0xc7   : > { %1886 = vmatmul.mubr.bf16.gmra.mrb[80].mxu0 %v4441_v50 }
  0xc8   : > { %2159 = vmatmul.mubr.bf16.gmra.mrb[80].mxu1 %v4442_v51  ;;  %1893 = vmatprep.mubr.bf16.mxu0 %v4447_v52 }
  0xc9   : > { %2166 = vmatprep.mubr.bf16.mxu1 %v4449_v53 }
  0xcf   : > { %1894 = vmatmul.mubr.bf16.gmra.mrb[84].mxu0 %v5110_v54 }
  0xd0   : > { %2167 = vmatmul.mubr.bf16.gmra.mrb[84].mxu1 %v5113_v55  ;;  %1901 = vmatprep.mubr.bf16.mxu0 %v5116_v56 }
  0xd1   : > { %2174 = vmatprep.mubr.bf16.mxu1 %v5119_v57 }
  0xd7   : > { %1902 = vmatmul.mubr.bf16.gmra.mrb[88].mxu0 %v5126_v58 }
  0xd8   : > { %2175 = vmatmul.mubr.bf16.gmra.mrb[88].mxu1 %v5129_v59  ;;  %1909 = vmatprep.mubr.bf16.mxu0 %v5132_v60 }
  0xd9   : > { %2182 = vmatprep.mubr.bf16.mxu1 %v5135_v61 }
  0xdf   : > { %1910 = vmatmul.mubr.bf16.gmra.mrb[92].mxu0 %v5142_v62 }
  0xe0   : > { %2183 = vmatmul.mubr.bf16.gmra.mrb[92].mxu1 %v5145_v63  ;;  %2448 = vmatprep.mubr.bf16.mxu0 %v4978_v9 }
  0xe1   : > { %2786 = vmatprep.mubr.bf16.mxu1 %v4975_v8 }
  0xe7   : > { %2449 = vmatmul.mubr.bf16.vlgmr.msra.gmra.mrb[96].mxu0 %v5001_v16 }
  0xe8   : > { %2787 = vmatmul.mubr.bf16.vlgmr.msra.gmra.mrb[96].mxu1 %v4991_v13  ;;  %2456 = vmatprep.mubr.bf16.mxu0 %v5010_v19 }
  0xe9   : > { %2794 = vmatprep.mubr.bf16.mxu1 %v5004_v17 }
  0xef   : > { %2457 = vmatmul.mubr.bf16.gmra.mrb[100].mxu0 %v5044_v29 }
  0xf0   : > { %2795 = vmatmul.mubr.bf16.gmra.mrb[100].mxu1 %v5038_v27  ;;  %2464 = vmatprep.mubr.bf16.mxu0 %v5050_v31 }
  0xf1   : > { %2802 = vmatprep.mubr.bf16.mxu1 %v5047_v30 }
  0xf7   : > { %2465 = vmatmul.mubr.bf16.gmra.mrb[104].mxu0 %v4432_v41 }
  0xf8   : > { %2803 = vmatmul.mubr.bf16.gmra.mrb[104].mxu1 %v5078_v39  ;;  %2472 = vmatprep.mubr.bf16.mxu0 %v4439_v43 }
  0xf9   : > { %2810 = vmatprep.mubr.bf16.mxu1 %v4437_v42 }
  0xfa   : > { %v3748_v0 = vpop.f32.mrb[0].mxu0 }
  0xfb   : > { %v3812_v1 = vpop.f32.mrb[0].mxu1  ;;  %v3749_v2 = vpop.f32.mrb[1].mxu0 }
  0xfc   : > { %v3750_v3 = vadd.f32 %v3749_v2, %v3748_v0  ;;  %v3813_v4 = vpop.f32.mrb[1].mxu1  ;;  %v3751_v5 = vpop.f32.mrb[2].mxu0 }
  0xfd   : > { %v3814_v6 = vadd.f32 %v3813_v4, %v3812_v1  ;;  %v3815_v7 = vpop.f32.mrb[2].mxu1  ;;  %v3752_v8 = vpop.f32.mrb[3].mxu0 }
  0xfe   : > { %v3753_v9 = vadd.f32 %v3752_v8, %v3751_v5  ;;  %v3816_v10 = vpop.f32.mrb[3].mxu1 }
  0xff   : > { %v5160_v11 = vadd.f32 %v3814_v6, %v3750_v3  ;;  %v3817_v12 = vadd.f32 %v3816_v10, %v3815_v7  ;;  %2473 = vmatmul.mubr.bf16.gmra.mrb[108].mxu0 %v4442_v51  ;;  %v4482_v3 = vld [vmem:[%s4614_s22 + $0x210] ss:$8 sps:$4 sm:$0xff]  }
 0x100   : > { %2811 = vmatmul.mubr.bf16.gmra.mrb[108].mxu1 %v4441_v50  ;;  %2480 = vmatprep.mubr.bf16.mxu0 %v4449_v53 }
 0x101   : > { %v5162_v13 = vadd.f32 %v3817_v12, %v3753_v9  ;;  %2818 = vmatprep.mubr.bf16.mxu1 %v4447_v52  ;;  %v4479_v52 = vld [vmem:[%s4614_s22 + $0x214] ss:$8 sps:$4 sm:$0xff]  }
 0x102   : > { %v3754_v14 = vpop.f32.mrb[4].mxu0 }
 0x103   : > { %v3818_v15 = vpop.f32.mrb[4].mxu1  ;;  %v3755_v16 = vpop.f32.mrb[5].mxu0 }
 0x104   : > { %v3756_v17 = vadd.f32 %v3755_v16, %v3754_v14  ;;  %v3819_v18 = vpop.f32.mrb[5].mxu1  ;;  %v3757_v19 = vpop.f32.mrb[6].mxu0 }
 0x105   : > { %v3820_v20 = vadd.f32 %v3819_v18, %v3818_v15  ;;  %v3821_v21 = vpop.f32.mrb[6].mxu1  ;;  %v3758_v22 = vpop.f32.mrb[7].mxu0 }
 0x106   : > { %v3759_v23 = vadd.f32 %v3758_v22, %v3757_v19  ;;  %v3822_v24 = vpop.f32.mrb[7].mxu1 }
 0x107   : > { %v5164_v25 = vadd.f32 %v3820_v20, %v3756_v17  ;;  %v3823_v26 = vadd.f32 %v3822_v24, %v3821_v21  ;;  %2481 = vmatmul.mubr.bf16.gmra.mrb[112].mxu0 %v5113_v55 }
 0x108   : > { %2819 = vmatmul.mubr.bf16.gmra.mrb[112].mxu1 %v5110_v54  ;;  %2488 = vmatprep.mubr.bf16.mxu0 %v5119_v57 }
 0x109   : > { %v5169_v27 = vadd.f32 %v3823_v26, %v3759_v23  ;;  %2826 = vmatprep.mubr.bf16.mxu1 %v5116_v56 }
 0x10a   : > { %v3760_v28 = vpop.f32.mrb[8].mxu0 }
 0x10b   : > { %v3824_v29 = vpop.f32.mrb[8].mxu1  ;;  %v3761_v30 = vpop.f32.mrb[9].mxu0 }
 0x10c   : > { %v3762_v31 = vadd.f32 %v3761_v30, %v3760_v28  ;;  %v3825_v32 = vpop.f32.mrb[9].mxu1  ;;  %v3763_v33 = vpop.f32.mrb[10].mxu0 }
 0x10d   : > { %v3826_v34 = vadd.f32 %v3825_v32, %v3824_v29  ;;  %v3827_v35 = vpop.f32.mrb[10].mxu1  ;;  %v3764_v36 = vpop.f32.mrb[11].mxu0 }
 0x10e   : > { %v3765_v37 = vadd.f32 %v3764_v36, %v3763_v33  ;;  %v3828_v38 = vpop.f32.mrb[11].mxu1 }
 0x10f   : > { %v5172_v39 = vadd.f32 %v3826_v34, %v3762_v31  ;;  %v3829_v40 = vadd.f32 %v3828_v38, %v3827_v35  ;;  %2489 = vmatmul.mubr.bf16.gmra.mrb[116].mxu0 %v5129_v59 }
 0x110   : > { %2827 = vmatmul.mubr.bf16.gmra.mrb[116].mxu1 %v5126_v58  ;;  %2496 = vmatprep.mubr.bf16.mxu0 %v5135_v61  ;;  %v4481_v61 = vld [vmem:[%s4614_s22 + $0x200] ss:$8 sps:$4 sm:$0xff]   ;;  %s3604_s22 = sshll.u32 %s5299_s10, 7 }
 0x111   : > { %v5177_v41 = vadd.f32 %v3829_v40, %v3765_v37  ;;  %2834 = vmatprep.mubr.bf16.mxu1 %v5132_v60  ;;  %s5212_s20 = scalar_lea.vmem %s5297_s2, %s3604_s22 }
 0x112   : > { %v3766_v42 = vpop.f32.mrb[12].mxu0 }
 0x113   : > { %v3830_v43 = vpop.f32.mrb[12].mxu1  ;;  %v3767_v44 = vpop.f32.mrb[13].mxu0 }
 0x114   : > { %v3768_v45 = vadd.f32 %v3767_v44, %v3766_v42  ;;  %v3831_v46 = vpop.f32.mrb[13].mxu1  ;;  %v3769_v47 = vpop.f32.mrb[14].mxu0 }
 0x115   : > { %v3832_v49 = vadd.f32 %v3831_v46, %v3830_v43  ;;  %v3833_v50 = vpop.f32.mrb[14].mxu1  ;;  %v3770_v51 = vpop.f32.mrb[15].mxu0 }
 0x116   : > { %v3771_v53 = vadd.f32 %v3770_v51, %v3769_v47  ;;  %v3834_v54 = vpop.f32.mrb[15].mxu1 }
 0x117   : > { %v5182_v55 = vadd.f32 %v3832_v49, %v3768_v45  ;;  %v3835_v56 = vadd.f32 %v3834_v54, %v3833_v50  ;;  %2497 = vmatmul.mubr.bf16.gmra.mrb[120].mxu0 %v5145_v63 }
 0x118   : > { %2835 = vmatmul.mubr.bf16.gmra.mrb[120].mxu1 %v5142_v62  ;;  %2504 = vmatprep.mubr.bf16.mxu0 %v4477_v48 }
 0x119   : > { %v5186_v57 = vadd.f32 %v3835_v56, %v3771_v53  ;;  %2842 = vmatprep.mubr.bf16.mxu1 %v4479_v52 }
 0x11a   : > { %v3772_v58 = vpop.f32.mrb[16].mxu0 }
 0x11b   : > { %v3836_v59 = vpop.f32.mrb[16].mxu1  ;;  %v3773_v60 = vpop.f32.mrb[17].mxu0 }
 0x11c   : > { %v3774_v0 = vadd.f32 %v3773_v60, %v3772_v58  ;;  %v3837_v1 = vpop.f32.mrb[17].mxu1  ;;  %v3775_v2 = vpop.f32.mrb[18].mxu0 }
 0x11d   : > { %v3838_v4 = vadd.f32 %v3837_v1, %v3836_v59  ;;  %v3839_v5 = vpop.f32.mrb[18].mxu1  ;;  %v3776_v6 = vpop.f32.mrb[19].mxu0 }
 0x11e   : > { %v3777_v7 = vadd.f32 %v3776_v6, %v3775_v2  ;;  %v3840_v8 = vpop.f32.mrb[19].mxu1 }
 0x11f   : > { %v5190_v63 = vadd.f32 %v3838_v4, %v3774_v0  ;;  %v3841_v62 = vadd.f32 %v3840_v8, %v3839_v5  ;;  %2505 = vmatmul.mubr.bf16.gmra.mrb[124].mxu0 %v4481_v61 }
 0x120   : > { %2843 = vmatmul.mubr.bf16.gmra.mrb[124].mxu1 %v4482_v3 }
 0x121   : > { %v5192_v9 = vadd.f32 %v3841_v62, %v3777_v7 }
 0x122   : > { %v3778_v10 = vpop.f32.mrb[20].mxu0 }
 0x123   : > { %v3842_v12 = vpop.f32.mrb[20].mxu1  ;;  %v3779_v14 = vpop.f32.mrb[21].mxu0 }
 0x124   : > { %v3780_v15 = vadd.f32 %v3779_v14, %v3778_v10  ;;  %v3843_v16 = vpop.f32.mrb[21].mxu1  ;;  %v3781_v17 = vpop.f32.mrb[22].mxu0 }
 0x125   : > { %v3844_v18 = vadd.f32 %v3843_v16, %v3842_v12  ;;  %v3845_v19 = vpop.f32.mrb[22].mxu1  ;;  %v3782_v20 = vpop.f32.mrb[23].mxu0 }
 0x126   : > { %v3783_v21 = vadd.f32 %v3782_v20, %v3781_v17  ;;  %v3846_v22 = vpop.f32.mrb[23].mxu1 }
 0x127   : > { %v5194_v23 = vadd.f32 %v3844_v18, %v3780_v15  ;;  %v3847_v24 = vadd.f32 %v3846_v22, %v3845_v19 }
 0x129   : > { %v5196_v26 = vadd.f32 %v3847_v24, %v3783_v21 }
 0x12a   : > { %v3784_v28 = vpop.f32.mrb[24].mxu0 }
 0x12b   : > { %v3848_v29 = vpop.f32.mrb[24].mxu1  ;;  %v3785_v30 = vpop.f32.mrb[25].mxu0 }
 0x12c   : > { %v3786_v31 = vadd.f32 %v3785_v30, %v3784_v28  ;;  %v3849_v32 = vpop.f32.mrb[25].mxu1  ;;  %v3787_v33 = vpop.f32.mrb[26].mxu0 }
 0x12d   : > { %v3850_v34 = vadd.f32 %v3849_v32, %v3848_v29  ;;  %v3851_v35 = vpop.f32.mrb[26].mxu1  ;;  %v3788_v36 = vpop.f32.mrb[27].mxu0 }
 0x12e   : > { %v3789_v37 = vadd.f32 %v3788_v36, %v3787_v33  ;;  %v3852_v38 = vpop.f32.mrb[27].mxu1 }
 0x12f   : > { %v5198_v40 = vadd.f32 %v3850_v34, %v3786_v31  ;;  %v3853_v42 = vadd.f32 %v3852_v38, %v3851_v35 }
 0x131   : > { %v5200_v43 = vadd.f32 %v3853_v42, %v3789_v37 }
 0x132   : > { %v3790_v44 = vpop.f32.mrb[28].mxu0 }
 0x133   : > { %v3854_v45 = vpop.f32.mrb[28].mxu1  ;;  %v3791_v46 = vpop.f32.mrb[29].mxu0 }
 0x134   : > { %v3792_v47 = vadd.f32 %v3791_v46, %v3790_v44  ;;  %v3855_v48 = vpop.f32.mrb[29].mxu1  ;;  %v3793_v49 = vpop.f32.mrb[30].mxu0 }
 0x135   : > { %v3856_v50 = vadd.f32 %v3855_v48, %v3854_v45  ;;  %v3857_v51 = vpop.f32.mrb[30].mxu1  ;;  %v3794_v52 = vpop.f32.mrb[31].mxu0 }
 0x136   : > { %v3795_v53 = vadd.f32 %v3794_v52, %v3793_v49  ;;  %v3858_v54 = vpop.f32.mrb[31].mxu1 }
 0x137   : > { %v5202_v56 = vadd.f32 %v3856_v50, %v3792_v47  ;;  %v3859_v58 = vadd.f32 %v3858_v54, %v3857_v51 }
 0x139   : > { %v5204_v59 = vadd.f32 %v3859_v58, %v3795_v53 }
 0x13a   : > { %v3876_v60 = vpop.f32.mrb[32].mxu0 }
 0x13b   : > { %v3940_v61 = vpop.f32.mrb[32].mxu1  ;;  %v3877_v0 = vpop.f32.mrb[33].mxu0 }
 0x13c   : > { %v3878_v1 = vadd.f32 %v3877_v0, %v3876_v60  ;;  %v3941_v2 = vpop.f32.mrb[33].mxu1  ;;  %v3879_v3 = vpop.f32.mrb[34].mxu0 }
 0x13d   : > { %v3942_v4 = vadd.f32 %v3941_v2, %v3940_v61  ;;  %v3943_v5 = vpop.f32.mrb[34].mxu1  ;;  %v3880_v6 = vpop.f32.mrb[35].mxu0 }
 0x13e   : > { %v1112_v7 = vadd.f32 %v3878_v1, %v5160_v11  ;;  %v3881_v8 = vadd.f32 %v3880_v6, %v3879_v3  ;;  %v3944_v62 = vpop.f32.mrb[35].mxu1 }
 0x13f   : > { %v3945_v10 = vadd.f32 %v3944_v62, %v3943_v5 }
 0x140   : > { %v1451_v12 = vadd.f32 %v3942_v4, %v1112_v7  ;;  %v1113_v14 = vadd.f32 %v3881_v8, %v5162_v13 }
 0x142   : > { %v1452_v15 = vadd.f32 %v3945_v10, %v1113_v14  ;;  %v3882_v16 = vpop.f32.mrb[36].mxu0 }
 0x143   : > { %v3946_v17 = vpop.f32.mrb[36].mxu1  ;;  %v3883_v18 = vpop.f32.mrb[37].mxu0 }
 0x144   : > { %v3640_v19 = vpack.c.bf16 %v1452_v15, %v1451_v12  ;;  %v3884_v20 = vadd.f32 %v3883_v18, %v3882_v16  ;;  %v3947_v11 = vpop.f32.mrb[37].mxu1  ;;  %v3885_v21 = vpop.f32.mrb[38].mxu0 }
 0x145   : > { %v3948_v22 = vadd.f32 %v3947_v11, %v3946_v17  ;;  %v3949_v24 = vpop.f32.mrb[38].mxu1  ;;  %v3886_v28 = vpop.f32.mrb[39].mxu0 }
 0x146   : > { %3641 = vst [vmem:[%s5212_s20] sm:$0xff] %v3640_v19   ;;  %v1114_v13 = vadd.f32 %v3884_v20, %v5164_v25  ;;  %v3887_v29 = vadd.f32 %v3886_v28, %v3885_v21  ;;  %v3950_v30 = vpop.f32.mrb[39].mxu1 }
 0x147   : > { %v3951_v31 = vadd.f32 %v3950_v30, %v3949_v24 }
 0x148   : > { %v1453_v32 = vadd.f32 %v3948_v22, %v1114_v13  ;;  %v1115_v33 = vadd.f32 %v3887_v29, %v5169_v27 }
 0x14a   : > { %v1454_v34 = vadd.f32 %v3951_v31, %v1115_v33  ;;  %v3888_v35 = vpop.f32.mrb[40].mxu0 }
 0x14b   : > { %v3952_v36 = vpop.f32.mrb[40].mxu1  ;;  %v3889_v37 = vpop.f32.mrb[41].mxu0 }
 0x14c   : > { %v3645_v38 = vpack.c.bf16 %v1454_v34, %v1453_v32  ;;  %v3890_v42 = vadd.f32 %v3889_v37, %v3888_v35  ;;  %v3953_v44 = vpop.f32.mrb[41].mxu1  ;;  %v3891_v45 = vpop.f32.mrb[42].mxu0 }
 0x14d   : > { %v3954_v46 = vadd.f32 %v3953_v44, %v3952_v36  ;;  %v3955_v47 = vpop.f32.mrb[42].mxu1  ;;  %v3892_v48 = vpop.f32.mrb[43].mxu0 }
 0x14e   : > { %3717 = vst [vmem:[%s5212_s20 + $0x8] sm:$0xff] %v3645_v38   ;;  %v1116_v25 = vadd.f32 %v3890_v42, %v5172_v39  ;;  %v3893_v49 = vadd.f32 %v3892_v48, %v3891_v45  ;;  %v3956_v50 = vpop.f32.mrb[43].mxu1 }
 0x14f   : > { %v3957_v51 = vadd.f32 %v3956_v50, %v3955_v47 }
 0x150   : > { %v1455_v52 = vadd.f32 %v3954_v46, %v1116_v25  ;;  %v1117_v27 = vadd.f32 %v3893_v49, %v5177_v41 }
 0x152   : > { %v1456_v53 = vadd.f32 %v3957_v51, %v1117_v27  ;;  %v3894_v54 = vpop.f32.mrb[44].mxu0 }
 0x153   : > { %v3958_v58 = vpop.f32.mrb[44].mxu1  ;;  %v3895_v60 = vpop.f32.mrb[45].mxu0 }
 0x154   : > { %v3650_v61 = vpack.c.bf16 %v1456_v53, %v1455_v52  ;;  %v3896_v0 = vadd.f32 %v3895_v60, %v3894_v54  ;;  %v3959_v1 = vpop.f32.mrb[45].mxu1  ;;  %v3897_v2 = vpop.f32.mrb[46].mxu0 }
 0x155   : > { %v3960_v3 = vadd.f32 %v3959_v1, %v3958_v58  ;;  %v3961_v4 = vpop.f32.mrb[46].mxu1  ;;  %v3898_v5 = vpop.f32.mrb[47].mxu0 }
 0x156   : > { %3718 = vst [vmem:[%s5212_s20 + $0x10] sm:$0xff] %v3650_v61   ;;  %v1118_v39 = vadd.f32 %v3896_v0, %v5182_v55  ;;  %v3899_v6 = vadd.f32 %v3898_v5, %v3897_v2  ;;  %v3962_v7 = vpop.f32.mrb[47].mxu1 }
 0x157   : > { %v3963_v8 = vadd.f32 %v3962_v7, %v3961_v4 }
 0x158   : > { %v1457_v62 = vadd.f32 %v3960_v3, %v1118_v39  ;;  %v1119_v41 = vadd.f32 %v3899_v6, %v5186_v57 }
 0x15a   : > { %v1458_v10 = vadd.f32 %v3963_v8, %v1119_v41  ;;  %v3900_v12 = vpop.f32.mrb[48].mxu0 }
 0x15b   : > { %v3964_v14 = vpop.f32.mrb[48].mxu1  ;;  %v3901_v15 = vpop.f32.mrb[49].mxu0 }
 0x15c   : > { %v3655_v16 = vpack.c.bf16 %v1458_v10, %v1457_v62  ;;  %v3902_v17 = vadd.f32 %v3901_v15, %v3900_v12  ;;  %v3965_v18 = vpop.f32.mrb[49].mxu1  ;;  %v3903_v19 = vpop.f32.mrb[50].mxu0 }
 0x15d   : > { %v3966_v20 = vadd.f32 %v3965_v18, %v3964_v14  ;;  %v3967_v11 = vpop.f32.mrb[50].mxu1  ;;  %v3904_v21 = vpop.f32.mrb[51].mxu0 }
 0x15e   : > { %3719 = vst [vmem:[%s5212_s20 + $0x18] sm:$0xff] %v3655_v16   ;;  %v1120_v55 = vadd.f32 %v3902_v17, %v5190_v63  ;;  %v3905_v22 = vadd.f32 %v3904_v21, %v3903_v19  ;;  %v3968_v24 = vpop.f32.mrb[51].mxu1 }
 0x15f   : > { %v3969_v28 = vadd.f32 %v3968_v24, %v3967_v11 }
 0x160   : > { %v1459_v13 = vadd.f32 %v3966_v20, %v1120_v55  ;;  %v1121_v57 = vadd.f32 %v3905_v22, %v5192_v9 }
 0x162   : > { %v1460_v29 = vadd.f32 %v3969_v28, %v1121_v57  ;;  %v3906_v30 = vpop.f32.mrb[52].mxu0 }
 0x163   : > { %v3970_v31 = vpop.f32.mrb[52].mxu1  ;;  %v3907_v32 = vpop.f32.mrb[53].mxu0 }
 0x164   : > { %v3660_v33 = vpack.c.bf16 %v1460_v29, %v1459_v13  ;;  %v3908_v34 = vadd.f32 %v3907_v32, %v3906_v30  ;;  %v3971_v35 = vpop.f32.mrb[53].mxu1  ;;  %v3909_v36 = vpop.f32.mrb[54].mxu0 }
 0x165   : > { %v3972_v37 = vadd.f32 %v3971_v35, %v3970_v31  ;;  %v3973_v38 = vpop.f32.mrb[54].mxu1  ;;  %v3910_v42 = vpop.f32.mrb[55].mxu0 }
 0x166   : > { %3720 = vst [vmem:[%s5212_s20 + $0x20] sm:$0xff] %v3660_v33   ;;  %v1122_v63 = vadd.f32 %v3908_v34, %v5194_v23  ;;  %v3911_v44 = vadd.f32 %v3910_v42, %v3909_v36  ;;  %v3974_v45 = vpop.f32.mrb[55].mxu1 }
 0x167   : > { %v3975_v46 = vadd.f32 %v3974_v45, %v3973_v38 }
 0x168   : > { %v1461_v47 = vadd.f32 %v3972_v37, %v1122_v63  ;;  %v1123_v9 = vadd.f32 %v3911_v44, %v5196_v26 }
 0x16a   : > { %v1462_v48 = vadd.f32 %v3975_v46, %v1123_v9  ;;  %v3912_v25 = vpop.f32.mrb[56].mxu0 }
 0x16b   : > { %v3976_v49 = vpop.f32.mrb[56].mxu1  ;;  %v3913_v50 = vpop.f32.mrb[57].mxu0 }
 0x16c   : > { %v3665_v51 = vpack.c.bf16 %v1462_v48, %v1461_v47  ;;  %v3914_v52 = vadd.f32 %v3913_v50, %v3912_v25  ;;  %v3977_v27 = vpop.f32.mrb[57].mxu1  ;;  %v3915_v53 = vpop.f32.mrb[58].mxu0 }
 0x16d   : > { %v3978_v54 = vadd.f32 %v3977_v27, %v3976_v49  ;;  %v3979_v58 = vpop.f32.mrb[58].mxu1  ;;  %v3916_v60 = vpop.f32.mrb[59].mxu0 }
 0x16e   : > { %3721 = vst [vmem:[%s5212_s20 + $0x28] sm:$0xff] %v3665_v51   ;;  %v1124_v23 = vadd.f32 %v3914_v52, %v5198_v40  ;;  %v3917_v61 = vadd.f32 %v3916_v60, %v3915_v53  ;;  %v3980_v0 = vpop.f32.mrb[59].mxu1 }
 0x16f   : > { %v3981_v1 = vadd.f32 %v3980_v0, %v3979_v58 }
 0x170   : > { %v1463_v2 = vadd.f32 %v3978_v54, %v1124_v23  ;;  %v1125_v26 = vadd.f32 %v3917_v61, %v5200_v43 }
 0x172   : > { %v1464_v3 = vadd.f32 %v3981_v1, %v1125_v26  ;;  %v3918_v4 = vpop.f32.mrb[60].mxu0 }
 0x173   : > { %v3982_v5 = vpop.f32.mrb[60].mxu1  ;;  %v3919_v39 = vpop.f32.mrb[61].mxu0 }
 0x174   : > { %v3670_v6 = vpack.c.bf16 %v1464_v3, %v1463_v2  ;;  %v3920_v7 = vadd.f32 %v3919_v39, %v3918_v4  ;;  %v3983_v8 = vpop.f32.mrb[61].mxu1  ;;  %v3921_v62 = vpop.f32.mrb[62].mxu0 }
 0x175   : > { %v3984_v41 = vadd.f32 %v3983_v8, %v3982_v5  ;;  %v3985_v10 = vpop.f32.mrb[62].mxu1  ;;  %v3922_v12 = vpop.f32.mrb[63].mxu0 }
 0x176   : > { %3722 = vst [vmem:[%s5212_s20 + $0x30] sm:$0xff] %v3670_v6   ;;  %v1126_v40 = vadd.f32 %v3920_v7, %v5202_v56  ;;  %v3923_v14 = vadd.f32 %v3922_v12, %v3921_v62  ;;  %v3986_v15 = vpop.f32.mrb[63].mxu1 }
 0x177   : > { %v3987_v16 = vadd.f32 %v3986_v15, %v3985_v10 }
 0x178   : > { %v1465_v17 = vadd.f32 %v3984_v41, %v1126_v40  ;;  %v1127_v43 = vadd.f32 %v3923_v14, %v5204_v59 }
 0x17a   : > { %v1466_v18 = vadd.f32 %v3987_v16, %v1127_v43  ;;  %v4004_v19 = vpop.f32.mrb[64].mxu0 }
 0x17b   : > { %v4068_v20 = vpop.f32.mrb[64].mxu1  ;;  %v4005_v11 = vpop.f32.mrb[65].mxu0 }
 0x17c   : > { %v3675_v21 = vpack.c.bf16 %v1466_v18, %v1465_v17  ;;  %v4006_v55 = vadd.f32 %v4005_v11, %v4004_v19  ;;  %v4069_v22 = vpop.f32.mrb[65].mxu1  ;;  %v4007_v24 = vpop.f32.mrb[66].mxu0 }
 0x17d   : > { %v4070_v28 = vadd.f32 %v4069_v22, %v4068_v20  ;;  %v4071_v13 = vpop.f32.mrb[66].mxu1  ;;  %v4008_v57 = vpop.f32.mrb[67].mxu0 }
 0x17e   : > { %3723 = vst [vmem:[%s5212_s20 + $0x38] sm:$0xff] %v3675_v21   ;;  %v4009_v56 = vadd.f32 %v4008_v57, %v4007_v24  ;;  %v4072_v29 = vpop.f32.mrb[67].mxu1 }
 0x17f   : > { %v5236_v30 = vadd.f32 %v4070_v28, %v4006_v55  ;;  %v4073_v31 = vadd.f32 %v4072_v29, %v4071_v13 }
 0x181   : > { %v5238_v32 = vadd.f32 %v4073_v31, %v4009_v56 }
 0x182   : > { %v4010_v59 = vpop.f32.mrb[68].mxu0 }
 0x183   : > { %v4074_v33 = vpop.f32.mrb[68].mxu1  ;;  %v4011_v34 = vpop.f32.mrb[69].mxu0 }
 0x184   : > { %v4012_v35 = vadd.f32 %v4011_v34, %v4010_v59  ;;  %v4075_v36 = vpop.f32.mrb[69].mxu1  ;;  %v4013_v37 = vpop.f32.mrb[70].mxu0 }
 0x185   : > { %v4076_v38 = vadd.f32 %v4075_v36, %v4074_v33  ;;  %v4077_v42 = vpop.f32.mrb[70].mxu1  ;;  %v4014_v63 = vpop.f32.mrb[71].mxu0 }
 0x186   : > { %v4015_v44 = vadd.f32 %v4014_v63, %v4013_v37  ;;  %v4078_v45 = vpop.f32.mrb[71].mxu1 }
 0x187   : > { %v5240_v46 = vadd.f32 %v4076_v38, %v4012_v35  ;;  %v4079_v47 = vadd.f32 %v4078_v45, %v4077_v42 }
 0x189   : > { %v5242_v9 = vadd.f32 %v4079_v47, %v4015_v44 }
 0x18a   : > { %v4016_v48 = vpop.f32.mrb[72].mxu0 }
 0x18b   : > { %v4080_v25 = vpop.f32.mrb[72].mxu1  ;;  %v4017_v49 = vpop.f32.mrb[73].mxu0 }
 0x18c   : > { %v4018_v50 = vadd.f32 %v4017_v49, %v4016_v48  ;;  %v4081_v51 = vpop.f32.mrb[73].mxu1  ;;  %v4019_v52 = vpop.f32.mrb[74].mxu0 }
 0x18d   : > { %v4082_v27 = vadd.f32 %v4081_v51, %v4080_v25  ;;  %v4083_v53 = vpop.f32.mrb[74].mxu1  ;;  %v4020_v54 = vpop.f32.mrb[75].mxu0 }
 0x18e   : > { %v4021_v58 = vadd.f32 %v4020_v54, %v4019_v52  ;;  %v4084_v60 = vpop.f32.mrb[75].mxu1 }
 0x18f   : > { %v5244_v23 = vadd.f32 %v4082_v27, %v4018_v50  ;;  %v4085_v61 = vadd.f32 %v4084_v60, %v4083_v53 }
 0x191   : > { %v5246_v0 = vadd.f32 %v4085_v61, %v4021_v58 }
 0x192   : > { %v4022_v1 = vpop.f32.mrb[76].mxu0 }
 0x193   : > { %v4086_v2 = vpop.f32.mrb[76].mxu1  ;;  %v4023_v26 = vpop.f32.mrb[77].mxu0 }
 0x194   : > { %v4024_v3 = vadd.f32 %v4023_v26, %v4022_v1  ;;  %v4087_v4 = vpop.f32.mrb[77].mxu1  ;;  %v4025_v5 = vpop.f32.mrb[78].mxu0 }
 0x195   : > { %v4088_v39 = vadd.f32 %v4087_v4, %v4086_v2  ;;  %v4089_v6 = vpop.f32.mrb[78].mxu1  ;;  %v4026_v7 = vpop.f32.mrb[79].mxu0 }
 0x196   : > { %v4027_v8 = vadd.f32 %v4026_v7, %v4025_v5  ;;  %v4090_v62 = vpop.f32.mrb[79].mxu1 }
 0x197   : > { %v5248_v41 = vadd.f32 %v4088_v39, %v4024_v3  ;;  %v4091_v10 = vadd.f32 %v4090_v62, %v4089_v6 }
 0x199   : > { %v5250_v12 = vadd.f32 %v4091_v10, %v4027_v8 }
 0x19a   : > { %v4028_v40 = vpop.f32.mrb[80].mxu0 }
 0x19b   : > { %v4092_v14 = vpop.f32.mrb[80].mxu1  ;;  %v4029_v15 = vpop.f32.mrb[81].mxu0 }
 0x19c   : > { %v4030_v16 = vadd.f32 %v4029_v15, %v4028_v40  ;;  %v4093_v17 = vpop.f32.mrb[81].mxu1  ;;  %v4031_v43 = vpop.f32.mrb[82].mxu0 }
 0x19d   : > { %v4094_v18 = vadd.f32 %v4093_v17, %v4092_v14  ;;  %v4095_v19 = vpop.f32.mrb[82].mxu1  ;;  %v4032_v20 = vpop.f32.mrb[83].mxu0 }
 0x19e   : > { %v4033_v11 = vadd.f32 %v4032_v20, %v4031_v43  ;;  %v4096_v21 = vpop.f32.mrb[83].mxu1 }
 0x19f   : > { %v5252_v55 = vadd.f32 %v4094_v18, %v4030_v16  ;;  %v4097_v22 = vadd.f32 %v4096_v21, %v4095_v19 }
 0x1a1   : > { %v5254_v24 = vadd.f32 %v4097_v22, %v4033_v11 }
 0x1a2   : > { %v4034_v28 = vpop.f32.mrb[84].mxu0 }
 0x1a3   : > { %v4098_v13 = vpop.f32.mrb[84].mxu1  ;;  %v4035_v57 = vpop.f32.mrb[85].mxu0 }
 0x1a4   : > { %v4036_v56 = vadd.f32 %v4035_v57, %v4034_v28  ;;  %v4099_v29 = vpop.f32.mrb[85].mxu1  ;;  %v4037_v31 = vpop.f32.mrb[86].mxu0 }
 0x1a5   : > { %v4100_v59 = vadd.f32 %v4099_v29, %v4098_v13  ;;  %v4101_v33 = vpop.f32.mrb[86].mxu1  ;;  %v4038_v34 = vpop.f32.mrb[87].mxu0 }
 0x1a6   : > { %v4039_v35 = vadd.f32 %v4038_v34, %v4037_v31  ;;  %v4102_v36 = vpop.f32.mrb[87].mxu1 }
 0x1a7   : > { %v5256_v37 = vadd.f32 %v4100_v59, %v4036_v56  ;;  %v4103_v38 = vadd.f32 %v4102_v36, %v4101_v33 }
 0x1a9   : > { %v5258_v42 = vadd.f32 %v4103_v38, %v4039_v35 }
 0x1aa   : > { %v4040_v63 = vpop.f32.mrb[88].mxu0 }
 0x1ab   : > { %v4104_v44 = vpop.f32.mrb[88].mxu1  ;;  %v4041_v45 = vpop.f32.mrb[89].mxu0 }
 0x1ac   : > { %v4042_v47 = vadd.f32 %v4041_v45, %v4040_v63  ;;  %v4105_v48 = vpop.f32.mrb[89].mxu1  ;;  %v4043_v25 = vpop.f32.mrb[90].mxu0 }
 0x1ad   : > { %v4106_v49 = vadd.f32 %v4105_v48, %v4104_v44  ;;  %v4107_v50 = vpop.f32.mrb[90].mxu1  ;;  %v4044_v51 = vpop.f32.mrb[91].mxu0 }
 0x1ae   : > { %v4045_v52 = vadd.f32 %v4044_v51, %v4043_v25  ;;  %v4108_v27 = vpop.f32.mrb[91].mxu1 }
 0x1af   : > { %v5260_v53 = vadd.f32 %v4106_v49, %v4042_v47  ;;  %v4109_v54 = vadd.f32 %v4108_v27, %v4107_v50 }
 0x1b1   : > { %v5262_v58 = vadd.f32 %v4109_v54, %v4045_v52 }
 0x1b2   : > { %v4046_v60 = vpop.f32.mrb[92].mxu0 }
 0x1b3   : > { %v4110_v61 = vpop.f32.mrb[92].mxu1  ;;  %v4047_v1 = vpop.f32.mrb[93].mxu0 }
 0x1b4   : > { %v4048_v2 = vadd.f32 %v4047_v1, %v4046_v60  ;;  %v4111_v26 = vpop.f32.mrb[93].mxu1  ;;  %v4049_v3 = vpop.f32.mrb[94].mxu0 }
 0x1b5   : > { %v4112_v4 = vadd.f32 %v4111_v26, %v4110_v61  ;;  %v4113_v5 = vpop.f32.mrb[94].mxu1  ;;  %v4050_v39 = vpop.f32.mrb[95].mxu0 }
 0x1b6   : > { %v4051_v6 = vadd.f32 %v4050_v39, %v4049_v3  ;;  %v4114_v7 = vpop.f32.mrb[95].mxu1 }
 0x1b7   : > { %v5264_v8 = vadd.f32 %v4112_v4, %v4048_v2  ;;  %v4115_v62 = vadd.f32 %v4114_v7, %v4113_v5 }
 0x1b9   : > { %v5266_v10 = vadd.f32 %v4115_v62, %v4051_v6 }
 0x1ba   : > { %v4132_v40 = vpop.f32.mrb[96].mxu0 }
 0x1bb   : > { %v4196_v14 = vpop.f32.mrb[96].mxu1  ;;  %v4133_v15 = vpop.f32.mrb[97].mxu0 }
 0x1bc   : > { %v4134_v16 = vadd.f32 %v4133_v15, %v4132_v40  ;;  %v4197_v17 = vpop.f32.mrb[97].mxu1  ;;  %v4135_v43 = vpop.f32.mrb[98].mxu0 }
 0x1bd   : > { %v4198_v18 = vadd.f32 %v4197_v17, %v4196_v14  ;;  %v4199_v19 = vpop.f32.mrb[98].mxu1  ;;  %v4136_v20 = vpop.f32.mrb[99].mxu0 }
 0x1be   : > { %v2513_v11 = vadd.f32 %v4134_v16, %v5236_v30  ;;  %v4137_v21 = vadd.f32 %v4136_v20, %v4135_v43  ;;  %v4200_v22 = vpop.f32.mrb[99].mxu1 }
 0x1bf   : > { %v4201_v28 = vadd.f32 %v4200_v22, %v4199_v19 }
 0x1c0   : > { %v2851_v13 = vadd.f32 %v4198_v18, %v2513_v11  ;;  %v2514_v57 = vadd.f32 %v4137_v21, %v5238_v32 }
 0x1c2   : > { %v2852_v56 = vadd.f32 %v4201_v28, %v2514_v57  ;;  %v4138_v29 = vpop.f32.mrb[100].mxu0 }
 0x1c3   : > { %v4202_v31 = vpop.f32.mrb[100].mxu1  ;;  %v4139_v59 = vpop.f32.mrb[101].mxu0 }
 0x1c4   : > { %v3680_v33 = vpack.c.bf16 %v2852_v56, %v2851_v13  ;;  %v4140_v34 = vadd.f32 %v4139_v59, %v4138_v29  ;;  %v4203_v35 = vpop.f32.mrb[101].mxu1  ;;  %v4141_v36 = vpop.f32.mrb[102].mxu0 }
 0x1c5   : > { %v4204_v38 = vadd.f32 %v4203_v35, %v4202_v31  ;;  %v4205_v63 = vpop.f32.mrb[102].mxu1  ;;  %v4142_v44 = vpop.f32.mrb[103].mxu0 }
 0x1c6   : > { %3724 = vst [vmem:[%s5212_s20 + $0x40] sm:$0xff] %v3680_v33   ;;  %v2515_v30 = vadd.f32 %v4140_v34, %v5240_v46  ;;  %v4143_v45 = vadd.f32 %v4142_v44, %v4141_v36  ;;  %v4206_v47 = vpop.f32.mrb[103].mxu1 }
 0x1c7   : > { %v4207_v48 = vadd.f32 %v4206_v47, %v4205_v63 }
 0x1c8   : > { %v2853_v25 = vadd.f32 %v4204_v38, %v2515_v30  ;;  %v2516_v32 = vadd.f32 %v4143_v45, %v5242_v9 }
 0x1ca   : > { %v2854_v49 = vadd.f32 %v4207_v48, %v2516_v32  ;;  %v4144_v50 = vpop.f32.mrb[104].mxu0 }
 0x1cb   : > { %v4208_v51 = vpop.f32.mrb[104].mxu1  ;;  %v4145_v52 = vpop.f32.mrb[105].mxu0 }
 0x1cc   : > { %v3685_v27 = vpack.c.bf16 %v2854_v49, %v2853_v25  ;;  %v4146_v54 = vadd.f32 %v4145_v52, %v4144_v50  ;;  %v4209_v60 = vpop.f32.mrb[105].mxu1  ;;  %v4147_v61 = vpop.f32.mrb[106].mxu0 }
 0x1cd   : > { %v4210_v1 = vadd.f32 %v4209_v60, %v4208_v51  ;;  %v4211_v2 = vpop.f32.mrb[106].mxu1  ;;  %v4148_v26 = vpop.f32.mrb[107].mxu0 }
 0x1ce   : > { %3725 = vst [vmem:[%s5212_s20 + $0x48] sm:$0xff] %v3685_v27   ;;  %v2517_v46 = vadd.f32 %v4146_v54, %v5244_v23  ;;  %v4149_v3 = vadd.f32 %v4148_v26, %v4147_v61  ;;  %v4212_v4 = vpop.f32.mrb[107].mxu1 }
 0x1cf   : > { %v4213_v5 = vadd.f32 %v4212_v4, %v4211_v2 }
 0x1d0   : > { %v2855_v39 = vadd.f32 %v4210_v1, %v2517_v46  ;;  %v2518_v9 = vadd.f32 %v4149_v3, %v5246_v0 }
 0x1d2   : > { %v2856_v6 = vadd.f32 %v4213_v5, %v2518_v9  ;;  %v4150_v7 = vpop.f32.mrb[108].mxu0 }
 0x1d3   : > { %v4214_v62 = vpop.f32.mrb[108].mxu1  ;;  %v4151_v40 = vpop.f32.mrb[109].mxu0 }
 0x1d4   : > { %v3690_v14 = vpack.c.bf16 %v2856_v6, %v2855_v39  ;;  %v4152_v15 = vadd.f32 %v4151_v40, %v4150_v7  ;;  %v4215_v16 = vpop.f32.mrb[109].mxu1  ;;  %v4153_v17 = vpop.f32.mrb[110].mxu0 }
 0x1d5   : > { %v4216_v43 = vadd.f32 %v4215_v16, %v4214_v62  ;;  %v4217_v18 = vpop.f32.mrb[110].mxu1  ;;  %v4154_v19 = vpop.f32.mrb[111].mxu0 }
 0x1d6   : > { %3726 = vst [vmem:[%s5212_s20 + $0x50] sm:$0xff] %v3690_v14   ;;  %v2519_v23 = vadd.f32 %v4152_v15, %v5248_v41  ;;  %v4155_v20 = vadd.f32 %v4154_v19, %v4153_v17  ;;  %v4218_v11 = vpop.f32.mrb[111].mxu1 }
 0x1d7   : > { %v4219_v21 = vadd.f32 %v4218_v11, %v4217_v18 }
 0x1d8   : > { %v2857_v22 = vadd.f32 %v4216_v43, %v2519_v23  ;;  %v2520_v0 = vadd.f32 %v4155_v20, %v5250_v12 }
 0x1da   : > { %v2858_v28 = vadd.f32 %v4219_v21, %v2520_v0  ;;  %v4156_v13 = vpop.f32.mrb[112].mxu0 }
 0x1db   : > { %v4220_v57 = vpop.f32.mrb[112].mxu1  ;;  %v4157_v56 = vpop.f32.mrb[113].mxu0 }
 0x1dc   : > { %v3695_v29 = vpack.c.bf16 %v2858_v28, %v2857_v22  ;;  %v4158_v31 = vadd.f32 %v4157_v56, %v4156_v13  ;;  %v4221_v59 = vpop.f32.mrb[113].mxu1  ;;  %v4159_v33 = vpop.f32.mrb[114].mxu0 }
 0x1dd   : > { %v4222_v34 = vadd.f32 %v4221_v59, %v4220_v57  ;;  %v4223_v35 = vpop.f32.mrb[114].mxu1  ;;  %v4160_v36 = vpop.f32.mrb[115].mxu0 }
 0x1de   : > { %3727 = vst [vmem:[%s5212_s20 + $0x58] sm:$0xff] %v3695_v29   ;;  %v2521_v41 = vadd.f32 %v4158_v31, %v5252_v55  ;;  %v4161_v38 = vadd.f32 %v4160_v36, %v4159_v33  ;;  %v4224_v63 = vpop.f32.mrb[115].mxu1 }
 0x1df   : > { %v4225_v44 = vadd.f32 %v4224_v63, %v4223_v35 }
 0x1e0   : > { %v2859_v30 = vadd.f32 %v4222_v34, %v2521_v41  ;;  %v2522_v12 = vadd.f32 %v4161_v38, %v5254_v24 }
 0x1e2   : > { %v2860_v45 = vadd.f32 %v4225_v44, %v2522_v12  ;;  %v4162_v47 = vpop.f32.mrb[116].mxu0 }
 0x1e3   : > { %v4226_v48 = vpop.f32.mrb[116].mxu1  ;;  %v4163_v25 = vpop.f32.mrb[117].mxu0 }
 0x1e4   : > { %v3700_v32 = vpack.c.bf16 %v2860_v45, %v2859_v30  ;;  %v4164_v49 = vadd.f32 %v4163_v25, %v4162_v47  ;;  %v4227_v50 = vpop.f32.mrb[117].mxu1  ;;  %v4165_v51 = vpop.f32.mrb[118].mxu0 }
 0x1e5   : > { %v4228_v52 = vadd.f32 %v4227_v50, %v4226_v48  ;;  %v4229_v27 = vpop.f32.mrb[118].mxu1  ;;  %v4166_v54 = vpop.f32.mrb[119].mxu0 }
 0x1e6   : > { %3728 = vst [vmem:[%s5212_s20 + $0x60] sm:$0xff] %v3700_v32   ;;  %v2523_v55 = vadd.f32 %v4164_v49, %v5256_v37  ;;  %v4167_v60 = vadd.f32 %v4166_v54, %v4165_v51  ;;  %v4230_v61 = vpop.f32.mrb[119].mxu1 }
 0x1e7   : > { %v4231_v1 = vadd.f32 %v4230_v61, %v4229_v27 }
 0x1e8   : > { %v2861_v2 = vadd.f32 %v4228_v52, %v2523_v55  ;;  %v2524_v24 = vadd.f32 %v4167_v60, %v5258_v42 }
 0x1ea   : > { %v2862_v26 = vadd.f32 %v4231_v1, %v2524_v24  ;;  %v4168_v46 = vpop.f32.mrb[120].mxu0 }
 0x1eb   : > { %v4232_v3 = vpop.f32.mrb[120].mxu1  ;;  %v4169_v4 = vpop.f32.mrb[121].mxu0 }
 0x1ec   : > { %v3705_v5 = vpack.c.bf16 %v2862_v26, %v2861_v2  ;;  %v4170_v39 = vadd.f32 %v4169_v4, %v4168_v46  ;;  %v4233_v9 = vpop.f32.mrb[121].mxu1  ;;  %v4171_v6 = vpop.f32.mrb[122].mxu0 }
 0x1ed   : > { %v4234_v7 = vadd.f32 %v4233_v9, %v4232_v3  ;;  %v4235_v62 = vpop.f32.mrb[122].mxu1  ;;  %v4172_v40 = vpop.f32.mrb[123].mxu0 }
 0x1ee   : > { %3729 = vst [vmem:[%s5212_s20 + $0x68] sm:$0xff] %v3705_v5   ;;  %v2525_v37 = vadd.f32 %v4170_v39, %v5260_v53  ;;  %v4173_v14 = vadd.f32 %v4172_v40, %v4171_v6  ;;  %v4236_v15 = vpop.f32.mrb[123].mxu1 }
 0x1ef   : > { %v4237_v16 = vadd.f32 %v4236_v15, %v4235_v62 }
 0x1f0   : > { %v2863_v17 = vadd.f32 %v4234_v7, %v2525_v37  ;;  %v2526_v42 = vadd.f32 %v4173_v14, %v5262_v58 }
 0x1f2   : > { %v2864_v43 = vadd.f32 %v4237_v16, %v2526_v42  ;;  %v4174_v18 = vpop.f32.mrb[124].mxu0 }
 0x1f3   : > { %v4238_v19 = vpop.f32.mrb[124].mxu1  ;;  %v4175_v23 = vpop.f32.mrb[125].mxu0 }
 0x1f4   : > { %v3710_v20 = vpack.c.bf16 %v2864_v43, %v2863_v17  ;;  %v4176_v11 = vadd.f32 %v4175_v23, %v4174_v18  ;;  %v4239_v21 = vpop.f32.mrb[125].mxu1  ;;  %v4177_v22 = vpop.f32.mrb[126].mxu0 }
 0x1f5   : > { %v4240_v0 = vadd.f32 %v4239_v21, %v4238_v19  ;;  %v4241_v28 = vpop.f32.mrb[126].mxu1  ;;  %v4178_v13 = vpop.f32.mrb[127].mxu0 }
 0x1f6   : > { %3730 = vst [vmem:[%s5212_s20 + $0x70] sm:$0xff] %v3710_v20   ;;  %v2527_v53 = vadd.f32 %v4176_v11, %v5264_v8  ;;  %v4179_v57 = vadd.f32 %v4178_v13, %v4177_v22  ;;  %v4242_v56 = vpop.f32.mrb[127].mxu1 }
 0x1f7   : > { %v4243_v29 = vadd.f32 %v4242_v56, %v4241_v28 }
 0x1f8   : > { %v2865_v31 = vadd.f32 %v4240_v0, %v2527_v53  ;;  %v2528_v58 = vadd.f32 %v4179_v57, %v5266_v10 }
 0x1fa   : > { %v2866_v59 = vadd.f32 %v4243_v29, %v2528_v58 }
 0x1fc   : > { %v3715_v33 = vpack.c.bf16 %v2866_v59, %v2865_v31 }
 0x1fe   : > { %3731 = vst [vmem:[%s5212_s20 + $0x78] sm:$0xff] %v3715_v33  }
 0x1ff PF: > { %s12_s9 = sadd.s32 1, %s4489_s9  }
 0x200   : > { %p9_p4 = scmp.ge.s32.totalorder %s12_s9, 4  }
 0x202   :  { %11 = sbr.rel (!%p9_p4) target bundleno = 1 (0x1), region = 68 }

// kernel: discriminator_forward.10
= control target key start
LH: loop header
LB: loop body
LE: loop exit
PB: predicated region body
PF: predicated region fallthrough
CT: control target
= control target key end

     0   :  { %s980_s12 = smov 0   ;;  %s982_s13 = smov 0   ;;  %s1201_s0 = inlined_call_operand.vmem [shape: bf16[128,256], index: 0, kind: input, shape index: {}]   ;;  %s1202_s1 = inlined_call_operand.vmem [shape: f32[1,256], index: 1, kind: input, shape index: {}]   ;;  %s1203_s2 = inlined_call_operand.vmem [shape: f32[1,256], index: 2, kind: input, shape index: {}]   ;;  %s1204_s3 = inlined_call_operand.vmem [shape: bf16[128,256], index: 3, kind: output, shape index: {}]  }
   0x1   :  { %s984_s14 = smov 0  }
   0x2 LB: > { %s996_s15 = sadd.s32 4294967295, %s958_s14   ;;  %s999_s16 = sadd.s32 1, %s958_s14   ;;  %s958_s14 = sphi %s984_s14, %s1208_s14   ;;  %s954_s13 = sphi %s982_s13, %s1207_s13   ;;  %s950_s12 = sphi %s980_s12, %s1206_s12  }
   0x3   : > { %s17_s17 = ssub.s32 %s958_s14, %s999_s16  ;;  %s20_s18 = sadd.s32 1, %s954_s13 }
   0x4   : > { %p18_p0 = scmp.eq.s32.totalorder %s17_s17, 0  ;;  %p27_p1 = scmp.ne.s32.totalorder %s954_s13, %s950_s12 }
   0x5   : > { %p28_p2 = scmp.eq.s32.totalorder %s958_s14, 0  ;;  %p109_p3 = scmp.eq.s32.totalorder %s996_s15, 1 }
   0x6   : > { %s1009_s19 = scalar_select %p18_p0, %s954_s13, %s20_s18  }
   0x7   : > { %p29_p4 = por %p28_p2, %p27_p1  ;;  %p1011_p5 = por %p109_p3, %p27_p1 }
   0x8   : > { %p780_p6 = scmp.ge.s32.totalorder %s958_s14, 2 }
   0xa   : > { %131 = sbr.rel (%p780_p6) target bundleno = 31 (0x1f), region = 16 }
  0x11   : > { %134 = sbr.rel (!%p29_p4) target bundleno = 31 (0x1f), region = 20  ;;  %s136_s21 = sand.u32 (%p29_p4), 1, %s954_s13  }
  0x12   : > { %s782_s22 = sshll.u32 (%p29_p4), %s958_s14, 2  ;;  %s781_s23 = sshll.u32 (%p29_p4), %s136_s21, 6 }
  0x13   : > { %s1021_s26 = scalar_lea.vmem (%p29_p4), %s1201_s0, %s782_s22  ;;  %s138_s27 = scalar_lea.vmem (%p29_p4), [#allocation2], %s781_s23 }
  0x14   : > { %v156_v0 = vld [vmem:[%s1021_s26] sm:$0xf] (%p29_p4)  ;;  %v158_v1 = vld [vmem:[%s1021_s26 + $0x8] sm:$0xf] (%p29_p4)  ;;  %v160_v2 = vld [vmem:[%s1021_s26 + $0x10] sm:$0xf] (%p29_p4) }
  0x15   : > { %157 = vst [vmem:[%s138_s27] sm:$0xf] (%p29_p4), %v156_v0  ;;  %159 = vst [vmem:[%s138_s27 + $0x4] sm:$0xf] (%p29_p4), %v158_v1  ;;  %v162_v3 = vld [vmem:[%s1021_s26 + $0x18] sm:$0xf] (%p29_p4) }
  0x16   : > { %v164_v4 = vld [vmem:[%s1021_s26 + $0x20] sm:$0xf] (%p29_p4)  ;;  %161 = vst [vmem:[%s138_s27 + $0x8] sm:$0xf] (%p29_p4), %v160_v2  ;;  %163 = vst [vmem:[%s138_s27 + $0xc] sm:$0xf] (%p29_p4), %v162_v3 }
  0x17   : > { %165 = vst [vmem:[%s138_s27 + $0x10] sm:$0xf] (%p29_p4), %v164_v4  ;;  %v166_v5 = vld [vmem:[%s1021_s26 + $0x28] sm:$0xf] (%p29_p4)  ;;  %v168_v6 = vld [vmem:[%s1021_s26 + $0x30] sm:$0xf] (%p29_p4) }
  0x18   : > { %v170_v7 = vld [vmem:[%s1021_s26 + $0x38] sm:$0xf]  ;;  %167 = vst [vmem:[%s138_s27 + $0x14] sm:$0xf] %v166_v5  ;;  %169 = vst [vmem:[%s138_s27 + $0x18] sm:$0xf] %v168_v6 }
  0x19   : > { %171 = vst [vmem:[%s138_s27 + $0x1c] sm:$0xf] %v170_v7  ;;  %v172_v8 = vld [vmem:[%s1021_s26 + $0x40] sm:$0xf]  ;;  %v174_v9 = vld [vmem:[%s1021_s26 + $0x48] sm:$0xf] }
  0x1a   : > { %v176_v10 = vld [vmem:[%s1021_s26 + $0x50] sm:$0xf]  ;;  %173 = vst [vmem:[%s138_s27 + $0x20] sm:$0xf] %v172_v8  ;;  %175 = vst [vmem:[%s138_s27 + $0x24] sm:$0xf] %v174_v9 }
  0x1b   : > { %177 = vst [vmem:[%s138_s27 + $0x28] sm:$0xf] %v176_v10  ;;  %v178_v11 = vld [vmem:[%s1021_s26 + $0x58] sm:$0xf]  ;;  %v180_v12 = vld [vmem:[%s1021_s26 + $0x60] sm:$0xf] }
  0x1c   : > { %v182_v13 = vld [vmem:[%s1021_s26 + $0x68] sm:$0xf]  ;;  %179 = vst [vmem:[%s138_s27 + $0x2c] sm:$0xf] %v178_v11  ;;  %181 = vst [vmem:[%s138_s27 + $0x30] sm:$0xf] %v180_v12 }
  0x1d   : > { %183 = vst [vmem:[%s138_s27 + $0x34] sm:$0xf] %v182_v13  ;;  %v184_v14 = vld [vmem:[%s1021_s26 + $0x70] sm:$0xf]  ;;  %v186_v15 = vld [vmem:[%s1021_s26 + $0x78] sm:$0xf] }
  0x1e   : > { %185 = vst [vmem:[%s138_s27 + $0x38] sm:$0xf] %v184_v14  ;;  %187 = vst [vmem:[%s138_s27 + $0x3c] sm:$0xf] %v186_v15 }
  0x1f PF: > { %p783_p7 = scmp.ge.s32.totalorder %s958_s14, 1  ;;  %p253_p8 = scmp.lt.s32.totalorder %s958_s14, 3 }
  0x21   : > { %p254_p9 = pnand %p783_p7, %p253_p8 }
  0x22   : > { %s260_s28 = sand.u32 (!%p254_p9), 1, %s950_s12   ;;  %p288_p10 = scmp.lt.s32.totalorder (!%p254_p9), %s996_s15, 1 }
  0x23   : > { %257 = sbr.rel (%p254_p9) target bundleno = 185 (0xb9), region = 69  ;;  %s1042_s29 = sshll.u32 (!%p254_p9), %s260_s28, 6 }
  0x24   : > { %s1045_s30 = scalar_lea.vmem (!%p254_p9), [#allocation2], %s1042_s29  ;;  %s1126_s11 = scalar_lea.vmem (!%p254_p9), [#allocation3], %s1042_s29 }
  0x25   : > { %v825_v16 = vld [vmem:[%s1045_s30] sm:$0xff] (!%p254_p9)   ;;  %v896_v17 = vld [vmem:[%s1045_s30 + $0x8] sm:$0xff] (!%p254_p9)   ;;  %v897_v21 = vld [vmem:[%s1045_s30 + $0x10] sm:$0xff] (!%p254_p9)  }
  0x26   : > { %v826_v18 = vunpack.c.l.bf16 (!%p254_p9), %v825_v16  ;;  %v827_v19 = vunpack.c.h.bf16 (!%p254_p9), %v825_v16  ;;  %v830_v20 = vunpack.c.l.bf16 (!%p254_p9), %v896_v17  ;;  %v831_v22 = vunpack.c.h.bf16 (!%p254_p9), %v896_v17  ;;  %v898_v26 = vld [vmem:[%s1045_s30 + $0x18] sm:$0xff] (!%p254_p9)   ;;  %v899_v31 = vld [vmem:[%s1045_s30 + $0x20] sm:$0xff] (!%p254_p9)   ;;  %v900_v36 = vld [vmem:[%s1045_s30 + $0x28] sm:$0xff] (!%p254_p9)  }
  0x27   : > { %v834_v24 = vunpack.c.l.bf16 (!%p254_p9), %v897_v21  ;;  %v835_v27 = vunpack.c.h.bf16 (!%p254_p9), %v897_v21  ;;  %v838_v29 = vunpack.c.l.bf16 (!%p254_p9), %v898_v26  ;;  %v839_v32 = vunpack.c.h.bf16 (!%p254_p9), %v898_v26  ;;  %v901_v41 = vld [vmem:[%s1045_s30 + $0x30] sm:$0xff] (!%p254_p9)   ;;  %v902_v46 = vld [vmem:[%s1045_s30 + $0x38] sm:$0xff] (!%p254_p9)  }
  0x28   : > { %v326_v23 = vadd.f32 (!%p254_p9), %v827_v19, %v826_v18  ;;  %v842_v34 = vunpack.c.l.bf16 (!%p254_p9), %v899_v31  ;;  %v843_v37 = vunpack.c.h.bf16 (!%p254_p9), %v899_v31  ;;  %v846_v39 = vunpack.c.l.bf16 (!%p254_p9), %v900_v36 }
  0x29   : > { %v847_v42 = vunpack.c.h.bf16 (!%p254_p9), %v900_v36  ;;  %v850_v44 = vunpack.c.l.bf16 (!%p254_p9), %v901_v41  ;;  %v851_v47 = vunpack.c.h.bf16 (!%p254_p9), %v901_v41  ;;  %v854_v49 = vunpack.c.l.bf16 (!%p254_p9), %v902_v46 }
  0x2a   : > { %v327_v25 = vadd.f32 %v830_v20, %v326_v23  ;;  %v855_v51 = vunpack.c.h.bf16 %v902_v46  ;;  %s289_s4 = scalar_select %p288_p10, %s996_s15, 1 }
  0x2b   : > { %s805_s12 = sshll.u32 (%p1011_p5), %s996_s15, 2 }
  0x2c   : > { %v328_v28 = vadd.f32 %v831_v22, %v327_v25  ;;  %s290_s7 = scalar_lea.vmem %s1202_s1, %s289_s4  ;;  %s293_s10 = scalar_lea.vmem %s1203_s2, %s289_s4 }
  0x2d   : > { %s603_s18 = scalar_lea.vmem (%p1011_p5), %s1204_s3, %s805_s12 }
  0x2e   : > { %v329_v30 = vadd.f32 %v834_v24, %v328_v28 }
  0x30   : > { %v330_v33 = vadd.f32 %v835_v27, %v329_v30 }
  0x32   : > { %v331_v35 = vadd.f32 %v838_v29, %v330_v33 }
  0x34   : > { %v332_v38 = vadd.f32 %v839_v32, %v331_v35 }
  0x36   : > { %v333_v40 = vadd.f32 %v842_v34, %v332_v38 }
  0x38   : > { %v334_v43 = vadd.f32 %v843_v37, %v333_v40 }
  0x3a   : > { %v335_v45 = vadd.f32 %v846_v39, %v334_v43 }
  0x3c   : > { %v336_v48 = vadd.f32 %v847_v42, %v335_v45 }
  0x3e   : > { %v337_v50 = vadd.f32 %v850_v44, %v336_v48 }
  0x40   : > { %v338_v52 = vadd.f32 %v851_v47, %v337_v50 }
  0x42   : > { %v339_v53 = vadd.f32 %v854_v49, %v338_v52 }
  0x44   : > { %v340_v54 = vadd.f32 %v855_v51, %v339_v53 }
  0x46   : > { %v341_v55 = vrot.slane %v340_v54, 4 }
  0x48   : > { %v342_v56 = vadd.f32 %v341_v55, %v340_v54  ;;  %v1097_v54 = vld [vmem:[%s290_s7] ss:$0 sm:$0xff] }
  0x4a   : > { %v343_v57 = vrot.slane %v342_v56, 2 }
  0x4c   : > { %v344_v58 = vadd.f32 %v343_v57, %v342_v56 }
  0x4e   : > { %v345_v59 = vrot.slane %v344_v58, 1 }
  0x50   : > { %v346_v60 = vadd.f32 %v345_v59, %v344_v58  ;;  %v1103_v59 = vld [vmem:[%s293_s10] ss:$0 sm:$0xff] }
  0x52   : > { %v348_v61 = vmul.f32 0.0078125, %v346_v60 }
  0x54   : > { %v349_v62 = vsub.f32 %v826_v18, %v348_v61  ;;  %v350_v63 = vsub.f32 %v827_v19, %v348_v61  ;;  %v351_v0 = vsub.f32 %v830_v20, %v348_v61  ;;  %v352_v1 = vsub.f32 %v831_v22, %v348_v61 }
  0x55   : > { %v353_v4 = vsub.f32 %v834_v24, %v348_v61  ;;  %v354_v6 = vsub.f32 %v835_v27, %v348_v61  ;;  %v355_v9 = vsub.f32 %v838_v29, %v348_v61  ;;  %v356_v12 = vsub.f32 %v839_v32, %v348_v61 }
  0x56   : > { %v365_v2 = vmul.f32 %v349_v62, %v349_v62  ;;  %v366_v3 = vmul.f32 %v350_v63, %v350_v63  ;;  %v367_v5 = vmul.f32 %v351_v0, %v351_v0  ;;  %v368_v7 = vmul.f32 %v352_v1, %v352_v1 }
  0x57   : > { %v369_v10 = vmul.f32 %v353_v4, %v353_v4  ;;  %v370_v13 = vmul.f32 %v354_v6, %v354_v6  ;;  %v1055_v15 = vsub.f32 %v842_v34, %v348_v61  ;;  %v371_v16 = vmul.f32 %v355_v9, %v355_v9 }
  0x58   : > { %v381_v8 = vadd.f32 %v366_v3, %v365_v2  ;;  %v1057_v18 = vsub.f32 %v843_v37, %v348_v61  ;;  %v372_v19 = vmul.f32 %v356_v12, %v356_v12  ;;  %v1059_v21 = vsub.f32 %v846_v39, %v348_v61 }
  0x59   : > { %v373_v22 = vmul.f32 %v1055_v15, %v1055_v15  ;;  %v1063_v24 = vsub.f32 %v847_v42, %v348_v61  ;;  %v1067_v27 = vsub.f32 %v850_v44, %v348_v61  ;;  %v1071_v30 = vsub.f32 %v851_v47, %v348_v61 }
  0x5a   : > { %v382_v11 = vadd.f32 %v381_v8, %v367_v5  ;;  %v374_v25 = vmul.f32 %v1057_v18, %v1057_v18  ;;  %v375_v28 = vmul.f32 %v1059_v21, %v1059_v21  ;;  %v1075_v33 = vsub.f32 %v854_v49, %v348_v61 }
  0x5b   : > { %v376_v31 = vmul.f32 %v1063_v24, %v1063_v24  ;;  %v377_v34 = vmul.f32 %v1067_v27, %v1067_v27  ;;  %v1079_v36 = vsub.f32 %v855_v51, %v348_v61  ;;  %v378_v37 = vmul.f32 %v1071_v30, %v1071_v30 }
  0x5c   : > { %v383_v14 = vadd.f32 %v382_v11, %v368_v7  ;;  %v379_v39 = vmul.f32 %v1075_v33, %v1075_v33 }
  0x5d   : > { %v380_v41 = vmul.f32 %v1079_v36, %v1079_v36 }
  0x5e   : > { %v384_v17 = vadd.f32 %v383_v14, %v369_v10 }
  0x60   : > { %v385_v20 = vadd.f32 %v384_v17, %v370_v13 }
  0x62   : > { %v386_v23 = vadd.f32 %v385_v20, %v371_v16 }
  0x64   : > { %v387_v26 = vadd.f32 %v386_v23, %v372_v19 }
  0x66   : > { %v388_v29 = vadd.f32 %v387_v26, %v373_v22 }
  0x68   : > { %v389_v32 = vadd.f32 %v388_v29, %v374_v25 }
  0x6a   : > { %v390_v35 = vadd.f32 %v389_v32, %v375_v28 }
  0x6c   : > { %v391_v38 = vadd.f32 %v390_v35, %v376_v31 }
  0x6e   : > { %v392_v40 = vadd.f32 %v391_v38, %v377_v34 }
  0x70   : > { %v393_v42 = vadd.f32 %v392_v40, %v378_v37 }
  0x72   : > { %v394_v43 = vadd.f32 %v393_v42, %v379_v39 }
  0x74   : > { %v395_v44 = vadd.f32 %v394_v43, %v380_v41 }
  0x76   : > { %v396_v45 = vrot.slane %v395_v44, 4 }
  0x78   : > { %v397_v46 = vadd.f32 %v396_v45, %v395_v44 }
  0x7a   : > { %v398_v47 = vrot.slane %v397_v46, 2 }
  0x7c   : > { %v399_v48 = vadd.f32 %v398_v47, %v397_v46 }
  0x7e   : > { %v400_v49 = vrot.slane %v399_v48, 1 }
  0x80   : > { %v401_v50 = vadd.f32 %v400_v49, %v399_v48 }
  0x82   : > { %v402_v51 = vmul.f32 0.0078125, %v401_v50 }
  0x84   : > { %v403_v52 = vadd.f32 1e-05, %v402_v51 }
  0x86   : > { %934 = vrsqrt.f32 %v403_v52 }
  0x90   : > { %v1095_v53 = vpop.eup %934 }
  0x91   : > { %v405_v55 = vmul.f32 %v1095_v53, %v349_v62  ;;  %v406_v56 = vmul.f32 %v1095_v53, %v350_v63  ;;  %v407_v57 = vmul.f32 %v1095_v53, %v351_v0  ;;  %v408_v58 = vmul.f32 %v1095_v53, %v352_v1 }
  0x92   : > { %v409_v60 = vmul.f32 %v1095_v53, %v353_v4  ;;  %v410_v61 = vmul.f32 %v1095_v53, %v354_v6  ;;  %v411_v2 = vmul.f32 %v1095_v53, %v355_v9  ;;  %v412_v3 = vmul.f32 %v1095_v53, %v356_v12 }
  0x93   : > { %v428_v5 = vmul.f32 %v1097_v54, %v405_v55  ;;  %v429_v62 = vmul.f32 %v1097_v54, %v406_v56  ;;  %v430_v63 = vmul.f32 %v1097_v54, %v407_v57  ;;  %v431_v0 = vmul.f32 %v1097_v54, %v408_v58 }
  0x94   : > { %v432_v1 = vmul.f32 %v1097_v54, %v409_v60  ;;  %v433_v7 = vmul.f32 %v1097_v54, %v410_v61  ;;  %v434_v4 = vmul.f32 %v1097_v54, %v411_v2  ;;  %v435_v6 = vmul.f32 %v1097_v54, %v412_v3 }
  0x95   : > { %v451_v8 = vadd.f32 %v1103_v59, %v428_v5  ;;  %v452_v9 = vadd.f32 %v1103_v59, %v429_v62  ;;  %v453_v10 = vadd.f32 %v1103_v59, %v430_v63  ;;  %v454_v11 = vadd.f32 %v1103_v59, %v431_v0 }
  0x96   : > { %v455_v12 = vadd.f32 %v1103_v59, %v432_v1  ;;  %v456_v13 = vadd.f32 %v1103_v59, %v433_v7  ;;  %v457_v14 = vadd.f32 %v1103_v59, %v434_v4  ;;  %v458_v16 = vadd.f32 %v1103_v59, %v435_v6 }
  0x97   : > { %vm467_vm0 = vcmp.gt.f32.partialorder %v451_v8, 0.0  ;;  %vm468_vm1 = vcmp.gt.f32.partialorder %v452_v9, 0.0  ;;  %v483_v17 = vmul.f32 0.2, %v451_v8  ;;  %v484_v19 = vmul.f32 0.2, %v452_v9 }
  0x98   : > { %vm469_vm2 = vcmp.gt.f32.partialorder %v453_v10, 0.0  ;;  %vm470_vm3 = vcmp.gt.f32.partialorder %v454_v11, 0.0  ;;  %v485_v20 = vmul.f32 0.2, %v453_v10  ;;  %v486_v22 = vmul.f32 0.2, %v454_v11 }
  0x99   : > { %v499_v23 = vsel %vm467_vm0, %v451_v8, %v483_v17  ;;  %v500_v25 = vsel %vm468_vm1, %v452_v9, %v484_v19  ;;  %vm471_vm4 = vcmp.gt.f32.partialorder %v455_v12, 0.0  ;;  %vm472_vm5 = vcmp.gt.f32.partialorder %v456_v13, 0.0 }
  0x9a   : > { %v859_v26 = vpack.c.bf16 %v500_v25, %v499_v23  ;;  %v501_v28 = vsel %vm469_vm2, %v453_v10, %v485_v20  ;;  %v502_v29 = vsel %vm470_vm3, %v454_v11, %v486_v22  ;;  %v487_v31 = vmul.f32 0.2, %v455_v12 }
  0x9b   : > { %v864_v32 = vpack.c.bf16 %v502_v29, %v501_v28  ;;  %v488_v34 = vmul.f32 0.2, %v456_v13  ;;  %vm473_vm6 = vcmp.gt.f32.partialorder %v457_v14, 0.0  ;;  %vm474_vm7 = vcmp.gt.f32.partialorder %v458_v16, 0.0 }
  0x9c   : > { %860 = vst [vmem:[%s1126_s11] sm:$0xff] %v859_v26   ;;  %v503_v35 = vsel %vm471_vm4, %v455_v12, %v487_v31  ;;  %v489_v37 = vmul.f32 0.2, %v457_v14  ;;  %v490_v38 = vmul.f32 0.2, %v458_v16  ;;  %v413_v39 = vmul.f32 %v1095_v53, %v1055_v15 }
  0x9d   : > { %903 = vst [vmem:[%s1126_s11 + $0x8] sm:$0xff] %v864_v32   ;;  %v504_v40 = vsel %vm472_vm5, %v456_v13, %v488_v34  ;;  %v414_v41 = vmul.f32 %v1095_v53, %v1057_v18  ;;  %v415_v42 = vmul.f32 %v1095_v53, %v1059_v21  ;;  %v416_v43 = vmul.f32 %v1095_v53, %v1063_v24 }
  0x9e   : > { %v869_v44 = vpack.c.bf16 %v504_v40, %v503_v35  ;;  %v505_v45 = vsel %vm473_vm6, %v457_v14, %v489_v37  ;;  %v506_v46 = vsel %vm474_vm7, %v458_v16, %v490_v38  ;;  %v436_v47 = vmul.f32 %v1097_v54, %v413_v39 }
  0x9f   : > { %v874_v48 = vpack.c.bf16 %v506_v46, %v505_v45  ;;  %v437_v15 = vmul.f32 %v1097_v54, %v414_v41  ;;  %v438_v49 = vmul.f32 %v1097_v54, %v415_v42  ;;  %v439_v50 = vmul.f32 %v1097_v54, %v416_v43 }
  0xa0   : > { %904 = vst [vmem:[%s1126_s11 + $0x10] sm:$0xff] %v869_v44   ;;  %v459_v18 = vadd.f32 %v1103_v59, %v436_v47  ;;  %v417_v21 = vmul.f32 %v1095_v53, %v1067_v27  ;;  %v418_v24 = vmul.f32 %v1095_v53, %v1071_v30  ;;  %v419_v51 = vmul.f32 %v1095_v53, %v1075_v33 }
  0xa1   : > { %905 = vst [vmem:[%s1126_s11 + $0x18] sm:$0xff] %v874_v48   ;;  %v460_v52 = vadd.f32 %v1103_v59, %v437_v15  ;;  %v461_v55 = vadd.f32 %v1103_v59, %v438_v49  ;;  %v462_v56 = vadd.f32 %v1103_v59, %v439_v50  ;;  %v420_v57 = vmul.f32 %v1095_v53, %v1079_v36 }
  0xa2   : > { %vm475_vm8 = vcmp.gt.f32.partialorder %v459_v18, 0.0  ;;  %v491_v58 = vmul.f32 0.2, %v459_v18  ;;  %v440_v27 = vmul.f32 %v1097_v54, %v417_v21  ;;  %v441_v60 = vmul.f32 %v1097_v54, %v418_v24 }
  0xa3   : > { %vm476_vm9 = vcmp.gt.f32.partialorder %v460_v52, 0.0  ;;  %v492_v30 = vmul.f32 0.2, %v460_v52  ;;  %vm477_vm10 = vcmp.gt.f32.partialorder %v461_v55, 0.0  ;;  %vm478_vm11 = vcmp.gt.f32.partialorder %v462_v56, 0.0 }
  0xa4   : > { %v507_v33 = vsel %vm475_vm8, %v459_v18, %v491_v58  ;;  %v493_v61 = vmul.f32 0.2, %v461_v55  ;;  %v494_v2 = vmul.f32 0.2, %v462_v56  ;;  %v463_v3 = vadd.f32 %v1103_v59, %v440_v27  ;;  %v621_v19 = vld [vmem:[%s1126_s11 + $0x4] sm:$0xf] (%p1011_p5) }
  0xa5   : > { %v508_v5 = vsel %vm476_vm9, %v460_v52, %v492_v30  ;;  %v464_v36 = vadd.f32 %v1103_v59, %v441_v60  ;;  %v442_v53 = vmul.f32 %v1097_v54, %v419_v51  ;;  %v443_v62 = vmul.f32 %v1097_v54, %v420_v57  ;;  %v623_v20 = vld [vmem:[%s1126_s11 + $0x8] sm:$0xf] (%p1011_p5)  ;;  %v625_v22 = vld [vmem:[%s1126_s11 + $0xc] sm:$0xf] (%p1011_p5)  ;;  %622 = vst [vmem:[%s603_s18 + $0x8] sm:$0xf] (%p1011_p5), %v621_v19 }
  0xa6   : > { %v879_v63 = vpack.c.bf16 %v508_v5, %v507_v33  ;;  %v509_v0 = vsel %vm477_vm10, %v461_v55, %v493_v61  ;;  %v510_v1 = vsel %vm478_vm11, %v462_v56, %v494_v2  ;;  %vm479_vm12 = vcmp.gt.f32.partialorder %v463_v3, 0.0  ;;  %624 = vst [vmem:[%s603_s18 + $0x10] sm:$0xf] (%p1011_p5), %v623_v20  ;;  %626 = vst [vmem:[%s603_s18 + $0x18] sm:$0xf] (%p1011_p5), %v625_v22 }
  0xa7   : > { %v884_v7 = vpack.c.bf16 %v510_v1, %v509_v0  ;;  %vm480_vm13 = vcmp.gt.f32.partialorder %v464_v36, 0.0  ;;  %v495_v4 = vmul.f32 0.2, %v463_v3  ;;  %v496_v6 = vmul.f32 0.2, %v464_v36 }
  0xa8   : > { %906 = vst [vmem:[%s1126_s11 + $0x20] sm:$0xff] %v879_v63   ;;  %v465_v8 = vadd.f32 %v1103_v59, %v442_v53  ;;  %v466_v9 = vadd.f32 %v1103_v59, %v443_v62  ;;  %v619_v59 = vld [vmem:[%s1126_s11] sm:$0xf] (%p1011_p5)  ;;  %v627_v23 = vld [vmem:[%s1126_s11 + $0x10] sm:$0xf] (%p1011_p5) }
  0xa9   : > { %907 = vst [vmem:[%s1126_s11 + $0x28] sm:$0xff] %v884_v7   ;;  %v511_v10 = vsel %vm479_vm12, %v463_v3, %v495_v4  ;;  %v512_v11 = vsel %vm480_vm13, %v464_v36, %v496_v6  ;;  %620 = vst [vmem:[%s603_s18] sm:$0xf] (%p1011_p5), %v619_v59  ;;  %v629_v25 = vld [vmem:[%s1126_s11 + $0x14] sm:$0xf] (%p1011_p5)  ;;  %v631_v26 = vld [vmem:[%s1126_s11 + $0x18] sm:$0xf] (%p1011_p5) }
  0xaa   : > { %v889_v12 = vpack.c.bf16 %v512_v11, %v511_v10  ;;  %vm481_vm14 = vcmp.gt.f32.partialorder %v465_v8, 0.0  ;;  %vm482_vm15 = vcmp.gt.f32.partialorder %v466_v9, 0.0  ;;  %v497_v54 = vmul.f32 0.2, %v465_v8  ;;  %601 = sbr.rel (!%p1011_p5) target bundleno = 185 (0xb9), region = 77 }
  0xab   : > { %v498_v13 = vmul.f32 0.2, %v466_v9  ;;  %628 = vst [vmem:[%s603_s18 + $0x20] sm:$0xf] (%p1011_p5), %v627_v23  ;;  %v633_v28 = vld [vmem:[%s1126_s11 + $0x1c] sm:$0xf] (%p1011_p5) }
  0xac   : > { %908 = vst [vmem:[%s1126_s11 + $0x30] sm:$0xff] %v889_v12   ;;  %v513_v14 = vsel %vm481_vm14, %v465_v8, %v497_v54  ;;  %630 = vst [vmem:[%s603_s18 + $0x28] sm:$0xf] (%p1011_p5), %v629_v25 }
  0xad   : > { %v514_v16 = vsel %vm482_vm15, %v466_v9, %v498_v13  ;;  %632 = vst [vmem:[%s603_s18 + $0x30] sm:$0xf] (%p1011_p5), %v631_v26  ;;  %634 = vst [vmem:[%s603_s18 + $0x38] sm:$0xf] (%p1011_p5), %v633_v28 }
  0xae   : > { %v894_v17 = vpack.c.bf16 %v514_v16, %v513_v14 }
  0xaf   : > { %v635_v29 = vld [vmem:[%s1126_s11 + $0x20] sm:$0xf] (%p1011_p5)  ;;  %v637_v31 = vld [vmem:[%s1126_s11 + $0x24] sm:$0xf] (%p1011_p5) }
  0xb0   : > { %909 = vst [vmem:[%s1126_s11 + $0x38] sm:$0xff] %v894_v17   ;;  %v639_v32 = vld [vmem:[%s1126_s11 + $0x28] sm:$0xf] (%p1011_p5)  ;;  %636 = vst [vmem:[%s603_s18 + $0x40] sm:$0xf] (%p1011_p5), %v635_v29 }
  0xb1   : > { %638 = vst [vmem:[%s603_s18 + $0x48] sm:$0xf] %v637_v31  ;;  %640 = vst [vmem:[%s603_s18 + $0x50] sm:$0xf] %v639_v32  ;;  %v641_v34 = vld [vmem:[%s1126_s11 + $0x2c] sm:$0xf] }
  0xb2   : > { %642 = vst [vmem:[%s603_s18 + $0x58] sm:$0xf] %v641_v34 }
  0xb3   : > { %v643_v35 = vld [vmem:[%s1126_s11 + $0x30] sm:$0xf]  ;;  %v645_v37 = vld [vmem:[%s1126_s11 + $0x34] sm:$0xf] }
  0xb4   : > { %644 = vst [vmem:[%s603_s18 + $0x60] sm:$0xf] %v643_v35  ;;  %646 = vst [vmem:[%s603_s18 + $0x68] sm:$0xf] %v645_v37 }
  0xb7   : > { %v647_v38 = vld [vmem:[%s1126_s11 + $0x38] sm:$0xf]  ;;  %v649_v39 = vld [vmem:[%s1126_s11 + $0x3c] sm:$0xf] }
  0xb8   : > { %648 = vst [vmem:[%s603_s18 + $0x70] sm:$0xf] %v647_v38  ;;  %650 = vst [vmem:[%s603_s18 + $0x78] sm:$0xf] %v649_v39 }
  0xb9 PF: > { %p10_p11 = scmp.ge.s32.totalorder %s999_s16, 4   ;;  %s1206_s12 = smov %s954_s13 }
  0xba   : > { %s1207_s13 = smov %s1009_s19  ;;  %s1208_s14 = smov %s999_s16 }
  0xbb   :  { %12 = sbr.rel (!%p10_p11) target bundleno = 2 (0x2), region = 155 }

// kernel: discriminator_forward.9
= control target key start
LH: loop header
LB: loop body
LE: loop exit
PB: predicated region body
PF: predicated region fallthrough
CT: control target
= control target key end

     0   :  { %s8373_s1 = inlined_call_operand.vmem [shape: bf16[4,512,256], index: 1, kind: input, shape index: {}]   ;;  %s8374_s0 = inlined_call_operand.vmem [shape: bf16[2,9,2,8,512], index: 0, kind: input, shape index: {}]   ;;  %s8375_s2 = inlined_call_operand.vmem [shape: bf16[2,64,256], index: 2, kind: output, shape index: {}]  }
   0x1   :  { %v6610_v0 = vld [vmem:[%s8373_s1 + $0x204] ss:$8 sps:$4 sm:$0xff]   ;;  %v6612_v1 = vld [vmem:[%s8373_s1 + $0x200] ss:$8 sps:$4 sm:$0xff]   ;;  %v6613_v2 = vld [vmem:[%s8373_s1 + $0x214] ss:$8 sps:$4 sm:$0xff]  }
   0x2   :  { %573 = vmatprep.subr.bf16.mxu0 %v6610_v0  ;;  %3171 = vmatprep.subr.bf16.mxu1 %v6610_v0  ;;  %v6615_v3 = vld [vmem:[%s8373_s1 + $0x210] ss:$8 sps:$4 sm:$0xff]   ;;  %v6616_v4 = vld [vmem:[%s8373_s1 + $0x224] ss:$8 sps:$4 sm:$0xff]   ;;  %v6618_v5 = vld [vmem:[%s8373_s1 + $0x220] ss:$8 sps:$4 sm:$0xff]  }
   0x3   :  { %574 = vmatpush1.bf16.msra.mxu0 %v6612_v1  ;;  %3172 = vmatpush1.bf16.msra.mxu1 %v6612_v1  ;;  %v6619_v6 = vld [vmem:[%s8373_s1 + $0x234] ss:$8 sps:$4 sm:$0xff]   ;;  %v6621_v7 = vld [vmem:[%s8373_s1 + $0x230] ss:$8 sps:$4 sm:$0xff]   ;;  %v6622_v8 = vld [vmem:[%s8373_s1 + $0x244] ss:$8 sps:$4 sm:$0xff]  }
   0x4   :  { %575 = vmatprep.subr.bf16.mxu0 %v6613_v2  ;;  %3173 = vmatprep.subr.bf16.mxu1 %v6613_v2  ;;  %v6624_v9 = vld [vmem:[%s8373_s1 + $0x240] ss:$8 sps:$4 sm:$0xff]   ;;  %v6625_v10 = vld [vmem:[%s8373_s1 + $0x254] ss:$8 sps:$4 sm:$0xff]   ;;  %v6627_v11 = vld [vmem:[%s8373_s1 + $0x250] ss:$8 sps:$4 sm:$0xff]  }
   0x5   :  { %v6628_v12 = vld [vmem:[%s8373_s1 + $0x264] ss:$8 sps:$4 sm:$0xff]   ;;  %v7051_v13 = vld [vmem:[%s8374_s0 + $0x10] sm:$0xff]  ;;  %v6630_v16 = vld [vmem:[%s8373_s1 + $0x260] ss:$8 sps:$4 sm:$0xff]  }
   0x6   :  { %v7056_v14 = vld [vmem:[%s8374_s0 + $0x30] sm:$0xff]  ;;  %v6634_v22 = vld [vmem:[%s8373_s1 + $0x284] ss:$8 sps:$4 sm:$0xff]   ;;  %v6636_v23 = vld [vmem:[%s8373_s1 + $0x280] ss:$8 sps:$4 sm:$0xff]  }
   0x7   :  { %576 = vmatpush1.bf16.msra.mxu0 %v6615_v3  ;;  %3174 = vmatpush1.bf16.msra.mxu1 %v6615_v3  ;;  %v5291_v15 = vcombine.high %v7051_v13, %v7056_v14  ;;  %v7066_v17 = vld [vmem:[%s8374_s0 + $0x130] sm:$0xff]  ;;  %v6640_v26 = vld [vmem:[%s8373_s1 + $0x2a4] ss:$8 sps:$4 sm:$0xff]   ;;  %v6642_v27 = vld [vmem:[%s8373_s1 + $0x2a0] ss:$8 sps:$4 sm:$0xff]   ;;  %v5290_v40 = vcombine.low %v7051_v13, %v7056_v14 }
   0x8   :  { %577 = vmatprep.subr.bf16.mxu0 %v6616_v4  ;;  %3175 = vmatprep.subr.bf16.mxu1 %v6616_v4  ;;  %v7071_v18 = vld [vmem:[%s8374_s0 + $0x150] sm:$0xff]  ;;  %v6646_v30 = vld [vmem:[%s8373_s1 + $0x2c4] ss:$8 sps:$4 sm:$0xff]   ;;  %v6648_v31 = vld [vmem:[%s8373_s1 + $0x2c0] ss:$8 sps:$4 sm:$0xff]  }
   0x9   :  { %v6631_v19 = vld [vmem:[%s8373_s1 + $0x274] ss:$8 sps:$4 sm:$0xff]   ;;  %v5875_v20 = vcombine.high %v7066_v17, %v7071_v18  ;;  %605 = vmatprep.mubr.bf16.mxu0 %v5291_v15  ;;  %v6633_v21 = vld [vmem:[%s8373_s1 + $0x270] ss:$8 sps:$4 sm:$0xff]   ;;  %v6652_v34 = vld [vmem:[%s8373_s1 + $0x2e4] ss:$8 sps:$4 sm:$0xff]   ;;  %v5874_v41 = vcombine.low %v7066_v17, %v7071_v18 }
   0xa   :  { %v6637_v24 = vld [vmem:[%s8373_s1 + $0x294] ss:$8 sps:$4 sm:$0xff]   ;;  %v6639_v25 = vld [vmem:[%s8373_s1 + $0x290] ss:$8 sps:$4 sm:$0xff]   ;;  %v6654_v35 = vld [vmem:[%s8373_s1 + $0x2e0] ss:$8 sps:$4 sm:$0xff]  }
   0xb   :  { %578 = vmatpush1.bf16.msra.mxu0 %v6618_v5  ;;  %3176 = vmatpush1.bf16.msra.mxu1 %v6618_v5  ;;  %v6643_v28 = vld [vmem:[%s8373_s1 + $0x2b4] ss:$8 sps:$4 sm:$0xff]   ;;  %v6645_v29 = vld [vmem:[%s8373_s1 + $0x2b0] ss:$8 sps:$4 sm:$0xff]   ;;  %v6660_v38 = vld [vmem:[%s8373_s1 + $0x304] ss:$8 sps:$4 sm:$0xff]  }
   0xc   :  { %579 = vmatprep.subr.bf16.mxu0 %v6619_v6  ;;  %3177 = vmatprep.subr.bf16.mxu1 %v6619_v6  ;;  %v6649_v32 = vld [vmem:[%s8373_s1 + $0x2d4] ss:$8 sps:$4 sm:$0xff]   ;;  %v6651_v33 = vld [vmem:[%s8373_s1 + $0x2d0] ss:$8 sps:$4 sm:$0xff]   ;;  %v6658_v45 = vld [vmem:[%s8373_s1 + $0x300] ss:$8 sps:$4 sm:$0xff]  }
   0xd   :  { %3203 = vmatprep.mubr.bf16.mxu1 %v5875_v20  ;;  %v6655_v36 = vld [vmem:[%s8373_s1 + $0x2f4] ss:$8 sps:$4 sm:$0xff]   ;;  %v6657_v37 = vld [vmem:[%s8373_s1 + $0x2f0] ss:$8 sps:$4 sm:$0xff]   ;;  %v6666_v50 = vld [vmem:[%s8373_s1 + $0x324] ss:$8 sps:$4 sm:$0xff]  }
   0xe   :  { %v5214_v39 = vld [vmem:[%s8374_s0 + $0x50] sm:$0xff]  ;;  %v6664_v57 = vld [vmem:[%s8373_s1 + $0x320] ss:$8 sps:$4 sm:$0xff]   ;;  %v6672_v62 = vld [vmem:[%s8373_s1 + $0x344] ss:$8 sps:$4 sm:$0xff]  }
   0xf   :  { %580 = vmatpush1.bf16.msra.mxu0 %v6621_v7  ;;  %3178 = vmatpush1.bf16.msra.mxu1 %v6621_v7  ;;  %v5216_v42 = vld [vmem:[%s8374_s0 + $0x70] sm:$0xff]  ;;  %v6670_v5 = vld [vmem:[%s8373_s1 + $0x340] ss:$8 sps:$4 sm:$0xff]   ;;  %v7221_v13 = vld [vmem:[%s8374_s0 + $0x138] sm:$0xff] }
  0x10   :  { %581 = vmatprep.subr.bf16.mxu0 %v6622_v8  ;;  %3179 = vmatprep.subr.bf16.mxu1 %v6622_v8  ;;  %v5798_v43 = vld [vmem:[%s8374_s0 + $0x170] sm:$0xff]  ;;  %v5295_v47 = vcombine.high %v5214_v39, %v5216_v42  ;;  %v5294_v52 = vcombine.low %v5214_v39, %v5216_v42  ;;  %v7226_v14 = vld [vmem:[%s8374_s0 + $0x158] sm:$0xff]  ;;  %v6676_v17 = vld [vmem:[%s8373_s1 + $0x360] ss:$8 sps:$4 sm:$0xff]  }
  0x11   :  { %v5800_v44 = vld [vmem:[%s8374_s0 + $0x190] sm:$0xff]  ;;  %v5877_v20 = vcombine.high %v7221_v13, %v7226_v14  ;;  %v5215_v39 = vld [vmem:[%s8374_s0 + $0x58] sm:$0xff] }
  0x12   :  { %v6663_v46 = vld [vmem:[%s8373_s1 + $0x314] ss:$8 sps:$4 sm:$0xff]   ;;  %v5879_v48 = vcombine.high %v5798_v43, %v5800_v44  ;;  %v6661_v49 = vld [vmem:[%s8373_s1 + $0x310] ss:$8 sps:$4 sm:$0xff]   ;;  %v5878_v53 = vcombine.low %v5798_v43, %v5800_v44  ;;  %v5876_v44 = vcombine.low %v7221_v13, %v7226_v14  ;;  %v7376_v14 = vld [vmem:[%s8374_s0 + $0x20] sm:$0xff] }
  0x13   :  { %582 = vmatpush1.bf16.msra.mxu0 %v6624_v9  ;;  %3180 = vmatpush1.bf16.msra.mxu1 %v6624_v9  ;;  %v5218_v51 = vld [vmem:[%s8374_s0 + $0x90] sm:$0xff]  ;;  %v5801_v42 = vld [vmem:[%s8374_s0 + $0x198] sm:$0xff] }
  0x14   :  { %583 = vmatprep.subr.bf16.mxu0 %v6625_v10  ;;  %3181 = vmatprep.subr.bf16.mxu1 %v6625_v10  ;;  %v5220_v54 = vld [vmem:[%s8374_s0 + $0xb0] sm:$0xff]  ;;  %v6678_v10 = vld [vmem:[%s8373_s1 + $0x364] ss:$8 sps:$4 sm:$0xff]  }
  0x15   :  { %v5802_v55 = vld [vmem:[%s8374_s0 + $0x1b0] sm:$0xff]  ;;  %v5299_v59 = vcombine.high %v5218_v51, %v5220_v54  ;;  %v5298_v1 = vcombine.low %v5218_v51, %v5220_v54  ;;  %v5219_v51 = vld [vmem:[%s8374_s0 + $0x98] sm:$0xff] }
  0x16   :  { %v5804_v56 = vld [vmem:[%s8374_s0 + $0x1d0] sm:$0xff]  ;;  %v5805_v54 = vld [vmem:[%s8374_s0 + $0x1d8] sm:$0xff] }
  0x17   :  { %584 = vmatpush1.bf16.msra.mxu0 %v6627_v11  ;;  %3182 = vmatpush1.bf16.msra.mxu1 %v6627_v11  ;;  %v6669_v58 = vld [vmem:[%s8373_s1 + $0x334] ss:$8 sps:$4 sm:$0xff]   ;;  %v5883_v60 = vcombine.high %v5802_v55, %v5804_v56  ;;  %v6667_v61 = vld [vmem:[%s8373_s1 + $0x330] ss:$8 sps:$4 sm:$0xff]   ;;  %v5882_v2 = vcombine.low %v5802_v55, %v5804_v56 }
  0x18   :  { %585 = vmatprep.subr.bf16.mxu0 %v6628_v12  ;;  %3183 = vmatprep.subr.bf16.mxu1 %v6628_v12  ;;  %v5222_v63 = vld [vmem:[%s8374_s0 + $0xd0] sm:$0xff]  ;;  %v7211_v11 = vld [vmem:[%s8374_s0 + $0x18] sm:$0xff] }
  0x19   :  { %v5224_v0 = vld [vmem:[%s8374_s0 + $0xf0] sm:$0xff]  ;;  %v7216_v12 = vld [vmem:[%s8374_s0 + $0x38] sm:$0xff] }
  0x1a   :  { %v5806_v3 = vld [vmem:[%s8374_s0 + $0x1f0] sm:$0xff]  ;;  %v5303_v7 = vcombine.high %v5222_v63, %v5224_v0  ;;  %v5302_v15 = vcombine.low %v5222_v63, %v5224_v0  ;;  %v5292_v43 = vcombine.low %v7211_v11, %v7216_v12  ;;  %v5223_v63 = vld [vmem:[%s8374_s0 + $0xd8] sm:$0xff] }
  0x1b   :  { %586 = vmatpush1.bf16.msra.mxu0 %v6630_v16  ;;  %3184 = vmatpush1.bf16.msra.mxu1 %v6630_v16  ;;  %v5808_v4 = vld [vmem:[%s8374_s0 + $0x210] sm:$0xff]  ;;  %v5225_v0 = vld [vmem:[%s8374_s0 + $0xf8] sm:$0xff] }
  0x1c   :  { %587 = vmatprep.subr.bf16.mxu0 %v6631_v19  ;;  %3185 = vmatprep.subr.bf16.mxu1 %v6631_v19  ;;  %v6675_v6 = vld [vmem:[%s8373_s1 + $0x354] ss:$8 sps:$4 sm:$0xff]   ;;  %v5887_v8 = vcombine.high %v5806_v3, %v5808_v4  ;;  %v6673_v9 = vld [vmem:[%s8373_s1 + $0x350] ss:$8 sps:$4 sm:$0xff]   ;;  %v5886_v16 = vcombine.low %v5806_v3, %v5808_v4  ;;  %v5293_v19 = vcombine.high %v7211_v11, %v7216_v12  ;;  %v7371_v11 = vld [vmem:[%s8374_s0] sm:$0xff] }
  0x1d   :  { %v6681_v18 = vld [vmem:[%s8373_s1 + $0x374] ss:$8 sps:$4 sm:$0xff]   ;;  %v5304_v12 = vcombine.low %v5223_v63, %v5225_v0 }
  0x1f   :  { %588 = vmatpush1.bf16.msra.mxu0 %v6633_v21  ;;  %3186 = vmatpush1.bf16.msra.mxu1 %v6633_v21  ;;  %v6679_v21 = vld [vmem:[%s8373_s1 + $0x370] ss:$8 sps:$4 sm:$0xff]  }
  0x20   :  { %589 = vmatprep.subr.bf16.mxu0 %v6634_v22  ;;  %3187 = vmatprep.subr.bf16.mxu1 %v6634_v22  ;;  %v6684_v22 = vld [vmem:[%s8373_s1 + $0x384] ss:$8 sps:$4 sm:$0xff]  }
  0x23   :  { %590 = vmatpush1.bf16.msra.mxu0 %v6636_v23  ;;  %3188 = vmatpush1.bf16.msra.mxu1 %v6636_v23  ;;  %v6682_v23 = vld [vmem:[%s8373_s1 + $0x380] ss:$8 sps:$4 sm:$0xff]  }
  0x24   :  { %591 = vmatprep.subr.bf16.mxu0 %v6637_v24  ;;  %3189 = vmatprep.subr.bf16.mxu1 %v6637_v24  ;;  %v6687_v24 = vld [vmem:[%s8373_s1 + $0x394] ss:$8 sps:$4 sm:$0xff]  }
  0x27   :  { %592 = vmatpush1.bf16.msra.mxu0 %v6639_v25  ;;  %3190 = vmatpush1.bf16.msra.mxu1 %v6639_v25  ;;  %v6685_v25 = vld [vmem:[%s8373_s1 + $0x390] ss:$8 sps:$4 sm:$0xff]  }
  0x28   :  { %593 = vmatprep.subr.bf16.mxu0 %v6640_v26  ;;  %3191 = vmatprep.subr.bf16.mxu1 %v6640_v26  ;;  %v6690_v26 = vld [vmem:[%s8373_s1 + $0x3a4] ss:$8 sps:$4 sm:$0xff]  }
  0x2b   :  { %594 = vmatpush1.bf16.msra.mxu0 %v6642_v27  ;;  %3192 = vmatpush1.bf16.msra.mxu1 %v6642_v27  ;;  %v6688_v27 = vld [vmem:[%s8373_s1 + $0x3a0] ss:$8 sps:$4 sm:$0xff]  }
  0x2c   :  { %595 = vmatprep.subr.bf16.mxu0 %v6643_v28  ;;  %3193 = vmatprep.subr.bf16.mxu1 %v6643_v28  ;;  %v6693_v28 = vld [vmem:[%s8373_s1 + $0x3b4] ss:$8 sps:$4 sm:$0xff]  }
  0x2f   :  { %596 = vmatpush1.bf16.msra.mxu0 %v6645_v29  ;;  %3194 = vmatpush1.bf16.msra.mxu1 %v6645_v29  ;;  %v6691_v29 = vld [vmem:[%s8373_s1 + $0x3b0] ss:$8 sps:$4 sm:$0xff]  }
  0x30   :  { %597 = vmatprep.subr.bf16.mxu0 %v6646_v30  ;;  %3195 = vmatprep.subr.bf16.mxu1 %v6646_v30  ;;  %v6696_v30 = vld [vmem:[%s8373_s1 + $0x3c4] ss:$8 sps:$4 sm:$0xff]  }
  0x33   :  { %598 = vmatpush1.bf16.msra.mxu0 %v6648_v31  ;;  %3196 = vmatpush1.bf16.msra.mxu1 %v6648_v31  ;;  %v6694_v31 = vld [vmem:[%s8373_s1 + $0x3c0] ss:$8 sps:$4 sm:$0xff]  }
  0x34   :  { %599 = vmatprep.subr.bf16.mxu0 %v6649_v32  ;;  %3197 = vmatprep.subr.bf16.mxu1 %v6649_v32  ;;  %v6699_v32 = vld [vmem:[%s8373_s1 + $0x3d4] ss:$8 sps:$4 sm:$0xff]  }
  0x37   :  { %600 = vmatpush1.bf16.msra.mxu0 %v6651_v33  ;;  %3198 = vmatpush1.bf16.msra.mxu1 %v6651_v33  ;;  %v6697_v33 = vld [vmem:[%s8373_s1 + $0x3d0] ss:$8 sps:$4 sm:$0xff]  }
  0x38   :  { %601 = vmatprep.subr.bf16.mxu0 %v6652_v34  ;;  %3199 = vmatprep.subr.bf16.mxu1 %v6652_v34  ;;  %v6702_v34 = vld [vmem:[%s8373_s1 + $0x3e4] ss:$8 sps:$4 sm:$0xff]  }
  0x3b   :  { %602 = vmatpush1.bf16.msra.mxu0 %v6654_v35  ;;  %3200 = vmatpush1.bf16.msra.mxu1 %v6654_v35  ;;  %v6700_v35 = vld [vmem:[%s8373_s1 + $0x3e0] ss:$8 sps:$4 sm:$0xff]  }
  0x3c   :  { %603 = vmatprep.subr.bf16.mxu0 %v6655_v36  ;;  %3201 = vmatprep.subr.bf16.mxu1 %v6655_v36  ;;  %v6705_v36 = vld [vmem:[%s8373_s1 + $0x3f4] ss:$8 sps:$4 sm:$0xff]  }
  0x3f   :  { %604 = vmatpush1.bf16.msra.mxu0 %v6657_v37  ;;  %3202 = vmatpush1.bf16.msra.mxu1 %v6657_v37  ;;  %v6703_v37 = vld [vmem:[%s8373_s1 + $0x3f0] ss:$8 sps:$4 sm:$0xff]  }
  0x40   :  { %646 = vmatprep.subr.bf16.mxu0 %v6660_v38  ;;  %3244 = vmatprep.subr.bf16.mxu1 %v6660_v38  ;;  %v6708_v38 = vld [vmem:[%s8373_s1 + $0x4] ss:$8 sps:$4 sm:$0xff]  }
  0x42   :  { %606 = vmatmul.mubr.bf16.vlgmr.msra.gmra.mrb[0].mxu0 %v5290_v40  ;;  %3204 = vmatmul.mubr.bf16.vlgmr.msra.gmra.mrb[0].mxu1 %v5874_v41  ;;  %v5217_v40 = vld [vmem:[%s8374_s0 + $0x78] sm:$0xff] }
  0x43   :  { %647 = vmatpush1.bf16.msra.mxu0 %v6658_v45  ;;  %3245 = vmatpush1.bf16.msra.mxu1 %v6658_v45  ;;  %v5799_v41 = vld [vmem:[%s8374_s0 + $0x178] sm:$0xff]  ;;  %v6706_v45 = vld [vmem:[%s8373_s1] ss:$8 sps:$4 sm:$0xff]   ;;  %v5296_v55 = vcombine.low %v5215_v39, %v5217_v40 }
  0x44   :  { %648 = vmatprep.subr.bf16.mxu0 %v6663_v46  ;;  %3246 = vmatprep.subr.bf16.mxu1 %v6663_v46  ;;  %v6711_v46 = vld [vmem:[%s8373_s1 + $0x14] ss:$8 sps:$4 sm:$0xff]   ;;  %v5880_v56 = vcombine.low %v5799_v41, %v5801_v42 }
  0x45   :  { %615 = vmatprep.mubr.bf16.mxu0 %v5295_v47  ;;  %3213 = vmatprep.mubr.bf16.mxu1 %v5879_v48  ;;  %v5297_v47 = vcombine.high %v5215_v39, %v5217_v40  ;;  %v5881_v48 = vcombine.high %v5799_v41, %v5801_v42  ;;  %v7455_v39 = vld [vmem:[%s8374_s0 + $0x40] sm:$0xff]  ;;  %v5370_v40 = vcombine.low %v7371_v11, %v7376_v14 }
  0x46   :  { %v7464_v42 = vld [vmem:[%s8374_s0 + $0x60] sm:$0xff] }
  0x47   :  { %649 = vmatpush1.bf16.msra.mxu0 %v6661_v49  ;;  %3247 = vmatpush1.bf16.msra.mxu1 %v6661_v49  ;;  %v6709_v49 = vld [vmem:[%s8373_s1 + $0x10] ss:$8 sps:$4 sm:$0xff]  }
  0x48   :  { %650 = vmatprep.subr.bf16.mxu0 %v6666_v50  ;;  %3248 = vmatprep.subr.bf16.mxu1 %v6666_v50  ;;  %v6714_v50 = vld [vmem:[%s8373_s1 + $0x24] ss:$8 sps:$4 sm:$0xff]  }
  0x4a   :  { %616 = vmatmul.mubr.bf16.gmra.mrb[4].mxu0 %v5294_v52  ;;  %3214 = vmatmul.mubr.bf16.gmra.mrb[4].mxu1 %v5878_v53  ;;  %v5221_v52 = vld [vmem:[%s8374_s0 + $0xb8] sm:$0xff] }
  0x4b   :  { %651 = vmatpush1.bf16.msra.mxu0 %v6664_v57  ;;  %3249 = vmatpush1.bf16.msra.mxu1 %v6664_v57  ;;  %v5803_v53 = vld [vmem:[%s8374_s0 + $0x1b8] sm:$0xff]  ;;  %v6712_v57 = vld [vmem:[%s8373_s1 + $0x20] ss:$8 sps:$4 sm:$0xff]   ;;  %v5300_v3 = vcombine.low %v5219_v51, %v5221_v52 }
  0x4c   :  { %652 = vmatprep.subr.bf16.mxu0 %v6669_v58  ;;  %3250 = vmatprep.subr.bf16.mxu1 %v6669_v58  ;;  %v6717_v58 = vld [vmem:[%s8373_s1 + $0x34] ss:$8 sps:$4 sm:$0xff]   ;;  %v5884_v4 = vcombine.low %v5803_v53, %v5805_v54 }
  0x4d   :  { %625 = vmatprep.mubr.bf16.mxu0 %v5299_v59  ;;  %3223 = vmatprep.mubr.bf16.mxu1 %v5883_v60  ;;  %v5301_v59 = vcombine.high %v5219_v51, %v5221_v52  ;;  %v5885_v60 = vcombine.high %v5803_v53, %v5805_v54  ;;  %v7495_v51 = vld [vmem:[%s8374_s0 + $0x80] sm:$0xff]  ;;  %v5374_v52 = vcombine.low %v7455_v39, %v7464_v42 }
  0x4e   :  { %v7504_v54 = vld [vmem:[%s8374_s0 + $0xa0] sm:$0xff] }
  0x4f   :  { %653 = vmatpush1.bf16.msra.mxu0 %v6667_v61  ;;  %3251 = vmatpush1.bf16.msra.mxu1 %v6667_v61  ;;  %v6715_v61 = vld [vmem:[%s8373_s1 + $0x30] ss:$8 sps:$4 sm:$0xff]  }
  0x50   :  { %654 = vmatprep.subr.bf16.mxu0 %v6672_v62  ;;  %3252 = vmatprep.subr.bf16.mxu1 %v6672_v62  ;;  %v6720_v62 = vld [vmem:[%s8373_s1 + $0x44] ss:$8 sps:$4 sm:$0xff]  }
  0x52   :  { %626 = vmatmul.mubr.bf16.gmra.mrb[8].mxu0 %v5298_v1  ;;  %3224 = vmatmul.mubr.bf16.gmra.mrb[8].mxu1 %v5882_v2  ;;  %v5807_v1 = vld [vmem:[%s8374_s0 + $0x1f8] sm:$0xff] }
  0x53   :  { %655 = vmatpush1.bf16.msra.mxu0 %v6670_v5  ;;  %3253 = vmatpush1.bf16.msra.mxu1 %v6670_v5  ;;  %v5809_v2 = vld [vmem:[%s8374_s0 + $0x218] sm:$0xff]  ;;  %v6718_v5 = vld [vmem:[%s8373_s1 + $0x40] ss:$8 sps:$4 sm:$0xff]  }
  0x54   :  { %656 = vmatprep.subr.bf16.mxu0 %v6675_v6  ;;  %3254 = vmatprep.subr.bf16.mxu1 %v6675_v6  ;;  %v6723_v6 = vld [vmem:[%s8373_s1 + $0x54] ss:$8 sps:$4 sm:$0xff]   ;;  %v5888_v13 = vcombine.low %v5807_v1, %v5809_v2 }
  0x55   :  { %635 = vmatprep.mubr.bf16.mxu0 %v5303_v7  ;;  %3233 = vmatprep.mubr.bf16.mxu1 %v5887_v8  ;;  %v5305_v7 = vcombine.high %v5223_v63, %v5225_v0  ;;  %v5889_v8 = vcombine.high %v5807_v1, %v5809_v2  ;;  %v7535_v63 = vld [vmem:[%s8374_s0 + $0xc0] sm:$0xff]  ;;  %v5378_v0 = vcombine.low %v7495_v51, %v7504_v54 }
  0x56   :  { %v7544_v2 = vld [vmem:[%s8374_s0 + $0xe0] sm:$0xff] }
  0x57   :  { %657 = vmatpush1.bf16.msra.mxu0 %v6673_v9  ;;  %3255 = vmatpush1.bf16.msra.mxu1 %v6673_v9  ;;  %v6721_v9 = vld [vmem:[%s8373_s1 + $0x50] ss:$8 sps:$4 sm:$0xff]  }
  0x58   :  { %658 = vmatprep.subr.bf16.mxu0 %v6678_v10  ;;  %3256 = vmatprep.subr.bf16.mxu1 %v6678_v10  ;;  %v6726_v10 = vld [vmem:[%s8373_s1 + $0x64] ss:$8 sps:$4 sm:$0xff]  }
  0x5a   :  { %636 = vmatmul.mubr.bf16.gmra.mrb[12].mxu0 %v5302_v15  ;;  %3234 = vmatmul.mubr.bf16.gmra.mrb[12].mxu1 %v5886_v16  ;;  %v7381_v15 = vld [vmem:[%s8374_s0 + $0x120] sm:$0xff] }
  0x5b   :  { %659 = vmatpush1.bf16.msra.mxu0 %v6676_v17  ;;  %3257 = vmatpush1.bf16.msra.mxu1 %v6676_v17  ;;  %v7386_v16 = vld [vmem:[%s8374_s0 + $0x140] sm:$0xff] }
  0x5c   :  { %660 = vmatprep.subr.bf16.mxu0 %v6681_v18  ;;  %3258 = vmatprep.subr.bf16.mxu1 %v6681_v18  ;;  %v6724_v17 = vld [vmem:[%s8373_s1 + $0x60] ss:$8 sps:$4 sm:$0xff]   ;;  %v6729_v18 = vld [vmem:[%s8373_s1 + $0x74] ss:$8 sps:$4 sm:$0xff]   ;;  %v5954_v41 = vcombine.low %v7381_v15, %v7386_v16 }
  0x5d   :  { %678 = vmatprep.mubr.bf16.mxu0 %v5293_v19  ;;  %3276 = vmatprep.mubr.bf16.mxu1 %v5877_v20  ;;  %v5371_v19 = vcombine.high %v7371_v11, %v7376_v14  ;;  %v5955_v20 = vcombine.high %v7381_v15, %v7386_v16  ;;  %v7575_v11 = vld [vmem:[%s8374_s0 + $0x8] sm:$0xff] }
  0x5e   :  { %v7584_v15 = vld [vmem:[%s8374_s0 + $0x28] sm:$0xff] }
  0x5f   :  { %661 = vmatpush1.bf16.msra.mxu0 %v6679_v21  ;;  %3259 = vmatpush1.bf16.msra.mxu1 %v6679_v21  ;;  %v6727_v21 = vld [vmem:[%s8373_s1 + $0x70] ss:$8 sps:$4 sm:$0xff]  }
  0x60   :  { %662 = vmatprep.subr.bf16.mxu0 %v6684_v22  ;;  %3260 = vmatprep.subr.bf16.mxu1 %v6684_v22  ;;  %v6732_v22 = vld [vmem:[%s8373_s1 + $0x84] ss:$8 sps:$4 sm:$0xff]  }
  0x63   :  { %663 = vmatpush1.bf16.msra.mxu0 %v6682_v23  ;;  %3261 = vmatpush1.bf16.msra.mxu1 %v6682_v23  ;;  %v6730_v23 = vld [vmem:[%s8373_s1 + $0x80] ss:$8 sps:$4 sm:$0xff]  }
  0x64   :  { %664 = vmatprep.subr.bf16.mxu0 %v6687_v24  ;;  %3262 = vmatprep.subr.bf16.mxu1 %v6687_v24  ;;  %v6735_v24 = vld [vmem:[%s8373_s1 + $0x94] ss:$8 sps:$4 sm:$0xff]  }
  0x67   :  { %665 = vmatpush1.bf16.msra.mxu0 %v6685_v25  ;;  %3263 = vmatpush1.bf16.msra.mxu1 %v6685_v25  ;;  %v6733_v25 = vld [vmem:[%s8373_s1 + $0x90] ss:$8 sps:$4 sm:$0xff]  }
  0x68   :  { %666 = vmatprep.subr.bf16.mxu0 %v6690_v26  ;;  %3264 = vmatprep.subr.bf16.mxu1 %v6690_v26  ;;  %v6738_v26 = vld [vmem:[%s8373_s1 + $0xa4] ss:$8 sps:$4 sm:$0xff]  }
  0x6b   :  { %667 = vmatpush1.bf16.msra.mxu0 %v6688_v27  ;;  %3265 = vmatpush1.bf16.msra.mxu1 %v6688_v27  ;;  %v6736_v27 = vld [vmem:[%s8373_s1 + $0xa0] ss:$8 sps:$4 sm:$0xff]  }
  0x6c   :  { %668 = vmatprep.subr.bf16.mxu0 %v6693_v28  ;;  %3266 = vmatprep.subr.bf16.mxu1 %v6693_v28  ;;  %v6741_v28 = vld [vmem:[%s8373_s1 + $0xb4] ss:$8 sps:$4 sm:$0xff]  }
  0x6f   :  { %669 = vmatpush1.bf16.msra.mxu0 %v6691_v29  ;;  %3267 = vmatpush1.bf16.msra.mxu1 %v6691_v29  ;;  %v6739_v29 = vld [vmem:[%s8373_s1 + $0xb0] ss:$8 sps:$4 sm:$0xff]  }
  0x70   :  { %670 = vmatprep.subr.bf16.mxu0 %v6696_v30  ;;  %3268 = vmatprep.subr.bf16.mxu1 %v6696_v30  ;;  %v6744_v30 = vld [vmem:[%s8373_s1 + $0xc4] ss:$8 sps:$4 sm:$0xff]  }
  0x73   :  { %671 = vmatpush1.bf16.msra.mxu0 %v6694_v31  ;;  %3269 = vmatpush1.bf16.msra.mxu1 %v6694_v31  ;;  %v6742_v31 = vld [vmem:[%s8373_s1 + $0xc0] ss:$8 sps:$4 sm:$0xff]  }
  0x74   :  { %672 = vmatprep.subr.bf16.mxu0 %v6699_v32  ;;  %3270 = vmatprep.subr.bf16.mxu1 %v6699_v32  ;;  %v6747_v32 = vld [vmem:[%s8373_s1 + $0xd4] ss:$8 sps:$4 sm:$0xff]  }
  0x77   :  { %673 = vmatpush1.bf16.msra.mxu0 %v6697_v33  ;;  %3271 = vmatpush1.bf16.msra.mxu1 %v6697_v33  ;;  %v6745_v33 = vld [vmem:[%s8373_s1 + $0xd0] ss:$8 sps:$4 sm:$0xff]  }
  0x78   :  { %674 = vmatprep.subr.bf16.mxu0 %v6702_v34  ;;  %3272 = vmatprep.subr.bf16.mxu1 %v6702_v34  ;;  %v6750_v34 = vld [vmem:[%s8373_s1 + $0xe4] ss:$8 sps:$4 sm:$0xff]  }
  0x7b   :  { %675 = vmatpush1.bf16.msra.mxu0 %v6700_v35  ;;  %3273 = vmatpush1.bf16.msra.mxu1 %v6700_v35  ;;  %v6748_v35 = vld [vmem:[%s8373_s1 + $0xe0] ss:$8 sps:$4 sm:$0xff]  }
  0x7c   :  { %676 = vmatprep.subr.bf16.mxu0 %v6705_v36  ;;  %3274 = vmatprep.subr.bf16.mxu1 %v6705_v36  ;;  %v6753_v36 = vld [vmem:[%s8373_s1 + $0xf4] ss:$8 sps:$4 sm:$0xff]  }
  0x7f   :  { %677 = vmatpush1.bf16.msra.mxu0 %v6703_v37  ;;  %3275 = vmatpush1.bf16.msra.mxu1 %v6703_v37  ;;  %v6751_v37 = vld [vmem:[%s8373_s1 + $0xf0] ss:$8 sps:$4 sm:$0xff]  }
  0x80   :  { %1119 = vmatprep.subr.bf16.mxu0 %v6708_v38  ;;  %3717 = vmatprep.subr.bf16.mxu1 %v6708_v38  ;;  %v6756_v38 = vld [vmem:[%s8373_s1 + $0x104] ss:$8 sps:$4 sm:$0xff]  }
  0x82   :  { %679 = vmatmul.mubr.bf16.vlgmr.msra.gmra.mrb[0].mxu0 %v5292_v43  ;;  %3277 = vmatmul.mubr.bf16.vlgmr.msra.gmra.mrb[0].mxu1 %v5876_v44  ;;  %v7469_v43 = vld [vmem:[%s8374_s0 + $0x160] sm:$0xff] }
  0x83   :  { %1120 = vmatpush1.bf16.msra.mxu0 %v6706_v45  ;;  %3718 = vmatpush1.bf16.msra.mxu1 %v6706_v45  ;;  %v7474_v44 = vld [vmem:[%s8374_s0 + $0x180] sm:$0xff] }
  0x84   :  { %1121 = vmatprep.subr.bf16.mxu0 %v6711_v46  ;;  %3719 = vmatprep.subr.bf16.mxu1 %v6711_v46  ;;  %v6754_v45 = vld [vmem:[%s8373_s1 + $0x100] ss:$8 sps:$4 sm:$0xff]   ;;  %v6759_v46 = vld [vmem:[%s8373_s1 + $0x114] ss:$8 sps:$4 sm:$0xff]   ;;  %v5958_v53 = vcombine.low %v7469_v43, %v7474_v44 }
  0x85   :  { %688 = vmatprep.mubr.bf16.mxu0 %v5297_v47  ;;  %3286 = vmatprep.mubr.bf16.mxu1 %v5881_v48  ;;  %v5375_v47 = vcombine.high %v7455_v39, %v7464_v42  ;;  %v5959_v48 = vcombine.high %v7469_v43, %v7474_v44 }
  0x87   :  { %1122 = vmatpush1.bf16.msra.mxu0 %v6709_v49  ;;  %3720 = vmatpush1.bf16.msra.mxu1 %v6709_v49  ;;  %v6757_v49 = vld [vmem:[%s8373_s1 + $0x110] ss:$8 sps:$4 sm:$0xff]  }
  0x88   :  { %1123 = vmatprep.subr.bf16.mxu0 %v6714_v50  ;;  %3721 = vmatprep.subr.bf16.mxu1 %v6714_v50  ;;  %v6762_v50 = vld [vmem:[%s8373_s1 + $0x124] ss:$8 sps:$4 sm:$0xff]  }
  0x8a   :  { %689 = vmatmul.mubr.bf16.gmra.mrb[4].mxu0 %v5296_v55  ;;  %3287 = vmatmul.mubr.bf16.gmra.mrb[4].mxu1 %v5880_v56  ;;  %v7509_v55 = vld [vmem:[%s8374_s0 + $0x1a0] sm:$0xff] }
  0x8b   :  { %1124 = vmatpush1.bf16.msra.mxu0 %v6712_v57  ;;  %3722 = vmatpush1.bf16.msra.mxu1 %v6712_v57  ;;  %v7514_v56 = vld [vmem:[%s8374_s0 + $0x1c0] sm:$0xff] }
  0x8c   :  { %1125 = vmatprep.subr.bf16.mxu0 %v6717_v58  ;;  %3723 = vmatprep.subr.bf16.mxu1 %v6717_v58  ;;  %v6760_v57 = vld [vmem:[%s8373_s1 + $0x120] ss:$8 sps:$4 sm:$0xff]   ;;  %v6765_v58 = vld [vmem:[%s8373_s1 + $0x134] ss:$8 sps:$4 sm:$0xff]   ;;  %v5962_v1 = vcombine.low %v7509_v55, %v7514_v56 }
  0x8d   :  { %698 = vmatprep.mubr.bf16.mxu0 %v5301_v59  ;;  %3296 = vmatprep.mubr.bf16.mxu1 %v5885_v60  ;;  %v5379_v59 = vcombine.high %v7495_v51, %v7504_v54  ;;  %v5963_v60 = vcombine.high %v7509_v55, %v7514_v56 }
  0x8f   :  { %1126 = vmatpush1.bf16.msra.mxu0 %v6715_v61  ;;  %3724 = vmatpush1.bf16.msra.mxu1 %v6715_v61  ;;  %v6763_v61 = vld [vmem:[%s8373_s1 + $0x130] ss:$8 sps:$4 sm:$0xff]  }
  0x90   :  { %1127 = vmatprep.subr.bf16.mxu0 %v6720_v62  ;;  %3725 = vmatprep.subr.bf16.mxu1 %v6720_v62  ;;  %v6768_v62 = vld [vmem:[%s8373_s1 + $0x144] ss:$8 sps:$4 sm:$0xff]  }
  0x92   :  { %699 = vmatmul.mubr.bf16.gmra.mrb[8].mxu0 %v5300_v3  ;;  %3297 = vmatmul.mubr.bf16.gmra.mrb[8].mxu1 %v5884_v4  ;;  %v7549_v3 = vld [vmem:[%s8374_s0 + $0x1e0] sm:$0xff] }
  0x93   :  { %1128 = vmatpush1.bf16.msra.mxu0 %v6718_v5  ;;  %3726 = vmatpush1.bf16.msra.mxu1 %v6718_v5  ;;  %v7554_v4 = vld [vmem:[%s8374_s0 + $0x200] sm:$0xff] }
  0x94   :  { %1129 = vmatprep.subr.bf16.mxu0 %v6723_v6  ;;  %3727 = vmatprep.subr.bf16.mxu1 %v6723_v6  ;;  %v6766_v5 = vld [vmem:[%s8373_s1 + $0x140] ss:$8 sps:$4 sm:$0xff]   ;;  %v6771_v6 = vld [vmem:[%s8373_s1 + $0x154] ss:$8 sps:$4 sm:$0xff]  }
  0x95   :  { %708 = vmatprep.mubr.bf16.mxu0 %v5305_v7  ;;  %3306 = vmatprep.mubr.bf16.mxu1 %v5889_v8  ;;  %v5383_v7 = vcombine.high %v7535_v63, %v7544_v2  ;;  %v5967_v8 = vcombine.high %v7549_v3, %v7554_v4 }
  0x97   :  { %1130 = vmatpush1.bf16.msra.mxu0 %v6721_v9  ;;  %3728 = vmatpush1.bf16.msra.mxu1 %v6721_v9  ;;  %v6769_v9 = vld [vmem:[%s8373_s1 + $0x150] ss:$8 sps:$4 sm:$0xff]  }
  0x98   :  { %1131 = vmatprep.subr.bf16.mxu0 %v6726_v10  ;;  %3729 = vmatprep.subr.bf16.mxu1 %v6726_v10  ;;  %v6774_v10 = vld [vmem:[%s8373_s1 + $0x164] ss:$8 sps:$4 sm:$0xff]  }
  0x9a   :  { %709 = vmatmul.mubr.bf16.gmra.mrb[12].mxu0 %v5304_v12  ;;  %3307 = vmatmul.mubr.bf16.gmra.mrb[12].mxu1 %v5888_v13  ;;  %v5382_v12 = vcombine.low %v7535_v63, %v7544_v2  ;;  %v5966_v13 = vcombine.low %v7549_v3, %v7554_v4 }
  0x9b   :  { %1132 = vmatpush1.bf16.msra.mxu0 %v6724_v17  ;;  %3730 = vmatpush1.bf16.msra.mxu1 %v6724_v17  ;;  %v7589_v17 = vld [vmem:[%s8374_s0 + $0x128] sm:$0xff] }
  0x9c   :  { %1133 = vmatprep.subr.bf16.mxu0 %v6729_v18  ;;  %3731 = vmatprep.subr.bf16.mxu1 %v6729_v18  ;;  %v7594_v18 = vld [vmem:[%s8374_s0 + $0x148] sm:$0xff] }
  0x9d   :  { %1151 = vmatprep.mubr.bf16.mxu0 %v5371_v19  ;;  %3749 = vmatprep.mubr.bf16.mxu1 %v5955_v20  ;;  %v6772_v19 = vld [vmem:[%s8373_s1 + $0x160] ss:$8 sps:$4 sm:$0xff]   ;;  %v6777_v20 = vld [vmem:[%s8373_s1 + $0x174] ss:$8 sps:$4 sm:$0xff]  }
  0x9f   :  { %1134 = vmatpush1.bf16.msra.mxu0 %v6727_v21  ;;  %3732 = vmatpush1.bf16.msra.mxu1 %v6727_v21  ;;  %v5373_v21 = vcombine.high %v7575_v11, %v7584_v15 }
  0xa0   :  { %1135 = vmatprep.subr.bf16.mxu0 %v6732_v22  ;;  %3733 = vmatprep.subr.bf16.mxu1 %v6732_v22  ;;  %v5957_v22 = vcombine.high %v7589_v17, %v7594_v18 }
  0xa3   :  { %1136 = vmatpush1.bf16.msra.mxu0 %v6730_v23  ;;  %3734 = vmatpush1.bf16.msra.mxu1 %v6730_v23  ;;  %v6775_v23 = vld [vmem:[%s8373_s1 + $0x170] ss:$8 sps:$4 sm:$0xff]  }
  0xa4   :  { %1137 = vmatprep.subr.bf16.mxu0 %v6735_v24  ;;  %3735 = vmatprep.subr.bf16.mxu1 %v6735_v24  ;;  %v6780_v24 = vld [vmem:[%s8373_s1 + $0x184] ss:$8 sps:$4 sm:$0xff]  }
  0xa7   :  { %1138 = vmatpush1.bf16.msra.mxu0 %v6733_v25  ;;  %3736 = vmatpush1.bf16.msra.mxu1 %v6733_v25  ;;  %v6778_v25 = vld [vmem:[%s8373_s1 + $0x180] ss:$8 sps:$4 sm:$0xff]  }
  0xa8   :  { %1139 = vmatprep.subr.bf16.mxu0 %v6738_v26  ;;  %3737 = vmatprep.subr.bf16.mxu1 %v6738_v26  ;;  %v6783_v26 = vld [vmem:[%s8373_s1 + $0x194] ss:$8 sps:$4 sm:$0xff]  }
  0xab   :  { %1140 = vmatpush1.bf16.msra.mxu0 %v6736_v27  ;;  %3738 = vmatpush1.bf16.msra.mxu1 %v6736_v27  ;;  %v6781_v27 = vld [vmem:[%s8373_s1 + $0x190] ss:$8 sps:$4 sm:$0xff]  }
  0xac   :  { %1141 = vmatprep.subr.bf16.mxu0 %v6741_v28  ;;  %3739 = vmatprep.subr.bf16.mxu1 %v6741_v28  ;;  %v6786_v28 = vld [vmem:[%s8373_s1 + $0x1a4] ss:$8 sps:$4 sm:$0xff]  }
  0xaf   :  { %1142 = vmatpush1.bf16.msra.mxu0 %v6739_v29  ;;  %3740 = vmatpush1.bf16.msra.mxu1 %v6739_v29  ;;  %v6784_v29 = vld [vmem:[%s8373_s1 + $0x1a0] ss:$8 sps:$4 sm:$0xff]  }
  0xb0   :  { %1143 = vmatprep.subr.bf16.mxu0 %v6744_v30  ;;  %3741 = vmatprep.subr.bf16.mxu1 %v6744_v30  ;;  %v6789_v30 = vld [vmem:[%s8373_s1 + $0x1b4] ss:$8 sps:$4 sm:$0xff]  }
  0xb3   :  { %1144 = vmatpush1.bf16.msra.mxu0 %v6742_v31  ;;  %3742 = vmatpush1.bf16.msra.mxu1 %v6742_v31  ;;  %v6787_v31 = vld [vmem:[%s8373_s1 + $0x1b0] ss:$8 sps:$4 sm:$0xff]  }
  0xb4   :  { %1145 = vmatprep.subr.bf16.mxu0 %v6747_v32  ;;  %3743 = vmatprep.subr.bf16.mxu1 %v6747_v32  ;;  %v6792_v32 = vld [vmem:[%s8373_s1 + $0x1c4] ss:$8 sps:$4 sm:$0xff]  }
  0xb7   :  { %1146 = vmatpush1.bf16.msra.mxu0 %v6745_v33  ;;  %3744 = vmatpush1.bf16.msra.mxu1 %v6745_v33  ;;  %v6790_v33 = vld [vmem:[%s8373_s1 + $0x1c0] ss:$8 sps:$4 sm:$0xff]  }
  0xb8   :  { %1147 = vmatprep.subr.bf16.mxu0 %v6750_v34  ;;  %3745 = vmatprep.subr.bf16.mxu1 %v6750_v34  ;;  %v6795_v34 = vld [vmem:[%s8373_s1 + $0x1d4] ss:$8 sps:$4 sm:$0xff]  }
  0xbb   :  { %1148 = vmatpush1.bf16.msra.mxu0 %v6748_v35  ;;  %3746 = vmatpush1.bf16.msra.mxu1 %v6748_v35  ;;  %v6793_v35 = vld [vmem:[%s8373_s1 + $0x1d0] ss:$8 sps:$4 sm:$0xff]  }
  0xbc   :  { %1149 = vmatprep.subr.bf16.mxu0 %v6753_v36  ;;  %3747 = vmatprep.subr.bf16.mxu1 %v6753_v36  ;;  %v6798_v36 = vld [vmem:[%s8373_s1 + $0x1e4] ss:$8 sps:$4 sm:$0xff]  }
  0xbf   :  { %1150 = vmatpush1.bf16.msra.mxu0 %v6751_v37  ;;  %3748 = vmatpush1.bf16.msra.mxu1 %v6751_v37  ;;  %v6796_v37 = vld [vmem:[%s8373_s1 + $0x1e0] ss:$8 sps:$4 sm:$0xff]  }
  0xc0   :  { %1192 = vmatprep.subr.bf16.mxu0 %v6756_v38  ;;  %3790 = vmatprep.subr.bf16.mxu1 %v6756_v38  ;;  %v6801_v38 = vld [vmem:[%s8373_s1 + $0x1f4] ss:$8 sps:$4 sm:$0xff]  }
  0xc2   :  { %1152 = vmatmul.mubr.bf16.vlgmr.msra.gmra.mrb[0].mxu0 %v5370_v40  ;;  %3750 = vmatmul.mubr.bf16.vlgmr.msra.gmra.mrb[0].mxu1 %v5954_v41  ;;  %v6799_v40 = vld [vmem:[%s8373_s1 + $0x1f0] ss:$8 sps:$4 sm:$0xff]   ;;  %v6804_v41 = vld [vmem:[%s8373_s1 + $0x404] ss:$8 sps:$4 sm:$0xff]  }
  0xc3   :  { %1193 = vmatpush1.bf16.msra.mxu0 %v6754_v45  ;;  %3791 = vmatpush1.bf16.msra.mxu1 %v6754_v45  ;;  %v7663_v45 = vld [vmem:[%s8374_s0 + $0x48] sm:$0xff] }
  0xc4   :  { %1194 = vmatprep.subr.bf16.mxu0 %v6759_v46  ;;  %3792 = vmatprep.subr.bf16.mxu1 %v6759_v46  ;;  %v5372_v46 = vcombine.low %v7575_v11, %v7584_v15  ;;  %v6811_v11 = vld [vmem:[%s8373_s1 + $0x430] ss:$8 sps:$4 sm:$0xff]  }
  0xc5   :  { %1161 = vmatprep.mubr.bf16.mxu0 %v5375_v47  ;;  %3759 = vmatprep.mubr.bf16.mxu1 %v5959_v48  ;;  %v5956_v47 = vcombine.low %v7589_v17, %v7594_v18  ;;  %v7672_v48 = vld [vmem:[%s8374_s0 + $0x68] sm:$0xff] }
  0xc7   :  { %1195 = vmatpush1.bf16.msra.mxu0 %v6757_v49  ;;  %3793 = vmatpush1.bf16.msra.mxu1 %v6757_v49  ;;  %v7677_v49 = vld [vmem:[%s8374_s0 + $0x168] sm:$0xff] }
  0xc8   :  { %1196 = vmatprep.subr.bf16.mxu0 %v6762_v50  ;;  %3794 = vmatprep.subr.bf16.mxu1 %v6762_v50  ;;  %v7682_v50 = vld [vmem:[%s8374_s0 + $0x188] sm:$0xff] }
  0xca   :  { %1162 = vmatmul.mubr.bf16.gmra.mrb[4].mxu0 %v5374_v52  ;;  %3760 = vmatmul.mubr.bf16.gmra.mrb[4].mxu1 %v5958_v53  ;;  %v6802_v52 = vld [vmem:[%s8373_s1 + $0x400] ss:$8 sps:$4 sm:$0xff]   ;;  %v6807_v53 = vld [vmem:[%s8373_s1 + $0x414] ss:$8 sps:$4 sm:$0xff]  }
  0xcb   :  { %1197 = vmatpush1.bf16.msra.mxu0 %v6760_v57  ;;  %3795 = vmatpush1.bf16.msra.mxu1 %v6760_v57  ;;  %v5377_v57 = vcombine.high %v7663_v45, %v7672_v48 }
  0xcc   :  { %1198 = vmatprep.subr.bf16.mxu0 %v6765_v58  ;;  %3796 = vmatprep.subr.bf16.mxu1 %v6765_v58  ;;  %v5961_v58 = vcombine.high %v7677_v49, %v7682_v50 }
  0xcd   :  { %1171 = vmatprep.mubr.bf16.mxu0 %v5379_v59  ;;  %3769 = vmatprep.mubr.bf16.mxu1 %v5963_v60  ;;  %v6805_v59 = vld [vmem:[%s8373_s1 + $0x410] ss:$8 sps:$4 sm:$0xff]   ;;  %v6810_v60 = vld [vmem:[%s8373_s1 + $0x424] ss:$8 sps:$4 sm:$0xff]  }
  0xcf   :  { %1199 = vmatpush1.bf16.msra.mxu0 %v6763_v61  ;;  %3797 = vmatpush1.bf16.msra.mxu1 %v6763_v61  ;;  %v7703_v61 = vld [vmem:[%s8374_s0 + $0x88] sm:$0xff] }
  0xd0   :  { %1200 = vmatprep.subr.bf16.mxu0 %v6768_v62  ;;  %3798 = vmatprep.subr.bf16.mxu1 %v6768_v62  ;;  %v5376_v62 = vcombine.low %v7663_v45, %v7672_v48 }
  0xd2   :  { %1172 = vmatmul.mubr.bf16.gmra.mrb[8].mxu0 %v5378_v0  ;;  %3770 = vmatmul.mubr.bf16.gmra.mrb[8].mxu1 %v5962_v1  ;;  %v5960_v0 = vcombine.low %v7677_v49, %v7682_v50  ;;  %v7712_v1 = vld [vmem:[%s8374_s0 + $0xa8] sm:$0xff] }
  0xd3   :  { %1201 = vmatpush1.bf16.msra.mxu0 %v6766_v5  ;;  %3799 = vmatpush1.bf16.msra.mxu1 %v6766_v5  ;;  %v7717_v5 = vld [vmem:[%s8374_s0 + $0x1a8] sm:$0xff]  ;;  %v5380_v17 = vcombine.low %v7703_v61, %v7712_v1 }
  0xd4   :  { %1202 = vmatprep.subr.bf16.mxu0 %v6771_v6  ;;  %3800 = vmatprep.subr.bf16.mxu1 %v6771_v6  ;;  %v7722_v6 = vld [vmem:[%s8374_s0 + $0x1c8] sm:$0xff] }
  0xd5   :  { %1181 = vmatprep.mubr.bf16.mxu0 %v5383_v7  ;;  %3779 = vmatprep.mubr.bf16.mxu1 %v5967_v8  ;;  %v6808_v7 = vld [vmem:[%s8373_s1 + $0x420] ss:$8 sps:$4 sm:$0xff]   ;;  %v6813_v8 = vld [vmem:[%s8373_s1 + $0x434] ss:$8 sps:$4 sm:$0xff]  }
  0xd7   :  { %1203 = vmatpush1.bf16.msra.mxu0 %v6769_v9  ;;  %3801 = vmatpush1.bf16.msra.mxu1 %v6769_v9  ;;  %v5381_v9 = vcombine.high %v7703_v61, %v7712_v1 }
  0xd8   :  { %1204 = vmatprep.subr.bf16.mxu0 %v6774_v10  ;;  %3802 = vmatprep.subr.bf16.mxu1 %v6774_v10  ;;  %v5965_v10 = vcombine.high %v7717_v5, %v7722_v6 }
  0xda   :  { %1182 = vmatmul.mubr.bf16.gmra.mrb[12].mxu0 %v5382_v12  ;;  %3780 = vmatmul.mubr.bf16.gmra.mrb[12].mxu1 %v5966_v13  ;;  %v6816_v12 = vld [vmem:[%s8373_s1 + $0x444] ss:$8 sps:$4 sm:$0xff]  }
  0xdb   :  { %1205 = vmatpush1.bf16.msra.mxu0 %v6772_v19  ;;  %3803 = vmatpush1.bf16.msra.mxu1 %v6772_v19  ;;  %v7743_v13 = vld [vmem:[%s8374_s0 + $0xc8] sm:$0xff]  ;;  %v5964_v19 = vcombine.low %v7717_v5, %v7722_v6 }
  0xdc   :  { %1206 = vmatprep.subr.bf16.mxu0 %v6777_v20  ;;  %3804 = vmatprep.subr.bf16.mxu1 %v6777_v20  ;;  %v7752_v20 = vld [vmem:[%s8374_s0 + $0xe8] sm:$0xff] }
  0xdd   :  { %1224 = vmatprep.mubr.bf16.mxu0 %v5373_v21  ;;  %3822 = vmatprep.mubr.bf16.mxu1 %v5957_v22  ;;  %v7757_v21 = vld [vmem:[%s8374_s0 + $0x1e8] sm:$0xff] }
  0xde   :  { %v7762_v22 = vld [vmem:[%s8374_s0 + $0x208] sm:$0xff] }
  0xdf   :  { %1207 = vmatpush1.bf16.msra.mxu0 %v6775_v23  ;;  %3805 = vmatpush1.bf16.msra.mxu1 %v6775_v23  ;;  %v6814_v23 = vld [vmem:[%s8373_s1 + $0x440] ss:$8 sps:$4 sm:$0xff]  }
  0xe0   :  { %1208 = vmatprep.subr.bf16.mxu0 %v6780_v24  ;;  %3806 = vmatprep.subr.bf16.mxu1 %v6780_v24  ;;  %v6819_v24 = vld [vmem:[%s8373_s1 + $0x454] ss:$8 sps:$4 sm:$0xff]  }
  0xe3   :  { %1209 = vmatpush1.bf16.msra.mxu0 %v6778_v25  ;;  %3807 = vmatpush1.bf16.msra.mxu1 %v6778_v25  ;;  %v5385_v25 = vcombine.high %v7743_v13, %v7752_v20 }
  0xe4   :  { %1210 = vmatprep.subr.bf16.mxu0 %v6783_v26  ;;  %3808 = vmatprep.subr.bf16.mxu1 %v6783_v26  ;;  %v5969_v26 = vcombine.high %v7757_v21, %v7762_v22 }
  0xe7   :  { %1211 = vmatpush1.bf16.msra.mxu0 %v6781_v27  ;;  %3809 = vmatpush1.bf16.msra.mxu1 %v6781_v27  ;;  %v6817_v27 = vld [vmem:[%s8373_s1 + $0x450] ss:$8 sps:$4 sm:$0xff]  }
  0xe8   :  { %1212 = vmatprep.subr.bf16.mxu0 %v6786_v28  ;;  %3810 = vmatprep.subr.bf16.mxu1 %v6786_v28  ;;  %v6822_v28 = vld [vmem:[%s8373_s1 + $0x464] ss:$8 sps:$4 sm:$0xff]  }
  0xeb   :  { %1213 = vmatpush1.bf16.msra.mxu0 %v6784_v29  ;;  %3811 = vmatpush1.bf16.msra.mxu1 %v6784_v29  ;;  %v5384_v29 = vcombine.low %v7743_v13, %v7752_v20 }
  0xec   :  { %1214 = vmatprep.subr.bf16.mxu0 %v6789_v30  ;;  %3812 = vmatprep.subr.bf16.mxu1 %v6789_v30  ;;  %v5968_v30 = vcombine.low %v7757_v21, %v7762_v22 }
  0xef   :  { %1215 = vmatpush1.bf16.msra.mxu0 %v6787_v31  ;;  %3813 = vmatpush1.bf16.msra.mxu1 %v6787_v31  ;;  %v6820_v31 = vld [vmem:[%s8373_s1 + $0x460] ss:$8 sps:$4 sm:$0xff]  }
  0xf0   :  { %1216 = vmatprep.subr.bf16.mxu0 %v6792_v32  ;;  %3814 = vmatprep.subr.bf16.mxu1 %v6792_v32  ;;  %v6825_v32 = vld [vmem:[%s8373_s1 + $0x474] ss:$8 sps:$4 sm:$0xff]  }
  0xf3   :  { %1217 = vmatpush1.bf16.msra.mxu0 %v6790_v33  ;;  %3815 = vmatpush1.bf16.msra.mxu1 %v6790_v33  ;;  %v5531_v33 = vcombine.high %v7376_v14, %v7455_v39 }
  0xf4   :  { %1218 = vmatprep.subr.bf16.mxu0 %v6795_v34  ;;  %3816 = vmatprep.subr.bf16.mxu1 %v6795_v34  ;;  %v6115_v34 = vcombine.high %v7386_v16, %v7469_v43 }
  0xf7   :  { %1219 = vmatpush1.bf16.msra.mxu0 %v6793_v35  ;;  %3817 = vmatpush1.bf16.msra.mxu1 %v6793_v35  ;;  %v6823_v35 = vld [vmem:[%s8373_s1 + $0x470] ss:$8 sps:$4 sm:$0xff]  }
  0xf8   :  { %1220 = vmatprep.subr.bf16.mxu0 %v6798_v36  ;;  %3818 = vmatprep.subr.bf16.mxu1 %v6798_v36  ;;  %v6828_v36 = vld [vmem:[%s8373_s1 + $0x484] ss:$8 sps:$4 sm:$0xff]  }
  0xfb   :  { %1221 = vmatpush1.bf16.msra.mxu0 %v6796_v37  ;;  %3819 = vmatpush1.bf16.msra.mxu1 %v6796_v37  ;;  %v6826_v37 = vld [vmem:[%s8373_s1 + $0x480] ss:$8 sps:$4 sm:$0xff]  }
  0xfc   :  { %1222 = vmatprep.subr.bf16.mxu0 %v6801_v38  ;;  %3820 = vmatprep.subr.bf16.mxu1 %v6801_v38  ;;  %v6831_v38 = vld [vmem:[%s8373_s1 + $0x494] ss:$8 sps:$4 sm:$0xff]  }
  0xff   :  { %1223 = vmatpush1.bf16.msra.mxu0 %v6799_v40  ;;  %3821 = vmatpush1.bf16.msra.mxu1 %v6799_v40  ;;  %v6829_v40 = vld [vmem:[%s8373_s1 + $0x490] ss:$8 sps:$4 sm:$0xff]  }
 0x100   :  { %1747 = vmatprep.subr.bf16.mxu0 %v6804_v41  ;;  %4344 = vmatprep.subr.bf16.mxu1 %v6804_v41  ;;  %v6834_v41 = vld [vmem:[%s8373_s1 + $0x4a4] ss:$8 sps:$4 sm:$0xff]  }
 0x102   :  { %1225 = vmatmul.mubr.bf16.vlgmr.msra.gmra.mrb[0].mxu0 %v5372_v46  ;;  %3823 = vmatmul.mubr.bf16.vlgmr.msra.gmra.mrb[0].mxu1 %v5956_v47  ;;  %v6832_v46 = vld [vmem:[%s8373_s1 + $0x4a0] ss:$8 sps:$4 sm:$0xff]   ;;  %v6837_v47 = vld [vmem:[%s8373_s1 + $0x4b4] ss:$8 sps:$4 sm:$0xff]  }
 0x103   :  { %1748 = vmatpush1.bf16.msra.mxu0 %v6802_v52  ;;  %4345 = vmatpush1.bf16.msra.mxu1 %v6802_v52  ;;  %v6835_v52 = vld [vmem:[%s8373_s1 + $0x4b0] ss:$8 sps:$4 sm:$0xff]  }
 0x104   :  { %1749 = vmatprep.subr.bf16.mxu0 %v6807_v53  ;;  %4346 = vmatprep.subr.bf16.mxu1 %v6807_v53  ;;  %v6840_v53 = vld [vmem:[%s8373_s1 + $0x4c4] ss:$8 sps:$4 sm:$0xff]  }
 0x105   :  { %1234 = vmatprep.mubr.bf16.mxu0 %v5377_v57  ;;  %3832 = vmatprep.mubr.bf16.mxu1 %v5961_v58  ;;  %v6838_v57 = vld [vmem:[%s8373_s1 + $0x4c0] ss:$8 sps:$4 sm:$0xff]   ;;  %v6843_v58 = vld [vmem:[%s8373_s1 + $0x4d4] ss:$8 sps:$4 sm:$0xff]  }
 0x107   :  { %1750 = vmatpush1.bf16.msra.mxu0 %v6805_v59  ;;  %4347 = vmatpush1.bf16.msra.mxu1 %v6805_v59  ;;  %v6841_v59 = vld [vmem:[%s8373_s1 + $0x4d0] ss:$8 sps:$4 sm:$0xff]  }
 0x108   :  { %1751 = vmatprep.subr.bf16.mxu0 %v6810_v60  ;;  %4348 = vmatprep.subr.bf16.mxu1 %v6810_v60  ;;  %v6846_v60 = vld [vmem:[%s8373_s1 + $0x4e4] ss:$8 sps:$4 sm:$0xff]  }
 0x10a   :  { %1235 = vmatmul.mubr.bf16.gmra.mrb[4].mxu0 %v5376_v62  ;;  %3833 = vmatmul.mubr.bf16.gmra.mrb[4].mxu1 %v5960_v0  ;;  %v6844_v62 = vld [vmem:[%s8373_s1 + $0x4e0] ss:$8 sps:$4 sm:$0xff]   ;;  %v6849_v0 = vld [vmem:[%s8373_s1 + $0x4f4] ss:$8 sps:$4 sm:$0xff]  }
 0x10b   :  { %1752 = vmatpush1.bf16.msra.mxu0 %v6808_v7  ;;  %4349 = vmatpush1.bf16.msra.mxu1 %v6808_v7  ;;  %v6847_v7 = vld [vmem:[%s8373_s1 + $0x4f0] ss:$8 sps:$4 sm:$0xff]  }
 0x10c   :  { %1753 = vmatprep.subr.bf16.mxu0 %v6813_v8  ;;  %4350 = vmatprep.subr.bf16.mxu1 %v6813_v8  ;;  %v6852_v8 = vld [vmem:[%s8373_s1 + $0x504] ss:$8 sps:$4 sm:$0xff]  }
 0x10d   :  { %1244 = vmatprep.mubr.bf16.mxu0 %v5381_v9  ;;  %3842 = vmatprep.mubr.bf16.mxu1 %v5965_v10  ;;  %v5530_v9 = vcombine.low %v7376_v14, %v7455_v39  ;;  %v6114_v10 = vcombine.low %v7386_v16, %v7469_v43  ;;  %v6119_v14 = vcombine.high %v7474_v44, %v7509_v55  ;;  %v6853_v16 = vld [vmem:[%s8373_s1 + $0x510] ss:$8 sps:$4 sm:$0xff]   ;;  %v6858_v39 = vld [vmem:[%s8373_s1 + $0x524] ss:$8 sps:$4 sm:$0xff]  }
 0x10e   :  { %v5534_v43 = vcombine.low %v7464_v42, %v7495_v51 }
 0x10f   :  { %1754 = vmatpush1.bf16.msra.mxu0 %v6811_v11  ;;  %4351 = vmatpush1.bf16.msra.mxu1 %v6811_v11  ;;  %v6850_v11 = vld [vmem:[%s8373_s1 + $0x500] ss:$8 sps:$4 sm:$0xff]  }
 0x110   :  { %1755 = vmatprep.subr.bf16.mxu0 %v6816_v12  ;;  %4352 = vmatprep.subr.bf16.mxu1 %v6816_v12  ;;  %v6855_v12 = vld [vmem:[%s8373_s1 + $0x514] ss:$8 sps:$4 sm:$0xff]  }
 0x112   :  { %1245 = vmatmul.mubr.bf16.gmra.mrb[8].mxu0 %v5380_v17  ;;  %3843 = vmatmul.mubr.bf16.gmra.mrb[8].mxu1 %v5964_v19  ;;  %v5535_v17 = vcombine.high %v7464_v42, %v7495_v51  ;;  %v6118_v19 = vcombine.low %v7474_v44, %v7509_v55  ;;  %v6123_v42 = vcombine.high %v7514_v56, %v7549_v3  ;;  %v6859_v44 = vld [vmem:[%s8373_s1 + $0x530] ss:$8 sps:$4 sm:$0xff]   ;;  %v6864_v51 = vld [vmem:[%s8373_s1 + $0x544] ss:$8 sps:$4 sm:$0xff]  }
 0x113   :  { %1756 = vmatpush1.bf16.msra.mxu0 %v6814_v23  ;;  %4353 = vmatpush1.bf16.msra.mxu1 %v6814_v23  ;;  %v6856_v23 = vld [vmem:[%s8373_s1 + $0x520] ss:$8 sps:$4 sm:$0xff]   ;;  %v5538_v55 = vcombine.low %v7504_v54, %v7535_v63 }
 0x114   :  { %1757 = vmatprep.subr.bf16.mxu0 %v6819_v24  ;;  %4354 = vmatprep.subr.bf16.mxu1 %v6819_v24  ;;  %v6861_v24 = vld [vmem:[%s8373_s1 + $0x534] ss:$8 sps:$4 sm:$0xff]  }
 0x115   :  { %1254 = vmatprep.mubr.bf16.mxu0 %v5385_v25  ;;  %3852 = vmatprep.mubr.bf16.mxu1 %v5969_v26  ;;  %v5539_v25 = vcombine.high %v7504_v54, %v7535_v63  ;;  %v6122_v26 = vcombine.low %v7514_v56, %v7549_v3  ;;  %v6867_v54 = vld [vmem:[%s8373_s1 + $0x554] ss:$8 sps:$4 sm:$0xff]   ;;  %v6865_v3 = vld [vmem:[%s8373_s1 + $0x550] ss:$8 sps:$4 sm:$0xff]  }
 0x117   :  { %1758 = vmatpush1.bf16.msra.mxu0 %v6817_v27  ;;  %4355 = vmatpush1.bf16.msra.mxu1 %v6817_v27  ;;  %v5464_v27 = vld [vmem:[%s8374_s0 + $0x100] sm:$0xff] }
 0x118   :  { %1759 = vmatprep.subr.bf16.mxu0 %v6822_v28  ;;  %4356 = vmatprep.subr.bf16.mxu1 %v6822_v28  ;;  %v6048_v28 = vld [vmem:[%s8374_s0 + $0x220] sm:$0xff]  ;;  %v5543_v56 = vcombine.high %v7544_v2, %v5464_v27 }
 0x119   :  { %v6127_v63 = vcombine.high %v7554_v4, %v6048_v28 }
 0x11a   :  { %1255 = vmatmul.mubr.bf16.gmra.mrb[12].mxu0 %v5384_v29  ;;  %3853 = vmatmul.mubr.bf16.gmra.mrb[12].mxu1 %v5968_v30  ;;  %v6862_v29 = vld [vmem:[%s8373_s1 + $0x540] ss:$8 sps:$4 sm:$0xff]   ;;  %v6870_v30 = vld [vmem:[%s8373_s1 + $0x564] ss:$8 sps:$4 sm:$0xff]  }
 0x11b   :  { %1760 = vmatpush1.bf16.msra.mxu0 %v6820_v31  ;;  %4357 = vmatpush1.bf16.msra.mxu1 %v6820_v31  ;;  %v5542_v31 = vcombine.low %v7544_v2, %v5464_v27  ;;  %v6117_v2 = vcombine.high %v7594_v18, %v7677_v49  ;;  %v8057_v27 = vld [vmem:[%s8374_s0 + $0x150] sm:$0xff] }
 0x11c   :  { %1761 = vmatprep.subr.bf16.mxu0 %v6825_v32  ;;  %4358 = vmatprep.subr.bf16.mxu1 %v6825_v32  ;;  %v6126_v32 = vcombine.low %v7554_v4, %v6048_v28  ;;  %v6871_v4 = vld [vmem:[%s8373_s1 + $0x570] ss:$8 sps:$4 sm:$0xff]  }
 0x11d   :  { %1779 = vmatprep.mubr.bf16.mxu0 %v5531_v33  ;;  %4376 = vmatprep.mubr.bf16.mxu1 %v6115_v34  ;;  %v6868_v33 = vld [vmem:[%s8373_s1 + $0x560] ss:$8 sps:$4 sm:$0xff]   ;;  %v6873_v34 = vld [vmem:[%s8373_s1 + $0x574] ss:$8 sps:$4 sm:$0xff]  }
 0x11e   :  { %v8062_v28 = vld [vmem:[%s8374_s0 + $0x170] sm:$0xff] }
 0x11f   :  { %1762 = vmatpush1.bf16.msra.mxu0 %v6823_v35  ;;  %4359 = vmatpush1.bf16.msra.mxu1 %v6823_v35  ;;  %v5533_v35 = vcombine.high %v7584_v15, %v7663_v45 }
 0x120   :  { %1763 = vmatprep.subr.bf16.mxu0 %v6828_v36  ;;  %4360 = vmatprep.subr.bf16.mxu1 %v6828_v36  ;;  %v6876_v36 = vld [vmem:[%s8373_s1 + $0x584] ss:$8 sps:$4 sm:$0xff]  }
 0x123   :  { %1764 = vmatpush1.bf16.msra.mxu0 %v6826_v37  ;;  %4361 = vmatpush1.bf16.msra.mxu1 %v6826_v37  ;;  %v6874_v37 = vld [vmem:[%s8373_s1 + $0x580] ss:$8 sps:$4 sm:$0xff]  }
 0x124   :  { %1765 = vmatprep.subr.bf16.mxu0 %v6831_v38  ;;  %4362 = vmatprep.subr.bf16.mxu1 %v6831_v38  ;;  %v6879_v38 = vld [vmem:[%s8373_s1 + $0x594] ss:$8 sps:$4 sm:$0xff]  }
 0x127   :  { %1766 = vmatpush1.bf16.msra.mxu0 %v6829_v40  ;;  %4363 = vmatpush1.bf16.msra.mxu1 %v6829_v40  ;;  %v6877_v40 = vld [vmem:[%s8373_s1 + $0x590] ss:$8 sps:$4 sm:$0xff]  }
 0x128   :  { %1767 = vmatprep.subr.bf16.mxu0 %v6834_v41  ;;  %4364 = vmatprep.subr.bf16.mxu1 %v6834_v41  ;;  %v6882_v41 = vld [vmem:[%s8373_s1 + $0x5a4] ss:$8 sps:$4 sm:$0xff]  }
 0x12b   :  { %1768 = vmatpush1.bf16.msra.mxu0 %v6832_v46  ;;  %4365 = vmatpush1.bf16.msra.mxu1 %v6832_v46  ;;  %v6880_v46 = vld [vmem:[%s8373_s1 + $0x5a0] ss:$8 sps:$4 sm:$0xff]  }
 0x12c   :  { %1769 = vmatprep.subr.bf16.mxu0 %v6837_v47  ;;  %4366 = vmatprep.subr.bf16.mxu1 %v6837_v47  ;;  %v6885_v47 = vld [vmem:[%s8373_s1 + $0x5b4] ss:$8 sps:$4 sm:$0xff]  }
 0x12f   :  { %1770 = vmatpush1.bf16.msra.mxu0 %v6835_v52  ;;  %4367 = vmatpush1.bf16.msra.mxu1 %v6835_v52  ;;  %v6883_v52 = vld [vmem:[%s8373_s1 + $0x5b0] ss:$8 sps:$4 sm:$0xff]  }
 0x130   :  { %1771 = vmatprep.subr.bf16.mxu0 %v6840_v53  ;;  %4368 = vmatprep.subr.bf16.mxu1 %v6840_v53  ;;  %v6888_v53 = vld [vmem:[%s8373_s1 + $0x5c4] ss:$8 sps:$4 sm:$0xff]  }
 0x133   :  { %1772 = vmatpush1.bf16.msra.mxu0 %v6838_v57  ;;  %4369 = vmatpush1.bf16.msra.mxu1 %v6838_v57  ;;  %v6886_v57 = vld [vmem:[%s8373_s1 + $0x5c0] ss:$8 sps:$4 sm:$0xff]  }
 0x134   :  { %1773 = vmatprep.subr.bf16.mxu0 %v6843_v58  ;;  %4370 = vmatprep.subr.bf16.mxu1 %v6843_v58  ;;  %v6891_v58 = vld [vmem:[%s8373_s1 + $0x5d4] ss:$8 sps:$4 sm:$0xff]  }
 0x137   :  { %1774 = vmatpush1.bf16.msra.mxu0 %v6841_v59  ;;  %4371 = vmatpush1.bf16.msra.mxu1 %v6841_v59  ;;  %v6889_v59 = vld [vmem:[%s8373_s1 + $0x5d0] ss:$8 sps:$4 sm:$0xff]  }
 0x138   :  { %1775 = vmatprep.subr.bf16.mxu0 %v6846_v60  ;;  %4372 = vmatprep.subr.bf16.mxu1 %v6846_v60  ;;  %v6894_v60 = vld [vmem:[%s8373_s1 + $0x5e4] ss:$8 sps:$4 sm:$0xff]  }
 0x13b   :  { %1776 = vmatpush1.bf16.msra.mxu0 %v6844_v62  ;;  %4373 = vmatpush1.bf16.msra.mxu1 %v6844_v62  ;;  %v6892_v62 = vld [vmem:[%s8373_s1 + $0x5e0] ss:$8 sps:$4 sm:$0xff]  }
 0x13c   :  { %1777 = vmatprep.subr.bf16.mxu0 %v6849_v0  ;;  %4374 = vmatprep.subr.bf16.mxu1 %v6849_v0  ;;  %v6897_v0 = vld [vmem:[%s8373_s1 + $0x5f4] ss:$8 sps:$4 sm:$0xff]  }
 0x13f   :  { %1778 = vmatpush1.bf16.msra.mxu0 %v6847_v7  ;;  %4375 = vmatpush1.bf16.msra.mxu1 %v6847_v7  ;;  %v6895_v7 = vld [vmem:[%s8373_s1 + $0x5f0] ss:$8 sps:$4 sm:$0xff]  }
 0x140   :  { %1820 = vmatprep.subr.bf16.mxu0 %v6852_v8  ;;  %4417 = vmatprep.subr.bf16.mxu1 %v6852_v8  ;;  %v6900_v8 = vld [vmem:[%s8373_s1 + $0x604] ss:$8 sps:$4 sm:$0xff]  }
 0x142   :  { %1780 = vmatmul.mubr.bf16.vlgmr.msra.gmra.mrb[0].mxu0 %v5530_v9  ;;  %4377 = vmatmul.mubr.bf16.vlgmr.msra.gmra.mrb[0].mxu1 %v6114_v10  ;;  %v5532_v9 = vcombine.low %v7584_v15, %v7663_v45  ;;  %v6116_v10 = vcombine.low %v7594_v18, %v7677_v49  ;;  %v6121_v15 = vcombine.high %v7682_v50, %v7717_v5  ;;  %v6901_v18 = vld [vmem:[%s8373_s1 + $0x610] ss:$8 sps:$4 sm:$0xff]   ;;  %v6906_v45 = vld [vmem:[%s8373_s1 + $0x624] ss:$8 sps:$4 sm:$0xff]  }
 0x143   :  { %1821 = vmatpush1.bf16.msra.mxu0 %v6850_v11  ;;  %4418 = vmatpush1.bf16.msra.mxu1 %v6850_v11  ;;  %v6898_v11 = vld [vmem:[%s8373_s1 + $0x600] ss:$8 sps:$4 sm:$0xff]   ;;  %v5536_v49 = vcombine.low %v7672_v48, %v7703_v61 }
 0x144   :  { %1822 = vmatprep.subr.bf16.mxu0 %v6855_v12  ;;  %4419 = vmatprep.subr.bf16.mxu1 %v6855_v12  ;;  %v6903_v12 = vld [vmem:[%s8373_s1 + $0x614] ss:$8 sps:$4 sm:$0xff]  }
 0x145   :  { %1789 = vmatprep.mubr.bf16.mxu0 %v5535_v17  ;;  %4386 = vmatprep.mubr.bf16.mxu1 %v6119_v14  ;;  %v5537_v17 = vcombine.high %v7672_v48, %v7703_v61  ;;  %v6120_v14 = vcombine.low %v7682_v50, %v7717_v5  ;;  %v6125_v48 = vcombine.high %v7722_v6, %v7757_v21  ;;  %v6907_v50 = vld [vmem:[%s8373_s1 + $0x630] ss:$8 sps:$4 sm:$0xff]   ;;  %v6912_v61 = vld [vmem:[%s8373_s1 + $0x644] ss:$8 sps:$4 sm:$0xff]  }
 0x146   :  { %v5540_v5 = vcombine.low %v7712_v1, %v7743_v13 }
 0x147   :  { %1823 = vmatpush1.bf16.msra.mxu0 %v6853_v16  ;;  %4420 = vmatpush1.bf16.msra.mxu1 %v6853_v16  ;;  %v6904_v16 = vld [vmem:[%s8373_s1 + $0x620] ss:$8 sps:$4 sm:$0xff]  }
 0x148   :  { %1824 = vmatprep.subr.bf16.mxu0 %v6858_v39  ;;  %4421 = vmatprep.subr.bf16.mxu1 %v6858_v39  ;;  %v6909_v39 = vld [vmem:[%s8373_s1 + $0x634] ss:$8 sps:$4 sm:$0xff]  }
 0x14a   :  { %1790 = vmatmul.mubr.bf16.gmra.mrb[4].mxu0 %v5534_v43  ;;  %4387 = vmatmul.mubr.bf16.gmra.mrb[4].mxu1 %v6118_v19  ;;  %v5541_v43 = vcombine.high %v7712_v1, %v7743_v13  ;;  %v6124_v19 = vcombine.low %v7722_v6, %v7757_v21  ;;  %v6915_v1 = vld [vmem:[%s8373_s1 + $0x654] ss:$8 sps:$4 sm:$0xff]   ;;  %v6913_v21 = vld [vmem:[%s8373_s1 + $0x650] ss:$8 sps:$4 sm:$0xff]  }
 0x14b   :  { %1825 = vmatpush1.bf16.msra.mxu0 %v6856_v23  ;;  %4422 = vmatpush1.bf16.msra.mxu1 %v6856_v23  ;;  %v5465_v23 = vld [vmem:[%s8374_s0 + $0x108] sm:$0xff] }
 0x14c   :  { %1826 = vmatprep.subr.bf16.mxu0 %v6861_v24  ;;  %4423 = vmatprep.subr.bf16.mxu1 %v6861_v24  ;;  %v6049_v24 = vld [vmem:[%s8374_s0 + $0x228] sm:$0xff]  ;;  %v5545_v6 = vcombine.high %v7752_v20, %v5465_v23 }
 0x14d   :  { %1799 = vmatprep.mubr.bf16.mxu0 %v5539_v25  ;;  %4396 = vmatprep.mubr.bf16.mxu1 %v6123_v42  ;;  %v6910_v25 = vld [vmem:[%s8373_s1 + $0x640] ss:$8 sps:$4 sm:$0xff]   ;;  %v6129_v13 = vcombine.high %v7762_v22, %v6049_v24  ;;  %v6918_v42 = vld [vmem:[%s8373_s1 + $0x664] ss:$8 sps:$4 sm:$0xff]  }
 0x14f   :  { %1827 = vmatpush1.bf16.msra.mxu0 %v6859_v44  ;;  %4424 = vmatpush1.bf16.msra.mxu1 %v6859_v44  ;;  %v8045_v44 = vld [vmem:[%s8374_s0 + $0x30] sm:$0xff] }
 0x150   :  { %1828 = vmatprep.subr.bf16.mxu0 %v6864_v51  ;;  %4425 = vmatprep.subr.bf16.mxu1 %v6864_v51  ;;  %v5544_v51 = vcombine.low %v7752_v20, %v5465_v23  ;;  %v6916_v20 = vld [vmem:[%s8373_s1 + $0x660] ss:$8 sps:$4 sm:$0xff]   ;;  %v6206_v23 = vld [vmem:[%s8374_s0 + $0x210] sm:$0xff] }
 0x152   :  { %1800 = vmatmul.mubr.bf16.gmra.mrb[8].mxu0 %v5538_v55  ;;  %4397 = vmatmul.mubr.bf16.gmra.mrb[8].mxu1 %v6122_v26  ;;  %v6128_v55 = vcombine.low %v7762_v22, %v6049_v24  ;;  %v8052_v26 = vld [vmem:[%s8374_s0 + $0x50] sm:$0xff] }
 0x153   :  { %1829 = vmatpush1.bf16.msra.mxu0 %v6862_v29  ;;  %4426 = vmatpush1.bf16.msra.mxu1 %v6862_v29  ;;  %v6921_v22 = vld [vmem:[%s8373_s1 + $0x674] ss:$8 sps:$4 sm:$0xff]   ;;  %v5691_v29 = vcombine.high %v8045_v44, %v8052_v26 }
 0x154   :  { %1830 = vmatprep.subr.bf16.mxu0 %v6867_v54  ;;  %4427 = vmatprep.subr.bf16.mxu1 %v6867_v54  ;;  %v6275_v54 = vcombine.high %v8057_v27, %v8062_v28  ;;  %v6208_v24 = vld [vmem:[%s8374_s0 + $0x230] sm:$0xff] }
 0x155   :  { %1809 = vmatprep.mubr.bf16.mxu0 %v5543_v56  ;;  %4406 = vmatprep.mubr.bf16.mxu1 %v6127_v63  ;;  %v6919_v56 = vld [vmem:[%s8373_s1 + $0x670] ss:$8 sps:$4 sm:$0xff]   ;;  %v6924_v63 = vld [vmem:[%s8373_s1 + $0x684] ss:$8 sps:$4 sm:$0xff]  }
 0x157   :  { %1831 = vmatpush1.bf16.msra.mxu0 %v6865_v3  ;;  %4428 = vmatpush1.bf16.msra.mxu1 %v6865_v3  ;;  %v6922_v3 = vld [vmem:[%s8373_s1 + $0x680] ss:$8 sps:$4 sm:$0xff]  }
 0x158   :  { %1832 = vmatprep.subr.bf16.mxu0 %v6870_v30  ;;  %4429 = vmatprep.subr.bf16.mxu1 %v6870_v30  ;;  %v6927_v30 = vld [vmem:[%s8373_s1 + $0x694] ss:$8 sps:$4 sm:$0xff]  }
 0x15a   :  { %1810 = vmatmul.mubr.bf16.gmra.mrb[12].mxu0 %v5542_v31  ;;  %4407 = vmatmul.mubr.bf16.gmra.mrb[12].mxu1 %v6126_v32  ;;  %v6925_v31 = vld [vmem:[%s8373_s1 + $0x690] ss:$8 sps:$4 sm:$0xff]   ;;  %v6930_v32 = vld [vmem:[%s8373_s1 + $0x6a4] ss:$8 sps:$4 sm:$0xff]  }
 0x15b   :  { %1833 = vmatpush1.bf16.msra.mxu0 %v6868_v33  ;;  %4430 = vmatpush1.bf16.msra.mxu1 %v6868_v33  ;;  %v6928_v33 = vld [vmem:[%s8373_s1 + $0x6a0] ss:$8 sps:$4 sm:$0xff]  }
 0x15c   :  { %1834 = vmatprep.subr.bf16.mxu0 %v6873_v34  ;;  %4431 = vmatprep.subr.bf16.mxu1 %v6873_v34  ;;  %v6933_v34 = vld [vmem:[%s8373_s1 + $0x6b4] ss:$8 sps:$4 sm:$0xff]  }
 0x15d   :  { %1852 = vmatprep.mubr.bf16.mxu0 %v5533_v35  ;;  %4449 = vmatprep.mubr.bf16.mxu1 %v6117_v2  ;;  %v6931_v35 = vld [vmem:[%s8373_s1 + $0x6b0] ss:$8 sps:$4 sm:$0xff]   ;;  %v6936_v2 = vld [vmem:[%s8373_s1 + $0x6c4] ss:$8 sps:$4 sm:$0xff]  }
 0x15f   :  { %1835 = vmatpush1.bf16.msra.mxu0 %v6871_v4  ;;  %4432 = vmatpush1.bf16.msra.mxu1 %v6871_v4  ;;  %v6934_v4 = vld [vmem:[%s8373_s1 + $0x6c0] ss:$8 sps:$4 sm:$0xff]  }
 0x160   :  { %1836 = vmatprep.subr.bf16.mxu0 %v6876_v36  ;;  %4433 = vmatprep.subr.bf16.mxu1 %v6876_v36  ;;  %v6939_v36 = vld [vmem:[%s8373_s1 + $0x6d4] ss:$8 sps:$4 sm:$0xff]  }
 0x163   :  { %1837 = vmatpush1.bf16.msra.mxu0 %v6874_v37  ;;  %4434 = vmatpush1.bf16.msra.mxu1 %v6874_v37  ;;  %v6937_v37 = vld [vmem:[%s8373_s1 + $0x6d0] ss:$8 sps:$4 sm:$0xff]  }
 0x164   :  { %1838 = vmatprep.subr.bf16.mxu0 %v6879_v38  ;;  %4435 = vmatprep.subr.bf16.mxu1 %v6879_v38  ;;  %v6942_v38 = vld [vmem:[%s8373_s1 + $0x6e4] ss:$8 sps:$4 sm:$0xff]  }
 0x167   :  { %1839 = vmatpush1.bf16.msra.mxu0 %v6877_v40  ;;  %4436 = vmatpush1.bf16.msra.mxu1 %v6877_v40  ;;  %v6940_v40 = vld [vmem:[%s8373_s1 + $0x6e0] ss:$8 sps:$4 sm:$0xff]  }
 0x168   :  { %1840 = vmatprep.subr.bf16.mxu0 %v6882_v41  ;;  %4437 = vmatprep.subr.bf16.mxu1 %v6882_v41  ;;  %v6945_v41 = vld [vmem:[%s8373_s1 + $0x6f4] ss:$8 sps:$4 sm:$0xff]  }
 0x16b   :  { %1841 = vmatpush1.bf16.msra.mxu0 %v6880_v46  ;;  %4438 = vmatpush1.bf16.msra.mxu1 %v6880_v46  ;;  %v6943_v46 = vld [vmem:[%s8373_s1 + $0x6f0] ss:$8 sps:$4 sm:$0xff]  }
 0x16c   :  { %1842 = vmatprep.subr.bf16.mxu0 %v6885_v47  ;;  %4439 = vmatprep.subr.bf16.mxu1 %v6885_v47  ;;  %v6948_v47 = vld [vmem:[%s8373_s1 + $0x704] ss:$8 sps:$4 sm:$0xff]  }
 0x16f   :  { %1843 = vmatpush1.bf16.msra.mxu0 %v6883_v52  ;;  %4440 = vmatpush1.bf16.msra.mxu1 %v6883_v52  ;;  %v5614_v52 = vld [vmem:[%s8374_s0 + $0x70] sm:$0xff] }
 0x170   :  { %1844 = vmatprep.subr.bf16.mxu0 %v6888_v53  ;;  %4441 = vmatprep.subr.bf16.mxu1 %v6888_v53  ;;  %v5690_v53 = vcombine.low %v8045_v44, %v8052_v26  ;;  %v8207_v44 = vld [vmem:[%s8374_s0 + $0x38] sm:$0xff] }
 0x171   :  { %v8212_v26 = vld [vmem:[%s8374_s0 + $0x58] sm:$0xff] }
 0x173   :  { %1845 = vmatpush1.bf16.msra.mxu0 %v6886_v57  ;;  %4442 = vmatpush1.bf16.msra.mxu1 %v6886_v57  ;;  %v6274_v57 = vcombine.low %v8057_v27, %v8062_v28  ;;  %v8217_v27 = vld [vmem:[%s8374_s0 + $0x158] sm:$0xff] }
 0x174   :  { %1846 = vmatprep.subr.bf16.mxu0 %v6891_v58  ;;  %4443 = vmatprep.subr.bf16.mxu1 %v6891_v58  ;;  %v5616_v58 = vld [vmem:[%s8374_s0 + $0x90] sm:$0xff]  ;;  %v8222_v28 = vld [vmem:[%s8374_s0 + $0x178] sm:$0xff] }
 0x177   :  { %1847 = vmatpush1.bf16.msra.mxu0 %v6889_v59  ;;  %4444 = vmatpush1.bf16.msra.mxu1 %v6889_v59  ;;  %v6198_v59 = vld [vmem:[%s8374_s0 + $0x190] sm:$0xff] }
 0x178   :  { %1848 = vmatprep.subr.bf16.mxu0 %v6894_v60  ;;  %4445 = vmatprep.subr.bf16.mxu1 %v6894_v60  ;;  %v6200_v60 = vld [vmem:[%s8374_s0 + $0x1b0] sm:$0xff] }
 0x17b   :  { %1849 = vmatpush1.bf16.msra.mxu0 %v6892_v62  ;;  %4446 = vmatpush1.bf16.msra.mxu1 %v6892_v62  ;;  %v6946_v62 = vld [vmem:[%s8373_s1 + $0x700] ss:$8 sps:$4 sm:$0xff]  }
 0x17c   :  { %1850 = vmatprep.subr.bf16.mxu0 %v6897_v0  ;;  %4447 = vmatprep.subr.bf16.mxu1 %v6897_v0  ;;  %v6951_v0 = vld [vmem:[%s8373_s1 + $0x714] ss:$8 sps:$4 sm:$0xff]  }
 0x17f   :  { %1851 = vmatpush1.bf16.msra.mxu0 %v6895_v7  ;;  %4448 = vmatpush1.bf16.msra.mxu1 %v6895_v7  ;;  %v5695_v7 = vcombine.high %v5614_v52, %v5616_v58 }
 0x180   :  { %2391 = vmatprep.subr.bf16.mxu0 %v6900_v8  ;;  %4987 = vmatprep.subr.bf16.mxu1 %v6900_v8  ;;  %v6279_v8 = vcombine.high %v6198_v59, %v6200_v60 }
 0x182   :  { %1853 = vmatmul.mubr.bf16.vlgmr.msra.gmra.mrb[0].mxu0 %v5532_v9  ;;  %4450 = vmatmul.mubr.bf16.vlgmr.msra.gmra.mrb[0].mxu1 %v6116_v10  ;;  %v6949_v9 = vld [vmem:[%s8373_s1 + $0x710] ss:$8 sps:$4 sm:$0xff]   ;;  %v6954_v10 = vld [vmem:[%s8373_s1 + $0x724] ss:$8 sps:$4 sm:$0xff]  }
 0x183   :  { %2392 = vmatpush1.bf16.msra.mxu0 %v6898_v11  ;;  %4988 = vmatpush1.bf16.msra.mxu1 %v6898_v11  ;;  %v5618_v11 = vld [vmem:[%s8374_s0 + $0xb0] sm:$0xff] }
 0x184   :  { %2393 = vmatprep.subr.bf16.mxu0 %v6903_v12  ;;  %4989 = vmatprep.subr.bf16.mxu1 %v6903_v12  ;;  %v5694_v12 = vcombine.low %v5614_v52, %v5616_v58  ;;  %v5617_v52 = vld [vmem:[%s8374_s0 + $0x98] sm:$0xff]  ;;  %v5692_v58 = vcombine.low %v8207_v44, %v8212_v26 }
 0x185   :  { %1862 = vmatprep.mubr.bf16.mxu0 %v5537_v17  ;;  %4459 = vmatprep.mubr.bf16.mxu1 %v6121_v15  ;;  %v6278_v17 = vcombine.low %v6198_v59, %v6200_v60  ;;  %v5620_v15 = vld [vmem:[%s8374_s0 + $0xd0] sm:$0xff]  ;;  %v6276_v59 = vcombine.low %v8217_v27, %v8222_v28 }
 0x187   :  { %2394 = vmatpush1.bf16.msra.mxu0 %v6901_v18  ;;  %4990 = vmatpush1.bf16.msra.mxu1 %v6901_v18  ;;  %v6202_v18 = vld [vmem:[%s8374_s0 + $0x1d0] sm:$0xff] }
 0x188   :  { %2395 = vmatprep.subr.bf16.mxu0 %v6906_v45  ;;  %4991 = vmatprep.subr.bf16.mxu1 %v6906_v45  ;;  %v6204_v45 = vld [vmem:[%s8374_s0 + $0x1f0] sm:$0xff] }
 0x18a   :  { %1863 = vmatmul.mubr.bf16.gmra.mrb[4].mxu0 %v5536_v49  ;;  %4460 = vmatmul.mubr.bf16.gmra.mrb[4].mxu1 %v6120_v14  ;;  %v6952_v49 = vld [vmem:[%s8373_s1 + $0x720] ss:$8 sps:$4 sm:$0xff]   ;;  %v6957_v14 = vld [vmem:[%s8373_s1 + $0x734] ss:$8 sps:$4 sm:$0xff]  }
 0x18b   :  { %2396 = vmatpush1.bf16.msra.mxu0 %v6904_v16  ;;  %4992 = vmatpush1.bf16.msra.mxu1 %v6904_v16  ;;  %v5699_v16 = vcombine.high %v5618_v11, %v5620_v15 }
 0x18c   :  { %2397 = vmatprep.subr.bf16.mxu0 %v6909_v39  ;;  %4993 = vmatprep.subr.bf16.mxu1 %v6909_v39  ;;  %v6283_v39 = vcombine.high %v6202_v18, %v6204_v45 }
 0x18d   :  { %1872 = vmatprep.mubr.bf16.mxu0 %v5541_v43  ;;  %4469 = vmatprep.mubr.bf16.mxu1 %v6125_v48  ;;  %v6955_v43 = vld [vmem:[%s8373_s1 + $0x730] ss:$8 sps:$4 sm:$0xff]   ;;  %v6960_v48 = vld [vmem:[%s8373_s1 + $0x744] ss:$8 sps:$4 sm:$0xff]  }
 0x18f   :  { %2398 = vmatpush1.bf16.msra.mxu0 %v6907_v50  ;;  %4994 = vmatpush1.bf16.msra.mxu1 %v6907_v50  ;;  %v5622_v50 = vld [vmem:[%s8374_s0 + $0xf0] sm:$0xff] }
 0x190   :  { %2399 = vmatprep.subr.bf16.mxu0 %v6912_v61  ;;  %4995 = vmatprep.subr.bf16.mxu1 %v6912_v61  ;;  %v5698_v61 = vcombine.low %v5618_v11, %v5620_v15  ;;  %v5623_v15 = vld [vmem:[%s8374_s0 + $0xf8] sm:$0xff] }
 0x192   :  { %1873 = vmatmul.mubr.bf16.gmra.mrb[8].mxu0 %v5540_v5  ;;  %4470 = vmatmul.mubr.bf16.gmra.mrb[8].mxu1 %v6124_v19  ;;  %v6282_v5 = vcombine.low %v6202_v18, %v6204_v45  ;;  %v5624_v19 = vld [vmem:[%s8374_s0 + $0x110] sm:$0xff]  ;;  %v5625_v18 = vld [vmem:[%s8374_s0 + $0x118] sm:$0xff] }
 0x193   :  { %2400 = vmatpush1.bf16.msra.mxu0 %v6910_v25  ;;  %4996 = vmatpush1.bf16.msra.mxu1 %v6910_v25  ;;  %v6958_v25 = vld [vmem:[%s8373_s1 + $0x740] ss:$8 sps:$4 sm:$0xff]   ;;  %v6207_v45 = vld [vmem:[%s8374_s0 + $0x218] sm:$0xff] }
 0x194   :  { %2401 = vmatprep.subr.bf16.mxu0 %v6915_v1  ;;  %4997 = vmatprep.subr.bf16.mxu1 %v6915_v1  ;;  %v6963_v1 = vld [vmem:[%s8373_s1 + $0x754] ss:$8 sps:$4 sm:$0xff]  }
 0x195   :  { %1882 = vmatprep.mubr.bf16.mxu0 %v5545_v6  ;;  %4479 = vmatprep.mubr.bf16.mxu1 %v6129_v13  ;;  %v5703_v6 = vcombine.high %v5622_v50, %v5624_v19  ;;  %v6287_v13 = vcombine.high %v6206_v23, %v6208_v24 }
 0x197   :  { %2402 = vmatpush1.bf16.msra.mxu0 %v6913_v21  ;;  %4998 = vmatpush1.bf16.msra.mxu1 %v6913_v21  ;;  %v6961_v21 = vld [vmem:[%s8373_s1 + $0x750] ss:$8 sps:$4 sm:$0xff]  }
 0x198   :  { %2403 = vmatprep.subr.bf16.mxu0 %v6918_v42  ;;  %4999 = vmatprep.subr.bf16.mxu1 %v6918_v42  ;;  %v6966_v42 = vld [vmem:[%s8373_s1 + $0x764] ss:$8 sps:$4 sm:$0xff]  }
 0x19a   :  { %1883 = vmatmul.mubr.bf16.gmra.mrb[12].mxu0 %v5544_v51  ;;  %4480 = vmatmul.mubr.bf16.gmra.mrb[12].mxu1 %v6128_v55  ;;  %v5702_v51 = vcombine.low %v5622_v50, %v5624_v19  ;;  %v6286_v55 = vcombine.low %v6206_v23, %v6208_v24 }
 0x19b   :  { %2404 = vmatpush1.bf16.msra.mxu0 %v6916_v20  ;;  %5000 = vmatpush1.bf16.msra.mxu1 %v6916_v20  ;;  %v6964_v20 = vld [vmem:[%s8373_s1 + $0x760] ss:$8 sps:$4 sm:$0xff]  }
 0x19c   :  { %2405 = vmatprep.subr.bf16.mxu0 %v6921_v22  ;;  %5001 = vmatprep.subr.bf16.mxu1 %v6921_v22  ;;  %v6969_v22 = vld [vmem:[%s8373_s1 + $0x774] ss:$8 sps:$4 sm:$0xff]  }
 0x19d   :  { %2423 = vmatprep.mubr.bf16.mxu0 %v5691_v29  ;;  %5019 = vmatprep.mubr.bf16.mxu1 %v6275_v54  ;;  %v5693_v29 = vcombine.high %v8207_v44, %v8212_v26  ;;  %v6277_v54 = vcombine.high %v8217_v27, %v8222_v28 }
 0x19f   :  { %2406 = vmatpush1.bf16.msra.mxu0 %v6919_v56  ;;  %5002 = vmatpush1.bf16.msra.mxu1 %v6919_v56  ;;  %v6967_v56 = vld [vmem:[%s8373_s1 + $0x770] ss:$8 sps:$4 sm:$0xff]  }
 0x1a0   :  { %2407 = vmatprep.subr.bf16.mxu0 %v6924_v63  ;;  %5003 = vmatprep.subr.bf16.mxu1 %v6924_v63  ;;  %v6972_v63 = vld [vmem:[%s8373_s1 + $0x784] ss:$8 sps:$4 sm:$0xff]  }
 0x1a3   :  { %2408 = vmatpush1.bf16.msra.mxu0 %v6922_v3  ;;  %5004 = vmatpush1.bf16.msra.mxu1 %v6922_v3  ;;  %v6970_v3 = vld [vmem:[%s8373_s1 + $0x780] ss:$8 sps:$4 sm:$0xff]  }
 0x1a4   :  { %2409 = vmatprep.subr.bf16.mxu0 %v6927_v30  ;;  %5005 = vmatprep.subr.bf16.mxu1 %v6927_v30  ;;  %v6975_v30 = vld [vmem:[%s8373_s1 + $0x794] ss:$8 sps:$4 sm:$0xff]  }
 0x1a7   :  { %2410 = vmatpush1.bf16.msra.mxu0 %v6925_v31  ;;  %5006 = vmatpush1.bf16.msra.mxu1 %v6925_v31  ;;  %v6973_v31 = vld [vmem:[%s8373_s1 + $0x790] ss:$8 sps:$4 sm:$0xff]  }
 0x1a8   :  { %2411 = vmatprep.subr.bf16.mxu0 %v6930_v32  ;;  %5007 = vmatprep.subr.bf16.mxu1 %v6930_v32  ;;  %v6978_v32 = vld [vmem:[%s8373_s1 + $0x7a4] ss:$8 sps:$4 sm:$0xff]  }
 0x1ab   :  { %2412 = vmatpush1.bf16.msra.mxu0 %v6928_v33  ;;  %5008 = vmatpush1.bf16.msra.mxu1 %v6928_v33  ;;  %v6976_v33 = vld [vmem:[%s8373_s1 + $0x7a0] ss:$8 sps:$4 sm:$0xff]  }
 0x1ac   :  { %2413 = vmatprep.subr.bf16.mxu0 %v6933_v34  ;;  %5009 = vmatprep.subr.bf16.mxu1 %v6933_v34  ;;  %v6981_v34 = vld [vmem:[%s8373_s1 + $0x7b4] ss:$8 sps:$4 sm:$0xff]  }
 0x1af   :  { %2414 = vmatpush1.bf16.msra.mxu0 %v6931_v35  ;;  %5010 = vmatpush1.bf16.msra.mxu1 %v6931_v35  ;;  %v6979_v35 = vld [vmem:[%s8373_s1 + $0x7b0] ss:$8 sps:$4 sm:$0xff]  }
 0x1b0   :  { %2415 = vmatprep.subr.bf16.mxu0 %v6936_v2  ;;  %5011 = vmatprep.subr.bf16.mxu1 %v6936_v2  ;;  %v6984_v2 = vld [vmem:[%s8373_s1 + $0x7c4] ss:$8 sps:$4 sm:$0xff]  }
 0x1b3   :  { %2416 = vmatpush1.bf16.msra.mxu0 %v6934_v4  ;;  %5012 = vmatpush1.bf16.msra.mxu1 %v6934_v4  ;;  %v6982_v4 = vld [vmem:[%s8373_s1 + $0x7c0] ss:$8 sps:$4 sm:$0xff]  }
 0x1b4   :  { %2417 = vmatprep.subr.bf16.mxu0 %v6939_v36  ;;  %5013 = vmatprep.subr.bf16.mxu1 %v6939_v36  ;;  %v6987_v36 = vld [vmem:[%s8373_s1 + $0x7d4] ss:$8 sps:$4 sm:$0xff]  }
 0x1b7   :  { %2418 = vmatpush1.bf16.msra.mxu0 %v6937_v37  ;;  %5014 = vmatpush1.bf16.msra.mxu1 %v6937_v37  ;;  %v6985_v37 = vld [vmem:[%s8373_s1 + $0x7d0] ss:$8 sps:$4 sm:$0xff]  }
 0x1b8   :  { %2419 = vmatprep.subr.bf16.mxu0 %v6942_v38  ;;  %5015 = vmatprep.subr.bf16.mxu1 %v6942_v38  ;;  %v6990_v38 = vld [vmem:[%s8373_s1 + $0x7e4] ss:$8 sps:$4 sm:$0xff]  }
 0x1bb   :  { %2420 = vmatpush1.bf16.msra.mxu0 %v6940_v40  ;;  %5016 = vmatpush1.bf16.msra.mxu1 %v6940_v40  ;;  %v6988_v40 = vld [vmem:[%s8373_s1 + $0x7e0] ss:$8 sps:$4 sm:$0xff]  }
 0x1bc   :  { %2421 = vmatprep.subr.bf16.mxu0 %v6945_v41  ;;  %5017 = vmatprep.subr.bf16.mxu1 %v6945_v41  ;;  %v6993_v41 = vld [vmem:[%s8373_s1 + $0x7f4] ss:$8 sps:$4 sm:$0xff]  }
 0x1bf   :  { %2422 = vmatpush1.bf16.msra.mxu0 %v6943_v46  ;;  %5018 = vmatpush1.bf16.msra.mxu1 %v6943_v46  ;;  %v6991_v46 = vld [vmem:[%s8373_s1 + $0x7f0] ss:$8 sps:$4 sm:$0xff]  }
 0x1c0   :  { %2464 = vmatprep.subr.bf16.mxu0 %v6948_v47  ;;  %5060 = vmatprep.subr.bf16.mxu1 %v6948_v47  ;;  %v5615_v47 = vld [vmem:[%s8374_s0 + $0x78] sm:$0xff] }
 0x1c1   :  { %v5697_v60 = vcombine.high %v5615_v47, %v5617_v52 }
 0x1c2   :  { %2424 = vmatmul.mubr.bf16.vlgmr.msra.gmra.mrb[0].mxu0 %v5690_v53  ;;  %5020 = vmatmul.mubr.bf16.vlgmr.msra.gmra.mrb[0].mxu1 %v6274_v57  ;;  %v6199_v53 = vld [vmem:[%s8374_s0 + $0x198] sm:$0xff] }
 0x1c3   :  { %2465 = vmatpush1.bf16.msra.mxu0 %v6946_v62  ;;  %5061 = vmatpush1.bf16.msra.mxu1 %v6946_v62  ;;  %v6201_v57 = vld [vmem:[%s8374_s0 + $0x1b8] sm:$0xff] }
 0x1c4   :  { %2466 = vmatprep.subr.bf16.mxu0 %v6951_v0  ;;  %5062 = vmatprep.subr.bf16.mxu1 %v6951_v0  ;;  %v6281_v62 = vcombine.high %v6199_v53, %v6201_v57  ;;  %v5619_v0 = vld [vmem:[%s8374_s0 + $0xb8] sm:$0xff]  ;;  %v6280_v11 = vcombine.low %v6199_v53, %v6201_v57 }
 0x1c5   :  { %2433 = vmatprep.mubr.bf16.mxu0 %v5695_v7  ;;  %5029 = vmatprep.mubr.bf16.mxu1 %v6279_v8  ;;  %v5621_v7 = vld [vmem:[%s8374_s0 + $0xd8] sm:$0xff] }
 0x1c6   :  { %v6203_v8 = vld [vmem:[%s8374_s0 + $0x1d8] sm:$0xff] }
 0x1c7   :  { %2467 = vmatpush1.bf16.msra.mxu0 %v6949_v9  ;;  %5063 = vmatpush1.bf16.msra.mxu1 %v6949_v9  ;;  %v6205_v9 = vld [vmem:[%s8374_s0 + $0x1f8] sm:$0xff] }
 0x1c8   :  { %2468 = vmatprep.subr.bf16.mxu0 %v6954_v10  ;;  %5064 = vmatprep.subr.bf16.mxu1 %v6954_v10  ;;  %v5696_v10 = vcombine.low %v5615_v47, %v5617_v52 }
 0x1ca   :  { %2434 = vmatmul.mubr.bf16.gmra.mrb[4].mxu0 %v5694_v12  ;;  %5030 = vmatmul.mubr.bf16.gmra.mrb[4].mxu1 %v6278_v17  ;;  %v5701_v12 = vcombine.high %v5619_v0, %v5621_v7  ;;  %v6285_v17 = vcombine.high %v6203_v8, %v6205_v9 }
 0x1cb   :  { %2469 = vmatpush1.bf16.msra.mxu0 %v6952_v49  ;;  %5065 = vmatpush1.bf16.msra.mxu1 %v6952_v49  ;;  %v6209_v49 = vld [vmem:[%s8374_s0 + $0x238] sm:$0xff] }
 0x1cc   :  { %2470 = vmatprep.subr.bf16.mxu0 %v6957_v14  ;;  %5066 = vmatprep.subr.bf16.mxu1 %v6957_v14  ;;  %v5700_v14 = vcombine.low %v5619_v0, %v5621_v7  ;;  %v6288_v50 = vcombine.low %v6207_v45, %v6209_v49 }
 0x1cd   :  { %2443 = vmatprep.mubr.bf16.mxu0 %v5699_v16  ;;  %5039 = vmatprep.mubr.bf16.mxu1 %v6283_v39  ;;  %v6284_v16 = vcombine.low %v6203_v8, %v6205_v9  ;;  %v5705_v39 = vcombine.high %v5623_v15, %v5625_v18 }
 0x1cf   :  { %2471 = vmatpush1.bf16.msra.mxu0 %v6955_v43  ;;  %5067 = vmatpush1.bf16.msra.mxu1 %v6955_v43  ;;  %v6289_v43 = vcombine.high %v6207_v45, %v6209_v49 }
 0x1d0   :  { %2472 = vmatprep.subr.bf16.mxu0 %v6960_v48  ;;  %5068 = vmatprep.subr.bf16.mxu1 %v6960_v48  ;;  %v5704_v48 = vcombine.low %v5623_v15, %v5625_v18 }
 0x1d2   :  { %2444 = vmatmul.mubr.bf16.gmra.mrb[8].mxu0 %v5698_v61  ;;  %5040 = vmatmul.mubr.bf16.gmra.mrb[8].mxu1 %v6282_v5 }
 0x1d3   :  { %2473 = vmatpush1.bf16.msra.mxu0 %v6958_v25  ;;  %5069 = vmatpush1.bf16.msra.mxu1 %v6958_v25 }
 0x1d4   :  { %2474 = vmatprep.subr.bf16.mxu0 %v6963_v1  ;;  %5070 = vmatprep.subr.bf16.mxu1 %v6963_v1 }
 0x1d5   :  { %2453 = vmatprep.mubr.bf16.mxu0 %v5703_v6  ;;  %5049 = vmatprep.mubr.bf16.mxu1 %v6287_v13 }
 0x1d7   :  { %2475 = vmatpush1.bf16.msra.mxu0 %v6961_v21  ;;  %5071 = vmatpush1.bf16.msra.mxu1 %v6961_v21 }
 0x1d8   :  { %2476 = vmatprep.subr.bf16.mxu0 %v6966_v42  ;;  %5072 = vmatprep.subr.bf16.mxu1 %v6966_v42 }
 0x1da   :  { %2454 = vmatmul.mubr.bf16.gmra.mrb[12].mxu0 %v5702_v51  ;;  %5050 = vmatmul.mubr.bf16.gmra.mrb[12].mxu1 %v6286_v55 }
 0x1db   :  { %2477 = vmatpush1.bf16.msra.mxu0 %v6964_v20  ;;  %5073 = vmatpush1.bf16.msra.mxu1 %v6964_v20 }
 0x1dc   :  { %2478 = vmatprep.subr.bf16.mxu0 %v6969_v22  ;;  %5074 = vmatprep.subr.bf16.mxu1 %v6969_v22 }
 0x1dd   :  { %2496 = vmatprep.mubr.bf16.mxu0 %v5693_v29  ;;  %5092 = vmatprep.mubr.bf16.mxu1 %v6277_v54 }
 0x1df   :  { %2479 = vmatpush1.bf16.msra.mxu0 %v6967_v56  ;;  %5075 = vmatpush1.bf16.msra.mxu1 %v6967_v56 }
 0x1e0   :  { %2480 = vmatprep.subr.bf16.mxu0 %v6972_v63  ;;  %5076 = vmatprep.subr.bf16.mxu1 %v6972_v63 }
 0x1e3   :  { %2481 = vmatpush1.bf16.msra.mxu0 %v6970_v3  ;;  %5077 = vmatpush1.bf16.msra.mxu1 %v6970_v3 }
 0x1e4   :  { %2482 = vmatprep.subr.bf16.mxu0 %v6975_v30  ;;  %5078 = vmatprep.subr.bf16.mxu1 %v6975_v30 }
 0x1e7   :  { %2483 = vmatpush1.bf16.msra.mxu0 %v6973_v31  ;;  %5079 = vmatpush1.bf16.msra.mxu1 %v6973_v31 }
 0x1e8   :  { %2484 = vmatprep.subr.bf16.mxu0 %v6978_v32  ;;  %5080 = vmatprep.subr.bf16.mxu1 %v6978_v32 }
 0x1eb   :  { %2485 = vmatpush1.bf16.msra.mxu0 %v6976_v33  ;;  %5081 = vmatpush1.bf16.msra.mxu1 %v6976_v33 }
 0x1ec   :  { %2486 = vmatprep.subr.bf16.mxu0 %v6981_v34  ;;  %5082 = vmatprep.subr.bf16.mxu1 %v6981_v34 }
 0x1ef   :  { %2487 = vmatpush1.bf16.msra.mxu0 %v6979_v35  ;;  %5083 = vmatpush1.bf16.msra.mxu1 %v6979_v35 }
 0x1f0   :  { %2488 = vmatprep.subr.bf16.mxu0 %v6984_v2  ;;  %5084 = vmatprep.subr.bf16.mxu1 %v6984_v2 }
 0x1f3   :  { %2489 = vmatpush1.bf16.msra.mxu0 %v6982_v4  ;;  %5085 = vmatpush1.bf16.msra.mxu1 %v6982_v4 }
 0x1f4   :  { %2490 = vmatprep.subr.bf16.mxu0 %v6987_v36  ;;  %5086 = vmatprep.subr.bf16.mxu1 %v6987_v36 }
 0x1f7   :  { %2491 = vmatpush1.bf16.msra.mxu0 %v6985_v37  ;;  %5087 = vmatpush1.bf16.msra.mxu1 %v6985_v37 }
 0x1f8   :  { %2492 = vmatprep.subr.bf16.mxu0 %v6990_v38  ;;  %5088 = vmatprep.subr.bf16.mxu1 %v6990_v38 }
 0x1fb   :  { %2493 = vmatpush1.bf16.msra.mxu0 %v6988_v40  ;;  %5089 = vmatpush1.bf16.msra.mxu1 %v6988_v40 }
 0x1fc   :  { %2494 = vmatprep.subr.bf16.mxu0 %v6993_v41  ;;  %5090 = vmatprep.subr.bf16.mxu1 %v6993_v41 }
 0x1ff   :  { %2495 = vmatpush1.bf16.msra.mxu0 %v6991_v46  ;;  %5091 = vmatpush1.bf16.msra.mxu1 %v6991_v46 }
 0x202   :  { %2497 = vmatmul.mubr.bf16.vlgmr.msra.gmra.mrb[0].mxu0 %v5692_v58  ;;  %5093 = vmatmul.mubr.bf16.vlgmr.msra.gmra.mrb[0].mxu1 %v6276_v59 }
 0x203   :  { %2506 = vmatprep.mubr.bf16.mxu0 %v5697_v60  ;;  %5102 = vmatprep.mubr.bf16.mxu1 %v6281_v62 }
 0x20a   :  { %2507 = vmatmul.mubr.bf16.gmra.mrb[4].mxu0 %v5696_v10  ;;  %5103 = vmatmul.mubr.bf16.gmra.mrb[4].mxu1 %v6280_v11 }
 0x20b   :  { %2516 = vmatprep.mubr.bf16.mxu0 %v5701_v12  ;;  %5112 = vmatprep.mubr.bf16.mxu1 %v6285_v17 }
 0x212   :  { %2517 = vmatmul.mubr.bf16.gmra.mrb[8].mxu0 %v5700_v14  ;;  %5113 = vmatmul.mubr.bf16.gmra.mrb[8].mxu1 %v6284_v16 }
 0x213   :  { %2526 = vmatprep.mubr.bf16.mxu0 %v5705_v39  ;;  %5122 = vmatprep.mubr.bf16.mxu1 %v6289_v43 }
 0x21a   :  { %2527 = vmatmul.mubr.bf16.gmra.mrb[12].mxu0 %v5704_v48  ;;  %5123 = vmatmul.mubr.bf16.gmra.mrb[12].mxu1 %v6288_v50 }
 0x2d5   :  { %v2498_v61 = vpop.f32.mrb[0].mxu0  ;;  %v5094_v5 = vpop.f32.mrb[0].mxu1 }
 0x2d6   :  { %v2500_v19 = vpop.f32.mrb[1].mxu0  ;;  %v5096_v23 = vpop.f32.mrb[1].mxu1 }
 0x2d7   :  { %v6370_v24 = vpack.c.bf16 %v2500_v19, %v2498_v61  ;;  %v6378_v25 = vpack.c.bf16 %v5096_v23, %v5094_v5  ;;  %v2502_v1 = vpop.f32.mrb[2].mxu0  ;;  %v5098_v6 = vpop.f32.mrb[2].mxu1 }
 0x2d8   :  { %v2504_v13 = vpop.f32.mrb[3].mxu0  ;;  %v5100_v21 = vpop.f32.mrb[3].mxu1 }
 0x2d9   :  { %2601 = vst [vmem:[%s8375_s2] sm:$0xff] %v6370_v24  ;;  %6362 = vst [vmem:[%s8375_s2 + $0x40] sm:$0xff] %v6378_v25  ;;  %v6371_v42 = vpack.c.bf16 %v2504_v13, %v2502_v1  ;;  %v6379_v44 = vpack.c.bf16 %v5100_v21, %v5098_v6 }
 0x2db   :  { %2602 = vst [vmem:[%s8375_s2 + $0x8] sm:$0xff] %v6371_v42  ;;  %6363 = vst [vmem:[%s8375_s2 + $0x48] sm:$0xff] %v6379_v44 }
 0x2dd   :  { %v2508_v51 = vpop.f32.mrb[4].mxu0  ;;  %v5104_v55 = vpop.f32.mrb[4].mxu1 }
 0x2de   :  { %v2510_v26 = vpop.f32.mrb[5].mxu0  ;;  %v5106_v27 = vpop.f32.mrb[5].mxu1 }
 0x2df   :  { %v6372_v28 = vpack.c.bf16 %v2510_v26, %v2508_v51  ;;  %v6380_v20 = vpack.c.bf16 %v5106_v27, %v5104_v55  ;;  %v2512_v22 = vpop.f32.mrb[6].mxu0  ;;  %v5108_v29 = vpop.f32.mrb[6].mxu1 }
 0x2e0   :  { %v2514_v54 = vpop.f32.mrb[7].mxu0  ;;  %v5110_v56 = vpop.f32.mrb[7].mxu1 }
 0x2e1   :  { %2603 = vst [vmem:[%s8375_s2 + $0x10] sm:$0xff] %v6372_v28  ;;  %6364 = vst [vmem:[%s8375_s2 + $0x50] sm:$0xff] %v6380_v20  ;;  %v6373_v63 = vpack.c.bf16 %v2514_v54, %v2512_v22  ;;  %v6381_v3 = vpack.c.bf16 %v5110_v56, %v5108_v29 }
 0x2e3   :  { %2604 = vst [vmem:[%s8375_s2 + $0x18] sm:$0xff] %v6373_v63  ;;  %6365 = vst [vmem:[%s8375_s2 + $0x58] sm:$0xff] %v6381_v3 }
 0x2e5   :  { %v2518_v30 = vpop.f32.mrb[8].mxu0  ;;  %v5114_v31 = vpop.f32.mrb[8].mxu1 }
 0x2e6   :  { %v2520_v32 = vpop.f32.mrb[9].mxu0  ;;  %v5116_v33 = vpop.f32.mrb[9].mxu1 }
 0x2e7   :  { %v6374_v34 = vpack.c.bf16 %v2520_v32, %v2518_v30  ;;  %v6382_v35 = vpack.c.bf16 %v5116_v33, %v5114_v31  ;;  %v2522_v2 = vpop.f32.mrb[10].mxu0  ;;  %v5118_v4 = vpop.f32.mrb[10].mxu1 }
 0x2e8   :  { %v2524_v36 = vpop.f32.mrb[11].mxu0  ;;  %v5120_v37 = vpop.f32.mrb[11].mxu1 }
 0x2e9   :  { %2605 = vst [vmem:[%s8375_s2 + $0x20] sm:$0xff] %v6374_v34  ;;  %6366 = vst [vmem:[%s8375_s2 + $0x60] sm:$0xff] %v6382_v35  ;;  %v6375_v38 = vpack.c.bf16 %v2524_v36, %v2522_v2  ;;  %v6383_v40 = vpack.c.bf16 %v5120_v37, %v5118_v4 }
 0x2eb   :  { %2606 = vst [vmem:[%s8375_s2 + $0x28] sm:$0xff] %v6375_v38  ;;  %6367 = vst [vmem:[%s8375_s2 + $0x68] sm:$0xff] %v6383_v40 }
 0x2ed   :  { %v2528_v41 = vpop.f32.mrb[12].mxu0  ;;  %v5124_v46 = vpop.f32.mrb[12].mxu1 }
 0x2ee   :  { %v2530_v47 = vpop.f32.mrb[13].mxu0  ;;  %v5126_v52 = vpop.f32.mrb[13].mxu1 }
 0x2ef   :  { %v6376_v53 = vpack.c.bf16 %v2530_v47, %v2528_v41  ;;  %v6384_v57 = vpack.c.bf16 %v5126_v52, %v5124_v46  ;;  %v2532_v58 = vpop.f32.mrb[14].mxu0  ;;  %v5128_v59 = vpop.f32.mrb[14].mxu1 }
 0x2f0   :  { %v2534_v60 = vpop.f32.mrb[15].mxu0  ;;  %v5130_v62 = vpop.f32.mrb[15].mxu1 }
 0x2f1   :  { %2607 = vst [vmem:[%s8375_s2 + $0x30] sm:$0xff] %v6376_v53  ;;  %6368 = vst [vmem:[%s8375_s2 + $0x70] sm:$0xff] %v6384_v57  ;;  %v6377_v0 = vpack.c.bf16 %v2534_v60, %v2532_v58  ;;  %v6385_v7 = vpack.c.bf16 %v5130_v62, %v5128_v59 }
 0x2f3   :  { %2608 = vst [vmem:[%s8375_s2 + $0x38] sm:$0xff] %v6377_v0  ;;  %6369 = vst [vmem:[%s8375_s2 + $0x78] sm:$0xff] %v6385_v7 }

// kernel: discriminator_forward.11
= control target key start
LH: loop header
LB: loop body
LE: loop exit
PB: predicated region body
PF: predicated region fallthrough
CT: control target
= control target key end

     0   :  { %s3739_s24 = smov 0   ;;  %s3741_s25 = smov 0   ;;  %s4280_s0 = inlined_call_operand.vmem [shape: bf16[32,4096], index: 0, kind: input, shape index: {}]   ;;  %s4281_s1 = inlined_call_operand.vmem [shape: bf16[4096,512], index: 1, kind: input, shape index: {}]   ;;  %s4282_s2 = inlined_call_operand.vmem [shape: f32[1,512], index: 2, kind: input, shape index: {}]   ;;  %s4283_s3 = inlined_call_operand.vmem [shape: f32[1,512], index: 3, kind: input, shape index: {}]   ;;  %s4284_s4 = inlined_call_operand.vmem [shape: f32[32,512], index: 4, kind: input, shape index: {}]   ;;  %s4285_s5 = inlined_call_operand.vmem [shape: f32[2,128], index: 5, kind: input, shape index: {}]   ;;  %s4286_s6 = inlined_call_operand.vmem [shape: f32[1,128], index: 6, kind: input, shape index: {}]   ;;  %s4287_s7 = inlined_call_operand.vmem [shape: f32[2,1], index: 7, kind: output, shape index: {}]  }
   0x1   :  { %s3743_s26 = smov 0  }
   0x2 LB: > { %s3755_s27 = sadd.s32 4294967295, %s3696_s26   ;;  %s3758_s28 = sadd.s32 1, %s3696_s26   ;;  %s3696_s26 = sphi %s3743_s26, %s4290_s26   ;;  %s3692_s25 = sphi %s3741_s25, %s4289_s25   ;;  %s3688_s24 = sphi %s3739_s24, %s4288_s24  }
   0x3   : > { %s21_s29 = ssub.s32 %s3696_s26, %s3758_s28  ;;  %s24_s30 = sadd.s32 1, %s3692_s25 }
   0x4   : > { %p22_p0 = scmp.eq.s32.totalorder %s21_s29, 0  ;;  %p31_p1 = scmp.ne.s32.totalorder %s3692_s25, %s3688_s24 }
   0x5   : > { %p32_p2 = scmp.eq.s32.totalorder %s3696_s26, 0  ;;  %p2917_p4 = scmp.ge.s32.totalorder %s3696_s26, 4 }
   0x6   : > { %s3767_s8 = scalar_select %p22_p0, %s3692_s25, %s24_s30  }
   0x7   : > { %p33_p3 = por %p32_p2, %p31_p1  ;;  %224 = sbr.rel (%p2917_p4) target bundleno = 26 (0x1a), region = 36 }
   0xe   : > { %227 = sbr.rel (!%p33_p3) target bundleno = 26 (0x1a), region = 40  ;;  %s229_s9 = sand.u32 (%p33_p3), 1, %s3692_s25  }
   0xf   : > { %s3203_s10 = sshll.u32 (%p33_p3), %s3696_s26, 5  ;;  %s2918_s11 = sshll.u32 (%p33_p3), %s229_s9, 7 }
  0x10   : > { %s3775_s14 = scalar_lea.vmem (%p33_p3), %s4280_s0, %s3203_s10  ;;  %s231_s15 = scalar_lea.vmem (%p33_p3), [#allocation3], %s2918_s11 }
  0x11   : > { %v247_v0 = vld [vmem:[%s3775_s14] sm:$0xff] (%p33_p3)  ;;  %v249_v1 = vld [vmem:[%s3775_s14 + $0x8] sm:$0xff] (%p33_p3)  ;;  %v251_v2 = vld [vmem:[%s3775_s14 + $0x10] sm:$0xff] (%p33_p3) }
  0x12   : > { %248 = vst [vmem:[%s231_s15] sm:$0xff] (%p33_p3), %v247_v0  ;;  %250 = vst [vmem:[%s231_s15 + $0x8] sm:$0xff] (%p33_p3), %v249_v1  ;;  %v253_v3 = vld [vmem:[%s3775_s14 + $0x18] sm:$0xff] (%p33_p3)  ;;  %v255_v4 = vld [vmem:[%s3775_s14 + $0x80] sm:$0xff] (%p33_p3) }
  0x13   : > { %252 = vst [vmem:[%s231_s15 + $0x10] sm:$0xff] (%p33_p3), %v251_v2  ;;  %v257_v5 = vld [vmem:[%s3775_s14 + $0x88] sm:$0xff] (%p33_p3)  ;;  %254 = vst [vmem:[%s231_s15 + $0x18] sm:$0xff] (%p33_p3), %v253_v3  ;;  %v259_v6 = vld [vmem:[%s3775_s14 + $0x90] sm:$0xff] (%p33_p3) }
  0x14   : > { %256 = vst [vmem:[%s231_s15 + $0x20] sm:$0xff] (%p33_p3), %v255_v4  ;;  %258 = vst [vmem:[%s231_s15 + $0x28] sm:$0xff] (%p33_p3), %v257_v5  ;;  %v261_v7 = vld [vmem:[%s3775_s14 + $0x98] sm:$0xff] (%p33_p3)  ;;  %v263_v8 = vld [vmem:[%s3775_s14 + $0x100] sm:$0xff] (%p33_p3) }
  0x15   : > { %260 = vst [vmem:[%s231_s15 + $0x30] sm:$0xff] %v259_v6  ;;  %262 = vst [vmem:[%s231_s15 + $0x38] sm:$0xff] %v261_v7  ;;  %v265_v9 = vld [vmem:[%s3775_s14 + $0x108] sm:$0xff]  ;;  %v267_v10 = vld [vmem:[%s3775_s14 + $0x110] sm:$0xff] }
  0x16   : > { %264 = vst [vmem:[%s231_s15 + $0x40] sm:$0xff] %v263_v8  ;;  %v269_v11 = vld [vmem:[%s3775_s14 + $0x118] sm:$0xff]  ;;  %266 = vst [vmem:[%s231_s15 + $0x48] sm:$0xff] %v265_v9  ;;  %v271_v12 = vld [vmem:[%s3775_s14 + $0x180] sm:$0xff] }
  0x17   : > { %268 = vst [vmem:[%s231_s15 + $0x50] sm:$0xff] %v267_v10  ;;  %270 = vst [vmem:[%s231_s15 + $0x58] sm:$0xff] %v269_v11  ;;  %v273_v13 = vld [vmem:[%s3775_s14 + $0x188] sm:$0xff]  ;;  %v275_v14 = vld [vmem:[%s3775_s14 + $0x190] sm:$0xff] }
  0x18   : > { %272 = vst [vmem:[%s231_s15 + $0x60] sm:$0xff] %v271_v12  ;;  %274 = vst [vmem:[%s231_s15 + $0x68] sm:$0xff] %v273_v13  ;;  %v277_v15 = vld [vmem:[%s3775_s14 + $0x198] sm:$0xff] }
  0x19   : > { %276 = vst [vmem:[%s231_s15 + $0x70] sm:$0xff] %v275_v14  ;;  %278 = vst [vmem:[%s231_s15 + $0x78] sm:$0xff] %v277_v15 }
  0x1a PF: > { %p2921_p5 = scmp.ge.s32.totalorder %s3696_s26, 1  ;;  %p293_p6 = scmp.lt.s32.totalorder %s3696_s26, 5 }
  0x1c   : > { %p294_p7 = pnand %p2921_p5, %p293_p6 }
  0x1d   : > { %s300_s16 = sand.u32 (!%p294_p7), 1, %s3688_s24   ;;  %s2923_s17 = sshll.u32 (!%p294_p7), %s3755_s27, 7 }
  0x1e   : > { %297 = sbr.rel (%p294_p7) target bundleno = 822 (0x336), region = 67  ;;  %s2922_s18 = sshll.u32 (!%p294_p7), %s300_s16, 7 }
  0x1f   : > { %p334_p8 = scmp.lt.s32.totalorder (!%p294_p7), %s2923_s17, 511  ;;  %s3802_s23 = scalar_lea.vmem (!%p294_p7), [#allocation3], %s2922_s18 }
  0x20   : > { %p2926_p9 = scmp.ne.s32.totalorder (!%p294_p7), %s3755_s27, 0 }
  0x25   : > { %s4292_s17 = smov (!%p334_p8, %s2923_s17), 511  ;;  %343 = sbr.rel (%p2926_p9) target bundleno = 47 (0x2f), region = 75 }
  0x26   : > { %s3204_s19 = sshll.u32 %s4292_s17, 4  ;;  %v3698_v16 = vmov (!%p2926_p9), 0.0  }
  0x27   : > { %s3800_s22 = scalar_lea.vmem %s4281_s1, %s3204_s19  ;;  %344 = vst [vmem:[#allocation2] sm:$0xff] (!%p2926_p9), %v3698_v16  ;;  %345 = vst [vmem:[#allocation2 + $0x8] sm:$0xff] (!%p2926_p9), %v3698_v16 }
  0x28   : > { %346 = vst [vmem:[#allocation2 + $0x10] sm:$0xff] (!%p2926_p9), %v3698_v16  ;;  %347 = vst [vmem:[#allocation2 + $0x18] sm:$0xff] (!%p2926_p9), %v3698_v16 }
  0x29   : > { %348 = vst [vmem:[#allocation2 + $0x20] sm:$0xff] (!%p2926_p9), %v3698_v16  ;;  %349 = vst [vmem:[#allocation2 + $0x28] sm:$0xff] (!%p2926_p9), %v3698_v16 }
  0x2a   : > { %350 = vst [vmem:[#allocation2 + $0x30] sm:$0xff] (!%p2926_p9), %v3698_v16  ;;  %351 = vst [vmem:[#allocation2 + $0x38] sm:$0xff] (!%p2926_p9), %v3698_v16 }
  0x2b   : > { %352 = vst [vmem:[#allocation2 + $0x40] sm:$0xff] (!%p2926_p9), %v3698_v16  ;;  %353 = vst [vmem:[#allocation2 + $0x48] sm:$0xff] (!%p2926_p9), %v3698_v16 }
  0x2c   : > { %354 = vst [vmem:[#allocation2 + $0x50] sm:$0xff] %v3698_v16  ;;  %355 = vst [vmem:[#allocation2 + $0x58] sm:$0xff] %v3698_v16 }
  0x2d   : > { %356 = vst [vmem:[#allocation2 + $0x60] sm:$0xff] %v3698_v16  ;;  %357 = vst [vmem:[#allocation2 + $0x68] sm:$0xff] %v3698_v16 }
  0x2e   : > { %358 = vst [vmem:[#allocation2 + $0x70] sm:$0xff] %v3698_v16  ;;  %359 = vst [vmem:[#allocation2 + $0x78] sm:$0xff] %v3698_v16 }
  0x2f PF: > { %v3278_v17 = vld [vmem:[%s3800_s22 + $0x4] ss:$16 sps:$4 sm:$0xff]   ;;  %v3280_v18 = vld [vmem:[%s3800_s22 + $0xc] ss:$16 sps:$4 sm:$0xff]   ;;  %v3282_v19 = vld [vmem:[%s3800_s22] ss:$16 sps:$4 sm:$0xff]  }
  0x30   : > { %2008 = vmatprep.subr.bf16.mxu0 %v3278_v17  ;;  %v3283_v20 = vld [vmem:[%s3800_s22 + $0x8] ss:$16 sps:$4 sm:$0xff]   ;;  %2220 = vmatprep.subr.bf16.mxu1 %v3280_v18  ;;  %v3284_v21 = vld [vmem:[%s3800_s22 + $0x24] ss:$16 sps:$4 sm:$0xff]   ;;  %v3286_v22 = vld [vmem:[%s3800_s22 + $0x2c] ss:$16 sps:$4 sm:$0xff]  }
  0x31   : > { %2009 = vmatpush1.bf16.msra.mxu0 %v3282_v19  ;;  %2221 = vmatpush1.bf16.msra.mxu1 %v3283_v20  ;;  %v3288_v23 = vld [vmem:[%s3800_s22 + $0x20] ss:$16 sps:$4 sm:$0xff]   ;;  %v3289_v24 = vld [vmem:[%s3800_s22 + $0x28] ss:$16 sps:$4 sm:$0xff]   ;;  %v3290_v25 = vld [vmem:[%s3800_s22 + $0x44] ss:$16 sps:$4 sm:$0xff]  }
  0x32   : > { %2010 = vmatprep.subr.bf16.mxu0 %v3284_v21  ;;  %2222 = vmatprep.subr.bf16.mxu1 %v3286_v22  ;;  %v3292_v26 = vld [vmem:[%s3800_s22 + $0x4c] ss:$16 sps:$4 sm:$0xff]   ;;  %v3294_v27 = vld [vmem:[%s3800_s22 + $0x40] ss:$16 sps:$4 sm:$0xff]   ;;  %v3295_v28 = vld [vmem:[%s3800_s22 + $0x48] ss:$16 sps:$4 sm:$0xff]  }
  0x33   : > { %v3296_v29 = vld [vmem:[%s3800_s22 + $0x64] ss:$16 sps:$4 sm:$0xff]   ;;  %v3298_v30 = vld [vmem:[%s3800_s22 + $0x6c] ss:$16 sps:$4 sm:$0xff]   ;;  %v3300_v31 = vld [vmem:[%s3800_s22 + $0x60] ss:$16 sps:$4 sm:$0xff]  }
  0x34   : > { %v3301_v32 = vld [vmem:[%s3800_s22 + $0x68] ss:$16 sps:$4 sm:$0xff]   ;;  %v3302_v33 = vld [vmem:[%s3800_s22 + $0x84] ss:$16 sps:$4 sm:$0xff]   ;;  %v3304_v34 = vld [vmem:[%s3800_s22 + $0x8c] ss:$16 sps:$4 sm:$0xff]  }
  0x35   : > { %2011 = vmatpush1.bf16.msra.mxu0 %v3288_v23  ;;  %2223 = vmatpush1.bf16.msra.mxu1 %v3289_v24  ;;  %v3306_v35 = vld [vmem:[%s3800_s22 + $0x80] ss:$16 sps:$4 sm:$0xff]   ;;  %v3307_v36 = vld [vmem:[%s3800_s22 + $0x88] ss:$16 sps:$4 sm:$0xff]   ;;  %v3308_v37 = vld [vmem:[%s3800_s22 + $0xa4] ss:$16 sps:$4 sm:$0xff]  }
  0x36   : > { %2012 = vmatprep.subr.bf16.mxu0 %v3290_v25  ;;  %2224 = vmatprep.subr.bf16.mxu1 %v3292_v26  ;;  %v3310_v38 = vld [vmem:[%s3800_s22 + $0xac] ss:$16 sps:$4 sm:$0xff]   ;;  %v3312_v39 = vld [vmem:[%s3800_s22 + $0xa0] ss:$16 sps:$4 sm:$0xff]   ;;  %v3313_v40 = vld [vmem:[%s3800_s22 + $0xa8] ss:$16 sps:$4 sm:$0xff]  }
  0x37   : > { %v3314_v41 = vld [vmem:[%s3800_s22 + $0xc4] ss:$16 sps:$4 sm:$0xff]   ;;  %v3316_v42 = vld [vmem:[%s3800_s22 + $0xcc] ss:$16 sps:$4 sm:$0xff]   ;;  %v3318_v43 = vld [vmem:[%s3800_s22 + $0xc0] ss:$16 sps:$4 sm:$0xff]  }
  0x38   : > { %v3319_v44 = vld [vmem:[%s3800_s22 + $0xc8] ss:$16 sps:$4 sm:$0xff]   ;;  %v3320_v45 = vld [vmem:[%s3800_s22 + $0xe4] ss:$16 sps:$4 sm:$0xff]   ;;  %v3322_v46 = vld [vmem:[%s3800_s22 + $0xec] ss:$16 sps:$4 sm:$0xff]  }
  0x39   : > { %2013 = vmatpush1.bf16.msra.mxu0 %v3294_v27  ;;  %2225 = vmatpush1.bf16.msra.mxu1 %v3295_v28  ;;  %v3324_v47 = vld [vmem:[%s3800_s22 + $0xe0] ss:$16 sps:$4 sm:$0xff]   ;;  %v3325_v48 = vld [vmem:[%s3800_s22 + $0xe8] ss:$16 sps:$4 sm:$0xff]   ;;  %v3326_v49 = vld [vmem:[%s3800_s22 + $0x104] ss:$16 sps:$4 sm:$0xff]  }
  0x3a   : > { %2014 = vmatprep.subr.bf16.mxu0 %v3296_v29  ;;  %2226 = vmatprep.subr.bf16.mxu1 %v3298_v30  ;;  %v3328_v50 = vld [vmem:[%s3800_s22 + $0x10c] ss:$16 sps:$4 sm:$0xff]   ;;  %v3330_v51 = vld [vmem:[%s3800_s22 + $0x100] ss:$16 sps:$4 sm:$0xff]   ;;  %v3331_v52 = vld [vmem:[%s3800_s22 + $0x108] ss:$16 sps:$4 sm:$0xff]  }
  0x3b   : > { %v3332_v53 = vld [vmem:[%s3800_s22 + $0x124] ss:$16 sps:$4 sm:$0xff]   ;;  %v3334_v54 = vld [vmem:[%s3800_s22 + $0x12c] ss:$16 sps:$4 sm:$0xff]   ;;  %v3336_v55 = vld [vmem:[%s3800_s22 + $0x120] ss:$16 sps:$4 sm:$0xff]  }
  0x3c   : > { %v3337_v56 = vld [vmem:[%s3800_s22 + $0x128] ss:$16 sps:$4 sm:$0xff]   ;;  %v3338_v57 = vld [vmem:[%s3800_s22 + $0x144] ss:$16 sps:$4 sm:$0xff]   ;;  %v3340_v58 = vld [vmem:[%s3800_s22 + $0x14c] ss:$16 sps:$4 sm:$0xff]  }
  0x3d   : > { %2015 = vmatpush1.bf16.msra.mxu0 %v3300_v31  ;;  %2227 = vmatpush1.bf16.msra.mxu1 %v3301_v32  ;;  %v3342_v59 = vld [vmem:[%s3800_s22 + $0x140] ss:$16 sps:$4 sm:$0xff]   ;;  %v3343_v60 = vld [vmem:[%s3800_s22 + $0x148] ss:$16 sps:$4 sm:$0xff]   ;;  %v3344_v61 = vld [vmem:[%s3800_s22 + $0x164] ss:$16 sps:$4 sm:$0xff]  }
  0x3e   : > { %2016 = vmatprep.subr.bf16.mxu0 %v3302_v33  ;;  %2228 = vmatprep.subr.bf16.mxu1 %v3304_v34  ;;  %v3346_v62 = vld [vmem:[%s3800_s22 + $0x16c] ss:$16 sps:$4 sm:$0xff]   ;;  %v376_v63 = vld [vmem:[%s3802_s23] sm:$0xff]  ;;  %v3349_v2 = vld [vmem:[%s3800_s22 + $0x168] ss:$16 sps:$4 sm:$0xff]   ;;  %p3199_p10 = scmp.ne.s32.totalorder %s3755_s27, 3 }
  0x3f   : > { %v380_v0 = vld [vmem:[%s3802_s23 + $0x20] sm:$0xff]  ;;  %v3352_v5 = vld [vmem:[%s3800_s22 + $0x18c] ss:$16 sps:$4 sm:$0xff]   ;;  %v3355_v7 = vld [vmem:[%s3800_s22 + $0x188] ss:$16 sps:$4 sm:$0xff]  }
  0x40   : > { %v3348_v1 = vld [vmem:[%s3800_s22 + $0x160] ss:$16 sps:$4 sm:$0xff]   ;;  %v2928_v3 = vcombine.high %v376_v63, %v380_v0  ;;  %v3350_v4 = vld [vmem:[%s3800_s22 + $0x184] ss:$16 sps:$4 sm:$0xff]   ;;  %v3358_v9 = vld [vmem:[%s3800_s22 + $0x1ac] ss:$16 sps:$4 sm:$0xff]   ;;  %v2927_v22 = vcombine.low %v376_v63, %v380_v0 }
  0x41   : > { %2017 = vmatpush1.bf16.msra.mxu0 %v3306_v35  ;;  %2229 = vmatpush1.bf16.msra.mxu1 %v3307_v36  ;;  %v3354_v6 = vld [vmem:[%s3800_s22 + $0x180] ss:$16 sps:$4 sm:$0xff]   ;;  %v3356_v8 = vld [vmem:[%s3800_s22 + $0x1a4] ss:$16 sps:$4 sm:$0xff]   ;;  %v3361_v11 = vld [vmem:[%s3800_s22 + $0x1a8] ss:$16 sps:$4 sm:$0xff]  }
  0x42   : > { %2018 = vmatprep.subr.bf16.mxu0 %v3308_v37  ;;  %2230 = vmatprep.subr.bf16.mxu1 %v3310_v38  ;;  %v3360_v10 = vld [vmem:[%s3800_s22 + $0x1a0] ss:$16 sps:$4 sm:$0xff]   ;;  %v3362_v12 = vld [vmem:[%s3800_s22 + $0x1c4] ss:$16 sps:$4 sm:$0xff]   ;;  %v3364_v13 = vld [vmem:[%s3800_s22 + $0x1cc] ss:$16 sps:$4 sm:$0xff]  }
  0x43   : > { %2040 = vmatprep.mubr.bf16.mxu0 %v2928_v3  ;;  %2252 = vmatprep.mubr.bf16.mxu1 %v2928_v3  ;;  %v3366_v14 = vld [vmem:[%s3800_s22 + $0x1c0] ss:$16 sps:$4 sm:$0xff]   ;;  %v3367_v15 = vld [vmem:[%s3800_s22 + $0x1c8] ss:$16 sps:$4 sm:$0xff]   ;;  %v3368_v16 = vld [vmem:[%s3800_s22 + $0x1e4] ss:$16 sps:$4 sm:$0xff]  }
  0x44   : > { %v3370_v17 = vld [vmem:[%s3800_s22 + $0x1ec] ss:$16 sps:$4 sm:$0xff]   ;;  %v3372_v18 = vld [vmem:[%s3800_s22 + $0x1e0] ss:$16 sps:$4 sm:$0xff]   ;;  %v3373_v19 = vld [vmem:[%s3800_s22 + $0x1e8] ss:$16 sps:$4 sm:$0xff]  }
  0x45   : > { %2019 = vmatpush1.bf16.msra.mxu0 %v3312_v39  ;;  %2231 = vmatpush1.bf16.msra.mxu1 %v3313_v40  ;;  %v3376_v20 = vld [vmem:[%s3800_s22 + $0x204] ss:$16 sps:$4 sm:$0xff]   ;;  %v3379_v21 = vld [vmem:[%s3800_s22 + $0x20c] ss:$16 sps:$4 sm:$0xff]   ;;  %v3374_v23 = vld [vmem:[%s3800_s22 + $0x200] ss:$16 sps:$4 sm:$0xff]  }
  0x46   : > { %2020 = vmatprep.subr.bf16.mxu0 %v3314_v41  ;;  %2232 = vmatprep.subr.bf16.mxu1 %v3316_v42  ;;  %v3377_v24 = vld [vmem:[%s3800_s22 + $0x208] ss:$16 sps:$4 sm:$0xff]   ;;  %v3382_v25 = vld [vmem:[%s3800_s22 + $0x224] ss:$16 sps:$4 sm:$0xff]   ;;  %v3385_v26 = vld [vmem:[%s3800_s22 + $0x22c] ss:$16 sps:$4 sm:$0xff]  }
  0x47   : > { %v3380_v27 = vld [vmem:[%s3800_s22 + $0x220] ss:$16 sps:$4 sm:$0xff]   ;;  %v3383_v28 = vld [vmem:[%s3800_s22 + $0x228] ss:$16 sps:$4 sm:$0xff]   ;;  %v3388_v29 = vld [vmem:[%s3800_s22 + $0x244] ss:$16 sps:$4 sm:$0xff]  }
  0x48   : > { %v3391_v30 = vld [vmem:[%s3800_s22 + $0x24c] ss:$16 sps:$4 sm:$0xff]   ;;  %v3386_v31 = vld [vmem:[%s3800_s22 + $0x240] ss:$16 sps:$4 sm:$0xff]   ;;  %v3389_v32 = vld [vmem:[%s3800_s22 + $0x248] ss:$16 sps:$4 sm:$0xff]  }
  0x49   : > { %2021 = vmatpush1.bf16.msra.mxu0 %v3318_v43  ;;  %2233 = vmatpush1.bf16.msra.mxu1 %v3319_v44  ;;  %v3394_v33 = vld [vmem:[%s3800_s22 + $0x264] ss:$16 sps:$4 sm:$0xff]   ;;  %v3397_v34 = vld [vmem:[%s3800_s22 + $0x26c] ss:$16 sps:$4 sm:$0xff]   ;;  %v3392_v35 = vld [vmem:[%s3800_s22 + $0x260] ss:$16 sps:$4 sm:$0xff]  }
  0x4a   : > { %2022 = vmatprep.subr.bf16.mxu0 %v3320_v45  ;;  %2234 = vmatprep.subr.bf16.mxu1 %v3322_v46  ;;  %v3395_v36 = vld [vmem:[%s3800_s22 + $0x268] ss:$16 sps:$4 sm:$0xff]   ;;  %v3400_v37 = vld [vmem:[%s3800_s22 + $0x284] ss:$16 sps:$4 sm:$0xff]   ;;  %v3403_v38 = vld [vmem:[%s3800_s22 + $0x28c] ss:$16 sps:$4 sm:$0xff]  }
  0x4b   : > { %v3398_v39 = vld [vmem:[%s3800_s22 + $0x280] ss:$16 sps:$4 sm:$0xff]   ;;  %v3401_v40 = vld [vmem:[%s3800_s22 + $0x288] ss:$16 sps:$4 sm:$0xff]   ;;  %v3406_v41 = vld [vmem:[%s3800_s22 + $0x2a4] ss:$16 sps:$4 sm:$0xff]  }
  0x4c   : > { %v3409_v42 = vld [vmem:[%s3800_s22 + $0x2ac] ss:$16 sps:$4 sm:$0xff]   ;;  %v384_v43 = vld [vmem:[%s3802_s23 + $0x40] sm:$0xff]  ;;  %v3425_v63 = vld [vmem:[%s3800_s22 + $0x308] ss:$16 sps:$4 sm:$0xff]  }
  0x4d   : > { %2023 = vmatpush1.bf16.msra.mxu0 %v3324_v47  ;;  %2235 = vmatpush1.bf16.msra.mxu1 %v3325_v48  ;;  %v388_v44 = vld [vmem:[%s3802_s23 + $0x60] sm:$0xff]  ;;  %v3407_v47 = vld [vmem:[%s3800_s22 + $0x2a8] ss:$16 sps:$4 sm:$0xff]  }
  0x4e   : > { %2024 = vmatprep.subr.bf16.mxu0 %v3326_v49  ;;  %2236 = vmatprep.subr.bf16.mxu1 %v3328_v50  ;;  %v2936_v45 = vcombine.high %v384_v43, %v388_v44  ;;  %v3404_v46 = vld [vmem:[%s3800_s22 + $0x2a0] ss:$16 sps:$4 sm:$0xff]   ;;  %v2935_v48 = vcombine.low %v384_v43, %v388_v44  ;;  %v3412_v49 = vld [vmem:[%s3800_s22 + $0x2c4] ss:$16 sps:$4 sm:$0xff]   ;;  %v3415_v50 = vld [vmem:[%s3800_s22 + $0x2cc] ss:$16 sps:$4 sm:$0xff]  }
  0x4f   : > { %v3430_v0 = vld [vmem:[%s3800_s22 + $0x324] ss:$16 sps:$4 sm:$0xff]   ;;  %v3431_v3 = vld [vmem:[%s3800_s22 + $0x328] ss:$16 sps:$4 sm:$0xff]  }
  0x50   : > { %v3963_v44 = vld [vmem:[%s3802_s23 + $0x30] sm:$0xff] }
  0x51   : > { %2025 = vmatpush1.bf16.msra.mxu0 %v3330_v51  ;;  %2237 = vmatpush1.bf16.msra.mxu1 %v3331_v52  ;;  %v3900_v51 = vld [vmem:[%s3802_s23 + $0x8] sm:$0xff] }
  0x52   : > { %2026 = vmatprep.subr.bf16.mxu0 %v3332_v53  ;;  %2238 = vmatprep.subr.bf16.mxu1 %v3334_v54  ;;  %v3903_v52 = vld [vmem:[%s3802_s23 + $0x28] sm:$0xff]  ;;  %v3410_v53 = vld [vmem:[%s3800_s22 + $0x2c0] ss:$16 sps:$4 sm:$0xff]  }
  0x53   : > { %v3413_v54 = vld [vmem:[%s3800_s22 + $0x2c8] ss:$16 sps:$4 sm:$0xff]  }
  0x55   : > { %2027 = vmatpush1.bf16.msra.mxu0 %v3336_v55  ;;  %2239 = vmatpush1.bf16.msra.mxu1 %v3337_v56  ;;  %v2930_v55 = vcombine.high %v3900_v51, %v3903_v52  ;;  %v3418_v56 = vld [vmem:[%s3800_s22 + $0x2e4] ss:$16 sps:$4 sm:$0xff]  }
  0x56   : > { %2028 = vmatprep.subr.bf16.mxu0 %v3338_v57  ;;  %2240 = vmatprep.subr.bf16.mxu1 %v3340_v58  ;;  %v3421_v57 = vld [vmem:[%s3800_s22 + $0x2ec] ss:$16 sps:$4 sm:$0xff]   ;;  %v3416_v58 = vld [vmem:[%s3800_s22 + $0x2e0] ss:$16 sps:$4 sm:$0xff]  }
  0x59   : > { %2029 = vmatpush1.bf16.msra.mxu0 %v3342_v59  ;;  %2241 = vmatpush1.bf16.msra.mxu1 %v3343_v60  ;;  %v3419_v59 = vld [vmem:[%s3800_s22 + $0x2e8] ss:$16 sps:$4 sm:$0xff]   ;;  %v3424_v60 = vld [vmem:[%s3800_s22 + $0x304] ss:$16 sps:$4 sm:$0xff]  }
  0x5a   : > { %2030 = vmatprep.subr.bf16.mxu0 %v3344_v61  ;;  %2242 = vmatprep.subr.bf16.mxu1 %v3346_v62  ;;  %v3427_v61 = vld [vmem:[%s3800_s22 + $0x30c] ss:$16 sps:$4 sm:$0xff]   ;;  %v3422_v62 = vld [vmem:[%s3800_s22 + $0x300] ss:$16 sps:$4 sm:$0xff]  }
  0x5d   : > { %2031 = vmatpush1.bf16.msra.mxu0 %v3348_v1  ;;  %2243 = vmatpush1.bf16.msra.mxu1 %v3349_v2  ;;  %v3433_v1 = vld [vmem:[%s3800_s22 + $0x32c] ss:$16 sps:$4 sm:$0xff]   ;;  %v3428_v2 = vld [vmem:[%s3800_s22 + $0x320] ss:$16 sps:$4 sm:$0xff]  }
  0x5e   : > { %2032 = vmatprep.subr.bf16.mxu0 %v3350_v4  ;;  %2244 = vmatprep.subr.bf16.mxu1 %v3352_v5  ;;  %v3436_v4 = vld [vmem:[%s3800_s22 + $0x344] ss:$16 sps:$4 sm:$0xff]   ;;  %v3439_v5 = vld [vmem:[%s3800_s22 + $0x34c] ss:$16 sps:$4 sm:$0xff]  }
  0x61   : > { %2033 = vmatpush1.bf16.msra.mxu0 %v3354_v6  ;;  %2245 = vmatpush1.bf16.msra.mxu1 %v3355_v7  ;;  %v3434_v6 = vld [vmem:[%s3800_s22 + $0x340] ss:$16 sps:$4 sm:$0xff]   ;;  %v3437_v7 = vld [vmem:[%s3800_s22 + $0x348] ss:$16 sps:$4 sm:$0xff]  }
  0x62   : > { %2034 = vmatprep.subr.bf16.mxu0 %v3356_v8  ;;  %2246 = vmatprep.subr.bf16.mxu1 %v3358_v9  ;;  %v3442_v8 = vld [vmem:[%s3800_s22 + $0x364] ss:$16 sps:$4 sm:$0xff]   ;;  %v3445_v9 = vld [vmem:[%s3800_s22 + $0x36c] ss:$16 sps:$4 sm:$0xff]  }
  0x65   : > { %2035 = vmatpush1.bf16.msra.mxu0 %v3360_v10  ;;  %2247 = vmatpush1.bf16.msra.mxu1 %v3361_v11  ;;  %v3440_v10 = vld [vmem:[%s3800_s22 + $0x360] ss:$16 sps:$4 sm:$0xff]   ;;  %v3443_v11 = vld [vmem:[%s3800_s22 + $0x368] ss:$16 sps:$4 sm:$0xff]  }
  0x66   : > { %2036 = vmatprep.subr.bf16.mxu0 %v3362_v12  ;;  %2248 = vmatprep.subr.bf16.mxu1 %v3364_v13  ;;  %v3448_v12 = vld [vmem:[%s3800_s22 + $0x384] ss:$16 sps:$4 sm:$0xff]   ;;  %v3451_v13 = vld [vmem:[%s3800_s22 + $0x38c] ss:$16 sps:$4 sm:$0xff]  }
  0x69   : > { %2037 = vmatpush1.bf16.msra.mxu0 %v3366_v14  ;;  %2249 = vmatpush1.bf16.msra.mxu1 %v3367_v15  ;;  %v3446_v14 = vld [vmem:[%s3800_s22 + $0x380] ss:$16 sps:$4 sm:$0xff]   ;;  %v3449_v15 = vld [vmem:[%s3800_s22 + $0x388] ss:$16 sps:$4 sm:$0xff]  }
  0x6a   : > { %2038 = vmatprep.subr.bf16.mxu0 %v3368_v16  ;;  %2250 = vmatprep.subr.bf16.mxu1 %v3370_v17  ;;  %v3454_v16 = vld [vmem:[%s3800_s22 + $0x3a4] ss:$16 sps:$4 sm:$0xff]   ;;  %v3457_v17 = vld [vmem:[%s3800_s22 + $0x3ac] ss:$16 sps:$4 sm:$0xff]  }
  0x6d   : > { %2039 = vmatpush1.bf16.msra.mxu0 %v3372_v18  ;;  %2251 = vmatpush1.bf16.msra.mxu1 %v3373_v19  ;;  %v3452_v18 = vld [vmem:[%s3800_s22 + $0x3a0] ss:$16 sps:$4 sm:$0xff]   ;;  %v3455_v19 = vld [vmem:[%s3800_s22 + $0x3a8] ss:$16 sps:$4 sm:$0xff]  }
  0x6e   : > { %2061 = vmatprep.subr.bf16.mxu0 %v3376_v20  ;;  %2273 = vmatprep.subr.bf16.mxu1 %v3379_v21  ;;  %v3460_v20 = vld [vmem:[%s3800_s22 + $0x3c4] ss:$16 sps:$4 sm:$0xff]   ;;  %v3463_v21 = vld [vmem:[%s3800_s22 + $0x3cc] ss:$16 sps:$4 sm:$0xff]  }
  0x70   : > { %2041 = vmatmul.mubr.bf16.vlgmr.msra.gmra.mrb[0].mxu0 %v2927_v22  ;;  %2253 = vmatmul.mubr.bf16.vlgmr.msra.gmra.mrb[0].mxu1 %v2927_v22  ;;  %v3458_v22 = vld [vmem:[%s3800_s22 + $0x3c0] ss:$16 sps:$4 sm:$0xff]  }
  0x71   : > { %2062 = vmatpush1.bf16.msra.mxu0 %v3374_v23  ;;  %2274 = vmatpush1.bf16.msra.mxu1 %v3377_v24  ;;  %v3461_v23 = vld [vmem:[%s3800_s22 + $0x3c8] ss:$16 sps:$4 sm:$0xff]   ;;  %v3466_v24 = vld [vmem:[%s3800_s22 + $0x3e4] ss:$16 sps:$4 sm:$0xff]  }
  0x72   : > { %2063 = vmatprep.subr.bf16.mxu0 %v3382_v25  ;;  %2275 = vmatprep.subr.bf16.mxu1 %v3385_v26  ;;  %v3469_v25 = vld [vmem:[%s3800_s22 + $0x3ec] ss:$16 sps:$4 sm:$0xff]   ;;  %v3464_v26 = vld [vmem:[%s3800_s22 + $0x3e0] ss:$16 sps:$4 sm:$0xff]  }
  0x73   : > { %2050 = vmatprep.mubr.bf16.mxu0 %v2936_v45  ;;  %2262 = vmatprep.mubr.bf16.mxu1 %v2936_v45  ;;  %v3482_v45 = vld [vmem:[%s3800_s22 + $0x440] ss:$16 sps:$4 sm:$0xff]  }
  0x75   : > { %2064 = vmatpush1.bf16.msra.mxu0 %v3380_v27  ;;  %2276 = vmatpush1.bf16.msra.mxu1 %v3383_v28  ;;  %v3467_v27 = vld [vmem:[%s3800_s22 + $0x3e8] ss:$16 sps:$4 sm:$0xff]   ;;  %v3472_v28 = vld [vmem:[%s3800_s22 + $0x404] ss:$16 sps:$4 sm:$0xff]  }
  0x76   : > { %2065 = vmatprep.subr.bf16.mxu0 %v3388_v29  ;;  %2277 = vmatprep.subr.bf16.mxu1 %v3391_v30  ;;  %v3475_v29 = vld [vmem:[%s3800_s22 + $0x40c] ss:$16 sps:$4 sm:$0xff]   ;;  %v3470_v30 = vld [vmem:[%s3800_s22 + $0x400] ss:$16 sps:$4 sm:$0xff]  }
  0x78   : > { %2051 = vmatmul.mubr.bf16.gmra.mrb[4].mxu0 %v2935_v48  ;;  %2263 = vmatmul.mubr.bf16.gmra.mrb[4].mxu1 %v2935_v48  ;;  %v3493_v48 = vld [vmem:[%s3800_s22 + $0x46c] ss:$16 sps:$4 sm:$0xff]  }
  0x79   : > { %2066 = vmatpush1.bf16.msra.mxu0 %v3386_v31  ;;  %2278 = vmatpush1.bf16.msra.mxu1 %v3389_v32  ;;  %v3473_v31 = vld [vmem:[%s3800_s22 + $0x408] ss:$16 sps:$4 sm:$0xff]   ;;  %v2929_v32 = vcombine.low %v3900_v51, %v3903_v52  ;;  %v3496_v52 = vld [vmem:[%s3800_s22 + $0x484] ss:$16 sps:$4 sm:$0xff]  }
  0x7a   : > { %2067 = vmatprep.subr.bf16.mxu0 %v3394_v33  ;;  %2279 = vmatprep.subr.bf16.mxu1 %v3397_v34  ;;  %v385_v33 = vld [vmem:[%s3802_s23 + $0x48] sm:$0xff] }
  0x7b   : > { %2093 = vmatprep.mubr.bf16.mxu0 %v2930_v55  ;;  %2305 = vmatprep.mubr.bf16.mxu1 %v2930_v55  ;;  %v389_v34 = vld [vmem:[%s3802_s23 + $0x68] sm:$0xff] }
  0x7c   : > { %v2937_v43 = vcombine.low %v385_v33, %v389_v34  ;;  %v3491_v51 = vld [vmem:[%s3800_s22 + $0x468] ss:$16 sps:$4 sm:$0xff]  }
  0x7d   : > { %2068 = vmatpush1.bf16.msra.mxu0 %v3392_v35  ;;  %2280 = vmatpush1.bf16.msra.mxu1 %v3395_v36  ;;  %v3478_v35 = vld [vmem:[%s3800_s22 + $0x424] ss:$16 sps:$4 sm:$0xff]   ;;  %v3481_v36 = vld [vmem:[%s3800_s22 + $0x42c] ss:$16 sps:$4 sm:$0xff]   ;;  %v3497_v55 = vld [vmem:[%s3800_s22 + $0x488] ss:$16 sps:$4 sm:$0xff]  }
  0x7e   : > { %2069 = vmatprep.subr.bf16.mxu0 %v3400_v37  ;;  %2281 = vmatprep.subr.bf16.mxu1 %v3403_v38  ;;  %v2938_v37 = vcombine.high %v385_v33, %v389_v34  ;;  %v3476_v38 = vld [vmem:[%s3800_s22 + $0x420] ss:$16 sps:$4 sm:$0xff]   ;;  %v3565_v33 = vld [vmem:[%s3800_s22 + $0x5ec] ss:$16 sps:$4 sm:$0xff]  }
  0x7f   : > { %v3560_v34 = vld [vmem:[%s3800_s22 + $0x5e0] ss:$16 sps:$4 sm:$0xff]  }
  0x81   : > { %2070 = vmatpush1.bf16.msra.mxu0 %v3398_v39  ;;  %2282 = vmatpush1.bf16.msra.mxu1 %v3401_v40  ;;  %v3479_v39 = vld [vmem:[%s3800_s22 + $0x428] ss:$16 sps:$4 sm:$0xff]   ;;  %v3484_v40 = vld [vmem:[%s3800_s22 + $0x444] ss:$16 sps:$4 sm:$0xff]  }
  0x82   : > { %2071 = vmatprep.subr.bf16.mxu0 %v3406_v41  ;;  %2283 = vmatprep.subr.bf16.mxu1 %v3409_v42  ;;  %v3487_v41 = vld [vmem:[%s3800_s22 + $0x44c] ss:$16 sps:$4 sm:$0xff]   ;;  %v3960_v42 = vld [vmem:[%s3802_s23 + $0x10] sm:$0xff] }
  0x85   : > { %2072 = vmatpush1.bf16.msra.mxu0 %v3404_v46  ;;  %2284 = vmatpush1.bf16.msra.mxu1 %v3407_v47  ;;  %v3485_v46 = vld [vmem:[%s3800_s22 + $0x448] ss:$16 sps:$4 sm:$0xff]   ;;  %v3490_v47 = vld [vmem:[%s3800_s22 + $0x464] ss:$16 sps:$4 sm:$0xff]  }
  0x86   : > { %2073 = vmatprep.subr.bf16.mxu0 %v3412_v49  ;;  %2285 = vmatprep.subr.bf16.mxu1 %v3415_v50  ;;  %v2932_v49 = vcombine.high %v3960_v42, %v3963_v44  ;;  %v3488_v50 = vld [vmem:[%s3800_s22 + $0x460] ss:$16 sps:$4 sm:$0xff]  }
  0x89   : > { %2074 = vmatpush1.bf16.msra.mxu0 %v3410_v53  ;;  %2286 = vmatpush1.bf16.msra.mxu1 %v3413_v54  ;;  %v3499_v53 = vld [vmem:[%s3800_s22 + $0x48c] ss:$16 sps:$4 sm:$0xff]   ;;  %v3494_v54 = vld [vmem:[%s3800_s22 + $0x480] ss:$16 sps:$4 sm:$0xff]  }
  0x8a   : > { %2075 = vmatprep.subr.bf16.mxu0 %v3418_v56  ;;  %2287 = vmatprep.subr.bf16.mxu1 %v3421_v57  ;;  %v3502_v56 = vld [vmem:[%s3800_s22 + $0x4a4] ss:$16 sps:$4 sm:$0xff]   ;;  %v3505_v57 = vld [vmem:[%s3800_s22 + $0x4ac] ss:$16 sps:$4 sm:$0xff]  }
  0x8d   : > { %2076 = vmatpush1.bf16.msra.mxu0 %v3416_v58  ;;  %2288 = vmatpush1.bf16.msra.mxu1 %v3419_v59  ;;  %v3500_v58 = vld [vmem:[%s3800_s22 + $0x4a0] ss:$16 sps:$4 sm:$0xff]   ;;  %v3503_v59 = vld [vmem:[%s3800_s22 + $0x4a8] ss:$16 sps:$4 sm:$0xff]  }
  0x8e   : > { %2077 = vmatprep.subr.bf16.mxu0 %v3424_v60  ;;  %2289 = vmatprep.subr.bf16.mxu1 %v3427_v61  ;;  %v3508_v60 = vld [vmem:[%s3800_s22 + $0x4c4] ss:$16 sps:$4 sm:$0xff]   ;;  %v3511_v61 = vld [vmem:[%s3800_s22 + $0x4cc] ss:$16 sps:$4 sm:$0xff]  }
  0x91   : > { %2078 = vmatpush1.bf16.msra.mxu0 %v3422_v62  ;;  %2290 = vmatpush1.bf16.msra.mxu1 %v3425_v63  ;;  %v3506_v62 = vld [vmem:[%s3800_s22 + $0x4c0] ss:$16 sps:$4 sm:$0xff]   ;;  %v3509_v63 = vld [vmem:[%s3800_s22 + $0x4c8] ss:$16 sps:$4 sm:$0xff]  }
  0x92   : > { %2079 = vmatprep.subr.bf16.mxu0 %v3430_v0  ;;  %2291 = vmatprep.subr.bf16.mxu1 %v3433_v1  ;;  %v3514_v0 = vld [vmem:[%s3800_s22 + $0x4e4] ss:$16 sps:$4 sm:$0xff]   ;;  %v3517_v1 = vld [vmem:[%s3800_s22 + $0x4ec] ss:$16 sps:$4 sm:$0xff]  }
  0x95   : > { %2080 = vmatpush1.bf16.msra.mxu0 %v3428_v2  ;;  %2292 = vmatpush1.bf16.msra.mxu1 %v3431_v3  ;;  %v3512_v2 = vld [vmem:[%s3800_s22 + $0x4e0] ss:$16 sps:$4 sm:$0xff]   ;;  %v3515_v3 = vld [vmem:[%s3800_s22 + $0x4e8] ss:$16 sps:$4 sm:$0xff]  }
  0x96   : > { %2081 = vmatprep.subr.bf16.mxu0 %v3436_v4  ;;  %2293 = vmatprep.subr.bf16.mxu1 %v3439_v5  ;;  %v3520_v4 = vld [vmem:[%s3800_s22 + $0x504] ss:$16 sps:$4 sm:$0xff]   ;;  %v3523_v5 = vld [vmem:[%s3800_s22 + $0x50c] ss:$16 sps:$4 sm:$0xff]  }
  0x99   : > { %2082 = vmatpush1.bf16.msra.mxu0 %v3434_v6  ;;  %2294 = vmatpush1.bf16.msra.mxu1 %v3437_v7  ;;  %v3518_v6 = vld [vmem:[%s3800_s22 + $0x500] ss:$16 sps:$4 sm:$0xff]   ;;  %v3521_v7 = vld [vmem:[%s3800_s22 + $0x508] ss:$16 sps:$4 sm:$0xff]  }
  0x9a   : > { %2083 = vmatprep.subr.bf16.mxu0 %v3442_v8  ;;  %2295 = vmatprep.subr.bf16.mxu1 %v3445_v9  ;;  %v3526_v8 = vld [vmem:[%s3800_s22 + $0x524] ss:$16 sps:$4 sm:$0xff]   ;;  %v3529_v9 = vld [vmem:[%s3800_s22 + $0x52c] ss:$16 sps:$4 sm:$0xff]  }
  0x9d   : > { %2084 = vmatpush1.bf16.msra.mxu0 %v3440_v10  ;;  %2296 = vmatpush1.bf16.msra.mxu1 %v3443_v11  ;;  %v3524_v10 = vld [vmem:[%s3800_s22 + $0x520] ss:$16 sps:$4 sm:$0xff]   ;;  %v3527_v11 = vld [vmem:[%s3800_s22 + $0x528] ss:$16 sps:$4 sm:$0xff]  }
  0x9e   : > { %2085 = vmatprep.subr.bf16.mxu0 %v3448_v12  ;;  %2297 = vmatprep.subr.bf16.mxu1 %v3451_v13  ;;  %v3532_v12 = vld [vmem:[%s3800_s22 + $0x544] ss:$16 sps:$4 sm:$0xff]   ;;  %v3535_v13 = vld [vmem:[%s3800_s22 + $0x54c] ss:$16 sps:$4 sm:$0xff]  }
  0xa1   : > { %2086 = vmatpush1.bf16.msra.mxu0 %v3446_v14  ;;  %2298 = vmatpush1.bf16.msra.mxu1 %v3449_v15  ;;  %v3530_v14 = vld [vmem:[%s3800_s22 + $0x540] ss:$16 sps:$4 sm:$0xff]   ;;  %v3533_v15 = vld [vmem:[%s3800_s22 + $0x548] ss:$16 sps:$4 sm:$0xff]  }
  0xa2   : > { %2087 = vmatprep.subr.bf16.mxu0 %v3454_v16  ;;  %2299 = vmatprep.subr.bf16.mxu1 %v3457_v17  ;;  %v3538_v16 = vld [vmem:[%s3800_s22 + $0x564] ss:$16 sps:$4 sm:$0xff]   ;;  %v3541_v17 = vld [vmem:[%s3800_s22 + $0x56c] ss:$16 sps:$4 sm:$0xff]  }
  0xa5   : > { %2088 = vmatpush1.bf16.msra.mxu0 %v3452_v18  ;;  %2300 = vmatpush1.bf16.msra.mxu1 %v3455_v19  ;;  %v3536_v18 = vld [vmem:[%s3800_s22 + $0x560] ss:$16 sps:$4 sm:$0xff]   ;;  %v3539_v19 = vld [vmem:[%s3800_s22 + $0x568] ss:$16 sps:$4 sm:$0xff]  }
  0xa6   : > { %2089 = vmatprep.subr.bf16.mxu0 %v3460_v20  ;;  %2301 = vmatprep.subr.bf16.mxu1 %v3463_v21  ;;  %v3544_v20 = vld [vmem:[%s3800_s22 + $0x584] ss:$16 sps:$4 sm:$0xff]   ;;  %v3547_v21 = vld [vmem:[%s3800_s22 + $0x58c] ss:$16 sps:$4 sm:$0xff]  }
  0xa9   : > { %2090 = vmatpush1.bf16.msra.mxu0 %v3458_v22  ;;  %2302 = vmatpush1.bf16.msra.mxu1 %v3461_v23  ;;  %v3542_v22 = vld [vmem:[%s3800_s22 + $0x580] ss:$16 sps:$4 sm:$0xff]   ;;  %v3545_v23 = vld [vmem:[%s3800_s22 + $0x588] ss:$16 sps:$4 sm:$0xff]  }
  0xaa   : > { %2091 = vmatprep.subr.bf16.mxu0 %v3466_v24  ;;  %2303 = vmatprep.subr.bf16.mxu1 %v3469_v25  ;;  %v3550_v24 = vld [vmem:[%s3800_s22 + $0x5a4] ss:$16 sps:$4 sm:$0xff]   ;;  %v3553_v25 = vld [vmem:[%s3800_s22 + $0x5ac] ss:$16 sps:$4 sm:$0xff]  }
  0xad   : > { %2092 = vmatpush1.bf16.msra.mxu0 %v3464_v26  ;;  %2304 = vmatpush1.bf16.msra.mxu1 %v3467_v27  ;;  %v3548_v26 = vld [vmem:[%s3800_s22 + $0x5a0] ss:$16 sps:$4 sm:$0xff]   ;;  %v3551_v27 = vld [vmem:[%s3800_s22 + $0x5a8] ss:$16 sps:$4 sm:$0xff]  }
  0xae   : > { %2114 = vmatprep.subr.bf16.mxu0 %v3472_v28  ;;  %2326 = vmatprep.subr.bf16.mxu1 %v3475_v29  ;;  %v3556_v28 = vld [vmem:[%s3800_s22 + $0x5c4] ss:$16 sps:$4 sm:$0xff]   ;;  %v3559_v29 = vld [vmem:[%s3800_s22 + $0x5cc] ss:$16 sps:$4 sm:$0xff]  }
  0xb0   : > { %2094 = vmatmul.mubr.bf16.vlgmr.msra.gmra.mrb[0].mxu0 %v2929_v32  ;;  %2306 = vmatmul.mubr.bf16.vlgmr.msra.gmra.mrb[0].mxu1 %v2929_v32  ;;  %v3562_v32 = vld [vmem:[%s3800_s22 + $0x5e4] ss:$16 sps:$4 sm:$0xff]  }
  0xb1   : > { %2115 = vmatpush1.bf16.msra.mxu0 %v3470_v30  ;;  %2327 = vmatpush1.bf16.msra.mxu1 %v3473_v31  ;;  %v3554_v30 = vld [vmem:[%s3800_s22 + $0x5c0] ss:$16 sps:$4 sm:$0xff]   ;;  %v3557_v31 = vld [vmem:[%s3800_s22 + $0x5c8] ss:$16 sps:$4 sm:$0xff]  }
  0xb2   : > { %2116 = vmatprep.subr.bf16.mxu0 %v3478_v35  ;;  %2328 = vmatprep.subr.bf16.mxu1 %v3481_v36  ;;  %v3563_v35 = vld [vmem:[%s3800_s22 + $0x5e8] ss:$16 sps:$4 sm:$0xff]   ;;  %v3568_v36 = vld [vmem:[%s3800_s22 + $0x604] ss:$16 sps:$4 sm:$0xff]  }
  0xb3   : > { %2103 = vmatprep.mubr.bf16.mxu0 %v2938_v37  ;;  %2315 = vmatprep.mubr.bf16.mxu1 %v2938_v37  ;;  %v3571_v37 = vld [vmem:[%s3800_s22 + $0x60c] ss:$16 sps:$4 sm:$0xff]  }
  0xb5   : > { %2117 = vmatpush1.bf16.msra.mxu0 %v3476_v38  ;;  %2329 = vmatpush1.bf16.msra.mxu1 %v3479_v39  ;;  %v2931_v38 = vcombine.low %v3960_v42, %v3963_v44  ;;  %v386_v39 = vld [vmem:[%s3802_s23 + $0x50] sm:$0xff]  ;;  %v3575_v44 = vld [vmem:[%s3800_s22 + $0x628] ss:$16 sps:$4 sm:$0xff]  }
  0xb6   : > { %2118 = vmatprep.subr.bf16.mxu0 %v3484_v40  ;;  %2330 = vmatprep.subr.bf16.mxu1 %v3487_v41  ;;  %v390_v40 = vld [vmem:[%s3802_s23 + $0x70] sm:$0xff] }
  0xb7   : > { %v3566_v41 = vld [vmem:[%s3800_s22 + $0x600] ss:$16 sps:$4 sm:$0xff]  }
  0xb8   : > { %2104 = vmatmul.mubr.bf16.gmra.mrb[4].mxu0 %v2937_v43  ;;  %2316 = vmatmul.mubr.bf16.gmra.mrb[4].mxu1 %v2937_v43  ;;  %v3569_v43 = vld [vmem:[%s3800_s22 + $0x608] ss:$16 sps:$4 sm:$0xff]   ;;  %v3572_v42 = vld [vmem:[%s3800_s22 + $0x620] ss:$16 sps:$4 sm:$0xff]  }
  0xb9   : > { %2119 = vmatpush1.bf16.msra.mxu0 %v3482_v45  ;;  %2331 = vmatpush1.bf16.msra.mxu1 %v3485_v46  ;;  %v3574_v45 = vld [vmem:[%s3800_s22 + $0x624] ss:$16 sps:$4 sm:$0xff]   ;;  %v3577_v46 = vld [vmem:[%s3800_s22 + $0x62c] ss:$16 sps:$4 sm:$0xff]  }
  0xba   : > { %2120 = vmatprep.subr.bf16.mxu0 %v3490_v47  ;;  %2332 = vmatprep.subr.bf16.mxu1 %v3493_v48  ;;  %v2940_v47 = vcombine.high %v386_v39, %v390_v40  ;;  %v3580_v48 = vld [vmem:[%s3800_s22 + $0x644] ss:$16 sps:$4 sm:$0xff]  }
  0xbb   : > { %2146 = vmatprep.mubr.bf16.mxu0 %v2932_v49  ;;  %2358 = vmatprep.mubr.bf16.mxu1 %v2932_v49  ;;  %v3583_v49 = vld [vmem:[%s3800_s22 + $0x64c] ss:$16 sps:$4 sm:$0xff]  }
  0xbd   : > { %2121 = vmatpush1.bf16.msra.mxu0 %v3488_v50  ;;  %2333 = vmatpush1.bf16.msra.mxu1 %v3491_v51  ;;  %v2939_v50 = vcombine.low %v386_v39, %v390_v40  ;;  %v4036_v51 = vld [vmem:[%s3802_s23 + $0x18] sm:$0xff]  ;;  %v3658_v40 = vld [vmem:[%s3800_s22 + $0x7e4] ss:$16 sps:$4 sm:$0xff]  }
  0xbe   : > { %2122 = vmatprep.subr.bf16.mxu0 %v3496_v52  ;;  %2334 = vmatprep.subr.bf16.mxu1 %v3499_v53  ;;  %v4039_v52 = vld [vmem:[%s3802_s23 + $0x38] sm:$0xff]  ;;  %v3578_v53 = vld [vmem:[%s3800_s22 + $0x640] ss:$16 sps:$4 sm:$0xff]  }
  0xbf   : > { %v3653_v39 = vld [vmem:[%s3800_s22 + $0x7c8] ss:$16 sps:$4 sm:$0xff]  }
  0xc1   : > { %2123 = vmatpush1.bf16.msra.mxu0 %v3494_v54  ;;  %2335 = vmatpush1.bf16.msra.mxu1 %v3497_v55  ;;  %v3581_v54 = vld [vmem:[%s3800_s22 + $0x648] ss:$16 sps:$4 sm:$0xff]   ;;  %v3586_v55 = vld [vmem:[%s3800_s22 + $0x664] ss:$16 sps:$4 sm:$0xff]  }
  0xc2   : > { %2124 = vmatprep.subr.bf16.mxu0 %v3502_v56  ;;  %2336 = vmatprep.subr.bf16.mxu1 %v3505_v57  ;;  %v3589_v56 = vld [vmem:[%s3800_s22 + $0x66c] ss:$16 sps:$4 sm:$0xff]   ;;  %v2934_v57 = vcombine.high %v4036_v51, %v4039_v52 }
  0xc5   : > { %2125 = vmatpush1.bf16.msra.mxu0 %v3500_v58  ;;  %2337 = vmatpush1.bf16.msra.mxu1 %v3503_v59  ;;  %v3584_v58 = vld [vmem:[%s3800_s22 + $0x660] ss:$16 sps:$4 sm:$0xff]   ;;  %v3587_v59 = vld [vmem:[%s3800_s22 + $0x668] ss:$16 sps:$4 sm:$0xff]  }
  0xc6   : > { %2126 = vmatprep.subr.bf16.mxu0 %v3508_v60  ;;  %2338 = vmatprep.subr.bf16.mxu1 %v3511_v61  ;;  %v3592_v60 = vld [vmem:[%s3800_s22 + $0x684] ss:$16 sps:$4 sm:$0xff]   ;;  %v3595_v61 = vld [vmem:[%s3800_s22 + $0x68c] ss:$16 sps:$4 sm:$0xff]  }
  0xc9   : > { %2127 = vmatpush1.bf16.msra.mxu0 %v3506_v62  ;;  %2339 = vmatpush1.bf16.msra.mxu1 %v3509_v63  ;;  %v3590_v62 = vld [vmem:[%s3800_s22 + $0x680] ss:$16 sps:$4 sm:$0xff]   ;;  %v3593_v63 = vld [vmem:[%s3800_s22 + $0x688] ss:$16 sps:$4 sm:$0xff]  }
  0xca   : > { %2128 = vmatprep.subr.bf16.mxu0 %v3514_v0  ;;  %2340 = vmatprep.subr.bf16.mxu1 %v3517_v1  ;;  %v3598_v0 = vld [vmem:[%s3800_s22 + $0x6a4] ss:$16 sps:$4 sm:$0xff]   ;;  %v3601_v1 = vld [vmem:[%s3800_s22 + $0x6ac] ss:$16 sps:$4 sm:$0xff]  }
  0xcd   : > { %2129 = vmatpush1.bf16.msra.mxu0 %v3512_v2  ;;  %2341 = vmatpush1.bf16.msra.mxu1 %v3515_v3  ;;  %v3596_v2 = vld [vmem:[%s3800_s22 + $0x6a0] ss:$16 sps:$4 sm:$0xff]   ;;  %v3599_v3 = vld [vmem:[%s3800_s22 + $0x6a8] ss:$16 sps:$4 sm:$0xff]  }
  0xce   : > { %2130 = vmatprep.subr.bf16.mxu0 %v3520_v4  ;;  %2342 = vmatprep.subr.bf16.mxu1 %v3523_v5  ;;  %v3604_v4 = vld [vmem:[%s3800_s22 + $0x6c4] ss:$16 sps:$4 sm:$0xff]   ;;  %v3607_v5 = vld [vmem:[%s3800_s22 + $0x6cc] ss:$16 sps:$4 sm:$0xff]  }
  0xd1   : > { %2131 = vmatpush1.bf16.msra.mxu0 %v3518_v6  ;;  %2343 = vmatpush1.bf16.msra.mxu1 %v3521_v7  ;;  %v3602_v6 = vld [vmem:[%s3800_s22 + $0x6c0] ss:$16 sps:$4 sm:$0xff]   ;;  %v3605_v7 = vld [vmem:[%s3800_s22 + $0x6c8] ss:$16 sps:$4 sm:$0xff]  }
  0xd2   : > { %2132 = vmatprep.subr.bf16.mxu0 %v3526_v8  ;;  %2344 = vmatprep.subr.bf16.mxu1 %v3529_v9  ;;  %v3610_v8 = vld [vmem:[%s3800_s22 + $0x6e4] ss:$16 sps:$4 sm:$0xff]   ;;  %v3613_v9 = vld [vmem:[%s3800_s22 + $0x6ec] ss:$16 sps:$4 sm:$0xff]  }
  0xd5   : > { %2133 = vmatpush1.bf16.msra.mxu0 %v3524_v10  ;;  %2345 = vmatpush1.bf16.msra.mxu1 %v3527_v11  ;;  %v3608_v10 = vld [vmem:[%s3800_s22 + $0x6e0] ss:$16 sps:$4 sm:$0xff]   ;;  %v3611_v11 = vld [vmem:[%s3800_s22 + $0x6e8] ss:$16 sps:$4 sm:$0xff]  }
  0xd6   : > { %2134 = vmatprep.subr.bf16.mxu0 %v3532_v12  ;;  %2346 = vmatprep.subr.bf16.mxu1 %v3535_v13  ;;  %v3616_v12 = vld [vmem:[%s3800_s22 + $0x704] ss:$16 sps:$4 sm:$0xff]   ;;  %v3619_v13 = vld [vmem:[%s3800_s22 + $0x70c] ss:$16 sps:$4 sm:$0xff]  }
  0xd9   : > { %2135 = vmatpush1.bf16.msra.mxu0 %v3530_v14  ;;  %2347 = vmatpush1.bf16.msra.mxu1 %v3533_v15  ;;  %v3614_v14 = vld [vmem:[%s3800_s22 + $0x700] ss:$16 sps:$4 sm:$0xff]   ;;  %v3617_v15 = vld [vmem:[%s3800_s22 + $0x708] ss:$16 sps:$4 sm:$0xff]  }
  0xda   : > { %2136 = vmatprep.subr.bf16.mxu0 %v3538_v16  ;;  %2348 = vmatprep.subr.bf16.mxu1 %v3541_v17  ;;  %v3622_v16 = vld [vmem:[%s3800_s22 + $0x724] ss:$16 sps:$4 sm:$0xff]   ;;  %v3625_v17 = vld [vmem:[%s3800_s22 + $0x72c] ss:$16 sps:$4 sm:$0xff]  }
  0xdd   : > { %2137 = vmatpush1.bf16.msra.mxu0 %v3536_v18  ;;  %2349 = vmatpush1.bf16.msra.mxu1 %v3539_v19  ;;  %v3620_v18 = vld [vmem:[%s3800_s22 + $0x720] ss:$16 sps:$4 sm:$0xff]   ;;  %v3623_v19 = vld [vmem:[%s3800_s22 + $0x728] ss:$16 sps:$4 sm:$0xff]  }
  0xde   : > { %2138 = vmatprep.subr.bf16.mxu0 %v3544_v20  ;;  %2350 = vmatprep.subr.bf16.mxu1 %v3547_v21  ;;  %v3628_v20 = vld [vmem:[%s3800_s22 + $0x744] ss:$16 sps:$4 sm:$0xff]   ;;  %v3631_v21 = vld [vmem:[%s3800_s22 + $0x74c] ss:$16 sps:$4 sm:$0xff]  }
  0xe1   : > { %2139 = vmatpush1.bf16.msra.mxu0 %v3542_v22  ;;  %2351 = vmatpush1.bf16.msra.mxu1 %v3545_v23  ;;  %v3626_v22 = vld [vmem:[%s3800_s22 + $0x740] ss:$16 sps:$4 sm:$0xff]   ;;  %v3629_v23 = vld [vmem:[%s3800_s22 + $0x748] ss:$16 sps:$4 sm:$0xff]  }
  0xe2   : > { %2140 = vmatprep.subr.bf16.mxu0 %v3550_v24  ;;  %2352 = vmatprep.subr.bf16.mxu1 %v3553_v25  ;;  %v3634_v24 = vld [vmem:[%s3800_s22 + $0x764] ss:$16 sps:$4 sm:$0xff]   ;;  %v3637_v25 = vld [vmem:[%s3800_s22 + $0x76c] ss:$16 sps:$4 sm:$0xff]  }
  0xe5   : > { %2141 = vmatpush1.bf16.msra.mxu0 %v3548_v26  ;;  %2353 = vmatpush1.bf16.msra.mxu1 %v3551_v27  ;;  %v3632_v26 = vld [vmem:[%s3800_s22 + $0x760] ss:$16 sps:$4 sm:$0xff]   ;;  %v3635_v27 = vld [vmem:[%s3800_s22 + $0x768] ss:$16 sps:$4 sm:$0xff]  }
  0xe6   : > { %2142 = vmatprep.subr.bf16.mxu0 %v3556_v28  ;;  %2354 = vmatprep.subr.bf16.mxu1 %v3559_v29  ;;  %v3640_v28 = vld [vmem:[%s3800_s22 + $0x784] ss:$16 sps:$4 sm:$0xff]   ;;  %v3643_v29 = vld [vmem:[%s3800_s22 + $0x78c] ss:$16 sps:$4 sm:$0xff]  }
  0xe9   : > { %2143 = vmatpush1.bf16.msra.mxu0 %v3554_v30  ;;  %2355 = vmatpush1.bf16.msra.mxu1 %v3557_v31  ;;  %v3638_v30 = vld [vmem:[%s3800_s22 + $0x780] ss:$16 sps:$4 sm:$0xff]   ;;  %v3641_v31 = vld [vmem:[%s3800_s22 + $0x788] ss:$16 sps:$4 sm:$0xff]  }
  0xea   : > { %2144 = vmatprep.subr.bf16.mxu0 %v3562_v32  ;;  %2356 = vmatprep.subr.bf16.mxu1 %v3565_v33  ;;  %v3646_v32 = vld [vmem:[%s3800_s22 + $0x7a4] ss:$16 sps:$4 sm:$0xff]   ;;  %v3649_v33 = vld [vmem:[%s3800_s22 + $0x7ac] ss:$16 sps:$4 sm:$0xff]  }
  0xed   : > { %2145 = vmatpush1.bf16.msra.mxu0 %v3560_v34  ;;  %2357 = vmatpush1.bf16.msra.mxu1 %v3563_v35  ;;  %v3644_v34 = vld [vmem:[%s3800_s22 + $0x7a0] ss:$16 sps:$4 sm:$0xff]   ;;  %v3647_v35 = vld [vmem:[%s3800_s22 + $0x7a8] ss:$16 sps:$4 sm:$0xff]  }
  0xee   : > { %2167 = vmatprep.subr.bf16.mxu0 %v3568_v36  ;;  %2379 = vmatprep.subr.bf16.mxu1 %v3571_v37  ;;  %v3652_v36 = vld [vmem:[%s3800_s22 + $0x7c4] ss:$16 sps:$4 sm:$0xff]   ;;  %v3655_v37 = vld [vmem:[%s3800_s22 + $0x7cc] ss:$16 sps:$4 sm:$0xff]  }
  0xf0   : > { %2147 = vmatmul.mubr.bf16.vlgmr.msra.gmra.mrb[0].mxu0 %v2931_v38  ;;  %2359 = vmatmul.mubr.bf16.vlgmr.msra.gmra.mrb[0].mxu1 %v2931_v38  ;;  %v3650_v38 = vld [vmem:[%s3800_s22 + $0x7c0] ss:$16 sps:$4 sm:$0xff]  }
  0xf1   : > { %2168 = vmatpush1.bf16.msra.mxu0 %v3566_v41  ;;  %2380 = vmatpush1.bf16.msra.mxu1 %v3569_v43  ;;  %v3661_v41 = vld [vmem:[%s3800_s22 + $0x7ec] ss:$16 sps:$4 sm:$0xff]   ;;  %v3656_v43 = vld [vmem:[%s3800_s22 + $0x7e0] ss:$16 sps:$4 sm:$0xff]  }
  0xf2   : > { %2169 = vmatprep.subr.bf16.mxu0 %v3574_v45  ;;  %2381 = vmatprep.subr.bf16.mxu1 %v3577_v46  ;;  %v3659_v45 = vld [vmem:[%s3800_s22 + $0x7e8] ss:$16 sps:$4 sm:$0xff]  }
  0xf3   : > { %2156 = vmatprep.mubr.bf16.mxu0 %v2940_v47  ;;  %2368 = vmatprep.mubr.bf16.mxu1 %v2940_v47  ;;  %v387_v46 = vld [vmem:[%s3802_s23 + $0x58] sm:$0xff] }
  0xf4   : > { %v391_v47 = vld [vmem:[%s3802_s23 + $0x78] sm:$0xff] }
  0xf5   : > { %2170 = vmatpush1.bf16.msra.mxu0 %v3572_v42  ;;  %2382 = vmatpush1.bf16.msra.mxu1 %v3575_v44  ;;  %v2933_v42 = vcombine.low %v4036_v51, %v4039_v52  ;;  %v2942_v44 = vcombine.high %v387_v46, %v391_v47 }
  0xf6   : > { %2171 = vmatprep.subr.bf16.mxu0 %v3580_v48  ;;  %2383 = vmatprep.subr.bf16.mxu1 %v3583_v49  ;;  %v2941_v48 = vcombine.low %v387_v46, %v391_v47  ;;  %v360_v49 = vld [vmem:[#allocation2] sm:$0xff] }
  0xf8   : > { %2157 = vmatmul.mubr.bf16.gmra.mrb[4].mxu0 %v2939_v50  ;;  %2369 = vmatmul.mubr.bf16.gmra.mrb[4].mxu1 %v2939_v50  ;;  %v362_v50 = vld [vmem:[#allocation2 + $0x10] sm:$0xff] }
  0xf9   : > { %2172 = vmatpush1.bf16.msra.mxu0 %v3578_v53  ;;  %2384 = vmatpush1.bf16.msra.mxu1 %v3581_v54  ;;  %v361_v53 = vld [vmem:[#allocation2 + $0x8] sm:$0xff]  ;;  %v363_v54 = vld [vmem:[#allocation2 + $0x18] sm:$0xff] }
  0xfa   : > { %2173 = vmatprep.subr.bf16.mxu0 %v3586_v55  ;;  %2385 = vmatprep.subr.bf16.mxu1 %v3589_v56 }
  0xfb   : > { %2199 = vmatprep.mubr.bf16.mxu0 %v2934_v57  ;;  %2411 = vmatprep.mubr.bf16.mxu1 %v2934_v57  ;;  %v364_v57 = vld [vmem:[#allocation2 + $0x20] sm:$0xff] }
  0xfd   : > { %2174 = vmatpush1.bf16.msra.mxu0 %v3584_v58  ;;  %2386 = vmatpush1.bf16.msra.mxu1 %v3587_v59  ;;  %v366_v58 = vld [vmem:[#allocation2 + $0x30] sm:$0xff] }
  0xfe   : > { %2175 = vmatprep.subr.bf16.mxu0 %v3592_v60  ;;  %2387 = vmatprep.subr.bf16.mxu1 %v3595_v61  ;;  %v365_v61 = vld [vmem:[#allocation2 + $0x28] sm:$0xff] }
 0x101   : > { %2176 = vmatpush1.bf16.msra.mxu0 %v3590_v62  ;;  %2388 = vmatpush1.bf16.msra.mxu1 %v3593_v63  ;;  %v367_v62 = vld [vmem:[#allocation2 + $0x38] sm:$0xff] }
 0x102   : > { %2177 = vmatprep.subr.bf16.mxu0 %v3598_v0  ;;  %2389 = vmatprep.subr.bf16.mxu1 %v3601_v1 }
 0x105   : > { %2178 = vmatpush1.bf16.msra.mxu0 %v3596_v2  ;;  %2390 = vmatpush1.bf16.msra.mxu1 %v3599_v3 }
 0x106   : > { %2179 = vmatprep.subr.bf16.mxu0 %v3604_v4  ;;  %2391 = vmatprep.subr.bf16.mxu1 %v3607_v5 }
 0x109   : > { %2180 = vmatpush1.bf16.msra.mxu0 %v3602_v6  ;;  %2392 = vmatpush1.bf16.msra.mxu1 %v3605_v7 }
 0x10a   : > { %2181 = vmatprep.subr.bf16.mxu0 %v3610_v8  ;;  %2393 = vmatprep.subr.bf16.mxu1 %v3613_v9  ;;  %v368_v9 = vld [vmem:[#allocation2 + $0x40] sm:$0xff] }
 0x10d   : > { %2182 = vmatpush1.bf16.msra.mxu0 %v3608_v10  ;;  %2394 = vmatpush1.bf16.msra.mxu1 %v3611_v11  ;;  %v370_v10 = vld [vmem:[#allocation2 + $0x50] sm:$0xff]  ;;  %v369_v11 = vld [vmem:[#allocation2 + $0x48] sm:$0xff] }
 0x10e   : > { %2183 = vmatprep.subr.bf16.mxu0 %v3616_v12  ;;  %2395 = vmatprep.subr.bf16.mxu1 %v3619_v13  ;;  %v371_v12 = vld [vmem:[#allocation2 + $0x58] sm:$0xff] }
 0x111   : > { %2184 = vmatpush1.bf16.msra.mxu0 %v3614_v14  ;;  %2396 = vmatpush1.bf16.msra.mxu1 %v3617_v15  ;;  %v372_v15 = vld [vmem:[#allocation2 + $0x60] sm:$0xff] }
 0x112   : > { %2185 = vmatprep.subr.bf16.mxu0 %v3622_v16  ;;  %2397 = vmatprep.subr.bf16.mxu1 %v3625_v17  ;;  %v374_v16 = vld [vmem:[#allocation2 + $0x70] sm:$0xff] }
 0x115   : > { %2186 = vmatpush1.bf16.msra.mxu0 %v3620_v18  ;;  %2398 = vmatpush1.bf16.msra.mxu1 %v3623_v19 }
 0x116   : > { %2187 = vmatprep.subr.bf16.mxu0 %v3628_v20  ;;  %2399 = vmatprep.subr.bf16.mxu1 %v3631_v21  ;;  %v373_v21 = vld [vmem:[#allocation2 + $0x68] sm:$0xff] }
 0x119   : > { %2188 = vmatpush1.bf16.msra.mxu0 %v3626_v22  ;;  %2400 = vmatpush1.bf16.msra.mxu1 %v3629_v23  ;;  %v375_v22 = vld [vmem:[#allocation2 + $0x78] sm:$0xff] }
 0x11a   : > { %2189 = vmatprep.subr.bf16.mxu0 %v3634_v24  ;;  %2401 = vmatprep.subr.bf16.mxu1 %v3637_v25 }
 0x11d   : > { %2190 = vmatpush1.bf16.msra.mxu0 %v3632_v26  ;;  %2402 = vmatpush1.bf16.msra.mxu1 %v3635_v27 }
 0x11e   : > { %2191 = vmatprep.subr.bf16.mxu0 %v3640_v28  ;;  %2403 = vmatprep.subr.bf16.mxu1 %v3643_v29 }
 0x121   : > { %2192 = vmatpush1.bf16.msra.mxu0 %v3638_v30  ;;  %2404 = vmatpush1.bf16.msra.mxu1 %v3641_v31 }
 0x122   : > { %2193 = vmatprep.subr.bf16.mxu0 %v3646_v32  ;;  %2405 = vmatprep.subr.bf16.mxu1 %v3649_v33 }
 0x125   : > { %2194 = vmatpush1.bf16.msra.mxu0 %v3644_v34  ;;  %2406 = vmatpush1.bf16.msra.mxu1 %v3647_v35 }
 0x126   : > { %2195 = vmatprep.subr.bf16.mxu0 %v3652_v36  ;;  %2407 = vmatprep.subr.bf16.mxu1 %v3655_v37 }
 0x129   : > { %2196 = vmatpush1.bf16.msra.mxu0 %v3650_v38  ;;  %2408 = vmatpush1.bf16.msra.mxu1 %v3653_v39 }
 0x12a   : > { %2197 = vmatprep.subr.bf16.mxu0 %v3658_v40  ;;  %2409 = vmatprep.subr.bf16.mxu1 %v3661_v41 }
 0x12d   : > { %2198 = vmatpush1.bf16.msra.mxu0 %v3656_v43  ;;  %2410 = vmatpush1.bf16.msra.mxu1 %v3659_v45 }
 0x130   : > { %2200 = vmatmul.mubr.bf16.vlgmr.msra.gmra.mrb[0].mxu0 %v2933_v42  ;;  %2412 = vmatmul.mubr.bf16.vlgmr.msra.gmra.mrb[0].mxu1 %v2933_v42 }
 0x131   : > { %2209 = vmatprep.mubr.bf16.mxu0 %v2942_v44  ;;  %2421 = vmatprep.mubr.bf16.mxu1 %v2942_v44 }
 0x138   : > { %2210 = vmatmul.mubr.bf16.gmra.mrb[4].mxu0 %v2941_v48  ;;  %2422 = vmatmul.mubr.bf16.gmra.mrb[4].mxu1 %v2941_v48 }
 0x203   : > { %v2201_v55 = vpop.f32.mrb[0].mxu0  ;;  %v2413_v56 = vpop.f32.mrb[0].mxu1 }
 0x204   : > { %v2432_v59 = vadd.f32 %v2201_v55, %v360_v49  ;;  %v2434_v51 = vadd.f32 %v2413_v56, %v362_v50  ;;  %v2203_v52 = vpop.f32.mrb[1].mxu0  ;;  %v2415_v60 = vpop.f32.mrb[1].mxu1 }
 0x205   : > { %v2433_v63 = vadd.f32 %v2203_v52, %v361_v53  ;;  %v2435_v0 = vadd.f32 %v2415_v60, %v363_v54  ;;  %v2205_v1 = vpop.f32.mrb[2].mxu0  ;;  %v2417_v2 = vpop.f32.mrb[2].mxu1 }
 0x206   : > { %2448 = vst [vmem:[#allocation2] sm:$0xff] %v2432_v59  ;;  %2450 = vst [vmem:[#allocation2 + $0x10] sm:$0xff] %v2434_v51  ;;  %v2436_v3 = vadd.f32 %v2205_v1, %v364_v57  ;;  %v2438_v4 = vadd.f32 %v2417_v2, %v366_v58  ;;  %v2207_v5 = vpop.f32.mrb[3].mxu0  ;;  %v2419_v6 = vpop.f32.mrb[3].mxu1 }
 0x207   : > { %2449 = vst [vmem:[#allocation2 + $0x8] sm:$0xff] %v2433_v63  ;;  %2451 = vst [vmem:[#allocation2 + $0x18] sm:$0xff] %v2435_v0  ;;  %v2437_v7 = vadd.f32 %v2207_v5, %v365_v61  ;;  %v2439_v8 = vadd.f32 %v2419_v6, %v367_v62 }
 0x208   : > { %2452 = vst [vmem:[#allocation2 + $0x20] sm:$0xff] %v2436_v3  ;;  %2454 = vst [vmem:[#allocation2 + $0x30] sm:$0xff] %v2438_v4 }
 0x209   : > { %2453 = vst [vmem:[#allocation2 + $0x28] sm:$0xff] %v2437_v7  ;;  %2455 = vst [vmem:[#allocation2 + $0x38] sm:$0xff] %v2439_v8 }
 0x20b   : > { %v2211_v13 = vpop.f32.mrb[4].mxu0  ;;  %v2423_v14 = vpop.f32.mrb[4].mxu1  ;;  %2467 = sbr.rel (%p3199_p10) target bundleno = 822 (0x336), region = 79 }
 0x20c   : > { %v2440_v17 = vadd.f32 %v2211_v13, %v368_v9  ;;  %v2442_v18 = vadd.f32 %v2423_v14, %v370_v10  ;;  %v2213_v19 = vpop.f32.mrb[5].mxu0  ;;  %v2425_v20 = vpop.f32.mrb[5].mxu1 }
 0x20d   : > { %v2441_v23 = vadd.f32 %v2213_v19, %v369_v11  ;;  %v2443_v24 = vadd.f32 %v2425_v20, %v371_v12  ;;  %v2215_v25 = vpop.f32.mrb[6].mxu0  ;;  %v2427_v26 = vpop.f32.mrb[6].mxu1  ;;  %v2468_v33 = vld [vmem:[#allocation2] sm:$0xff] (!%p3199_p10)  ;;  %v2470_v35 = vld [vmem:[#allocation2 + $0x10] sm:$0xff] (!%p3199_p10) }
 0x20e   : > { %2456 = vst [vmem:[#allocation2 + $0x40] sm:$0xff] %v2440_v17  ;;  %2458 = vst [vmem:[#allocation2 + $0x50] sm:$0xff] %v2442_v18  ;;  %v2444_v27 = vadd.f32 %v2215_v25, %v372_v15  ;;  %v2446_v28 = vadd.f32 %v2427_v26, %v374_v16  ;;  %v2217_v29 = vpop.f32.mrb[7].mxu0  ;;  %v2429_v30 = vpop.f32.mrb[7].mxu1  ;;  %v2469_v34 = vld [vmem:[#allocation2 + $0x8] sm:$0xff] (!%p3199_p10)  ;;  %v2471_v36 = vld [vmem:[#allocation2 + $0x18] sm:$0xff] (!%p3199_p10) }
 0x20f   : > { %2457 = vst [vmem:[#allocation2 + $0x48] sm:$0xff] %v2441_v23  ;;  %2459 = vst [vmem:[#allocation2 + $0x58] sm:$0xff] %v2443_v24  ;;  %v2445_v31 = vadd.f32 %v2217_v29, %v373_v21  ;;  %v2447_v32 = vadd.f32 %v2429_v30, %v375_v22  ;;  %v2472_v37 = vld [vmem:[#allocation2 + $0x20] sm:$0xff] (!%p3199_p10)  ;;  %v2474_v39 = vld [vmem:[#allocation2 + $0x30] sm:$0xff] (!%p3199_p10) }
 0x210   : > { %2460 = vst [vmem:[#allocation2 + $0x60] sm:$0xff] %v2444_v27  ;;  %2462 = vst [vmem:[#allocation2 + $0x70] sm:$0xff] %v2446_v28  ;;  %v2473_v38 = vld [vmem:[#allocation2 + $0x28] sm:$0xff] (!%p3199_p10)  ;;  %v2475_v40 = vld [vmem:[#allocation2 + $0x38] sm:$0xff] (!%p3199_p10)  ;;  %v2484_v43 = vadd.f32 (!%p3199_p10), %v2472_v37, %v2468_v33  ;;  %v2502_v44 = vadd.f32 (!%p3199_p10), %v2474_v39, %v2470_v35 }
 0x211   : > { %2461 = vst [vmem:[#allocation2 + $0x68] sm:$0xff] %v2445_v31  ;;  %2463 = vst [vmem:[#allocation2 + $0x78] sm:$0xff] %v2447_v32  ;;  %v2493_v45 = vadd.f32 (!%p3199_p10), %v2473_v38, %v2469_v34  ;;  %v2511_v48 = vadd.f32 (!%p3199_p10), %v2475_v40, %v2471_v36 }
 0x215   : > { %v2476_v41 = vld [vmem:[#allocation2 + $0x40] sm:$0xff]  ;;  %v2478_v47 = vld [vmem:[#allocation2 + $0x50] sm:$0xff] }
 0x216   : > { %v2477_v46 = vld [vmem:[#allocation2 + $0x48] sm:$0xff]  ;;  %v2479_v42 = vld [vmem:[#allocation2 + $0x58] sm:$0xff]  ;;  %v2485_v54 = vadd.f32 %v2484_v43, %v2476_v41  ;;  %v2503_v57 = vadd.f32 %v2502_v44, %v2478_v47 }
 0x217   : > { %v2480_v49 = vld [vmem:[#allocation2 + $0x60] sm:$0xff]  ;;  %v2482_v53 = vld [vmem:[#allocation2 + $0x70] sm:$0xff]  ;;  %v2494_v55 = vadd.f32 %v2493_v45, %v2477_v46  ;;  %v2512_v58 = vadd.f32 %v2511_v48, %v2479_v42 }
 0x218   : > { %v2481_v50 = vld [vmem:[#allocation2 + $0x68] sm:$0xff]  ;;  %v2483_v56 = vld [vmem:[#allocation2 + $0x78] sm:$0xff]  ;;  %v2486_v59 = vadd.f32 %v2485_v54, %v2480_v49  ;;  %v2504_v52 = vadd.f32 %v2503_v57, %v2482_v53 }
 0x219   : > { %v2495_v51 = vadd.f32 %v2494_v55, %v2481_v50  ;;  %v2513_v60 = vadd.f32 %v2512_v58, %v2483_v56 }
 0x21a   : > { %v2487_v61 = vrot.slane %v2486_v59, 4  ;;  %v2505_v63 = vrot.slane %v2504_v52, 4 }
 0x21b   : > { %v2496_v62 = vrot.slane %v2495_v51, 4  ;;  %v2514_v0 = vrot.slane %v2513_v60, 4 }
 0x21c   : > { %v2488_v1 = vadd.f32 %v2487_v61, %v2486_v59  ;;  %v2506_v3 = vadd.f32 %v2505_v63, %v2504_v52 }
 0x21d   : > { %v2497_v2 = vadd.f32 %v2496_v62, %v2495_v51  ;;  %v2515_v4 = vadd.f32 %v2514_v0, %v2513_v60 }
 0x21e   : > { %v2489_v5 = vrot.slane %v2488_v1, 2  ;;  %v2507_v7 = vrot.slane %v2506_v3, 2 }
 0x21f   : > { %v2498_v6 = vrot.slane %v2497_v2, 2  ;;  %v2516_v8 = vrot.slane %v2515_v4, 2 }
 0x220   : > { %v2490_v9 = vadd.f32 %v2489_v5, %v2488_v1  ;;  %v2508_v11 = vadd.f32 %v2507_v7, %v2506_v3 }
 0x221   : > { %v2499_v10 = vadd.f32 %v2498_v6, %v2497_v2  ;;  %v2517_v12 = vadd.f32 %v2516_v8, %v2515_v4 }
 0x222   : > { %v2491_v13 = vrot.slane %v2490_v9, 1  ;;  %v2509_v15 = vrot.slane %v2508_v11, 1 }
 0x223   : > { %v2500_v14 = vrot.slane %v2499_v10, 1  ;;  %v2518_v16 = vrot.slane %v2517_v12, 1 }
 0x224   : > { %v2492_v17 = vadd.f32 %v2491_v13, %v2490_v9  ;;  %v2510_v19 = vadd.f32 %v2509_v15, %v2508_v11 }
 0x225   : > { %v2501_v18 = vadd.f32 %v2500_v14, %v2499_v10  ;;  %v2519_v20 = vadd.f32 %v2518_v16, %v2517_v12 }
 0x226   : > { %v2521_v21 = vmul.f32 0.03125, %v2492_v17  ;;  %v2523_v23 = vmul.f32 0.03125, %v2510_v19 }
 0x227   : > { %v2522_v22 = vmul.f32 0.03125, %v2501_v18  ;;  %v2524_v24 = vmul.f32 0.03125, %v2519_v20 }
 0x228   : > { %v4102_v25 = vsub.f32 %v2468_v33, %v2521_v21  ;;  %v4106_v27 = vsub.f32 %v2472_v37, %v2521_v21  ;;  %v4110_v29 = vsub.f32 %v2470_v35, %v2523_v23  ;;  %v4114_v31 = vsub.f32 %v2474_v39, %v2523_v23 }
 0x229   : > { %v4104_v26 = vsub.f32 %v2469_v34, %v2522_v22  ;;  %v4108_v28 = vsub.f32 %v2473_v38, %v2522_v22  ;;  %v4112_v30 = vsub.f32 %v2471_v36, %v2524_v24  ;;  %v4116_v32 = vsub.f32 %v2475_v40, %v2524_v24 }
 0x22a   : > { %v4118_v43 = vsub.f32 %v2476_v41, %v2521_v21  ;;  %v4120_v45 = vsub.f32 %v2477_v46, %v2522_v22  ;;  %v4122_v33 = vsub.f32 %v2478_v47, %v2523_v23  ;;  %v4124_v34 = vsub.f32 %v2479_v42, %v2524_v24 }
 0x22b   : > { %v4126_v37 = vsub.f32 %v2480_v49, %v2521_v21  ;;  %v4128_v38 = vsub.f32 %v2481_v50, %v2522_v22  ;;  %v4130_v35 = vsub.f32 %v2482_v53, %v2523_v23  ;;  %v4132_v36 = vsub.f32 %v2483_v56, %v2524_v24 }
 0x22c   : > { %v2541_v39 = vmul.f32 %v4102_v25, %v4102_v25  ;;  %v2542_v40 = vmul.f32 %v4104_v26, %v4104_v26  ;;  %v2543_v41 = vmul.f32 %v4110_v29, %v4110_v29  ;;  %v2544_v46 = vmul.f32 %v4112_v30, %v4112_v30 }
 0x22d   : > { %v2545_v47 = vmul.f32 %v4106_v27, %v4106_v27  ;;  %v2546_v42 = vmul.f32 %v4108_v28, %v4108_v28  ;;  %v2547_v44 = vmul.f32 %v4114_v31, %v4114_v31  ;;  %v2548_v48 = vmul.f32 %v4116_v32, %v4116_v32 }
 0x22e   : > { %v2549_v49 = vmul.f32 %v4118_v43, %v4118_v43  ;;  %v2550_v50 = vmul.f32 %v4120_v45, %v4120_v45  ;;  %v2551_v53 = vmul.f32 %v4122_v33, %v4122_v33  ;;  %v2552_v54 = vmul.f32 %v4124_v34, %v4124_v34 }
 0x22f   : > { %v2553_v55 = vmul.f32 %v4126_v37, %v4126_v37  ;;  %v2554_v56 = vmul.f32 %v4128_v38, %v4128_v38  ;;  %v2555_v57 = vmul.f32 %v4130_v35, %v4130_v35  ;;  %v2556_v58 = vmul.f32 %v4132_v36, %v4132_v36 }
 0x230   : > { %v2557_v59 = vadd.f32 %v2545_v47, %v2541_v39  ;;  %v2566_v51 = vadd.f32 %v2546_v42, %v2542_v40  ;;  %v2575_v52 = vadd.f32 %v2547_v44, %v2543_v41  ;;  %v2584_v60 = vadd.f32 %v2548_v48, %v2544_v46 }
 0x232   : > { %v2558_v61 = vadd.f32 %v2557_v59, %v2549_v49  ;;  %v2567_v62 = vadd.f32 %v2566_v51, %v2550_v50  ;;  %v2576_v63 = vadd.f32 %v2575_v52, %v2551_v53  ;;  %v2585_v0 = vadd.f32 %v2584_v60, %v2552_v54  ;;  %v2621_v52 = vld [vmem:[%s4282_s2] sm:$0xf] }
 0x233   : > { %v2623_v49 = vlaneseq  ;;  %v2659_v60 = vld [vmem:[%s4283_s3] sm:$0xf] }
 0x234   : > { %v2559_v1 = vadd.f32 %v2558_v61, %v2553_v55  ;;  %v2568_v2 = vadd.f32 %v2567_v62, %v2554_v56  ;;  %v2577_v3 = vadd.f32 %v2576_v63, %v2555_v57  ;;  %v2586_v4 = vadd.f32 %v2585_v0, %v2556_v58 }
 0x235   : > { %v2624_v56 = vshrl.u32 %v2623_v49, 7 }
 0x236   : > { %v2560_v5 = vrot.slane %v2559_v1, 4  ;;  %v2569_v6 = vrot.slane %v2568_v2, 4  ;;  %v2578_v7 = vrot.slane %v2577_v3, 4  ;;  %v2587_v8 = vrot.slane %v2586_v4, 4 }
 0x237   : > { %v2625_v57 = vsub.s32 0, %v2624_v56  ;;  %v2629_v58 = vsub.s32 1, %v2624_v56  ;;  %v2633_v59 = vsub.s32 2, %v2624_v56  ;;  %v2637_v51 = vsub.s32 3, %v2624_v56 }
 0x238   : > { %v2561_v9 = vadd.f32 %v2560_v5, %v2559_v1  ;;  %v2570_v10 = vadd.f32 %v2569_v6, %v2568_v2  ;;  %v2579_v11 = vadd.f32 %v2578_v7, %v2577_v3  ;;  %v2588_v12 = vadd.f32 %v2587_v8, %v2586_v4 }
 0x239   : > { %v2626_v61 = vrot.slane %v2621_v52, %v2625_v57  ;;  %v2630_v62 = vrot.slane %v2621_v52, %v2629_v58  ;;  %v2634_v63 = vrot.slane %v2621_v52, %v2633_v59  ;;  %v2638_v0 = vrot.slane %v2621_v52, %v2637_v51 }
 0x23a   : > { %v2562_v13 = vrot.slane %v2561_v9, 2  ;;  %v2571_v14 = vrot.slane %v2570_v10, 2  ;;  %v2580_v15 = vrot.slane %v2579_v11, 2  ;;  %v2589_v16 = vrot.slane %v2588_v12, 2 }
 0x23b   : > { %v2664_v2 = vrot.slane %v2659_v60, %v2625_v57  ;;  %v2668_v3 = vrot.slane %v2659_v60, %v2629_v58  ;;  %v2672_v4 = vrot.slane %v2659_v60, %v2633_v59  ;;  %v2676_v5 = vrot.slane %v2659_v60, %v2637_v51 }
 0x23c   : > { %v2563_v17 = vadd.f32 %v2562_v13, %v2561_v9  ;;  %v2572_v18 = vadd.f32 %v2571_v14, %v2570_v10  ;;  %v2581_v19 = vadd.f32 %v2580_v15, %v2579_v11  ;;  %v2590_v20 = vadd.f32 %v2589_v16, %v2588_v12 }
 0x23e   : > { %v2564_v21 = vrot.slane %v2563_v17, 1  ;;  %v2573_v22 = vrot.slane %v2572_v18, 1  ;;  %v2582_v23 = vrot.slane %v2581_v19, 1  ;;  %v2591_v24 = vrot.slane %v2590_v20, 1 }
 0x240   : > { %v2565_v39 = vadd.f32 %v2564_v21, %v2563_v17  ;;  %v2574_v40 = vadd.f32 %v2573_v22, %v2572_v18  ;;  %v2583_v41 = vadd.f32 %v2582_v23, %v2581_v19  ;;  %v2592_v46 = vadd.f32 %v2591_v24, %v2590_v20 }
 0x242   : > { %v2593_v47 = vmul.f32 0.03125, %v2565_v39  ;;  %v2594_v42 = vmul.f32 0.03125, %v2574_v40  ;;  %v2595_v44 = vmul.f32 0.03125, %v2583_v41  ;;  %v2596_v48 = vmul.f32 0.03125, %v2592_v46 }
 0x244   : > { %v2597_v50 = vadd.f32 1e-05, %v2593_v47  ;;  %v2598_v53 = vadd.f32 1e-05, %v2594_v42  ;;  %v2599_v54 = vadd.f32 1e-05, %v2595_v44 }
 0x245   : > { %v2600_v55 = vadd.f32 1e-05, %v2596_v48 }
 0x246   : > { %3662 = vrsqrt.f32 %v2597_v50 }
 0x247   : > { %3664 = vrsqrt.f32 %v2598_v53 }
 0x248   : > { %3666 = vrsqrt.f32 %v2599_v54 }
 0x249   : > { %3668 = vrsqrt.f32 %v2600_v55 }
 0x250   : > { %v3663_v1 = vpop.eup %3662 }
 0x251   : > { %v3665_v6 = vpop.eup %3664  ;;  %v2605_v7 = vmul.f32 %v3663_v1, %v4102_v25  ;;  %v2609_v8 = vmul.f32 %v3663_v1, %v4106_v27  ;;  %v2613_v9 = vmul.f32 %v3663_v1, %v4118_v43  ;;  %v2617_v10 = vmul.f32 %v3663_v1, %v4126_v37 }
 0x252   : > { %v3667_v11 = vpop.eup %3666  ;;  %v2606_v12 = vmul.f32 %v3665_v6, %v4104_v26  ;;  %v2610_v13 = vmul.f32 %v3665_v6, %v4108_v28  ;;  %v2614_v14 = vmul.f32 %v3665_v6, %v4120_v45  ;;  %v2618_v15 = vmul.f32 %v3665_v6, %v4128_v38 }
 0x253   : > { %v3669_v16 = vpop.eup %3668  ;;  %v2607_v17 = vmul.f32 %v3667_v11, %v4110_v29  ;;  %v2611_v25 = vmul.f32 %v3667_v11, %v4114_v31  ;;  %v2615_v27 = vmul.f32 %v3667_v11, %v4122_v33  ;;  %v2619_v43 = vmul.f32 %v3667_v11, %v4130_v35 }
 0x254   : > { %v2608_v37 = vmul.f32 %v3669_v16, %v4112_v30  ;;  %v2612_v18 = vmul.f32 %v3669_v16, %v4116_v32  ;;  %v2616_v26 = vmul.f32 %v3669_v16, %v4124_v34  ;;  %v2620_v28 = vmul.f32 %v3669_v16, %v4132_v36 }
 0x255   : > { %v2643_v45 = vmul.f32 %v2626_v61, %v2605_v7  ;;  %v2644_v19 = vmul.f32 %v2630_v62, %v2606_v12  ;;  %v2645_v38 = vmul.f32 %v2634_v63, %v2607_v17  ;;  %v2647_v20 = vmul.f32 %v2626_v61, %v2609_v8  ;;  %v2745_v7 = vld [vmem:[%s4284_s4] sm:$0xff]  ;;  %v2746_v8 = vld [vmem:[%s4284_s4 + $0x8] sm:$0xff]  ;;  %v2747_v17 = vld [vmem:[%s4284_s4 + $0x10] sm:$0xff] }
 0x256   : > { %v2646_v21 = vmul.f32 %v2638_v0, %v2608_v37  ;;  %v2648_v29 = vmul.f32 %v2630_v62, %v2610_v13  ;;  %v2649_v22 = vmul.f32 %v2634_v63, %v2611_v25  ;;  %v2650_v31 = vmul.f32 %v2638_v0, %v2612_v18  ;;  %v2748_v25 = vld [vmem:[%s4284_s4 + $0x18] sm:$0xff] }
 0x257   : > { %v2651_v23 = vmul.f32 %v2626_v61, %v2613_v9  ;;  %v2652_v33 = vmul.f32 %v2630_v62, %v2614_v14  ;;  %v2653_v24 = vmul.f32 %v2634_v63, %v2615_v27  ;;  %v2654_v35 = vmul.f32 %v2638_v0, %v2616_v26  ;;  %v2749_v27 = vld [vmem:[%s4284_s4 + $0x20] sm:$0xff] }
 0x258   : > { %v2655_v39 = vmul.f32 %v2626_v61, %v2617_v10  ;;  %v2656_v30 = vmul.f32 %v2630_v62, %v2618_v15  ;;  %v2657_v40 = vmul.f32 %v2634_v63, %v2619_v43  ;;  %v2658_v32 = vmul.f32 %v2638_v0, %v2620_v28  ;;  %v2750_v28 = vld [vmem:[%s4284_s4 + $0x28] sm:$0xff] }
 0x259   : > { %v2681_v41 = vadd.f32 %v2664_v2, %v2643_v45  ;;  %v2682_v34 = vadd.f32 %v2668_v3, %v2644_v19  ;;  %v2683_v46 = vadd.f32 %v2672_v4, %v2645_v38  ;;  %v2684_v36 = vadd.f32 %v2676_v5, %v2646_v21  ;;  %v2751_v45 = vld [vmem:[%s4284_s4 + $0x30] sm:$0xff]  ;;  %v2752_v19 = vld [vmem:[%s4284_s4 + $0x38] sm:$0xff] }
 0x25a   : > { %v2685_v47 = vadd.f32 %v2664_v2, %v2647_v20  ;;  %v2686_v42 = vadd.f32 %v2668_v3, %v2648_v29  ;;  %v2687_v44 = vadd.f32 %v2672_v4, %v2649_v22  ;;  %v2688_v48 = vadd.f32 %v2676_v5, %v2650_v31  ;;  %v2753_v22 = vld [vmem:[%s4284_s4 + $0x40] sm:$0xff]  ;;  %v2754_v31 = vld [vmem:[%s4284_s4 + $0x48] sm:$0xff] }
 0x25b   : > { %v2689_v49 = vadd.f32 %v2664_v2, %v2651_v23  ;;  %v2690_v50 = vadd.f32 %v2668_v3, %v2652_v33  ;;  %v2691_v53 = vadd.f32 %v2672_v4, %v2653_v24  ;;  %v2692_v54 = vadd.f32 %v2676_v5, %v2654_v35  ;;  %v2755_v23 = vld [vmem:[%s4284_s4 + $0x50] sm:$0xff]  ;;  %v2756_v35 = vld [vmem:[%s4284_s4 + $0x58] sm:$0xff] }
 0x25c   : > { %v2693_v55 = vadd.f32 %v2664_v2, %v2655_v39  ;;  %v2694_v56 = vadd.f32 %v2668_v3, %v2656_v30  ;;  %v2695_v57 = vadd.f32 %v2672_v4, %v2657_v40  ;;  %v2696_v58 = vadd.f32 %v2676_v5, %v2658_v32  ;;  %v2757_v39 = vld [vmem:[%s4284_s4 + $0x60] sm:$0xff]  ;;  %v2758_v30 = vld [vmem:[%s4284_s4 + $0x68] sm:$0xff] }
 0x25d   : > { %vm2697_vm0 = vcmp.gt.f32.partialorder %v2681_v41, 0.0  ;;  %vm2698_vm1 = vcmp.gt.f32.partialorder %v2682_v34, 0.0  ;;  %vm2699_vm2 = vcmp.gt.f32.partialorder %v2683_v46, 0.0  ;;  %vm2700_vm3 = vcmp.gt.f32.partialorder %v2684_v36, 0.0 }
 0x25e   : > { %vm2701_vm4 = vcmp.gt.f32.partialorder %v2685_v47, 0.0  ;;  %vm2702_vm5 = vcmp.gt.f32.partialorder %v2686_v42, 0.0  ;;  %vm2703_vm6 = vcmp.gt.f32.partialorder %v2687_v44, 0.0  ;;  %vm2704_vm7 = vcmp.gt.f32.partialorder %v2688_v48, 0.0 }
 0x25f   : > { %vm2705_vm8 = vcmp.gt.f32.partialorder %v2689_v49, 0.0  ;;  %vm2706_vm9 = vcmp.gt.f32.partialorder %v2690_v50, 0.0  ;;  %vm2707_vm10 = vcmp.gt.f32.partialorder %v2691_v53, 0.0  ;;  %vm2708_vm11 = vcmp.gt.f32.partialorder %v2692_v54, 0.0 }
 0x260   : > { %vm2709_vm12 = vcmp.gt.f32.partialorder %v2693_v55, 0.0  ;;  %vm2710_vm13 = vcmp.gt.f32.partialorder %v2694_v56, 0.0  ;;  %vm2711_vm14 = vcmp.gt.f32.partialorder %v2695_v57, 0.0  ;;  %vm2712_vm15 = vcmp.gt.f32.partialorder %v2696_v58, 0.0 }
 0x261   : > { %v2713_v59 = vmul.f32 0.2, %v2681_v41  ;;  %v2714_v51 = vmul.f32 0.2, %v2682_v34  ;;  %v2715_v52 = vmul.f32 0.2, %v2683_v46 }
 0x262   : > { %v2716_v60 = vmul.f32 0.2, %v2684_v36  ;;  %v2717_v61 = vmul.f32 0.2, %v2685_v47  ;;  %v2718_v62 = vmul.f32 0.2, %v2686_v42 }
 0x263   : > { %v2719_v63 = vmul.f32 0.2, %v2687_v44  ;;  %v2720_v0 = vmul.f32 0.2, %v2688_v48  ;;  %v2721_v1 = vmul.f32 0.2, %v2689_v49  ;;  %v2729_v2 = vsel %vm2697_vm0, %v2681_v41, %v2713_v59 }
 0x264   : > { %v2722_v3 = vmul.f32 0.2, %v2690_v50  ;;  %v2723_v4 = vmul.f32 0.2, %v2691_v53  ;;  %v2724_v5 = vmul.f32 0.2, %v2692_v54  ;;  %v2730_v6 = vsel %vm2698_vm1, %v2682_v34, %v2714_v51 }
 0x265   : > { %v2725_v9 = vmul.f32 0.2, %v2693_v55  ;;  %v2726_v10 = vmul.f32 0.2, %v2694_v56  ;;  %v2727_v11 = vmul.f32 0.2, %v2695_v57  ;;  %v2731_v12 = vsel %vm2699_vm2, %v2683_v46, %v2715_v52 }
 0x266   : > { %v2728_v13 = vmul.f32 0.2, %v2696_v58  ;;  %v2732_v14 = vsel %vm2700_vm3, %v2684_v36, %v2716_v60  ;;  %v2733_v15 = vsel %vm2701_vm4, %v2685_v47, %v2717_v61  ;;  %v2734_v16 = vsel %vm2702_vm5, %v2686_v42, %v2718_v62  ;;  %v2759_v41 = vld [vmem:[%s4284_s4 + $0x70] sm:$0xff]  ;;  %v2760_v34 = vld [vmem:[%s4284_s4 + $0x78] sm:$0xff] }
 0x267   : > { %v2735_v43 = vsel %vm2703_vm6, %v2687_v44, %v2719_v63  ;;  %v2736_v37 = vsel %vm2704_vm7, %v2688_v48, %v2720_v0  ;;  %v2737_v18 = vsel %vm2705_vm8, %v2689_v49, %v2721_v1  ;;  %v2738_v26 = vsel %vm2706_vm9, %v2690_v50, %v2722_v3 }
 0x268   : > { %v2739_v38 = vsel %vm2707_vm10, %v2691_v53, %v2723_v4  ;;  %v2740_v20 = vsel %vm2708_vm11, %v2692_v54, %v2724_v5  ;;  %v2741_v21 = vsel %vm2709_vm12, %v2693_v55, %v2725_v9  ;;  %v2742_v29 = vsel %vm2710_vm13, %v2694_v56, %v2726_v10 }
 0x269   : > { %v2743_v33 = vsel %vm2711_vm14, %v2695_v57, %v2727_v11  ;;  %v2744_v24 = vsel %vm2712_vm15, %v2696_v58, %v2728_v13  ;;  %v2761_v40 = vmul.f32 %v2745_v7, %v2729_v2  ;;  %v2762_v32 = vmul.f32 %v2746_v8, %v2730_v6 }
 0x26a   : > { %v2763_v46 = vmul.f32 %v2747_v17, %v2731_v12  ;;  %v2764_v36 = vmul.f32 %v2748_v25, %v2732_v14  ;;  %v2765_v47 = vmul.f32 %v2749_v27, %v2733_v15  ;;  %v2766_v42 = vmul.f32 %v2750_v28, %v2734_v16 }
 0x26b   : > { %v2767_v44 = vmul.f32 %v2751_v45, %v2735_v43  ;;  %v2768_v48 = vmul.f32 %v2752_v19, %v2736_v37  ;;  %v2769_v49 = vmul.f32 %v2753_v22, %v2737_v18  ;;  %v2770_v50 = vmul.f32 %v2754_v31, %v2738_v26 }
 0x26c   : > { %v2771_v53 = vmul.f32 %v2755_v23, %v2739_v38  ;;  %v2772_v54 = vmul.f32 %v2756_v35, %v2740_v20  ;;  %v2773_v55 = vmul.f32 %v2757_v39, %v2741_v21  ;;  %v2774_v56 = vmul.f32 %v2758_v30, %v2742_v29 }
 0x26d   : > { %v2775_v57 = vmul.f32 %v2759_v41, %v2743_v33  ;;  %v2776_v58 = vmul.f32 %v2760_v34, %v2744_v24  ;;  %v2777_v59 = vadd.f32 %v2765_v47, %v2761_v40  ;;  %v2784_v51 = vadd.f32 %v2766_v42, %v2762_v32 }
 0x26e   : > { %v2791_v52 = vadd.f32 %v2767_v44, %v2763_v46  ;;  %v2798_v60 = vadd.f32 %v2768_v48, %v2764_v36  ;;  %v2805_v61 = vadd.f32 %v2773_v55, %v2769_v49  ;;  %v2812_v62 = vadd.f32 %v2774_v56, %v2770_v50 }
 0x26f   : > { %v2778_v63 = vrot.slane %v2777_v59, 4  ;;  %v2785_v0 = vrot.slane %v2784_v51, 4  ;;  %v2819_v1 = vadd.f32 %v2775_v57, %v2771_v53  ;;  %v2826_v2 = vadd.f32 %v2776_v58, %v2772_v54 }
 0x270   : > { %v2792_v3 = vrot.slane %v2791_v52, 4  ;;  %v2799_v4 = vrot.slane %v2798_v60, 4  ;;  %v2806_v5 = vrot.slane %v2805_v61, 4  ;;  %v2813_v6 = vrot.slane %v2812_v62, 4 }
 0x271   : > { %v2779_v7 = vadd.f32 %v2778_v63, %v2777_v59  ;;  %v2786_v8 = vadd.f32 %v2785_v0, %v2784_v51  ;;  %v2820_v9 = vrot.slane %v2819_v1, 4  ;;  %v2827_v10 = vrot.slane %v2826_v2, 4  ;;  %v2848_v59 = vld [vmem:[%s4285_s5] sm:$0x3] }
 0x272   : > { %vm2833_vm0 = vcmask 1040384   ;;  %v2793_v11 = vadd.f32 %v2792_v3, %v2791_v52  ;;  %v2800_v12 = vadd.f32 %v2799_v4, %v2798_v60  ;;  %v2807_v13 = vadd.f32 %v2806_v5, %v2805_v61  ;;  %v3200_v51 = vld [vmem:[%s4286_s6] ss:$0 sm:$0xff] }
 0x273   : > { %v2814_v14 = vadd.f32 %v2813_v6, %v2812_v62  ;;  %vm2838_vm1 = vcmask 1041408   ;;  %v2780_v15 = vrot.slane %v2779_v7, 2  ;;  %v2787_v16 = vrot.slane %v2786_v8, 2 }
 0x274   : > { %v2821_v17 = vadd.f32 %v2820_v9, %v2819_v1  ;;  %v2828_v25 = vadd.f32 %v2827_v10, %v2826_v2  ;;  %v2794_v27 = vrot.slane %v2793_v11, 2  ;;  %v2801_v43 = vrot.slane %v2800_v12, 2 }
 0x275   : > { %v2808_v37 = vrot.slane %v2807_v13, 2  ;;  %v2815_v18 = vrot.slane %v2814_v14, 2  ;;  %v2781_v26 = vadd.f32 %v2780_v15, %v2779_v7  ;;  %v2788_v28 = vadd.f32 %v2787_v16, %v2786_v8 }
 0x276   : > { %v2822_v45 = vrot.slane %v2821_v17, 2  ;;  %v2829_v19 = vrot.slane %v2828_v25, 2  ;;  %v2795_v38 = vadd.f32 %v2794_v27, %v2793_v11  ;;  %v2802_v20 = vadd.f32 %v2801_v43, %v2800_v12 }
 0x277   : > { %v2809_v21 = vadd.f32 %v2808_v37, %v2807_v13  ;;  %v2816_v29 = vadd.f32 %v2815_v18, %v2814_v14  ;;  %v2782_v22 = vrot.slane %v2781_v26, 1  ;;  %v2789_v31 = vrot.slane %v2788_v28, 1 }
 0x278   : > { %v2823_v23 = vadd.f32 %v2822_v45, %v2821_v17  ;;  %v2830_v33 = vadd.f32 %v2829_v19, %v2828_v25  ;;  %v2796_v24 = vrot.slane %v2795_v38, 1  ;;  %v2803_v35 = vrot.slane %v2802_v20, 1 }
 0x279   : > { %v2810_v39 = vrot.slane %v2809_v21, 1  ;;  %v2817_v30 = vrot.slane %v2816_v29, 1  ;;  %v2783_v40 = vadd.f32 %v2782_v22, %v2781_v26  ;;  %v2790_v32 = vadd.f32 %v2789_v31, %v2788_v28 }
 0x27a   : > { %v2824_v41 = vrot.slane %v2823_v23, 1  ;;  %v2831_v34 = vrot.slane %v2830_v33, 1  ;;  %v2797_v46 = vadd.f32 %v2796_v24, %v2795_v38  ;;  %v2804_v36 = vadd.f32 %v2803_v35, %v2802_v20 }
 0x27b   : > { %v2811_v47 = vadd.f32 %v2810_v39, %v2809_v21  ;;  %v2818_v42 = vadd.f32 %v2817_v30, %v2816_v29  ;;  %v2856_v61 = vmul.f32 %v3200_v51, %v2848_v59  ;;  %vm2867_vm2 = vcmask 1024  }
 0x27c   : > { %v2825_v44 = vadd.f32 %v2824_v41, %v2823_v23  ;;  %v2832_v48 = vadd.f32 %v2831_v34, %v2830_v33 }
 0x27d   : > { %v2834_v49 = vsel %vm2833_vm0, %v2783_v40, %v2811_v47  ;;  %v2835_v50 = vsel %vm2833_vm0, %v2790_v32, %v2818_v42  ;;  %v2857_v63 = vsel %vm2838_vm1, %v2856_v61, 0.0 }
 0x27e   : > { %v2836_v53 = vsel %vm2833_vm0, %v2797_v46, %v2825_v44  ;;  %v2837_v54 = vsel %vm2833_vm0, %v2804_v36, %v2832_v48  ;;  %v2839_v55 = vsel %vm2838_vm1, %v2834_v49, 0.0  ;;  %v2840_v56 = vsel %vm2838_vm1, %v2835_v50, 0.0 }
 0x27f   : > { %v2841_v57 = vadd.f32 %v2840_v56, %v2839_v55  ;;  %v2842_v58 = vsel %vm2838_vm1, %v2836_v53, 0.0  ;;  %v2844_v52 = vsel %vm2838_vm1, %v2837_v54, 0.0 }
 0x281   : > { %v2843_v60 = vadd.f32 %v2842_v58, %v2841_v57 }
 0x283   : > { %v2845_v62 = vadd.f32 %v2844_v52, %v2843_v60 }
 0x285   : > { %2846 = vadd.xlane.f32.xlu0 %v2845_v62 }
 0x289   : > { %2858 = vadd.xlane.f32.xlu0 %v2857_v63 }
 0x312   : > { %v2847_v0 = vpop.xlane.xlu0 %2846 }
 0x316   : > { %v2859_v1 = vpop.xlane.xlu0 %2858 }
 0x317   : > { %v2860_v2 = vadd.f32 %v2859_v1, %v2847_v0 }
 0x319   : > { %v2861_v3 = vsub.f32 0.0, %v2860_v2 }
 0x31b   : > { %v2862_v4 = vmul.f32 1.442695, %v2861_v3 }
 0x31d   : > { %3670 = vpow2.f32 %v2862_v4 }
 0x327   : > { %v3671_v5 = vpop.eup %3670 }
 0x328   : > { %v2864_v6 = vadd.f32 1.0, %v3671_v5 }
 0x32a   : > { %3672 = vrcp.f32 %v2864_v6 }
 0x334   : > { %v3673_v7 = vpop.eup %3672 }
 0x335   : > { %2868 = vst.msk [vmem:[%s4287_s7] sm:$0x3] %vm2867_vm2, %v3673_v7 }
 0x336 PF: > { %p14_p11 = scmp.ge.s32.totalorder %s3758_s28, 6   ;;  %s4288_s24 = smov %s3692_s25 }
 0x337   : > { %s4289_s25 = smov %s3767_s8  ;;  %s4290_s26 = smov %s3758_s28 }
 0x338   :  { %16 = sbr.rel (!%p14_p11) target bundleno = 2 (0x2), region = 113 }

</bundles_post_ra>
